<compile_context>
chip_gen: v7x
topology: tpu7x:2x2x1
jax: 0.10.0
libtpu: 0.0.40
codegen_flags: <defaults>
</compile_context>

<pallas_src>
import functools

import jax
import jax.numpy as jnp
from jax.experimental import pallas as pl
from jax.experimental.pallas import tpu as pltpu

DISCR_FILTERS = 64
IMAGE_SIZE = 64
BN_EPS = 1e-5

M_TILE = 512                        # rows (N*Ho*Wo) per block in M-tiled kernels
FUSED_VMEM_BUDGET = 20 * 1024 * 1024  # full-M fused path only below this estimate

_STRIDES = [2, 2, 2, 2, 1]
_PADS = [1, 1, 1, 1, 0]
_BN = [False, True, True, True, False]
_LAYER_COUT = [DISCR_FILTERS, DISCR_FILTERS * 2, DISCR_FILTERS * 4,
               DISCR_FILTERS * 8, 1]


def _tpu_config():
    """(COUT_TILE, vmem_limit_bytes) keyed off the TPU generation."""
    try:
        kind = jax.devices()[0].device_kind.lower()
    except Exception:  # pragma: no cover
        kind = ""
    if "v5" in kind:                       # 4x128x128 MXU, 128 MiB VMEM
        return 128, 64 * 1024 * 1024
    if "v6" in kind:                       # 2x256x256 MXU, 128 MiB VMEM
        return 256, 64 * 1024 * 1024
    return 256, 48 * 1024 * 1024           # v7x (64 MiB VMEM) and others


COUT_TILE, VMEM_LIMIT = _tpu_config()


# ----------------------------------------------------------------------------
# Kernels
# ----------------------------------------------------------------------------
def _matmul_bias_act_kernel(x_ref, w_ref, b_ref, o_ref, *, apply_relu):
    """One (Cout-tile, M-tile) step: dot + bias [+ ReLU], cast to out dtype."""
    y = jnp.dot(x_ref[...], w_ref[...], preferred_element_type=jnp.float32)
    y = y + b_ref[...]
    if apply_relu:
        y = jnp.maximum(y, 0.0)
    o_ref[...] = y.astype(o_ref.dtype)


def _conv_bn_relu_fused_kernel(x_ref, w_ref, b_ref, g_ref, bt_ref, o_ref, *, eps):
    """Full-M resident conv + bias + training-mode BN (two-pass) + ReLU."""
    y = jnp.dot(x_ref[...], w_ref[...], preferred_element_type=jnp.float32)
    y = y + b_ref[...]                                   # (M, Ct) f32
    m = y.shape[0]
    mean = jnp.sum(y, axis=0, keepdims=True) * (1.0 / m)
    d = y - mean
    var = jnp.sum(d * d, axis=0, keepdims=True) * (1.0 / m)
    y = d * jax.lax.rsqrt(var + eps)
    y = y * g_ref[...] + bt_ref[...]
    o_ref[...] = jnp.maximum(y, 0.0).astype(o_ref.dtype)


def _conv45_fused_kernel(x_ref, w4_ref, b_ref, g_ref, bt_ref, w5_ref, p5_ref,
                         *, eps, n_spatial):
    """Fused layer-4 (conv+bias+BN+ReLU) and layer-5 (4x4 valid conv == dot).

    The layer-4 activation never leaves VMEM; each Cout tile emits its partial
    layer-5 contribution as a lane-dense (N, Ct) block (summed outside)."""
    y = jnp.dot(x_ref[...], w4_ref[...], preferred_element_type=jnp.float32)
    y = y + b_ref[...]                                   # (M, Ct) f32
    m = y.shape[0]
    mean = jnp.sum(y, axis=0, keepdims=True) * (1.0 / m)
    d = y - mean
    var = jnp.sum(d * d, axis=0, keepdims=True) * (1.0 / m)
    y = d * jax.lax.rsqrt(var + eps)
    y = y * g_ref[...] + bt_ref[...]
    y = jnp.maximum(y, 0.0)                              # layer-4 activation
    # Layer-5 partial dot for this channel tile, bf16 operand precision.
    y = y.astype(jnp.bfloat16).astype(jnp.float32)
    w5 = w5_ref[...].astype(jnp.float32)                 # (n_spatial, Ct)
    n = m // n_spatial
    y3 = y.reshape(n, n_spatial, y.shape[1])             # (N, 16, Ct)
    p5_ref[...] = jnp.sum(y3 * w5[None, :, :], axis=1)   # (N, Ct)


def _bn_relu_kernel(y_ref, s_ref, t_ref, o_ref):
    """Elementwise BN-apply (precomputed scale/shift) + ReLU + cast."""
    y = y_ref[...] * s_ref[...] + t_ref[...]
    o_ref[...] = jnp.maximum(y, 0.0).astype(o_ref.dtype)


# ----------------------------------------------------------------------------
# pallas_call wrappers
# ----------------------------------------------------------------------------
def _compiler_params(n_axes):
    return pltpu.CompilerParams(
        dimension_semantics=("parallel",) * n_axes,
        vmem_limit_bytes=VMEM_LIMIT)


def _round_up(x, m):
    return ((x + m - 1) // m) * m


def _m_tiling(M):
    if M >= M_TILE:
        return _round_up(M, M_TILE), M_TILE
    mp = _round_up(M, 8)
    return mp, mp


def matmul_bias_act(cols, w_blk, bias, *, apply_relu, out_dtype):
    """cols (M, K) bf16, w_blk (nj, K, Ct) bf16, bias (1, nj*Ct) f32 -> (M, nj*Ct)."""
    M, K = cols.shape
    nj, kw, Ct = w_blk.shape
    assert kw == K
    coutp = nj * Ct
    Mp, m_tile = _m_tiling(M)
    if Mp != M:
        cols = jnp.pad(cols, ((0, Mp - M), (0, 0)))
    nm = Mp // m_tile
    kernel = functools.partial(_matmul_bias_act_kernel, apply_relu=apply_relu)
    out = pl.pallas_call(
        kernel,
        out_shape=jax.ShapeDtypeStruct((Mp, coutp), out_dtype),
        grid_spec=pltpu.PrefetchScalarGridSpec(
            num_scalar_prefetch=0,
            grid=(nj, nm),
            in_specs=[
                pl.BlockSpec((m_tile, K), lambda j, m: (m, 0)),       # cols
                pl.BlockSpec((None, K, Ct), lambda j, m: (j, 0, 0)),  # weights
                pl.BlockSpec((1, Ct), lambda j, m: (0, j)),           # bias
            ],
            out_specs=pl.BlockSpec((m_tile, Ct), lambda j, m: (m, j)),
        ),
        compiler_params=_compiler_params(2),
    )(cols, w_blk, bias)
    return out[:M] if Mp != M else out


def conv_bn_relu_fused(cols, w_blk, bias, gamma, beta):
    """Full-M fused conv + bias + BN + ReLU (grid over Cout tiles only)."""
    M, K = cols.shape
    nj, _, Ct = w_blk.shape
    coutp = nj * Ct
    kernel = functools.partial(_conv_bn_relu_fused_kernel, eps=BN_EPS)
    return pl.pallas_call(
        kernel,
        out_shape=jax.ShapeDtypeStruct((M, coutp), jnp.bfloat16),
        grid_spec=pltpu.PrefetchScalarGridSpec(
            num_scalar_prefetch=0,
            grid=(nj,),
            in_specs=[
                pl.BlockSpec((M, K), lambda j: (0, 0)),
                pl.BlockSpec((None, K, Ct), lambda j: (j, 0, 0)),
                pl.BlockSpec((1, Ct), lambda j: (0, j)),
                pl.BlockSpec((1, Ct), lambda j: (0, j)),
                pl.BlockSpec((1, Ct), lambda j: (0, j)),
            ],
            out_specs=pl.BlockSpec((M, Ct), lambda j: (0, j)),
        ),
        compiler_params=_compiler_params(1),
    )(cols, w_blk, bias, gamma, beta)


def conv45_fused(cols, w4_blk, bias4, gamma4, beta4, w5_tiles, *, batch, n_spatial):
    """Fused layers 4+5. Returns per-Cout-tile layer-5 partials (nj, N, Ct)."""
    M, K = cols.shape
    nj, _, Ct = w4_blk.shape
    kernel = functools.partial(_conv45_fused_kernel, eps=BN_EPS, n_spatial=n_spatial)
    return pl.pallas_call(
        kernel,
        out_shape=jax.ShapeDtypeStruct((nj, batch, Ct), jnp.float32),
        grid_spec=pltpu.PrefetchScalarGridSpec(
            num_scalar_prefetch=0,
            grid=(nj,),
            in_specs=[
                pl.BlockSpec((M, K), lambda j: (0, 0)),                 # cols
                pl.BlockSpec((None, K, Ct), lambda j: (j, 0, 0)),       # w4
                pl.BlockSpec((1, Ct), lambda j: (0, j)),                # bias4
                pl.BlockSpec((1, Ct), lambda j: (0, j)),                # gamma4
                pl.BlockSpec((1, Ct), lambda j: (0, j)),                # beta4
                pl.BlockSpec((None, n_spatial, Ct), lambda j: (j, 0, 0)),  # w5
            ],
            out_specs=pl.BlockSpec((None, batch, Ct), lambda j: (j, 0, 0)),
        ),
        compiler_params=_compiler_params(1),
    )(cols, w4_blk, bias4, gamma4, beta4, w5_tiles)


def bn_relu_apply(y, scale, shift):
    """y (M, Cp) f32, scale/shift (1, Cp) f32 -> (M, Cp) bf16, M-tiled."""
    M, coutp = y.shape
    Mp, m_tile = _m_tiling(M)
    if Mp != M:
        y = jnp.pad(y, ((0, Mp - M), (0, 0)))
    nm = Mp // m_tile
    out = pl.pallas_call(
        _bn_relu_kernel,
        out_shape=jax.ShapeDtypeStruct((Mp, coutp), jnp.bfloat16),
        grid_spec=pltpu.PrefetchScalarGridSpec(
            num_scalar_prefetch=0,
            grid=(nm,),
            in_specs=[
                pl.BlockSpec((m_tile, coutp), lambda m: (m, 0)),
                pl.BlockSpec((1, coutp), lambda m: (0, 0)),
                pl.BlockSpec((1, coutp), lambda m: (0, 0)),
            ],
            out_specs=pl.BlockSpec((m_tile, coutp), lambda m: (m, 0)),
        ),
        compiler_params=_compiler_params(1),
    )(y, scale, shift)
    return out[:M] if Mp != M else out


def conv_bn_split(cols, w_blk, bias, gamma, beta, cout):
    """Batch-robust BN path: M-tiled conv+bias -> JAX column stats -> BN+ReLU."""
    y = matmul_bias_act(cols, w_blk, bias, apply_relu=False,
                        out_dtype=jnp.float32)                    # (M, coutp) f32
    coutp = y.shape[1]
    yv = y[:, :cout]
    mean = jnp.mean(yv, axis=0, keepdims=True)
    var = jnp.mean(jnp.square(yv - mean), axis=0, keepdims=True)  # two-pass
    scale_v = gamma[:, :cout] * jax.lax.rsqrt(var + BN_EPS)
    shift_v = beta[:, :cout] - mean * scale_v
    scale = _pad_last(scale_v, coutp)
    shift = _pad_last(shift_v, coutp)
    return bn_relu_apply(y, scale, shift)


def _fused_fits(M, K, Ct):
    """Rough VMEM estimate of the full-M fused path (cols/w buffers + f32 temps)."""
    est = 2 * M * K * 2 + 2 * K * Ct * 2 + 6 * M * Ct * 4
    return est <= FUSED_VMEM_BUDGET


# ----------------------------------------------------------------------------
# JAX-side glue (layout plumbing only)
# ----------------------------------------------------------------------------
def im2col_nhwc(x, k, stride, pad):
    """x (N, H, W, C) -> cols (N*Ho*Wo, k*k*C), K ordered as (kh, kw, C)."""
    N, H, W, C = x.shape
    xp = jnp.pad(x, ((0, 0), (pad, pad), (pad, pad), (0, 0)))
    Ho = (H + 2 * pad - k) // stride + 1
    Wo = (W + 2 * pad - k) // stride + 1
    taps = [xp[:, kh:kh + stride * Ho:stride, kw:kw + stride * Wo:stride, :]
            for kh in range(k) for kw in range(k)]
    cols = jnp.stack(taps, axis=3)                 # (N, Ho, Wo, k*k, C)
    return cols.reshape(N * Ho * Wo, k * k * C), Ho, Wo


def _pad_last(a, n):
    pad = n - a.shape[-1]
    if pad == 0:
        return a
    return jnp.pad(a, [(0, 0)] * (a.ndim - 1) + [(0, pad)])


def _pad_channels(h, c_to):
    c = h.shape[-1]
    if c == c_to:
        return h
    return jnp.pad(h, ((0, 0), (0, 0), (0, 0), (0, c_to - c)))


def _cout_tile(coutp):
    return COUT_TILE if coutp % COUT_TILE == 0 else 128


def init_params(key, in_channels):
    """Raw torch-layout parameters (OIHW conv weights + BN affine)."""
    specs = [
        (in_channels, DISCR_FILTERS),
        (DISCR_FILTERS, DISCR_FILTERS * 2),
        (DISCR_FILTERS * 2, DISCR_FILTERS * 4),
        (DISCR_FILTERS * 4, DISCR_FILTERS * 8),
        (DISCR_FILTERS * 8, 1),
    ]
    params = []
    for cin, cout in specs:
        key, k1, k2, k3, k4 = jax.random.split(key, 5)
        w = jax.random.normal(k1, (cout, cin, 4, 4), jnp.float32) * 0.05
        b = jax.random.normal(k2, (cout,), jnp.float32) * 0.05
        gamma = 1.0 + 0.1 * jax.random.normal(k3, (cout,), jnp.float32)
        beta = 0.1 * jax.random.normal(k4, (cout,), jnp.float32)
        params.append((w, b, gamma, beta))
    return params


def prepare_params(params):
    """One-time re-layout: block-major (nj, K, Ct) bf16 weights, padded vectors."""
    prepped = []
    for (w, b, gamma, beta) in params[:4]:
        cout, cin, k, _ = w.shape
        cin_pad = _round_up(cin, 8)
        coutp = _round_up(cout, 128)
        ct = _cout_tile(coutp)
        nj = coutp // ct
        wp = jnp.pad(w, ((0, coutp - cout), (0, cin_pad - cin), (0, 0), (0, 0)))
        w_mat = jnp.transpose(wp, (2, 3, 1, 0)).reshape(k * k * cin_pad, coutp)
        w_blk = w_mat.reshape(k * k * cin_pad, nj, ct).transpose(1, 0, 2)
        prepped.append(dict(
            w_blk=w_blk.astype(jnp.bfloat16),
            bias=_pad_last(b.reshape(1, -1).astype(jnp.float32), coutp),
            gamma=_pad_last(gamma.reshape(1, -1).astype(jnp.float32), coutp),
            beta=_pad_last(beta.reshape(1, -1).astype(jnp.float32), coutp),
        ))
    # Layer 5 (4x4 valid conv on the 4x4 layer-4 output, Cout = 1).
    w5, b5, _, _ = params[4]
    cout4 = params[3][0].shape[0]
    coutp4 = _round_up(cout4, 128)
    ct4 = _cout_tile(coutp4)
    nj4 = coutp4 // ct4
    w5_khwc = jnp.transpose(w5[0], (1, 2, 0))                 # (kh, kw, cin)
    w5_mat = _pad_last(w5_khwc.reshape(16, cout4), coutp4)    # (16, coutp4)
    w5_tiles = w5_mat.reshape(16, nj4, ct4).transpose(1, 0, 2).astype(jnp.bfloat16)
    w5_full = w5_khwc.reshape(16 * cout4, 1)                  # fallback matmul weight
    w5_blk = _pad_last(w5_full, 128)[None].astype(jnp.bfloat16)  # (1, 16*cout4, 128)
    prepped.append(dict(
        w5_tiles=w5_tiles,
        w5_blk=w5_blk,
        b5=_pad_last(b5.reshape(1, -1).astype(jnp.float32), 128),
        b5_scalar=b5.astype(jnp.float32),
    ))
    return prepped


def discriminator_forward(x_nchw, prepped, *, force_split=False):
    """x (N, C, H, W) f32 -> (N,) f32; same semantics as the torch module."""
    N = x_nchw.shape[0]
    h = jnp.transpose(x_nchw, (0, 2, 3, 1)).astype(jnp.bfloat16)   # NHWC bf16

    # Layers 1-3: layer 1 is always M-tiled (no BN); BN layers are hybrid.
    for i in range(3):
        p = prepped[i]
        w_blk = p["w_blk"]
        nj, K, ct = w_blk.shape
        coutp = nj * ct
        cout = _LAYER_COUT[i]
        h = _pad_channels(h, K // 16)
        cols, Ho, Wo = im2col_nhwc(h, 4, _STRIDES[i], _PADS[i])
        M = cols.shape[0]
        if _BN[i]:
            if (not force_split) and _fused_fits(M, K, ct):
                out = conv_bn_relu_fused(cols, w_blk, p["bias"], p["gamma"], p["beta"])
            else:
                out = conv_bn_split(cols, w_blk, p["bias"], p["gamma"], p["beta"], cout)
        else:
            out = matmul_bias_act(cols, w_blk, p["bias"], apply_relu=True,
                                  out_dtype=jnp.bfloat16)
        h = out.reshape(N, Ho, Wo, coutp)[..., :cout]     # drop lane padding (L1)

    # Layers 4 + 5: fused when the full-M block fits VMEM, otherwise split.
    p4, p5 = prepped[3], prepped[4]
    w4_blk = p4["w_blk"]
    nj4, K4, ct4 = w4_blk.shape
    coutp4 = nj4 * ct4
    cout4 = _LAYER_COUT[3]
    h = _pad_channels(h, K4 // 16)
    cols, Ho, Wo = im2col_nhwc(h, 4, _STRIDES[3], _PADS[3])        # Ho = Wo = 4
    M4 = cols.shape[0]
    n_spatial = Ho * Wo
    if (not force_split) and _fused_fits(M4, K4, ct4):
        partial5 = conv45_fused(cols, w4_blk, p4["bias"], p4["gamma"], p4["beta"],
                                p5["w5_tiles"], batch=N, n_spatial=n_spatial)
        logits = jnp.sum(partial5, axis=(0, 2)) + p5["b5_scalar"][0]
    else:
        h4 = conv_bn_split(cols, w4_blk, p4["bias"], p4["gamma"], p4["beta"], cout4)
        h4 = h4.reshape(N, Ho, Wo, coutp4)[..., :cout4]
        cols5 = h4.reshape(N, n_spatial * cout4)
        y5 = matmul_bias_act(cols5, p5["w5_blk"], p5["b5"], apply_relu=False,
                             out_dtype=jnp.float32)
        logits = y5[:, 0]
    return jax.nn.sigmoid(logits)                                  # view(-1,1).squeeze(1)


def reference_forward(x_nchw, params):
    """Pure-JAX (XLA conv) reference with matching bf16 operand precision."""
    h = x_nchw
    for i, (w, b, gamma, beta) in enumerate(params):
        h = jax.lax.conv_general_dilated(
            h.astype(jnp.bfloat16), w.astype(jnp.bfloat16),
            (_STRIDES[i],) * 2, [(_PADS[i], _PADS[i])] * 2,
            dimension_numbers=("NCHW", "OIHW", "NCHW"),
            preferred_element_type=jnp.float32)
        h = h + b[None, :, None, None]
        if _BN[i]:
            mean = jnp.mean(h, axis=(0, 2, 3), keepdims=True)
            var = jnp.mean(jnp.square(h - mean), axis=(0, 2, 3), keepdims=True)
            h = (h - mean) * jax.lax.rsqrt(var + BN_EPS)
            h = h * gamma[None, :, None, None] + beta[None, :, None, None]
        if i < 4:
            h = jnp.maximum(h, 0.0)
        else:
            h = jax.nn.sigmoid(h)
    return h.reshape(-1, 1).squeeze(1)


if __name__ == "__main__":
    key = jax.random.PRNGKey(0)
    kx, kp = jax.random.split(key)
    N, C = 2, 3                                  # Atari frames: 3 channels, 64x64
    x = jax.random.normal(kx, (N, C, IMAGE_SIZE, IMAGE_SIZE), jnp.float32)
    raw_params = init_params(kp, C)
    prepped = prepare_params(raw_params)         # one-time parameter re-layout

    fwd = jax.jit(discriminator_forward)
    out = jax.block_until_ready(fwd(x, prepped))

    # Also exercise the batch-robust split path (used for large batches).
    fwd_split = jax.jit(functools.partial(discriminator_forward, force_split=True))
    out_split = jax.block_until_ready(fwd_split(x, prepped))

    ref = jax.block_until_ready(reference_forward(x, raw_params))

    assert out.shape == (N,), out.shape
    ok_fused = bool(jnp.allclose(out, ref, rtol=2e-3, atol=2e-3))
    ok_split = bool(jnp.allclose(out_split, ref, rtol=2e-3, atol=2e-3))
    if ok_fused and ok_split:
        print("KERNEL_OK")
    else:
        print("MISMATCH", out, out_split, ref)
</pallas_src>

<mosaic_0001>
module attributes {stable_mosaic.version = 11 : i64} {
  func.func @_matmul_bias_act_kernel(%arg0: i32, %arg1: i32, %arg2: memref<512x128xbf16, #tpu.memory_space<vmem>>, %arg3: memref<1x128x128xbf16, #tpu.memory_space<vmem>>, %arg4: memref<1x128xf32, #tpu.memory_space<vmem>>, %arg5: memref<512x128xbf16, #tpu.memory_space<vmem>>) attributes {dimension_semantics = [#tpu.dimension_semantics<parallel>, #tpu.dimension_semantics<parallel>], iteration_bounds = array<i64: 1, 4>, scalar_prefetch = 0 : i64, scratch_operands = 0 : i64, tpu.core_type = #tpu.core_type<tc>, window_params = [{transform_indices = @transform_0, window_bounds = array<i64: 512, 128>}, {transform_indices = @transform_1, window_bounds = array<i64: 1, 128, 128>}, {transform_indices = @transform_2, window_bounds = array<i64: 1, 128>}, {transform_indices = @transform_3, window_bounds = array<i64: 512, 128>}]} {
    %c0 = arith.constant 0 : index
    %c0_0 = arith.constant 0 : index
    %0 = vector.load %arg2[%c0, %c0_0] : memref<512x128xbf16, #tpu.memory_space<vmem>>, vector<512x128xbf16>
    %c0_1 = arith.constant 0 : index
    %c0_2 = arith.constant 0 : index
    %c0_3 = arith.constant 0 : index
    %1 = vector.load %arg3[%c0_1, %c0_2, %c0_3] : memref<1x128x128xbf16, #tpu.memory_space<vmem>>, vector<1x128x128xbf16>
    %2 = vector.shape_cast %1 : vector<1x128x128xbf16> to vector<128x128xbf16>
    %cst = arith.constant dense<0.000000e+00> : vector<512x128xf32>
    %3 = tpu.matmul %0, %2, %cst {dimension_numbers = #tpu.dot_dimension_numbers<[1], [0], [0], [1], [0, 0, 1, 1], [], []>} : vector<512x128xbf16>, vector<128x128xbf16>, vector<512x128xf32> -> vector<512x128xf32>
    %c0_4 = arith.constant 0 : index
    %c0_5 = arith.constant 0 : index
    %4 = vector.load %arg4[%c0_4, %c0_5] : memref<1x128xf32, #tpu.memory_space<vmem>>, vector<1x128xf32>
    %5 = vector.broadcast %4 : vector<1x128xf32> to vector<512x128xf32>
    %6 = arith.addf %3, %5 : vector<512x128xf32>
    %cst_6 = arith.constant 0.000000e+00 : f32
    %7 = vector.broadcast %cst_6 : f32 to vector<512x128xf32>
    %8 = arith.maximumf %6, %7 : vector<512x128xf32>
    %9 = arith.truncf %8 : vector<512x128xf32> to vector<512x128xbf16>
    %c0_7 = arith.constant 0 : index
    %c0_8 = arith.constant 0 : index
    %10 = vector.load %arg5[%c0_7, %c0_8] : memref<512x128xbf16, #tpu.memory_space<vmem>>, vector<512x128xbf16>
    tpu.vector_store %arg5[%c0_7, %c0_8], %9 {strides = array<i32>} : memref<512x128xbf16, #tpu.memory_space<vmem>>, vector<512x128xbf16>,
    return
  }
  func.func @transform_0(%arg0: i32, %arg1: i32) -> (i32, i32) {
    %c0_i32 = arith.constant 0 : i32
    %c0_i32_0 = arith.constant 0 : i32
    return %arg1, %c0_i32 : i32, i32
  }
  func.func @transform_1(%arg0: i32, %arg1: i32) -> (i32, i32, i32) {
    %c0_i32 = arith.constant 0 : i32
    %c0_i32_0 = arith.constant 0 : i32
    %c0_i32_1 = arith.constant 0 : i32
    return %arg0, %c0_i32, %c0_i32_0 : i32, i32, i32
  }
  func.func @transform_2(%arg0: i32, %arg1: i32) -> (i32, i32) {
    %c0_i32 = arith.constant 0 : i32
    %c0_i32_0 = arith.constant 0 : i32
    return %c0_i32, %arg0 : i32, i32
  }
  func.func @transform_3(%arg0: i32, %arg1: i32) -> (i32, i32) {
    %c0_i32 = arith.constant 0 : i32
    return %arg1, %arg0 : i32, i32
  }
}

module attributes {stable_mosaic.version = 11 : i64} {
  func.func @_conv_bn_relu_fused_kernel(%arg0: i32, %arg1: memref<512x1024xbf16, #tpu.memory_space<vmem>>, %arg2: memref<1x1024x128xbf16, #tpu.memory_space<vmem>>, %arg3: memref<1x128xf32, #tpu.memory_space<vmem>>, %arg4: memref<1x128xf32, #tpu.memory_space<vmem>>, %arg5: memref<1x128xf32, #tpu.memory_space<vmem>>, %arg6: memref<512x128xbf16, #tpu.memory_space<vmem>>) attributes {dimension_semantics = [#tpu.dimension_semantics<parallel>], iteration_bounds = array<i64: 1>, scalar_prefetch = 0 : i64, scratch_operands = 0 : i64, tpu.core_type = #tpu.core_type<tc>, window_params = [{pipeline_mode = #tpu.pipeline_mode<synchronous>, transform_indices = @transform_0, window_bounds = array<i64: 512, 1024>}, {transform_indices = @transform_1, window_bounds = array<i64: 1, 1024, 128>}, {transform_indices = @transform_2, window_bounds = array<i64: 1, 128>}, {transform_indices = @transform_3, window_bounds = array<i64: 1, 128>}, {transform_indices = @transform_4, window_bounds = array<i64: 1, 128>}, {transform_indices = @transform_5, window_bounds = array<i64: 512, 128>}]} {
    %c0 = arith.constant 0 : index
    %c0_0 = arith.constant 0 : index
    %0 = vector.load %arg1[%c0, %c0_0] : memref<512x1024xbf16, #tpu.memory_space<vmem>>, vector<512x1024xbf16>
    %c0_1 = arith.constant 0 : index
    %c0_2 = arith.constant 0 : index
    %c0_3 = arith.constant 0 : index
    %1 = vector.load %arg2[%c0_1, %c0_2, %c0_3] : memref<1x1024x128xbf16, #tpu.memory_space<vmem>>, vector<1x1024x128xbf16>
    %2 = vector.shape_cast %1 : vector<1x1024x128xbf16> to vector<1024x128xbf16>
    %cst = arith.constant dense<0.000000e+00> : vector<512x128xf32>
    %3 = tpu.matmul %0, %2, %cst {dimension_numbers = #tpu.dot_dimension_numbers<[1], [0], [0], [1], [0, 0, 1, 1], [], []>} : vector<512x1024xbf16>, vector<1024x128xbf16>, vector<512x128xf32> -> vector<512x128xf32>
    %c0_4 = arith.constant 0 : index
    %c0_5 = arith.constant 0 : index
    %4 = vector.load %arg3[%c0_4, %c0_5] : memref<1x128xf32, #tpu.memory_space<vmem>>, vector<1x128xf32>
    %5 = vector.broadcast %4 : vector<1x128xf32> to vector<512x128xf32>
    %6 = arith.addf %3, %5 : vector<512x128xf32>
    %cst_6 = arith.constant dense<0.000000e+00> : vector<128xf32>
    %7 = vector.multi_reduction <add>, %6, %cst_6 [0] : vector<512x128xf32> to vector<128xf32>
    %8 = vector.shape_cast %7 : vector<128xf32> to vector<1x128xf32>
    %cst_7 = arith.constant 0.001953125 : f32
    %9 = vector.broadcast %cst_7 : f32 to vector<1x128xf32>
    %10 = arith.mulf %8, %9 : vector<1x128xf32>
    %11 = vector.broadcast %10 : vector<1x128xf32> to vector<512x128xf32>
    %12 = arith.subf %6, %11 : vector<512x128xf32>
    %13 = arith.mulf %12, %12 : vector<512x128xf32>
    %cst_8 = arith.constant dense<0.000000e+00> : vector<128xf32>
    %14 = vector.multi_reduction <add>, %13, %cst_8 [0] : vector<512x128xf32> to vector<128xf32>
    %15 = vector.shape_cast %14 : vector<128xf32> to vector<1x128xf32>
    %cst_9 = arith.constant 0.001953125 : f32
    %16 = vector.broadcast %cst_9 : f32 to vector<1x128xf32>
    %17 = arith.mulf %15, %16 : vector<1x128xf32>
    %cst_10 = arith.constant 9.99999974E-6 : f32
    %18 = vector.broadcast %cst_10 : f32 to vector<1x128xf32>
    %19 = arith.addf %17, %18 : vector<1x128xf32>
    %20 = math.rsqrt %19 : vector<1x128xf32>
    %21 = vector.broadcast %20 : vector<1x128xf32> to vector<512x128xf32>
    %22 = arith.mulf %12, %21 : vector<512x128xf32>
    %c0_11 = arith.constant 0 : index
    %c0_12 = arith.constant 0 : index
    %23 = vector.load %arg4[%c0_11, %c0_12] : memref<1x128xf32, #tpu.memory_space<vmem>>, vector<1x128xf32>
    %24 = vector.broadcast %23 : vector<1x128xf32> to vector<512x128xf32>
    %25 = arith.mulf %22, %24 : vector<512x128xf32>
    %c0_13 = arith.constant 0 : index
    %c0_14 = arith.constant 0 : index
    %26 = vector.load %arg5[%c0_13, %c0_14] : memref<1x128xf32, #tpu.memory_space<vmem>>, vector<1x128xf32>
    %27 = vector.broadcast %26 : vector<1x128xf32> to vector<512x128xf32>
    %28 = arith.addf %25, %27 : vector<512x128xf32>
    %cst_15 = arith.constant 0.000000e+00 : f32
    %29 = vector.broadcast %cst_15 : f32 to vector<512x128xf32>
    %30 = arith.maximumf %28, %29 : vector<512x128xf32>
    %31 = arith.truncf %30 : vector<512x128xf32> to vector<512x128xbf16>
    %c0_16 = arith.constant 0 : index
    %c0_17 = arith.constant 0 : index
    %32 = vector.load %arg6[%c0_16, %c0_17] : memref<512x128xbf16, #tpu.memory_space<vmem>>, vector<512x128xbf16>
    tpu.vector_store %arg6[%c0_16, %c0_17], %31 {strides = array<i32>} : memref<512x128xbf16, #tpu.memory_space<vmem>>, vector<512x128xbf16>,
    return
  }
  func.func @transform_0(%arg0: i32) -> (i32, i32) {
    %c0_i32 = arith.constant 0 : i32
    %c0_i32_0 = arith.constant 0 : i32
    %c0_i32_1 = arith.constant 0 : i32
    return %c0_i32, %c0_i32_0 : i32, i32
  }
  func.func @transform_1(%arg0: i32) -> (i32, i32, i32) {
    %c0_i32 = arith.constant 0 : i32
    %c0_i32_0 = arith.constant 0 : i32
    %c0_i32_1 = arith.constant 0 : i32
    return %arg0, %c0_i32, %c0_i32_0 : i32, i32, i32
  }
  func.func @transform_2(%arg0: i32) -> (i32, i32) {
    %c0_i32 = arith.constant 0 : i32
    %c0_i32_0 = arith.constant 0 : i32
    return %c0_i32, %arg0 : i32, i32
  }
  func.func @transform_3(%arg0: i32) -> (i32, i32) {
    %c0_i32 = arith.constant 0 : i32
    %c0_i32_0 = arith.constant 0 : i32
    return %c0_i32, %arg0 : i32, i32
  }
  func.func @transform_4(%arg0: i32) -> (i32, i32) {
    %c0_i32 = arith.constant 0 : i32
    %c0_i32_0 = arith.constant 0 : i32
    return %c0_i32, %arg0 : i32, i32
  }
  func.func @transform_5(%arg0: i32) -> (i32, i32) {
    %c0_i32 = arith.constant 0 : i32
    %c0_i32_0 = arith.constant 0 : i32
    return %c0_i32, %arg0 : i32, i32
  }
}

module attributes {stable_mosaic.version = 11 : i64} {
  func.func @_conv_bn_relu_fused_kernel(%arg0: i32, %arg1: memref<128x2048xbf16, #tpu.memory_space<vmem>>, %arg2: memref<1x2048x256xbf16, #tpu.memory_space<vmem>>, %arg3: memref<1x256xf32, #tpu.memory_space<vmem>>, %arg4: memref<1x256xf32, #tpu.memory_space<vmem>>, %arg5: memref<1x256xf32, #tpu.memory_space<vmem>>, %arg6: memref<128x256xbf16, #tpu.memory_space<vmem>>) attributes {dimension_semantics = [#tpu.dimension_semantics<parallel>], iteration_bounds = array<i64: 1>, scalar_prefetch = 0 : i64, scratch_operands = 0 : i64, tpu.core_type = #tpu.core_type<tc>, window_params = [{pipeline_mode = #tpu.pipeline_mode<synchronous>, transform_indices = @transform_0, window_bounds = array<i64: 128, 2048>}, {transform_indices = @transform_1, window_bounds = array<i64: 1, 2048, 256>}, {transform_indices = @transform_2, window_bounds = array<i64: 1, 256>}, {transform_indices = @transform_3, window_bounds = array<i64: 1, 256>}, {transform_indices = @transform_4, window_bounds = array<i64: 1, 256>}, {transform_indices = @transform_5, window_bounds = array<i64: 128, 256>}]} {
    %c0 = arith.constant 0 : index
    %c0_0 = arith.constant 0 : index
    %0 = vector.load %arg1[%c0, %c0_0] : memref<128x2048xbf16, #tpu.memory_space<vmem>>, vector<128x2048xbf16>
    %c0_1 = arith.constant 0 : index
    %c0_2 = arith.constant 0 : index
    %c0_3 = arith.constant 0 : index
    %1 = vector.load %arg2[%c0_1, %c0_2, %c0_3] : memref<1x2048x256xbf16, #tpu.memory_space<vmem>>, vector<1x2048x256xbf16>
    %2 = vector.shape_cast %1 : vector<1x2048x256xbf16> to vector<2048x256xbf16>
    %cst = arith.constant dense<0.000000e+00> : vector<128x256xf32>
    %3 = tpu.matmul %0, %2, %cst {dimension_numbers = #tpu.dot_dimension_numbers<[1], [0], [0], [1], [0, 0, 1, 1], [], []>} : vector<128x2048xbf16>, vector<2048x256xbf16>, vector<128x256xf32> -> vector<128x256xf32>
    %c0_4 = arith.constant 0 : index
    %c0_5 = arith.constant 0 : index
    %4 = vector.load %arg3[%c0_4, %c0_5] : memref<1x256xf32, #tpu.memory_space<vmem>>, vector<1x256xf32>
    %5 = vector.broadcast %4 : vector<1x256xf32> to vector<128x256xf32>
    %6 = arith.addf %3, %5 : vector<128x256xf32>
    %cst_6 = arith.constant dense<0.000000e+00> : vector<256xf32>
    %7 = vector.multi_reduction <add>, %6, %cst_6 [0] : vector<128x256xf32> to vector<256xf32>
    %8 = vector.shape_cast %7 : vector<256xf32> to vector<1x256xf32>
    %cst_7 = arith.constant 7.812500e-03 : f32
    %9 = vector.broadcast %cst_7 : f32 to vector<1x256xf32>
    %10 = arith.mulf %8, %9 : vector<1x256xf32>
    %11 = vector.broadcast %10 : vector<1x256xf32> to vector<128x256xf32>
    %12 = arith.subf %6, %11 : vector<128x256xf32>
    %13 = arith.mulf %12, %12 : vector<128x256xf32>
    %cst_8 = arith.constant dense<0.000000e+00> : vector<256xf32>
    %14 = vector.multi_reduction <add>, %13, %cst_8 [0] : vector<128x256xf32> to vector<256xf32>
    %15 = vector.shape_cast %14 : vector<256xf32> to vector<1x256xf32>
    %cst_9 = arith.constant 7.812500e-03 : f32
    %16 = vector.broadcast %cst_9 : f32 to vector<1x256xf32>
    %17 = arith.mulf %15, %16 : vector<1x256xf32>
    %cst_10 = arith.constant 9.99999974E-6 : f32
    %18 = vector.broadcast %cst_10 : f32 to vector<1x256xf32>
    %19 = arith.addf %17, %18 : vector<1x256xf32>
    %20 = math.rsqrt %19 : vector<1x256xf32>
    %21 = vector.broadcast %20 : vector<1x256xf32> to vector<128x256xf32>
    %22 = arith.mulf %12, %21 : vector<128x256xf32>
    %c0_11 = arith.constant 0 : index
    %c0_12 = arith.constant 0 : index
    %23 = vector.load %arg4[%c0_11, %c0_12] : memref<1x256xf32, #tpu.memory_space<vmem>>, vector<1x256xf32>
    %24 = vector.broadcast %23 : vector<1x256xf32> to vector<128x256xf32>
    %25 = arith.mulf %22, %24 : vector<128x256xf32>
    %c0_13 = arith.constant 0 : index
    %c0_14 = arith.constant 0 : index
    %26 = vector.load %arg5[%c0_13, %c0_14] : memref<1x256xf32, #tpu.memory_space<vmem>>, vector<1x256xf32>
    %27 = vector.broadcast %26 : vector<1x256xf32> to vector<128x256xf32>
    %28 = arith.addf %25, %27 : vector<128x256xf32>
    %cst_15 = arith.constant 0.000000e+00 : f32
    %29 = vector.broadcast %cst_15 : f32 to vector<128x256xf32>
    %30 = arith.maximumf %28, %29 : vector<128x256xf32>
    %31 = arith.truncf %30 : vector<128x256xf32> to vector<128x256xbf16>
    %c0_16 = arith.constant 0 : index
    %c0_17 = arith.constant 0 : index
    %32 = vector.load %arg6[%c0_16, %c0_17] : memref<128x256xbf16, #tpu.memory_space<vmem>>, vector<128x256xbf16>
    tpu.vector_store %arg6[%c0_16, %c0_17], %31 {strides = array<i32>} : memref<128x256xbf16, #tpu.memory_space<vmem>>, vector<128x256xbf16>,
    return
  }
  func.func @transform_0(%arg0: i32) -> (i32, i32) {
    %c0_i32 = arith.constant 0 : i32
    %c0_i32_0 = arith.constant 0 : i32
    %c0_i32_1 = arith.constant 0 : i32
    return %c0_i32, %c0_i32_0 : i32, i32
  }
  func.func @transform_1(%arg0: i32) -> (i32, i32, i32) {
    %c0_i32 = arith.constant 0 : i32
    %c0_i32_0 = arith.constant 0 : i32
    %c0_i32_1 = arith.constant 0 : i32
    return %arg0, %c0_i32, %c0_i32_0 : i32, i32, i32
  }
  func.func @transform_2(%arg0: i32) -> (i32, i32) {
    %c0_i32 = arith.constant 0 : i32
    %c0_i32_0 = arith.constant 0 : i32
    return %c0_i32, %arg0 : i32, i32
  }
  func.func @transform_3(%arg0: i32) -> (i32, i32) {
    %c0_i32 = arith.constant 0 : i32
    %c0_i32_0 = arith.constant 0 : i32
    return %c0_i32, %arg0 : i32, i32
  }
  func.func @transform_4(%arg0: i32) -> (i32, i32) {
    %c0_i32 = arith.constant 0 : i32
    %c0_i32_0 = arith.constant 0 : i32
    return %c0_i32, %arg0 : i32, i32
  }
  func.func @transform_5(%arg0: i32) -> (i32, i32) {
    %c0_i32 = arith.constant 0 : i32
    %c0_i32_0 = arith.constant 0 : i32
    return %c0_i32, %arg0 : i32, i32
  }
}

module attributes {stable_mosaic.version = 11 : i64} {
  func.func @_conv45_fused_kernel(%arg0: i32, %arg1: memref<32x4096xbf16, #tpu.memory_space<vmem>>, %arg2: memref<1x4096x256xbf16, #tpu.memory_space<vmem>>, %arg3: memref<1x256xf32, #tpu.memory_space<vmem>>, %arg4: memref<1x256xf32, #tpu.memory_space<vmem>>, %arg5: memref<1x256xf32, #tpu.memory_space<vmem>>, %arg6: memref<1x16x256xbf16, #tpu.memory_space<vmem>>, %arg7: memref<1x2x256xf32, #tpu.memory_space<vmem>>) attributes {dimension_semantics = [#tpu.dimension_semantics<parallel>], iteration_bounds = array<i64: 2>, scalar_prefetch = 0 : i64, scratch_operands = 0 : i64, tpu.core_type = #tpu.core_type<tc>, window_params = [{pipeline_mode = #tpu.pipeline_mode<synchronous>, transform_indices = @transform_0, window_bounds = array<i64: 32, 4096>}, {transform_indices = @transform_1, window_bounds = array<i64: 1, 4096, 256>}, {transform_indices = @transform_2, window_bounds = array<i64: 1, 256>}, {transform_indices = @transform_3, window_bounds = array<i64: 1, 256>}, {transform_indices = @transform_4, window_bounds = array<i64: 1, 256>}, {transform_indices = @transform_5, window_bounds = array<i64: 1, 16, 256>}, {transform_indices = @transform_6, window_bounds = array<i64: 1, 2, 256>}]} {
    %c0 = arith.constant 0 : index
    %c0_0 = arith.constant 0 : index
    %0 = vector.load %arg1[%c0, %c0_0] : memref<32x4096xbf16, #tpu.memory_space<vmem>>, vector<32x4096xbf16>
    %c0_1 = arith.constant 0 : index
    %c0_2 = arith.constant 0 : index
    %c0_3 = arith.constant 0 : index
    %1 = vector.load %arg2[%c0_1, %c0_2, %c0_3] : memref<1x4096x256xbf16, #tpu.memory_space<vmem>>, vector<1x4096x256xbf16>
    %2 = vector.shape_cast %1 : vector<1x4096x256xbf16> to vector<4096x256xbf16>
    %cst = arith.constant dense<0.000000e+00> : vector<32x256xf32>
    %3 = tpu.matmul %0, %2, %cst {dimension_numbers = #tpu.dot_dimension_numbers<[1], [0], [0], [1], [0, 0, 1, 1], [], []>} : vector<32x4096xbf16>, vector<4096x256xbf16>, vector<32x256xf32> -> vector<32x256xf32>
    %c0_4 = arith.constant 0 : index
    %c0_5 = arith.constant 0 : index
    %4 = vector.load %arg3[%c0_4, %c0_5] : memref<1x256xf32, #tpu.memory_space<vmem>>, vector<1x256xf32>
    %5 = vector.broadcast %4 : vector<1x256xf32> to vector<32x256xf32>
    %6 = arith.addf %3, %5 : vector<32x256xf32>
    %cst_6 = arith.constant dense<0.000000e+00> : vector<256xf32>
    %7 = vector.multi_reduction <add>, %6, %cst_6 [0] : vector<32x256xf32> to vector<256xf32>
    %8 = vector.shape_cast %7 : vector<256xf32> to vector<1x256xf32>
    %cst_7 = arith.constant 3.125000e-02 : f32
    %9 = vector.broadcast %cst_7 : f32 to vector<1x256xf32>
    %10 = arith.mulf %8, %9 : vector<1x256xf32>
    %11 = vector.broadcast %10 : vector<1x256xf32> to vector<32x256xf32>
    %12 = arith.subf %6, %11 : vector<32x256xf32>
    %13 = arith.mulf %12, %12 : vector<32x256xf32>
    %cst_8 = arith.constant dense<0.000000e+00> : vector<256xf32>
    %14 = vector.multi_reduction <add>, %13, %cst_8 [0] : vector<32x256xf32> to vector<256xf32>
    %15 = vector.shape_cast %14 : vector<256xf32> to vector<1x256xf32>
    %cst_9 = arith.constant 3.125000e-02 : f32
    %16 = vector.broadcast %cst_9 : f32 to vector<1x256xf32>
    %17 = arith.mulf %15, %16 : vector<1x256xf32>
    %cst_10 = arith.constant 9.99999974E-6 : f32
    %18 = vector.broadcast %cst_10 : f32 to vector<1x256xf32>
    %19 = arith.addf %17, %18 : vector<1x256xf32>
    %20 = math.rsqrt %19 : vector<1x256xf32>
    %21 = vector.broadcast %20 : vector<1x256xf32> to vector<32x256xf32>
    %22 = arith.mulf %12, %21 : vector<32x256xf32>
    %c0_11 = arith.constant 0 : index
    %c0_12 = arith.constant 0 : index
    %23 = vector.load %arg4[%c0_11, %c0_12] : memref<1x256xf32, #tpu.memory_space<vmem>>, vector<1x256xf32>
    %24 = vector.broadcast %23 : vector<1x256xf32> to vector<32x256xf32>
    %25 = arith.mulf %22, %24 : vector<32x256xf32>
    %c0_13 = arith.constant 0 : index
    %c0_14 = arith.constant 0 : index
    %26 = vector.load %arg5[%c0_13, %c0_14] : memref<1x256xf32, #tpu.memory_space<vmem>>, vector<1x256xf32>
    %27 = vector.broadcast %26 : vector<1x256xf32> to vector<32x256xf32>
    %28 = arith.addf %25, %27 : vector<32x256xf32>
    %cst_15 = arith.constant 0.000000e+00 : f32
    %29 = vector.broadcast %cst_15 : f32 to vector<32x256xf32>
    %30 = arith.maximumf %28, %29 : vector<32x256xf32>
    %31 = arith.truncf %30 : vector<32x256xf32> to vector<32x256xbf16>
    %32 = arith.extf %31 : vector<32x256xbf16> to vector<32x256xf32>
    %c0_16 = arith.constant 0 : index
    %c0_17 = arith.constant 0 : index
    %c0_18 = arith.constant 0 : index
    %33 = vector.load %arg6[%c0_16, %c0_17, %c0_18] : memref<1x16x256xbf16, #tpu.memory_space<vmem>>, vector<1x16x256xbf16>
    %34 = vector.shape_cast %33 : vector<1x16x256xbf16> to vector<16x256xbf16>
    %35 = arith.extf %34 : vector<16x256xbf16> to vector<16x256xf32>
    %36 = vector.shape_cast %32 : vector<32x256xf32> to vector<2x16x256xf32>
    %37 = vector.shape_cast %35 : vector<16x256xf32> to vector<1x16x256xf32>
    %38 = vector.broadcast %37 : vector<1x16x256xf32> to vector<2x16x256xf32>
    %39 = arith.mulf %36, %38 : vector<2x16x256xf32>
    %cst_19 = arith.constant dense<0.000000e+00> : vector<2x256xf32>
    %40 = vector.multi_reduction <add>, %39, %cst_19 [1] : vector<2x16x256xf32> to vector<2x256xf32>
    %c0_20 = arith.constant 0 : index
    %c0_21 = arith.constant 0 : index
    %c0_22 = arith.constant 0 : index
    %41 = vector.load %arg7[%c0_20, %c0_21, %c0_22] : memref<1x2x256xf32, #tpu.memory_space<vmem>>, vector<1x2x256xf32>
    %42 = vector.shape_cast %41 : vector<1x2x256xf32> to vector<2x256xf32>
    %43 = vector.shape_cast %40 : vector<2x256xf32> to vector<1x2x256xf32>
    tpu.vector_store %arg7[%c0_20, %c0_21, %c0_22], %43 {strides = array<i32>} : memref<1x2x256xf32, #tpu.memory_space<vmem>>, vector<1x2x256xf32>,
    return
  }
  func.func @transform_0(%arg0: i32) -> (i32, i32) {
    %c0_i32 = arith.constant 0 : i32
    %c0_i32_0 = arith.constant 0 : i32
    %c0_i32_1 = arith.constant 0 : i32
    return %c0_i32, %c0_i32_0 : i32, i32
  }
  func.func @transform_1(%arg0: i32) -> (i32, i32, i32) {
    %c0_i32 = arith.constant 0 : i32
    %c0_i32_0 = arith.constant 0 : i32
    %c0_i32_1 = arith.constant 0 : i32
    return %arg0, %c0_i32, %c0_i32_0 : i32, i32, i32
  }
  func.func @transform_2(%arg0: i32) -> (i32, i32) {
    %c0_i32 = arith.constant 0 : i32
    %c0_i32_0 = arith.constant 0 : i32
    return %c0_i32, %arg0 : i32, i32
  }
  func.func @transform_3(%arg0: i32) -> (i32, i32) {
    %c0_i32 = arith.constant 0 : i32
    %c0_i32_0 = arith.constant 0 : i32
    return %c0_i32, %arg0 : i32, i32
  }
  func.func @transform_4(%arg0: i32) -> (i32, i32) {
    %c0_i32 = arith.constant 0 : i32
    %c0_i32_0 = arith.constant 0 : i32
    return %c0_i32, %arg0 : i32, i32
  }
  func.func @transform_5(%arg0: i32) -> (i32, i32, i32) {
    %c0_i32 = arith.constant 0 : i32
    %c0_i32_0 = arith.constant 0 : i32
    %c0_i32_1 = arith.constant 0 : i32
    return %arg0, %c0_i32, %c0_i32_0 : i32, i32, i32
  }
  func.func @transform_6(%arg0: i32) -> (i32, i32, i32) {
    %c0_i32 = arith.constant 0 : i32
    %c0_i32_0 = arith.constant 0 : i32
    %c0_i32_1 = arith.constant 0 : i32
    return %arg0, %c0_i32, %c0_i32_0 : i32, i32, i32
  }
}

</mosaic_0001>

<bundles_post_ra>
// kernel: discriminator_forward.4
= control target key start
LH: loop header
LB: loop body
LE: loop exit
PB: predicated region body
PF: predicated region fallthrough
CT: control target
= control target key end

     0   :  { %s1948_s12 = smov 0   ;;  %s1950_s13 = smov 0   ;;  %s2149_s0 = inlined_call_operand.vmem [shape: bf16[2048,128], index: 0, kind: input, shape index: {}]   ;;  %s2150_s1 = inlined_call_operand.vmem [shape: bf16[1,128,128], index: 1, kind: input, shape index: {}]   ;;  %s2151_s2 = inlined_call_operand.vmem [shape: f32[1,128], index: 2, kind: input, shape index: {}]   ;;  %s2152_s3 = inlined_call_operand.vmem [shape: bf16[2048,128], index: 3, kind: output, shape index: {}]  }
   0x1   :  { %s1952_s14 = smov 0  }
   0x2 LB: > { %s22_s15 = sadd.s32 1, %s1922_s13  ;;  %p1337_p0 = scmp.ge.s32.totalorder %s1926_s14, 1  ;;  %s1926_s14 = sphi %s1952_s14, %s13_s14   ;;  %s1922_s13 = sphi %s1950_s13, %s2154_s13   ;;  %s1918_s12 = sphi %s1948_s12, %s2153_s12  }
   0x3   : > { %p23_p1 = scmp.ge.s32.totalorder %s22_s15, 4  ;;  %p170_p2 = scmp.lt.s32.totalorder %s1926_s14, 5 }
   0x5   : > { %s2156_s15 = smov (%p23_p1, %s22_s15), 0  ;;  %p171_p3 = pnand %p1337_p0, %p170_p2 }
   0x6   : > { %v1864_v0 = vld [vmem:[%s2150_s1] sm:$0xff] (!%p171_p3)   ;;  %s1338_s18 = sshll.u32 (!%p171_p3), %s1918_s12, 6  ;;  %v1865_v1 = vld [vmem:[%s2150_s1 + $0x8] sm:$0xff] (!%p171_p3)   ;;  %v1866_v2 = vld [vmem:[%s2150_s1 + $0x10] sm:$0xff] (!%p171_p3)  }
   0x7   : > { %174 = sbr.rel (%p171_p3) target bundleno = 317 (0x13d), region = 32  ;;  %p206_p4 = scmp.lt.s32.totalorder (!%p171_p3), %s1338_s18, 255  ;;  %1744 = vmatprep.subr.bf16.mxu0 (!%p171_p3), %v1864_v0  ;;  %1824 = vmatprep.subr.bf16.mxu1 (!%p171_p3), %v1864_v0  ;;  %v1867_v3 = vld [vmem:[%s2150_s1 + $0x18] sm:$0xff] (!%p171_p3)   ;;  %v1868_v6 = vld [vmem:[%s2150_s1 + $0x20] sm:$0xff] (!%p171_p3)   ;;  %v1869_v7 = vld [vmem:[%s2150_s1 + $0x28] sm:$0xff] (!%p171_p3)  }
   0x8   : > { %1745 = vmatpush3.bf16.msra.mxu0 (!%p171_p3), %v1864_v0  ;;  %1832 = vmatpush3.bf16.msra.mxu1 (!%p171_p3), %v1864_v0  ;;  %v1870_v8 = vld [vmem:[%s2150_s1 + $0x30] sm:$0xff] (!%p171_p3)   ;;  %v1871_v9 = vld [vmem:[%s2150_s1 + $0x38] sm:$0xff] (!%p171_p3)   ;;  %v2035_v40 = vld [vmem:[%s2151_s2] ss:$0 sm:$0xff] (!%p171_p3) }
   0x9   : > { %1746 = vmatprep.subr.bf16.mxu0 (!%p171_p3), %v1865_v1  ;;  %1825 = vmatprep.subr.bf16.mxu1 (!%p171_p3), %v1865_v1 }
   0xc   : > { %1747 = vmatpush3.bf16.msra.mxu0 (!%p171_p3), %v1865_v1  ;;  %1833 = vmatpush3.bf16.msra.mxu1 (!%p171_p3), %v1865_v1 }
   0xd   : > { %1748 = vmatprep.subr.bf16.mxu0 (!%p171_p3), %v1866_v2  ;;  %1826 = vmatprep.subr.bf16.mxu1 (!%p171_p3), %v1866_v2 }
   0xe   : > { %s2158_s18 = smov (!%p206_p4, %s1338_s18), 255 }
   0xf   : > { %s1339_s23 = sshll.u32 %s2158_s18, 2 }
  0x10   : > { %s1983_s26 = scalar_lea.vmem %s2149_s0, %s1339_s23  ;;  %1749 = vmatpush3.bf16.msra.mxu0 %v1866_v2  ;;  %1834 = vmatpush3.bf16.msra.mxu1 %v1866_v2  ;;  %s2050_s17 = scalar_lea.vmem %s2152_s3, %s1339_s23 }
  0x11   : > { %v1872_v4 = vld [vmem:[%s1983_s26] sm:$0xff]   ;;  %1750 = vmatprep.subr.bf16.mxu0 %v1867_v3  ;;  %1827 = vmatprep.subr.bf16.mxu1 %v1867_v3  ;;  %v1874_v10 = vld [vmem:[%s1983_s26 + $0x8] sm:$0xff]   ;;  %v1876_v12 = vld [vmem:[%s1983_s26 + $0x10] sm:$0xff]  }
  0x12   : > { %v1873_v5 = vld [vmem:[%s1983_s26 + $0x80] sm:$0xff]   ;;  %1760 = vmatprep.mubr.bf16.mxu0 %v1872_v4  ;;  %v1875_v11 = vld [vmem:[%s1983_s26 + $0x88] sm:$0xff]   ;;  %v1877_v13 = vld [vmem:[%s1983_s26 + $0x90] sm:$0xff]  }
  0x13   : > { %1792 = vmatprep.mubr.bf16.mxu1 %v1873_v5  ;;  %v1878_v14 = vld [vmem:[%s1983_s26 + $0x18] sm:$0xff]   ;;  %v1880_v16 = vld [vmem:[%s1983_s26 + $0x20] sm:$0xff]   ;;  %v1882_v18 = vld [vmem:[%s1983_s26 + $0x28] sm:$0xff]  }
  0x14   : > { %1751 = vmatpush3.bf16.msra.mxu0 %v1867_v3  ;;  %1835 = vmatpush3.bf16.msra.mxu1 %v1867_v3  ;;  %v1879_v15 = vld [vmem:[%s1983_s26 + $0x98] sm:$0xff]   ;;  %v1881_v17 = vld [vmem:[%s1983_s26 + $0xa0] sm:$0xff]   ;;  %v1883_v19 = vld [vmem:[%s1983_s26 + $0xa8] sm:$0xff]  }
  0x15   : > { %1752 = vmatprep.subr.bf16.mxu0 %v1868_v6  ;;  %1828 = vmatprep.subr.bf16.mxu1 %v1868_v6  ;;  %v1884_v20 = vld [vmem:[%s1983_s26 + $0x30] sm:$0xff]   ;;  %v1886_v22 = vld [vmem:[%s1983_s26 + $0x38] sm:$0xff]   ;;  %v1888_v24 = vld [vmem:[%s1983_s26 + $0x40] sm:$0xff]  }
  0x16   : > { %v1885_v21 = vld [vmem:[%s1983_s26 + $0xb0] sm:$0xff]   ;;  %v1887_v23 = vld [vmem:[%s1983_s26 + $0xb8] sm:$0xff]   ;;  %v1889_v25 = vld [vmem:[%s1983_s26 + $0xc0] sm:$0xff]  }
  0x17   : > { %v1890_v26 = vld [vmem:[%s1983_s26 + $0x48] sm:$0xff]   ;;  %v1892_v28 = vld [vmem:[%s1983_s26 + $0x50] sm:$0xff]   ;;  %v1894_v30 = vld [vmem:[%s1983_s26 + $0x58] sm:$0xff]  }
  0x18   : > { %1753 = vmatpush3.bf16.msra.mxu0 %v1868_v6  ;;  %1836 = vmatpush3.bf16.msra.mxu1 %v1868_v6  ;;  %v1891_v27 = vld [vmem:[%s1983_s26 + $0xc8] sm:$0xff]   ;;  %v1893_v29 = vld [vmem:[%s1983_s26 + $0xd0] sm:$0xff]   ;;  %v1895_v31 = vld [vmem:[%s1983_s26 + $0xd8] sm:$0xff]  }
  0x19   : > { %1754 = vmatprep.subr.bf16.mxu0 %v1869_v7  ;;  %1829 = vmatprep.subr.bf16.mxu1 %v1869_v7  ;;  %v1896_v32 = vld [vmem:[%s1983_s26 + $0x60] sm:$0xff]   ;;  %v1898_v34 = vld [vmem:[%s1983_s26 + $0x68] sm:$0xff]   ;;  %v1900_v36 = vld [vmem:[%s1983_s26 + $0x70] sm:$0xff]  }
  0x1a   : > { %v1897_v33 = vld [vmem:[%s1983_s26 + $0xe0] sm:$0xff]   ;;  %v1899_v35 = vld [vmem:[%s1983_s26 + $0xe8] sm:$0xff]   ;;  %v1901_v37 = vld [vmem:[%s1983_s26 + $0xf0] sm:$0xff]  }
  0x1b   : > { %v1902_v38 = vld [vmem:[%s1983_s26 + $0x78] sm:$0xff]  }
  0x1c   : > { %1755 = vmatpush3.bf16.msra.mxu0 %v1869_v7  ;;  %1837 = vmatpush3.bf16.msra.mxu1 %v1869_v7  ;;  %v1903_v39 = vld [vmem:[%s1983_s26 + $0xf8] sm:$0xff]  }
  0x1d   : > { %1756 = vmatprep.subr.bf16.mxu0 %v1870_v8  ;;  %1830 = vmatprep.subr.bf16.mxu1 %v1870_v8 }
  0x20   : > { %1757 = vmatpush3.bf16.msra.mxu0 %v1870_v8  ;;  %1838 = vmatpush3.bf16.msra.mxu1 %v1870_v8 }
  0x21   : > { %1758 = vmatprep.subr.bf16.mxu0 %v1871_v9  ;;  %1831 = vmatprep.subr.bf16.mxu1 %v1871_v9 }
  0x24   : > { %1759 = vmatpush3.bf16.msra.mxu0 %v1871_v9  ;;  %1839 = vmatpush3.bf16.msra.mxu1 %v1871_v9 }
  0x27   : > { %1761 = vmatmul.mubr.bf16.vlgmr.msra.gmra.mrb[0].mxu0 %v1874_v10  ;;  %1793 = vmatmul.mubr.bf16.vlgmr.msra.gmra.mrb[0].mxu1 %v1875_v11 }
  0x28   : > { %1764 = vmatprep.mubr.bf16.mxu0 %v1876_v12  ;;  %1796 = vmatprep.mubr.bf16.mxu1 %v1877_v13 }
  0x2f   : > { %1765 = vmatmul.mubr.bf16.gmra.mrb[4].mxu0 %v1878_v14  ;;  %1797 = vmatmul.mubr.bf16.gmra.mrb[4].mxu1 %v1879_v15 }
  0x30   : > { %1768 = vmatprep.mubr.bf16.mxu0 %v1880_v16  ;;  %1800 = vmatprep.mubr.bf16.mxu1 %v1881_v17 }
  0x37   : > { %1769 = vmatmul.mubr.bf16.gmra.mrb[8].mxu0 %v1882_v18  ;;  %1801 = vmatmul.mubr.bf16.gmra.mrb[8].mxu1 %v1883_v19 }
  0x38   : > { %1772 = vmatprep.mubr.bf16.mxu0 %v1884_v20  ;;  %1804 = vmatprep.mubr.bf16.mxu1 %v1885_v21 }
  0x3f   : > { %1773 = vmatmul.mubr.bf16.gmra.mrb[12].mxu0 %v1886_v22  ;;  %1805 = vmatmul.mubr.bf16.gmra.mrb[12].mxu1 %v1887_v23 }
  0x40   : > { %1776 = vmatprep.mubr.bf16.mxu0 %v1888_v24  ;;  %1808 = vmatprep.mubr.bf16.mxu1 %v1889_v25 }
  0x47   : > { %1777 = vmatmul.mubr.bf16.gmra.mrb[16].mxu0 %v1890_v26  ;;  %1809 = vmatmul.mubr.bf16.gmra.mrb[16].mxu1 %v1891_v27 }
  0x48   : > { %1780 = vmatprep.mubr.bf16.mxu0 %v1892_v28  ;;  %1812 = vmatprep.mubr.bf16.mxu1 %v1893_v29 }
  0x4f   : > { %1781 = vmatmul.mubr.bf16.gmra.mrb[20].mxu0 %v1894_v30  ;;  %1813 = vmatmul.mubr.bf16.gmra.mrb[20].mxu1 %v1895_v31 }
  0x50   : > { %1784 = vmatprep.mubr.bf16.mxu0 %v1896_v32  ;;  %1816 = vmatprep.mubr.bf16.mxu1 %v1897_v33 }
  0x57   : > { %1785 = vmatmul.mubr.bf16.gmra.mrb[24].mxu0 %v1898_v34  ;;  %1817 = vmatmul.mubr.bf16.gmra.mrb[24].mxu1 %v1899_v35 }
  0x58   : > { %1788 = vmatprep.mubr.bf16.mxu0 %v1900_v36  ;;  %1820 = vmatprep.mubr.bf16.mxu1 %v1901_v37 }
  0x5f   : > { %1789 = vmatmul.mubr.bf16.gmra.mrb[28].mxu0 %v1902_v38  ;;  %1821 = vmatmul.mubr.bf16.gmra.mrb[28].mxu1 %v1903_v39 }
  0xfa   : > { %v1762_v41 = vpop.f32.mrb[0].mxu0  ;;  %v1794_v42 = vpop.f32.mrb[0].mxu1 }
  0xfb   : > { %v599_v43 = vadd.f32 %v1762_v41, %v2035_v40  ;;  %v727_v44 = vadd.f32 %v1794_v42, %v2035_v40  ;;  %v590_v45 = vpop.f32.mrb[1].mxu0  ;;  %v718_v46 = vpop.f32.mrb[1].mxu1 }
  0xfc   : > { %v591_v47 = vadd.f32 %v2035_v40, %v590_v45  ;;  %v719_v48 = vadd.f32 %v2035_v40, %v718_v46  ;;  %v1763_v49 = vpop.f32.mrb[2].mxu0  ;;  %v1795_v50 = vpop.f32.mrb[2].mxu1 }
  0xfd   : > { %v602_v51 = vadd.f32 %v1763_v49, %v2035_v40  ;;  %v730_v52 = vadd.f32 %v1795_v50, %v2035_v40  ;;  %v593_v53 = vpop.f32.mrb[3].mxu0  ;;  %v721_v54 = vpop.f32.mrb[3].mxu1  ;;  %v847_v57 = vmax.f32 %v599_v43, 0.0  ;;  %v879_v58 = vmax.f32 %v727_v44, 0.0 }
  0xfe   : > { %v594_v55 = vadd.f32 %v2035_v40, %v593_v53  ;;  %v722_v56 = vadd.f32 %v2035_v40, %v721_v54  ;;  %v845_v61 = vmax.f32 %v591_v47, 0.0  ;;  %v877_v62 = vmax.f32 %v719_v48, 0.0 }
  0xff   : > { %v848_v59 = vmax.f32 %v602_v51, 0.0  ;;  %v880_v60 = vmax.f32 %v730_v52, 0.0 }
 0x100   : > { %v846_v63 = vmax.f32 %v594_v55, 0.0  ;;  %v878_v0 = vmax.f32 %v722_v56, 0.0 }
 0x101   : > { %v1521_v1 = vpack.c.bf16 %v848_v59, %v847_v57  ;;  %v1601_v2 = vpack.c.bf16 %v880_v60, %v879_v58 }
 0x102   : > { %v1516_v3 = vpack.c.bf16 %v846_v63, %v845_v61  ;;  %v1596_v4 = vpack.c.bf16 %v878_v0, %v877_v62  ;;  %v1766_v5 = vpop.f32.mrb[4].mxu0  ;;  %v1798_v6 = vpop.f32.mrb[4].mxu1 }
 0x103   : > { %1673 = vst [vmem:[%s2050_s17 + $0x8] sm:$0xff] %v1521_v1   ;;  %1689 = vst [vmem:[%s2050_s17 + $0x88] sm:$0xff] %v1601_v2   ;;  %v615_v7 = vadd.f32 %v1766_v5, %v2035_v40  ;;  %v743_v8 = vadd.f32 %v1798_v6, %v2035_v40  ;;  %v606_v9 = vpop.f32.mrb[5].mxu0  ;;  %v734_v10 = vpop.f32.mrb[5].mxu1 }
 0x104   : > { %1517 = vst [vmem:[%s2050_s17] sm:$0xff] %v1516_v3   ;;  %1688 = vst [vmem:[%s2050_s17 + $0x80] sm:$0xff] %v1596_v4   ;;  %v607_v11 = vadd.f32 %v2035_v40, %v606_v9  ;;  %v735_v12 = vadd.f32 %v2035_v40, %v734_v10  ;;  %v1767_v13 = vpop.f32.mrb[6].mxu0  ;;  %v1799_v14 = vpop.f32.mrb[6].mxu1 }
 0x105   : > { %v618_v15 = vadd.f32 %v1767_v13, %v2035_v40  ;;  %v746_v16 = vadd.f32 %v1799_v14, %v2035_v40  ;;  %v609_v17 = vpop.f32.mrb[7].mxu0  ;;  %v737_v18 = vpop.f32.mrb[7].mxu1  ;;  %v851_v21 = vmax.f32 %v615_v7, 0.0  ;;  %v883_v22 = vmax.f32 %v743_v8, 0.0 }
 0x106   : > { %v610_v19 = vadd.f32 %v2035_v40, %v609_v17  ;;  %v738_v20 = vadd.f32 %v2035_v40, %v737_v18  ;;  %v849_v25 = vmax.f32 %v607_v11, 0.0  ;;  %v881_v26 = vmax.f32 %v735_v12, 0.0 }
 0x107   : > { %v852_v23 = vmax.f32 %v618_v15, 0.0  ;;  %v884_v24 = vmax.f32 %v746_v16, 0.0 }
 0x108   : > { %v850_v27 = vmax.f32 %v610_v19, 0.0  ;;  %v882_v28 = vmax.f32 %v738_v20, 0.0 }
 0x109   : > { %v1531_v29 = vpack.c.bf16 %v852_v23, %v851_v21  ;;  %v1611_v30 = vpack.c.bf16 %v884_v24, %v883_v22 }
 0x10a   : > { %v1526_v31 = vpack.c.bf16 %v850_v27, %v849_v25  ;;  %v1606_v32 = vpack.c.bf16 %v882_v28, %v881_v26  ;;  %v1770_v33 = vpop.f32.mrb[8].mxu0  ;;  %v1802_v34 = vpop.f32.mrb[8].mxu1 }
 0x10b   : > { %1675 = vst [vmem:[%s2050_s17 + $0x18] sm:$0xff] %v1531_v29   ;;  %1691 = vst [vmem:[%s2050_s17 + $0x98] sm:$0xff] %v1611_v30   ;;  %v631_v35 = vadd.f32 %v1770_v33, %v2035_v40  ;;  %v759_v36 = vadd.f32 %v1802_v34, %v2035_v40  ;;  %v622_v37 = vpop.f32.mrb[9].mxu0  ;;  %v750_v38 = vpop.f32.mrb[9].mxu1 }
 0x10c   : > { %1674 = vst [vmem:[%s2050_s17 + $0x10] sm:$0xff] %v1526_v31   ;;  %1690 = vst [vmem:[%s2050_s17 + $0x90] sm:$0xff] %v1606_v32   ;;  %v623_v39 = vadd.f32 %v2035_v40, %v622_v37  ;;  %v751_v41 = vadd.f32 %v2035_v40, %v750_v38  ;;  %v1771_v42 = vpop.f32.mrb[10].mxu0  ;;  %v1803_v43 = vpop.f32.mrb[10].mxu1 }
 0x10d   : > { %v634_v44 = vadd.f32 %v1771_v42, %v2035_v40  ;;  %v762_v45 = vadd.f32 %v1803_v43, %v2035_v40  ;;  %v625_v46 = vpop.f32.mrb[11].mxu0  ;;  %v753_v47 = vpop.f32.mrb[11].mxu1  ;;  %v855_v50 = vmax.f32 %v631_v35, 0.0  ;;  %v887_v51 = vmax.f32 %v759_v36, 0.0 }
 0x10e   : > { %v626_v48 = vadd.f32 %v2035_v40, %v625_v46  ;;  %v754_v49 = vadd.f32 %v2035_v40, %v753_v47  ;;  %v853_v54 = vmax.f32 %v623_v39, 0.0  ;;  %v885_v55 = vmax.f32 %v751_v41, 0.0 }
 0x10f   : > { %v856_v52 = vmax.f32 %v634_v44, 0.0  ;;  %v888_v53 = vmax.f32 %v762_v45, 0.0 }
 0x110   : > { %v854_v56 = vmax.f32 %v626_v48, 0.0  ;;  %v886_v57 = vmax.f32 %v754_v49, 0.0 }
 0x111   : > { %v1541_v58 = vpack.c.bf16 %v856_v52, %v855_v50  ;;  %v1621_v59 = vpack.c.bf16 %v888_v53, %v887_v51 }
 0x112   : > { %v1536_v60 = vpack.c.bf16 %v854_v56, %v853_v54  ;;  %v1616_v61 = vpack.c.bf16 %v886_v57, %v885_v55  ;;  %v1774_v62 = vpop.f32.mrb[12].mxu0  ;;  %v1806_v63 = vpop.f32.mrb[12].mxu1 }
 0x113   : > { %1677 = vst [vmem:[%s2050_s17 + $0x28] sm:$0xff] %v1541_v58   ;;  %1693 = vst [vmem:[%s2050_s17 + $0xa8] sm:$0xff] %v1621_v59   ;;  %v647_v0 = vadd.f32 %v1774_v62, %v2035_v40  ;;  %v775_v1 = vadd.f32 %v1806_v63, %v2035_v40  ;;  %v638_v2 = vpop.f32.mrb[13].mxu0  ;;  %v766_v3 = vpop.f32.mrb[13].mxu1 }
 0x114   : > { %1676 = vst [vmem:[%s2050_s17 + $0x20] sm:$0xff] %v1536_v60   ;;  %1692 = vst [vmem:[%s2050_s17 + $0xa0] sm:$0xff] %v1616_v61   ;;  %v639_v4 = vadd.f32 %v2035_v40, %v638_v2  ;;  %v767_v5 = vadd.f32 %v2035_v40, %v766_v3  ;;  %v1775_v6 = vpop.f32.mrb[14].mxu0  ;;  %v1807_v7 = vpop.f32.mrb[14].mxu1 }
 0x115   : > { %v650_v8 = vadd.f32 %v1775_v6, %v2035_v40  ;;  %v778_v9 = vadd.f32 %v1807_v7, %v2035_v40  ;;  %v641_v10 = vpop.f32.mrb[15].mxu0  ;;  %v769_v11 = vpop.f32.mrb[15].mxu1  ;;  %v859_v14 = vmax.f32 %v647_v0, 0.0  ;;  %v891_v15 = vmax.f32 %v775_v1, 0.0 }
 0x116   : > { %v642_v12 = vadd.f32 %v2035_v40, %v641_v10  ;;  %v770_v13 = vadd.f32 %v2035_v40, %v769_v11  ;;  %v857_v18 = vmax.f32 %v639_v4, 0.0  ;;  %v889_v19 = vmax.f32 %v767_v5, 0.0 }
 0x117   : > { %v860_v16 = vmax.f32 %v650_v8, 0.0  ;;  %v892_v17 = vmax.f32 %v778_v9, 0.0 }
 0x118   : > { %v858_v20 = vmax.f32 %v642_v12, 0.0  ;;  %v890_v21 = vmax.f32 %v770_v13, 0.0 }
 0x119   : > { %v1551_v22 = vpack.c.bf16 %v860_v16, %v859_v14  ;;  %v1631_v23 = vpack.c.bf16 %v892_v17, %v891_v15 }
 0x11a   : > { %v1546_v24 = vpack.c.bf16 %v858_v20, %v857_v18  ;;  %v1626_v25 = vpack.c.bf16 %v890_v21, %v889_v19  ;;  %v1778_v26 = vpop.f32.mrb[16].mxu0  ;;  %v1810_v27 = vpop.f32.mrb[16].mxu1 }
 0x11b   : > { %1679 = vst [vmem:[%s2050_s17 + $0x38] sm:$0xff] %v1551_v22   ;;  %1695 = vst [vmem:[%s2050_s17 + $0xb8] sm:$0xff] %v1631_v23   ;;  %v663_v28 = vadd.f32 %v1778_v26, %v2035_v40  ;;  %v791_v29 = vadd.f32 %v1810_v27, %v2035_v40  ;;  %v654_v30 = vpop.f32.mrb[17].mxu0  ;;  %v782_v31 = vpop.f32.mrb[17].mxu1 }
 0x11c   : > { %1678 = vst [vmem:[%s2050_s17 + $0x30] sm:$0xff] %v1546_v24   ;;  %1694 = vst [vmem:[%s2050_s17 + $0xb0] sm:$0xff] %v1626_v25   ;;  %v655_v32 = vadd.f32 %v2035_v40, %v654_v30  ;;  %v783_v33 = vadd.f32 %v2035_v40, %v782_v31  ;;  %v1779_v34 = vpop.f32.mrb[18].mxu0  ;;  %v1811_v35 = vpop.f32.mrb[18].mxu1 }
 0x11d   : > { %v666_v36 = vadd.f32 %v1779_v34, %v2035_v40  ;;  %v794_v37 = vadd.f32 %v1811_v35, %v2035_v40  ;;  %v657_v38 = vpop.f32.mrb[19].mxu0  ;;  %v785_v39 = vpop.f32.mrb[19].mxu1  ;;  %v863_v43 = vmax.f32 %v663_v28, 0.0  ;;  %v895_v44 = vmax.f32 %v791_v29, 0.0 }
 0x11e   : > { %v658_v41 = vadd.f32 %v2035_v40, %v657_v38  ;;  %v786_v42 = vadd.f32 %v2035_v40, %v785_v39  ;;  %v861_v47 = vmax.f32 %v655_v32, 0.0  ;;  %v893_v48 = vmax.f32 %v783_v33, 0.0 }
 0x11f   : > { %v864_v45 = vmax.f32 %v666_v36, 0.0  ;;  %v896_v46 = vmax.f32 %v794_v37, 0.0 }
 0x120   : > { %v862_v49 = vmax.f32 %v658_v41, 0.0  ;;  %v894_v50 = vmax.f32 %v786_v42, 0.0 }
 0x121   : > { %v1561_v51 = vpack.c.bf16 %v864_v45, %v863_v43  ;;  %v1641_v52 = vpack.c.bf16 %v896_v46, %v895_v44 }
 0x122   : > { %v1556_v53 = vpack.c.bf16 %v862_v49, %v861_v47  ;;  %v1636_v54 = vpack.c.bf16 %v894_v50, %v893_v48  ;;  %v1782_v55 = vpop.f32.mrb[20].mxu0  ;;  %v1814_v56 = vpop.f32.mrb[20].mxu1 }
 0x123   : > { %1681 = vst [vmem:[%s2050_s17 + $0x48] sm:$0xff] %v1561_v51   ;;  %1697 = vst [vmem:[%s2050_s17 + $0xc8] sm:$0xff] %v1641_v52   ;;  %v679_v57 = vadd.f32 %v1782_v55, %v2035_v40  ;;  %v807_v58 = vadd.f32 %v1814_v56, %v2035_v40  ;;  %v670_v59 = vpop.f32.mrb[21].mxu0  ;;  %v798_v60 = vpop.f32.mrb[21].mxu1 }
 0x124   : > { %1680 = vst [vmem:[%s2050_s17 + $0x40] sm:$0xff] %v1556_v53   ;;  %1696 = vst [vmem:[%s2050_s17 + $0xc0] sm:$0xff] %v1636_v54   ;;  %v671_v61 = vadd.f32 %v2035_v40, %v670_v59  ;;  %v799_v62 = vadd.f32 %v2035_v40, %v798_v60  ;;  %v1783_v63 = vpop.f32.mrb[22].mxu0  ;;  %v1815_v0 = vpop.f32.mrb[22].mxu1 }
 0x125   : > { %v682_v1 = vadd.f32 %v1783_v63, %v2035_v40  ;;  %v810_v2 = vadd.f32 %v1815_v0, %v2035_v40  ;;  %v673_v3 = vpop.f32.mrb[23].mxu0  ;;  %v801_v4 = vpop.f32.mrb[23].mxu1  ;;  %v867_v7 = vmax.f32 %v679_v57, 0.0  ;;  %v899_v8 = vmax.f32 %v807_v58, 0.0 }
 0x126   : > { %v674_v5 = vadd.f32 %v2035_v40, %v673_v3  ;;  %v802_v6 = vadd.f32 %v2035_v40, %v801_v4  ;;  %v865_v11 = vmax.f32 %v671_v61, 0.0  ;;  %v897_v12 = vmax.f32 %v799_v62, 0.0 }
 0x127   : > { %v868_v9 = vmax.f32 %v682_v1, 0.0  ;;  %v900_v10 = vmax.f32 %v810_v2, 0.0 }
 0x128   : > { %v866_v13 = vmax.f32 %v674_v5, 0.0  ;;  %v898_v14 = vmax.f32 %v802_v6, 0.0 }
 0x129   : > { %v1571_v15 = vpack.c.bf16 %v868_v9, %v867_v7  ;;  %v1651_v16 = vpack.c.bf16 %v900_v10, %v899_v8 }
 0x12a   : > { %v1566_v17 = vpack.c.bf16 %v866_v13, %v865_v11  ;;  %v1646_v18 = vpack.c.bf16 %v898_v14, %v897_v12  ;;  %v1786_v19 = vpop.f32.mrb[24].mxu0  ;;  %v1818_v20 = vpop.f32.mrb[24].mxu1 }
 0x12b   : > { %1683 = vst [vmem:[%s2050_s17 + $0x58] sm:$0xff] %v1571_v15   ;;  %1699 = vst [vmem:[%s2050_s17 + $0xd8] sm:$0xff] %v1651_v16   ;;  %v695_v21 = vadd.f32 %v1786_v19, %v2035_v40  ;;  %v823_v22 = vadd.f32 %v1818_v20, %v2035_v40  ;;  %v686_v23 = vpop.f32.mrb[25].mxu0  ;;  %v814_v24 = vpop.f32.mrb[25].mxu1 }
 0x12c   : > { %1682 = vst [vmem:[%s2050_s17 + $0x50] sm:$0xff] %v1566_v17   ;;  %1698 = vst [vmem:[%s2050_s17 + $0xd0] sm:$0xff] %v1646_v18   ;;  %v687_v25 = vadd.f32 %v2035_v40, %v686_v23  ;;  %v815_v26 = vadd.f32 %v2035_v40, %v814_v24  ;;  %v1787_v27 = vpop.f32.mrb[26].mxu0  ;;  %v1819_v28 = vpop.f32.mrb[26].mxu1 }
 0x12d   : > { %v698_v29 = vadd.f32 %v1787_v27, %v2035_v40  ;;  %v826_v30 = vadd.f32 %v1819_v28, %v2035_v40  ;;  %v689_v31 = vpop.f32.mrb[27].mxu0  ;;  %v817_v32 = vpop.f32.mrb[27].mxu1  ;;  %v871_v35 = vmax.f32 %v695_v21, 0.0  ;;  %v903_v36 = vmax.f32 %v823_v22, 0.0 }
 0x12e   : > { %v690_v33 = vadd.f32 %v2035_v40, %v689_v31  ;;  %v818_v34 = vadd.f32 %v2035_v40, %v817_v32  ;;  %v869_v39 = vmax.f32 %v687_v25, 0.0  ;;  %v901_v41 = vmax.f32 %v815_v26, 0.0 }
 0x12f   : > { %v872_v37 = vmax.f32 %v698_v29, 0.0  ;;  %v904_v38 = vmax.f32 %v826_v30, 0.0 }
 0x130   : > { %v870_v42 = vmax.f32 %v690_v33, 0.0  ;;  %v902_v43 = vmax.f32 %v818_v34, 0.0 }
 0x131   : > { %v1581_v44 = vpack.c.bf16 %v872_v37, %v871_v35  ;;  %v1661_v45 = vpack.c.bf16 %v904_v38, %v903_v36 }
 0x132   : > { %v1576_v46 = vpack.c.bf16 %v870_v42, %v869_v39  ;;  %v1656_v47 = vpack.c.bf16 %v902_v43, %v901_v41  ;;  %v1790_v48 = vpop.f32.mrb[28].mxu0  ;;  %v1822_v49 = vpop.f32.mrb[28].mxu1 }
 0x133   : > { %1685 = vst [vmem:[%s2050_s17 + $0x68] sm:$0xff] %v1581_v44   ;;  %1701 = vst [vmem:[%s2050_s17 + $0xe8] sm:$0xff] %v1661_v45   ;;  %v711_v50 = vadd.f32 %v1790_v48, %v2035_v40  ;;  %v839_v51 = vadd.f32 %v1822_v49, %v2035_v40  ;;  %v702_v52 = vpop.f32.mrb[29].mxu0  ;;  %v830_v53 = vpop.f32.mrb[29].mxu1 }
 0x134   : > { %1684 = vst [vmem:[%s2050_s17 + $0x60] sm:$0xff] %v1576_v46   ;;  %1700 = vst [vmem:[%s2050_s17 + $0xe0] sm:$0xff] %v1656_v47   ;;  %v703_v54 = vadd.f32 %v2035_v40, %v702_v52  ;;  %v831_v55 = vadd.f32 %v2035_v40, %v830_v53  ;;  %v1791_v56 = vpop.f32.mrb[30].mxu0  ;;  %v1823_v57 = vpop.f32.mrb[30].mxu1 }
 0x135   : > { %v714_v58 = vadd.f32 %v1791_v56, %v2035_v40  ;;  %v842_v59 = vadd.f32 %v1823_v57, %v2035_v40  ;;  %v705_v60 = vpop.f32.mrb[31].mxu0  ;;  %v833_v61 = vpop.f32.mrb[31].mxu1  ;;  %v875_v0 = vmax.f32 %v711_v50, 0.0  ;;  %v907_v1 = vmax.f32 %v839_v51, 0.0 }
 0x136   : > { %v706_v62 = vadd.f32 %v2035_v40, %v705_v60  ;;  %v834_v63 = vadd.f32 %v2035_v40, %v833_v61  ;;  %v873_v4 = vmax.f32 %v703_v54, 0.0  ;;  %v905_v5 = vmax.f32 %v831_v55, 0.0 }
 0x137   : > { %v876_v2 = vmax.f32 %v714_v58, 0.0  ;;  %v908_v3 = vmax.f32 %v842_v59, 0.0 }
 0x138   : > { %v874_v6 = vmax.f32 %v706_v62, 0.0  ;;  %v906_v7 = vmax.f32 %v834_v63, 0.0 }
 0x139   : > { %v1591_v8 = vpack.c.bf16 %v876_v2, %v875_v0  ;;  %v1671_v9 = vpack.c.bf16 %v908_v3, %v907_v1 }
 0x13a   : > { %v1586_v10 = vpack.c.bf16 %v874_v6, %v873_v4  ;;  %v1666_v11 = vpack.c.bf16 %v906_v7, %v905_v5 }
 0x13b   : > { %1687 = vst [vmem:[%s2050_s17 + $0x78] sm:$0xff] %v1591_v8   ;;  %1703 = vst [vmem:[%s2050_s17 + $0xf8] sm:$0xff] %v1671_v9  }
 0x13c   : > { %1686 = vst [vmem:[%s2050_s17 + $0x70] sm:$0xff] %v1586_v10   ;;  %1702 = vst [vmem:[%s2050_s17 + $0xf0] sm:$0xff] %v1666_v11  }
 0x13d PF: > { %s13_s14 = sadd.s32 1, %s1926_s14   ;;  %s2153_s12 = smov %s1922_s13 }
 0x13e   : > { %p10_p5 = scmp.ge.s32.totalorder %s13_s14, 6   ;;  %s2154_s13 = smov %s2156_s15 }
 0x140   :  { %12 = sbr.rel (!%p10_p5) target bundleno = 2 (0x2), region = 68 }

// kernel: discriminator_forward.5
= control target key start
LH: loop header
LB: loop body
LE: loop exit
PB: predicated region body
PF: predicated region fallthrough
CT: control target
= control target key end

     0   :  { %v5189_v0 = vmov 0   ;;  %s7825_s1 = inlined_call_operand.vmem [shape: bf16[1,1024,128], index: 1, kind: input, shape index: {}]   ;;  %s7826_s0 = inlined_call_operand.vmem [shape: bf16[512,1024], index: 0, kind: input, shape index: {}]   ;;  %s7827_s2 = inlined_call_operand.vmem [shape: f32[1,128], index: 2, kind: input, shape index: {}]   ;;  %s7828_s3 = inlined_call_operand.vmem [shape: f32[1,128], index: 3, kind: input, shape index: {}]   ;;  %s7829_s4 = inlined_call_operand.vmem [shape: f32[1,128], index: 4, kind: input, shape index: {}]   ;;  %s7830_s5 = inlined_call_operand.vmem [shape: bf16[512,128], index: 5, kind: output, shape index: {}]  }
   0x1   :  { %2076 = vmatprep.subr.bf16.mxu1 %v5189_v0  ;;  %2654 = vmatprep.subr.bf16.mxu0 %v5189_v0  ;;  %v5123_v1 = vld [vmem:[%s7825_s1] sm:$0xff]   ;;  %v5125_v3 = vld [vmem:[%s7825_s1 + $0x8] sm:$0xff]   ;;  %v5127_v5 = vld [vmem:[%s7825_s1 + $0x10] sm:$0xff]  }
   0x2   :  { %v5124_v2 = vld [vmem:[%s7825_s1 + $0x100] sm:$0xff]   ;;  %2077 = vmatpush1.bf16.msra.mxu1 %v5123_v1  ;;  %v5126_v4 = vld [vmem:[%s7825_s1 + $0x108] sm:$0xff]   ;;  %v5128_v6 = vld [vmem:[%s7825_s1 + $0x110] sm:$0xff]  }
   0x3   :  { %2655 = vmatpush1.bf16.msra.mxu0 %v5124_v2  ;;  %2078 = vmatprep.subr.bf16.mxu1 %v5189_v0  ;;  %v5129_v7 = vld [vmem:[%s7825_s1 + $0x18] sm:$0xff]   ;;  %v5131_v9 = vld [vmem:[%s7825_s1 + $0x20] sm:$0xff]   ;;  %v5133_v11 = vld [vmem:[%s7825_s1 + $0x28] sm:$0xff]  }
   0x4   :  { %2656 = vmatprep.subr.bf16.mxu0 %v5189_v0  ;;  %v5130_v8 = vld [vmem:[%s7825_s1 + $0x118] sm:$0xff]   ;;  %v5132_v10 = vld [vmem:[%s7825_s1 + $0x120] sm:$0xff]   ;;  %v5134_v12 = vld [vmem:[%s7825_s1 + $0x128] sm:$0xff]  }
   0x5   :  { %v5135_v13 = vld [vmem:[%s7825_s1 + $0x30] sm:$0xff]   ;;  %v5137_v15 = vld [vmem:[%s7825_s1 + $0x38] sm:$0xff]   ;;  %v5139_v17 = vld [vmem:[%s7825_s1 + $0x40] sm:$0xff]  }
   0x6   :  { %2079 = vmatpush1.bf16.msra.mxu1 %v5125_v3  ;;  %v5136_v14 = vld [vmem:[%s7825_s1 + $0x130] sm:$0xff]   ;;  %v5138_v16 = vld [vmem:[%s7825_s1 + $0x138] sm:$0xff]   ;;  %v5140_v18 = vld [vmem:[%s7825_s1 + $0x140] sm:$0xff]  }
   0x7   :  { %2657 = vmatpush1.bf16.msra.mxu0 %v5126_v4  ;;  %2080 = vmatprep.subr.bf16.mxu1 %v5189_v0  ;;  %v5295_v19 = vld [vmem:[%s7826_s0] sm:$0xff]  ;;  %v5305_v21 = vld [vmem:[%s7826_s0 + $0x10] sm:$0xff]  ;;  %v5141_v24 = vld [vmem:[%s7825_s1 + $0x48] sm:$0xff]  }
   0x8   :  { %2658 = vmatprep.subr.bf16.mxu0 %v5189_v0  ;;  %v5300_v20 = vld [vmem:[%s7826_s0 + $0x20] sm:$0xff]  ;;  %v5312_v23 = vld [vmem:[%s7826_s0 + $0x30] sm:$0xff]  ;;  %v5142_v26 = vld [vmem:[%s7825_s1 + $0x148] sm:$0xff]  }
   0x9   :  { %v4098_v22 = vcombine.high %v5295_v19, %v5300_v20  ;;  %v4102_v25 = vcombine.high %v5305_v21, %v5312_v23  ;;  %v5143_v27 = vld [vmem:[%s7825_s1 + $0x50] sm:$0xff]   ;;  %v5145_v29 = vld [vmem:[%s7825_s1 + $0x58] sm:$0xff]   ;;  %v5147_v31 = vld [vmem:[%s7825_s1 + $0x60] sm:$0xff]   ;;  %v4097_v42 = vcombine.low %v5295_v19, %v5300_v20  ;;  %v4101_v44 = vcombine.low %v5305_v21, %v5312_v23 }
   0xa   :  { %2081 = vmatpush1.bf16.msra.mxu1 %v5127_v5  ;;  %v5144_v28 = vld [vmem:[%s7825_s1 + $0x150] sm:$0xff]   ;;  %v5146_v30 = vld [vmem:[%s7825_s1 + $0x158] sm:$0xff]   ;;  %v5148_v32 = vld [vmem:[%s7825_s1 + $0x160] sm:$0xff]  }
   0xb   :  { %2659 = vmatpush1.bf16.msra.mxu0 %v5128_v6  ;;  %2082 = vmatprep.subr.bf16.mxu1 %v5189_v0  ;;  %v5149_v33 = vld [vmem:[%s7825_s1 + $0x68] sm:$0xff]   ;;  %v5151_v35 = vld [vmem:[%s7825_s1 + $0x70] sm:$0xff]   ;;  %v5153_v37 = vld [vmem:[%s7825_s1 + $0x78] sm:$0xff]  }
   0xc   :  { %2660 = vmatprep.subr.bf16.mxu0 %v5189_v0  ;;  %2108 = vmatprep.mubr.bf16.mxu1 %v4098_v22  ;;  %v5150_v34 = vld [vmem:[%s7825_s1 + $0x168] sm:$0xff]   ;;  %v5152_v36 = vld [vmem:[%s7825_s1 + $0x170] sm:$0xff]   ;;  %v5154_v38 = vld [vmem:[%s7825_s1 + $0x178] sm:$0xff]  }
   0xd   :  { %2686 = vmatprep.mubr.bf16.mxu0 %v4102_v25  ;;  %v29_v39 = vld [vmem:[%s7826_s0 + $0x40] sm:$0xff]  ;;  %v31_v41 = vld [vmem:[%s7826_s0 + $0x50] sm:$0xff]  ;;  %v5157_v51 = vld [vmem:[%s7825_s1 + $0x88] sm:$0xff]  }
   0xe   :  { %2083 = vmatpush1.bf16.msra.mxu1 %v5129_v7  ;;  %v33_v40 = vld [vmem:[%s7826_s0 + $0x60] sm:$0xff]  ;;  %v35_v43 = vld [vmem:[%s7826_s0 + $0x70] sm:$0xff]  ;;  %v5158_v52 = vld [vmem:[%s7825_s1 + $0x188] sm:$0xff]  }
   0xf   :  { %2661 = vmatpush1.bf16.msra.mxu0 %v5130_v8  ;;  %2084 = vmatprep.subr.bf16.mxu1 %v5189_v0  ;;  %v5155_v45 = vld [vmem:[%s7825_s1 + $0x80] sm:$0xff]   ;;  %v4106_v47 = vcombine.high %v29_v39, %v33_v40  ;;  %v4110_v48 = vcombine.high %v31_v41, %v35_v43  ;;  %v39_v53 = vld [vmem:[%s7826_s0 + $0x90] sm:$0xff]  ;;  %v4105_v55 = vcombine.low %v29_v39, %v33_v40  ;;  %v5161_v2 = vld [vmem:[%s7825_s1 + $0x98] sm:$0xff]  }
  0x10   :  { %2662 = vmatprep.subr.bf16.mxu0 %v5189_v0  ;;  %v5156_v46 = vld [vmem:[%s7825_s1 + $0x180] sm:$0xff]   ;;  %v43_v54 = vld [vmem:[%s7826_s0 + $0xb0] sm:$0xff]  ;;  %v4109_v56 = vcombine.low %v31_v41, %v35_v43  ;;  %v5162_v3 = vld [vmem:[%s7825_s1 + $0x198] sm:$0xff]  }
  0x11   :  { %v37_v49 = vld [vmem:[%s7826_s0 + $0x80] sm:$0xff]  ;;  %v4118_v58 = vcombine.high %v39_v53, %v43_v54  ;;  %v5159_v59 = vld [vmem:[%s7825_s1 + $0x90] sm:$0xff]   ;;  %v4117_v6 = vcombine.low %v39_v53, %v43_v54  ;;  %v5174_v39 = vld [vmem:[%s7825_s1 + $0x1c8] sm:$0xff]  }
  0x12   :  { %2085 = vmatpush1.bf16.msra.mxu1 %v5131_v9  ;;  %v41_v50 = vld [vmem:[%s7826_s0 + $0xa0] sm:$0xff]  ;;  %v5160_v60 = vld [vmem:[%s7825_s1 + $0x190] sm:$0xff]   ;;  %v5177_v54 = vld [vmem:[%s7825_s1 + $0xd8] sm:$0xff]  }
  0x13   :  { %2663 = vmatpush1.bf16.msra.mxu0 %v5132_v10  ;;  %2086 = vmatprep.subr.bf16.mxu1 %v5189_v0  ;;  %v4114_v57 = vcombine.high %v37_v49, %v41_v50  ;;  %v45_v61 = vld [vmem:[%s7826_s0 + $0xc0] sm:$0xff]  ;;  %v47_v63 = vld [vmem:[%s7826_s0 + $0xd0] sm:$0xff]  ;;  %v4113_v4 = vcombine.low %v37_v49, %v41_v50 }
  0x14   :  { %2664 = vmatprep.subr.bf16.mxu0 %v5189_v0  ;;  %v49_v62 = vld [vmem:[%s7826_s0 + $0xe0] sm:$0xff]  ;;  %v51_v1 = vld [vmem:[%s7826_s0 + $0xf0] sm:$0xff] }
  0x15   :  { %v5163_v5 = vld [vmem:[%s7825_s1 + $0xa0] sm:$0xff]   ;;  %v4122_v7 = vcombine.high %v45_v61, %v49_v62  ;;  %v4126_v9 = vcombine.high %v47_v63, %v51_v1  ;;  %v5167_v20 = vld [vmem:[%s7825_s1 + $0xb0] sm:$0xff]  }
  0x16   :  { %2087 = vmatpush1.bf16.msra.mxu1 %v5133_v11  ;;  %v5164_v8 = vld [vmem:[%s7825_s1 + $0x1a0] sm:$0xff]   ;;  %v5168_v21 = vld [vmem:[%s7825_s1 + $0x1b0] sm:$0xff]  }
  0x17   :  { %2665 = vmatpush1.bf16.msra.mxu0 %v5134_v12  ;;  %2088 = vmatprep.subr.bf16.mxu1 %v5189_v0  ;;  %v53_v10 = vld [vmem:[%s7826_s0 + $0x100] sm:$0xff]  ;;  %v55_v12 = vld [vmem:[%s7826_s0 + $0x110] sm:$0xff] }
  0x18   :  { %2666 = vmatprep.subr.bf16.mxu0 %v5189_v0  ;;  %v57_v11 = vld [vmem:[%s7826_s0 + $0x120] sm:$0xff]  ;;  %v63_v25 = vld [vmem:[%s7826_s0 + $0x150] sm:$0xff] }
  0x19   :  { %v61_v22 = vld [vmem:[%s7826_s0 + $0x140] sm:$0xff]  ;;  %v83_v49 = vld [vmem:[%s7826_s0 + $0x1f0] sm:$0xff] }
  0x1a   :  { %2089 = vmatpush1.bf16.msra.mxu1 %v5135_v13  ;;  %v59_v13 = vld [vmem:[%s7826_s0 + $0x130] sm:$0xff]  ;;  %v65_v23 = vld [vmem:[%s7826_s0 + $0x160] sm:$0xff] }
  0x1b   :  { %2667 = vmatpush1.bf16.msra.mxu0 %v5136_v14  ;;  %2090 = vmatprep.subr.bf16.mxu1 %v5189_v0  ;;  %v5165_v14 = vld [vmem:[%s7825_s1 + $0xa8] sm:$0xff]   ;;  %v4134_v19 = vcombine.high %v55_v12, %v59_v13  ;;  %v4137_v40 = vcombine.low %v61_v22, %v65_v23 }
  0x1c   :  { %2668 = vmatprep.subr.bf16.mxu0 %v5189_v0 }
  0x1e   :  { %2091 = vmatpush1.bf16.msra.mxu1 %v5137_v15  ;;  %v5166_v15 = vld [vmem:[%s7825_s1 + $0x1a8] sm:$0xff]  }
  0x1f   :  { %2669 = vmatpush1.bf16.msra.mxu0 %v5138_v16  ;;  %2092 = vmatprep.subr.bf16.mxu1 %v5189_v0  ;;  %v4121_v16 = vcombine.low %v45_v61, %v49_v62 }
  0x20   :  { %2670 = vmatprep.subr.bf16.mxu0 %v5189_v0 }
  0x22   :  { %2093 = vmatpush1.bf16.msra.mxu1 %v5139_v17  ;;  %v4125_v17 = vcombine.low %v47_v63, %v51_v1  ;;  %v93_v1 = vld [vmem:[%s7826_s0 + $0x240] sm:$0xff] }
  0x23   :  { %2671 = vmatpush1.bf16.msra.mxu0 %v5140_v18  ;;  %2094 = vmatprep.subr.bf16.mxu1 %v5189_v0  ;;  %v4130_v18 = vcombine.high %v53_v10, %v57_v11 }
  0x24   :  { %2672 = vmatprep.subr.bf16.mxu0 %v5189_v0 }
  0x26   :  { %2095 = vmatpush1.bf16.msra.mxu1 %v5141_v24  ;;  %v5169_v24 = vld [vmem:[%s7825_s1 + $0xb8] sm:$0xff]  }
  0x27   :  { %2673 = vmatpush1.bf16.msra.mxu0 %v5142_v26  ;;  %2096 = vmatprep.subr.bf16.mxu1 %v5189_v0  ;;  %v67_v26 = vld [vmem:[%s7826_s0 + $0x170] sm:$0xff] }
  0x28   :  { %2674 = vmatprep.subr.bf16.mxu0 %v5189_v0  ;;  %v4141_v41 = vcombine.low %v63_v25, %v67_v26 }
  0x2a   :  { %2097 = vmatpush1.bf16.msra.mxu1 %v5143_v27  ;;  %v5170_v27 = vld [vmem:[%s7825_s1 + $0x1b8] sm:$0xff]  }
  0x2b   :  { %2675 = vmatpush1.bf16.msra.mxu0 %v5144_v28  ;;  %2098 = vmatprep.subr.bf16.mxu1 %v5189_v0  ;;  %v4129_v28 = vcombine.low %v53_v10, %v57_v11  ;;  %v5180_v10 = vld [vmem:[%s7825_s1 + $0x1e0] sm:$0xff]  }
  0x2c   :  { %2676 = vmatprep.subr.bf16.mxu0 %v5189_v0  ;;  %v101_v11 = vld [vmem:[%s7826_s0 + $0x280] sm:$0xff] }
  0x2e   :  { %2099 = vmatpush1.bf16.msra.mxu1 %v5145_v29  ;;  %v4133_v29 = vcombine.low %v55_v12, %v59_v13  ;;  %v105_v12 = vld [vmem:[%s7826_s0 + $0x2a0] sm:$0xff]  ;;  %v103_v13 = vld [vmem:[%s7826_s0 + $0x290] sm:$0xff] }
  0x2f   :  { %2677 = vmatpush1.bf16.msra.mxu0 %v5146_v30  ;;  %2100 = vmatprep.subr.bf16.mxu1 %v5189_v0  ;;  %v4138_v30 = vcombine.high %v61_v22, %v65_v23  ;;  %v115_v22 = vld [vmem:[%s7826_s0 + $0x2f0] sm:$0xff]  ;;  %v4177_v23 = vcombine.low %v101_v11, %v105_v12 }
  0x30   :  { %2678 = vmatprep.subr.bf16.mxu0 %v5189_v0 }
  0x32   :  { %2101 = vmatpush1.bf16.msra.mxu1 %v5147_v31  ;;  %v4142_v31 = vcombine.high %v63_v25, %v67_v26 }
  0x33   :  { %2679 = vmatpush1.bf16.msra.mxu0 %v5148_v32  ;;  %2102 = vmatprep.subr.bf16.mxu1 %v5189_v0  ;;  %v5171_v32 = vld [vmem:[%s7825_s1 + $0xc0] sm:$0xff]  }
  0x34   :  { %2680 = vmatprep.subr.bf16.mxu0 %v5189_v0 }
  0x36   :  { %2103 = vmatpush1.bf16.msra.mxu1 %v5149_v33  ;;  %v5172_v33 = vld [vmem:[%s7825_s1 + $0x1c0] sm:$0xff]  }
  0x37   :  { %2681 = vmatpush1.bf16.msra.mxu0 %v5150_v34  ;;  %2104 = vmatprep.subr.bf16.mxu1 %v5189_v0  ;;  %v69_v34 = vld [vmem:[%s7826_s0 + $0x180] sm:$0xff] }
  0x38   :  { %2682 = vmatprep.subr.bf16.mxu0 %v5189_v0 }
  0x3a   :  { %2105 = vmatpush1.bf16.msra.mxu1 %v5151_v35  ;;  %v73_v35 = vld [vmem:[%s7826_s0 + $0x1a0] sm:$0xff] }
  0x3b   :  { %2683 = vmatpush1.bf16.msra.mxu0 %v5152_v36  ;;  %2106 = vmatprep.subr.bf16.mxu1 %v5189_v0  ;;  %v5173_v36 = vld [vmem:[%s7825_s1 + $0xc8] sm:$0xff]   ;;  %v4145_v50 = vcombine.low %v69_v34, %v73_v35 }
  0x3c   :  { %2684 = vmatprep.subr.bf16.mxu0 %v5189_v0 }
  0x3e   :  { %2107 = vmatpush1.bf16.msra.mxu1 %v5153_v37  ;;  %v71_v37 = vld [vmem:[%s7826_s0 + $0x190] sm:$0xff] }
  0x3f   :  { %2685 = vmatpush1.bf16.msra.mxu0 %v5154_v38  ;;  %2365 = vmatprep.subr.bf16.mxu1 %v5189_v0  ;;  %v75_v38 = vld [vmem:[%s7826_s0 + $0x1b0] sm:$0xff] }
  0x40   :  { %2943 = vmatprep.subr.bf16.mxu0 %v5189_v0  ;;  %v4150_v43 = vcombine.high %v71_v37, %v75_v38 }
  0x41   :  { %2109 = vmatmul.mubr.bf16.vlgmr.msra.gmra.mrb[0].mxu1 %v4097_v42  ;;  %v4146_v42 = vcombine.high %v69_v34, %v73_v35 }
  0x42   :  { %2687 = vmatmul.mubr.bf16.vlgmr.msra.gmra.mrb[0].mxu0 %v4101_v44  ;;  %2366 = vmatpush1.bf16.msra.mxu1 %v5155_v45  ;;  %v5175_v44 = vld [vmem:[%s7825_s1 + $0xd0] sm:$0xff]  }
  0x43   :  { %2944 = vmatpush1.bf16.msra.mxu0 %v5156_v46  ;;  %2116 = vmatprep.mubr.bf16.mxu1 %v4106_v47  ;;  %v5176_v45 = vld [vmem:[%s7825_s1 + $0x1d0] sm:$0xff]   ;;  %v77_v46 = vld [vmem:[%s7826_s0 + $0x1c0] sm:$0xff] }
  0x44   :  { %2694 = vmatprep.mubr.bf16.mxu0 %v4110_v48  ;;  %2367 = vmatprep.subr.bf16.mxu1 %v5189_v0  ;;  %v81_v47 = vld [vmem:[%s7826_s0 + $0x1e0] sm:$0xff]  ;;  %v79_v48 = vld [vmem:[%s7826_s0 + $0x1d0] sm:$0xff] }
  0x45   :  { %2945 = vmatprep.subr.bf16.mxu0 %v5189_v0  ;;  %v4158_v53 = vcombine.high %v79_v48, %v83_v49  ;;  %v4157_v61 = vcombine.low %v79_v48, %v83_v49  ;;  %v137_v48 = vld [vmem:[%s7826_s0 + $0x3a0] sm:$0xff]  ;;  %v135_v49 = vld [vmem:[%s7826_s0 + $0x390] sm:$0xff] }
  0x46   :  { %2368 = vmatpush1.bf16.msra.mxu1 %v5157_v51  ;;  %v4149_v51 = vcombine.low %v71_v37, %v75_v38  ;;  %v125_v37 = vld [vmem:[%s7826_s0 + $0x340] sm:$0xff] }
  0x47   :  { %2946 = vmatpush1.bf16.msra.mxu0 %v5158_v52  ;;  %2369 = vmatprep.subr.bf16.mxu1 %v5189_v0  ;;  %v4154_v52 = vcombine.high %v77_v46, %v81_v47  ;;  %v129_v38 = vld [vmem:[%s7826_s0 + $0x360] sm:$0xff] }
  0x48   :  { %2947 = vmatprep.subr.bf16.mxu0 %v5189_v0 }
  0x49   :  { %2117 = vmatmul.mubr.bf16.gmra.mrb[4].mxu1 %v4105_v55  ;;  %v5178_v55 = vld [vmem:[%s7825_s1 + $0x1d8] sm:$0xff]  }
  0x4a   :  { %2695 = vmatmul.mubr.bf16.gmra.mrb[4].mxu0 %v4109_v56  ;;  %2124 = vmatprep.mubr.bf16.mxu1 %v4114_v57  ;;  %v85_v56 = vld [vmem:[%s7826_s0 + $0x200] sm:$0xff] }
  0x4b   :  { %2702 = vmatprep.mubr.bf16.mxu0 %v4118_v58  ;;  %2370 = vmatpush1.bf16.msra.mxu1 %v5159_v59  ;;  %v89_v57 = vld [vmem:[%s7826_s0 + $0x220] sm:$0xff]  ;;  %v87_v58 = vld [vmem:[%s7826_s0 + $0x210] sm:$0xff] }
  0x4c   :  { %2948 = vmatpush1.bf16.msra.mxu0 %v5160_v60  ;;  %2371 = vmatprep.subr.bf16.mxu1 %v5189_v0  ;;  %v91_v59 = vld [vmem:[%s7826_s0 + $0x230] sm:$0xff]  ;;  %v4153_v60 = vcombine.low %v77_v46, %v81_v47  ;;  %v4162_v62 = vcombine.high %v85_v56, %v89_v57  ;;  %v133_v47 = vld [vmem:[%s7826_s0 + $0x380] sm:$0xff] }
  0x4d   :  { %2949 = vmatprep.subr.bf16.mxu0 %v5189_v0  ;;  %v4166_v63 = vcombine.high %v87_v58, %v91_v59  ;;  %v5184_v46 = vld [vmem:[%s7825_s1 + $0x1f0] sm:$0xff]  }
  0x4f   :  { %2372 = vmatpush1.bf16.msra.mxu1 %v5161_v2  ;;  %v97_v2 = vld [vmem:[%s7826_s0 + $0x260] sm:$0xff] }
  0x50   :  { %2950 = vmatpush1.bf16.msra.mxu0 %v5162_v3  ;;  %2373 = vmatprep.subr.bf16.mxu1 %v5189_v0  ;;  %v95_v3 = vld [vmem:[%s7826_s0 + $0x250] sm:$0xff] }
  0x51   :  { %2125 = vmatmul.mubr.bf16.gmra.mrb[8].mxu1 %v4113_v4  ;;  %2951 = vmatprep.subr.bf16.mxu0 %v5189_v0  ;;  %v99_v4 = vld [vmem:[%s7826_s0 + $0x270] sm:$0xff] }
  0x52   :  { %2703 = vmatmul.mubr.bf16.gmra.mrb[8].mxu0 %v4117_v6  ;;  %2132 = vmatprep.mubr.bf16.mxu1 %v4122_v7  ;;  %v4165_v6 = vcombine.low %v87_v58, %v91_v59  ;;  %v4170_v7 = vcombine.high %v93_v1, %v97_v2  ;;  %v4209_v58 = vcombine.low %v133_v47, %v137_v48 }
  0x53   :  { %2710 = vmatprep.mubr.bf16.mxu0 %v4126_v9  ;;  %2374 = vmatpush1.bf16.msra.mxu1 %v5163_v5  ;;  %v4161_v5 = vcombine.low %v85_v56, %v89_v57  ;;  %v5179_v9 = vld [vmem:[%s7825_s1 + $0xe0] sm:$0xff]   ;;  %v143_v57 = vld [vmem:[%s7826_s0 + $0x3d0] sm:$0xff] }
  0x54   :  { %2952 = vmatpush1.bf16.msra.mxu0 %v5164_v8  ;;  %2375 = vmatprep.subr.bf16.mxu1 %v5189_v0  ;;  %v4174_v8 = vcombine.high %v95_v3, %v99_v4  ;;  %v145_v56 = vld [vmem:[%s7826_s0 + $0x3e0] sm:$0xff] }
  0x55   :  { %2953 = vmatprep.subr.bf16.mxu0 %v5189_v0 }
  0x57   :  { %2376 = vmatpush1.bf16.msra.mxu1 %v5165_v14  ;;  %v107_v14 = vld [vmem:[%s7826_s0 + $0x2b0] sm:$0xff] }
  0x58   :  { %2954 = vmatpush1.bf16.msra.mxu0 %v5166_v15  ;;  %2377 = vmatprep.subr.bf16.mxu1 %v5189_v0  ;;  %v4169_v15 = vcombine.low %v93_v1, %v97_v2  ;;  %v149_v1 = vld [vmem:[%s7826_s0 + $0x400] sm:$0xff] }
  0x59   :  { %2133 = vmatmul.mubr.bf16.gmra.mrb[12].mxu1 %v4121_v16  ;;  %2955 = vmatprep.subr.bf16.mxu0 %v5189_v0  ;;  %v4173_v16 = vcombine.low %v95_v3, %v99_v4  ;;  %v153_v2 = vld [vmem:[%s7826_s0 + $0x420] sm:$0xff]  ;;  %v151_v3 = vld [vmem:[%s7826_s0 + $0x410] sm:$0xff] }
  0x5a   :  { %2711 = vmatmul.mubr.bf16.gmra.mrb[12].mxu0 %v4125_v17  ;;  %2140 = vmatprep.mubr.bf16.mxu1 %v4130_v18  ;;  %v4178_v17 = vcombine.high %v101_v11, %v105_v12  ;;  %v4182_v18 = vcombine.high %v103_v13, %v107_v14  ;;  %v155_v4 = vld [vmem:[%s7826_s0 + $0x430] sm:$0xff] }
  0x5b   :  { %2718 = vmatprep.mubr.bf16.mxu0 %v4134_v19  ;;  %2378 = vmatpush1.bf16.msra.mxu1 %v5167_v20  ;;  %v109_v19 = vld [vmem:[%s7826_s0 + $0x2c0] sm:$0xff]  ;;  %v159_v11 = vld [vmem:[%s7826_s0 + $0x450] sm:$0xff] }
  0x5c   :  { %2956 = vmatpush1.bf16.msra.mxu0 %v5168_v21  ;;  %2379 = vmatprep.subr.bf16.mxu1 %v5189_v0  ;;  %v113_v20 = vld [vmem:[%s7826_s0 + $0x2e0] sm:$0xff]  ;;  %v111_v21 = vld [vmem:[%s7826_s0 + $0x2d0] sm:$0xff] }
  0x5d   :  { %2957 = vmatprep.subr.bf16.mxu0 %v5189_v0  ;;  %v4186_v25 = vcombine.high %v109_v19, %v113_v20  ;;  %v4190_v26 = vcombine.high %v111_v21, %v115_v22  ;;  %v4189_v34 = vcombine.low %v111_v21, %v115_v22  ;;  %v163_v12 = vld [vmem:[%s7826_s0 + $0x470] sm:$0xff] }
  0x5e   :  { %v4237_v22 = vcombine.low %v159_v11, %v163_v12 }
  0x5f   :  { %2380 = vmatpush1.bf16.msra.mxu1 %v5169_v24  ;;  %v4181_v24 = vcombine.low %v103_v13, %v107_v14  ;;  %v4225_v13 = vcombine.low %v149_v1, %v153_v2  ;;  %v4229_v14 = vcombine.low %v151_v3, %v155_v4 }
  0x60   :  { %2958 = vmatpush1.bf16.msra.mxu0 %v5170_v27  ;;  %2381 = vmatprep.subr.bf16.mxu1 %v5189_v0  ;;  %v5181_v27 = vld [vmem:[%s7825_s1 + $0xe8] sm:$0xff]  }
  0x61   :  { %2141 = vmatmul.mubr.bf16.gmra.mrb[16].mxu1 %v4129_v28  ;;  %2959 = vmatprep.subr.bf16.mxu0 %v5189_v0  ;;  %v5182_v28 = vld [vmem:[%s7825_s1 + $0x1e8] sm:$0xff]  }
  0x62   :  { %2719 = vmatmul.mubr.bf16.gmra.mrb[16].mxu0 %v4133_v29  ;;  %2148 = vmatprep.mubr.bf16.mxu1 %v4138_v30  ;;  %v117_v29 = vld [vmem:[%s7826_s0 + $0x300] sm:$0xff] }
  0x63   :  { %2726 = vmatprep.mubr.bf16.mxu0 %v4142_v31  ;;  %2382 = vmatpush1.bf16.msra.mxu1 %v5171_v32  ;;  %v121_v30 = vld [vmem:[%s7826_s0 + $0x320] sm:$0xff]  ;;  %v119_v31 = vld [vmem:[%s7826_s0 + $0x310] sm:$0xff] }
  0x64   :  { %2960 = vmatpush1.bf16.msra.mxu0 %v5172_v33  ;;  %2383 = vmatprep.subr.bf16.mxu1 %v5189_v0  ;;  %v123_v32 = vld [vmem:[%s7826_s0 + $0x330] sm:$0xff]  ;;  %v4185_v33 = vcombine.low %v109_v19, %v113_v20  ;;  %v4194_v35 = vcombine.high %v117_v29, %v121_v30 }
  0x65   :  { %2961 = vmatprep.subr.bf16.mxu0 %v5189_v0  ;;  %v167_v19 = vld [vmem:[%s7826_s0 + $0x490] sm:$0xff] }
  0x66   :  { %v171_v20 = vld [vmem:[%s7826_s0 + $0x4b0] sm:$0xff] }
  0x67   :  { %2384 = vmatpush1.bf16.msra.mxu1 %v5173_v36  ;;  %v4198_v36 = vcombine.high %v119_v31, %v123_v32 }
  0x68   :  { %2962 = vmatpush1.bf16.msra.mxu0 %v5174_v39  ;;  %2385 = vmatprep.subr.bf16.mxu1 %v5189_v0  ;;  %v127_v39 = vld [vmem:[%s7826_s0 + $0x350] sm:$0xff] }
  0x69   :  { %2149 = vmatmul.mubr.bf16.gmra.mrb[20].mxu1 %v4137_v40  ;;  %2963 = vmatprep.subr.bf16.mxu0 %v5189_v0  ;;  %v131_v40 = vld [vmem:[%s7826_s0 + $0x370] sm:$0xff] }
  0x6a   :  { %2727 = vmatmul.mubr.bf16.gmra.mrb[20].mxu0 %v4141_v41  ;;  %2156 = vmatprep.mubr.bf16.mxu1 %v4146_v42  ;;  %v4193_v41 = vcombine.low %v117_v29, %v121_v30  ;;  %v4197_v42 = vcombine.low %v119_v31, %v123_v32  ;;  %v4245_v30 = vcombine.low %v167_v19, %v171_v20 }
  0x6b   :  { %2734 = vmatprep.mubr.bf16.mxu0 %v4150_v43  ;;  %2386 = vmatpush1.bf16.msra.mxu1 %v5175_v44  ;;  %v4202_v43 = vcombine.high %v125_v37, %v129_v38  ;;  %v4206_v44 = vcombine.high %v127_v39, %v131_v40 }
  0x6c   :  { %2964 = vmatpush1.bf16.msra.mxu0 %v5176_v45  ;;  %2387 = vmatprep.subr.bf16.mxu1 %v5189_v0  ;;  %v5183_v45 = vld [vmem:[%s7825_s1 + $0xf0] sm:$0xff]  }
  0x6d   :  { %2965 = vmatprep.subr.bf16.mxu0 %v5189_v0 }
  0x6f   :  { %2388 = vmatpush1.bf16.msra.mxu1 %v5177_v54 }
  0x70   :  { %2966 = vmatpush1.bf16.msra.mxu0 %v5178_v55  ;;  %2389 = vmatprep.subr.bf16.mxu1 %v5189_v0  ;;  %v141_v55 = vld [vmem:[%s7826_s0 + $0x3c0] sm:$0xff] }
  0x71   :  { %2157 = vmatmul.mubr.bf16.gmra.mrb[24].mxu1 %v4145_v50  ;;  %2967 = vmatprep.subr.bf16.mxu0 %v5189_v0  ;;  %v139_v50 = vld [vmem:[%s7826_s0 + $0x3b0] sm:$0xff] }
  0x72   :  { %2735 = vmatmul.mubr.bf16.gmra.mrb[24].mxu0 %v4149_v51  ;;  %2164 = vmatprep.mubr.bf16.mxu1 %v4154_v52  ;;  %v4201_v51 = vcombine.low %v125_v37, %v129_v38  ;;  %v4205_v52 = vcombine.low %v127_v39, %v131_v40  ;;  %v4214_v54 = vcombine.high %v135_v49, %v139_v50 }
  0x73   :  { %2742 = vmatprep.mubr.bf16.mxu0 %v4158_v53  ;;  %2390 = vmatpush1.bf16.msra.mxu1 %v5179_v9  ;;  %v4210_v53 = vcombine.high %v133_v47, %v137_v48  ;;  %v4213_v59 = vcombine.low %v135_v49, %v139_v50  ;;  %v157_v9 = vld [vmem:[%s7826_s0 + $0x440] sm:$0xff] }
  0x74   :  { %2968 = vmatpush1.bf16.msra.mxu0 %v5180_v10  ;;  %2391 = vmatprep.subr.bf16.mxu1 %v5189_v0  ;;  %v161_v10 = vld [vmem:[%s7826_s0 + $0x460] sm:$0xff] }
  0x75   :  { %2969 = vmatprep.subr.bf16.mxu0 %v5189_v0  ;;  %v4233_v21 = vcombine.low %v157_v9, %v161_v10  ;;  %v197_v49 = vld [vmem:[%s7826_s0 + $0x580] sm:$0xff] }
  0x76   :  { %v201_v50 = vld [vmem:[%s7826_s0 + $0x5a0] sm:$0xff] }
  0x77   :  { %2392 = vmatpush1.bf16.msra.mxu1 %v5181_v27  ;;  %v175_v27 = vld [vmem:[%s7826_s0 + $0x4d0] sm:$0xff] }
  0x78   :  { %2970 = vmatpush1.bf16.msra.mxu0 %v5182_v28  ;;  %2393 = vmatprep.subr.bf16.mxu1 %v5189_v0  ;;  %v179_v28 = vld [vmem:[%s7826_s0 + $0x4f0] sm:$0xff] }
  0x79   :  { %2165 = vmatmul.mubr.bf16.gmra.mrb[28].mxu1 %v4153_v60  ;;  %2971 = vmatprep.subr.bf16.mxu0 %v5189_v0  ;;  %v4218_v60 = vcombine.high %v141_v55, %v145_v56  ;;  %v4254_v32 = vcombine.high %v175_v27, %v179_v28  ;;  %v4253_v38 = vcombine.low %v175_v27, %v179_v28  ;;  %v239_v27 = vld [vmem:[%s7826_s0 + $0x6d0] sm:$0xff] }
  0x7a   :  { %2743 = vmatmul.mubr.bf16.gmra.mrb[28].mxu0 %v4157_v61  ;;  %2172 = vmatprep.mubr.bf16.mxu1 %v4162_v62  ;;  %v5185_v62 = vld [vmem:[%s7825_s1 + $0xf8] sm:$0xff]   ;;  %v243_v28 = vld [vmem:[%s7826_s0 + $0x6f0] sm:$0xff] }
  0x7b   :  { %2750 = vmatprep.mubr.bf16.mxu0 %v4166_v63  ;;  %2394 = vmatpush1.bf16.msra.mxu1 %v5183_v45  ;;  %v5186_v63 = vld [vmem:[%s7825_s1 + $0x1f8] sm:$0xff]  }
  0x7c   :  { %2972 = vmatpush1.bf16.msra.mxu0 %v5184_v46  ;;  %2395 = vmatprep.subr.bf16.mxu1 %v5189_v0 }
  0x7d   :  { %2973 = vmatprep.subr.bf16.mxu0 %v5189_v0  ;;  %v147_v0 = vld [vmem:[%s7826_s0 + $0x3f0] sm:$0xff] }
  0x7e   :  { %v4222_v61 = vcombine.high %v143_v57, %v147_v0 }
  0x7f   :  { %2396 = vmatpush1.bf16.msra.mxu1 %v5185_v62 }
  0x80   :  { %2974 = vmatpush1.bf16.msra.mxu0 %v5186_v63 }
  0x81   :  { %2173 = vmatmul.mubr.bf16.gmra.mrb[32].mxu1 %v4161_v5  ;;  %v4217_v5 = vcombine.low %v141_v55, %v145_v56  ;;  %v4274_v55 = vcombine.high %v197_v49, %v201_v50 }
  0x82   :  { %2751 = vmatmul.mubr.bf16.gmra.mrb[32].mxu0 %v4165_v6  ;;  %2180 = vmatprep.mubr.bf16.mxu1 %v4170_v7  ;;  %v4221_v6 = vcombine.low %v143_v57, %v147_v0  ;;  %v4226_v7 = vcombine.high %v149_v1, %v153_v2  ;;  %v205_v57 = vld [vmem:[%s7826_s0 + $0x5c0] sm:$0xff] }
  0x83   :  { %2758 = vmatprep.mubr.bf16.mxu0 %v4174_v8  ;;  %v4230_v8 = vcombine.high %v151_v3, %v155_v4  ;;  %v209_v0 = vld [vmem:[%s7826_s0 + $0x5e0] sm:$0xff]  ;;  %v215_v3 = vld [vmem:[%s7826_s0 + $0x610] sm:$0xff] }
  0x84   :  { %v4282_v62 = vcombine.high %v205_v57, %v209_v0  ;;  %v213_v1 = vld [vmem:[%s7826_s0 + $0x600] sm:$0xff]  ;;  %v219_v4 = vld [vmem:[%s7826_s0 + $0x630] sm:$0xff] }
  0x85   :  { %v217_v2 = vld [vmem:[%s7826_s0 + $0x620] sm:$0xff] }
  0x89   :  { %2181 = vmatmul.mubr.bf16.gmra.mrb[36].mxu1 %v4169_v15  ;;  %v4234_v15 = vcombine.high %v157_v9, %v161_v10  ;;  %v221_v9 = vld [vmem:[%s7826_s0 + $0x640] sm:$0xff] }
  0x8a   :  { %2759 = vmatmul.mubr.bf16.gmra.mrb[36].mxu0 %v4173_v16  ;;  %2188 = vmatprep.mubr.bf16.mxu1 %v4178_v17  ;;  %v4238_v16 = vcombine.high %v159_v11, %v163_v12  ;;  %v165_v17 = vld [vmem:[%s7826_s0 + $0x480] sm:$0xff]  ;;  %v223_v11 = vld [vmem:[%s7826_s0 + $0x650] sm:$0xff] }
  0x8b   :  { %2766 = vmatprep.mubr.bf16.mxu0 %v4182_v18  ;;  %v169_v18 = vld [vmem:[%s7826_s0 + $0x4a0] sm:$0xff]  ;;  %v227_v12 = vld [vmem:[%s7826_s0 + $0x670] sm:$0xff] }
  0x8c   :  { %v4241_v29 = vcombine.low %v165_v17, %v169_v18  ;;  %v225_v10 = vld [vmem:[%s7826_s0 + $0x660] sm:$0xff] }
  0x91   :  { %2189 = vmatmul.mubr.bf16.gmra.mrb[40].mxu1 %v4177_v23  ;;  %v4242_v23 = vcombine.high %v165_v17, %v169_v18  ;;  %v229_v17 = vld [vmem:[%s7826_s0 + $0x680] sm:$0xff] }
  0x92   :  { %2767 = vmatmul.mubr.bf16.gmra.mrb[40].mxu0 %v4181_v24  ;;  %2196 = vmatprep.mubr.bf16.mxu1 %v4186_v25  ;;  %v4246_v24 = vcombine.high %v167_v19, %v171_v20  ;;  %v173_v25 = vld [vmem:[%s7826_s0 + $0x4c0] sm:$0xff]  ;;  %v231_v19 = vld [vmem:[%s7826_s0 + $0x690] sm:$0xff] }
  0x93   :  { %2774 = vmatprep.mubr.bf16.mxu0 %v4190_v26  ;;  %v177_v26 = vld [vmem:[%s7826_s0 + $0x4e0] sm:$0xff]  ;;  %v235_v20 = vld [vmem:[%s7826_s0 + $0x6b0] sm:$0xff] }
  0x94   :  { %v4250_v31 = vcombine.high %v173_v25, %v177_v26  ;;  %v4249_v37 = vcombine.low %v173_v25, %v177_v26  ;;  %v233_v18 = vld [vmem:[%s7826_s0 + $0x6a0] sm:$0xff] }
  0x95   :  { %v237_v25 = vld [vmem:[%s7826_s0 + $0x6c0] sm:$0xff] }
  0x96   :  { %v241_v26 = vld [vmem:[%s7826_s0 + $0x6e0] sm:$0xff] }
  0x99   :  { %2197 = vmatmul.mubr.bf16.gmra.mrb[44].mxu1 %v4185_v33  ;;  %v181_v33 = vld [vmem:[%s7826_s0 + $0x500] sm:$0xff] }
  0x9a   :  { %2775 = vmatmul.mubr.bf16.gmra.mrb[44].mxu0 %v4189_v34  ;;  %2204 = vmatprep.mubr.bf16.mxu1 %v4194_v35  ;;  %v185_v34 = vld [vmem:[%s7826_s0 + $0x520] sm:$0xff]  ;;  %v183_v35 = vld [vmem:[%s7826_s0 + $0x510] sm:$0xff] }
  0x9b   :  { %2782 = vmatprep.mubr.bf16.mxu0 %v4198_v36  ;;  %v187_v36 = vld [vmem:[%s7826_s0 + $0x530] sm:$0xff]  ;;  %v4258_v39 = vcombine.high %v181_v33, %v185_v34  ;;  %v4257_v45 = vcombine.low %v181_v33, %v185_v34  ;;  %v245_v33 = vld [vmem:[%s7826_s0 + $0x700] sm:$0xff] }
  0x9c   :  { %v4262_v40 = vcombine.high %v183_v35, %v187_v36  ;;  %v4261_v46 = vcombine.low %v183_v35, %v187_v36  ;;  %v249_v34 = vld [vmem:[%s7826_s0 + $0x720] sm:$0xff]  ;;  %v247_v35 = vld [vmem:[%s7826_s0 + $0x710] sm:$0xff] }
  0x9d   :  { %v251_v36 = vld [vmem:[%s7826_s0 + $0x730] sm:$0xff] }
  0xa1   :  { %2205 = vmatmul.mubr.bf16.gmra.mrb[48].mxu1 %v4193_v41  ;;  %v189_v41 = vld [vmem:[%s7826_s0 + $0x540] sm:$0xff] }
  0xa2   :  { %2783 = vmatmul.mubr.bf16.gmra.mrb[48].mxu0 %v4197_v42  ;;  %2212 = vmatprep.mubr.bf16.mxu1 %v4202_v43  ;;  %v193_v42 = vld [vmem:[%s7826_s0 + $0x560] sm:$0xff]  ;;  %v191_v43 = vld [vmem:[%s7826_s0 + $0x550] sm:$0xff] }
  0xa3   :  { %2790 = vmatprep.mubr.bf16.mxu0 %v4206_v44  ;;  %v195_v44 = vld [vmem:[%s7826_s0 + $0x570] sm:$0xff]  ;;  %v4266_v47 = vcombine.high %v189_v41, %v193_v42 }
  0xa4   :  { %v4270_v48 = vcombine.high %v191_v43, %v195_v44 }
  0xa9   :  { %2213 = vmatmul.mubr.bf16.gmra.mrb[52].mxu1 %v4201_v51  ;;  %v199_v51 = vld [vmem:[%s7826_s0 + $0x590] sm:$0xff] }
  0xaa   :  { %2791 = vmatmul.mubr.bf16.gmra.mrb[52].mxu0 %v4205_v52  ;;  %2220 = vmatprep.mubr.bf16.mxu1 %v4210_v53  ;;  %v203_v52 = vld [vmem:[%s7826_s0 + $0x5b0] sm:$0xff]  ;;  %v4265_v53 = vcombine.low %v189_v41, %v193_v42  ;;  %v253_v41 = vld [vmem:[%s7826_s0 + $0x740] sm:$0xff] }
  0xab   :  { %2798 = vmatprep.mubr.bf16.mxu0 %v4214_v54  ;;  %v4269_v54 = vcombine.low %v191_v43, %v195_v44  ;;  %v4278_v56 = vcombine.high %v199_v51, %v203_v52  ;;  %v257_v42 = vld [vmem:[%s7826_s0 + $0x760] sm:$0xff]  ;;  %v255_v43 = vld [vmem:[%s7826_s0 + $0x750] sm:$0xff] }
  0xac   :  { %v259_v44 = vld [vmem:[%s7826_s0 + $0x770] sm:$0xff] }
  0xb1   :  { %2221 = vmatmul.mubr.bf16.gmra.mrb[56].mxu1 %v4209_v58  ;;  %v207_v58 = vld [vmem:[%s7826_s0 + $0x5d0] sm:$0xff] }
  0xb2   :  { %2799 = vmatmul.mubr.bf16.gmra.mrb[56].mxu0 %v4213_v59  ;;  %2228 = vmatprep.mubr.bf16.mxu1 %v4218_v60  ;;  %v211_v59 = vld [vmem:[%s7826_s0 + $0x5f0] sm:$0xff]  ;;  %v4273_v60 = vcombine.low %v197_v49, %v201_v50  ;;  %v261_v49 = vld [vmem:[%s7826_s0 + $0x780] sm:$0xff] }
  0xb3   :  { %2806 = vmatprep.mubr.bf16.mxu0 %v4222_v61  ;;  %v4277_v61 = vcombine.low %v199_v51, %v203_v52  ;;  %v4286_v63 = vcombine.high %v207_v58, %v211_v59  ;;  %v265_v50 = vld [vmem:[%s7826_s0 + $0x7a0] sm:$0xff]  ;;  %v263_v51 = vld [vmem:[%s7826_s0 + $0x790] sm:$0xff] }
  0xb4   :  { %v267_v52 = vld [vmem:[%s7826_s0 + $0x7b0] sm:$0xff] }
  0xb9   :  { %2229 = vmatmul.mubr.bf16.gmra.mrb[60].mxu1 %v4217_v5  ;;  %v4281_v5 = vcombine.low %v205_v57, %v209_v0  ;;  %v269_v57 = vld [vmem:[%s7826_s0 + $0x7c0] sm:$0xff] }
  0xba   :  { %2807 = vmatmul.mubr.bf16.gmra.mrb[60].mxu0 %v4221_v6  ;;  %2236 = vmatprep.mubr.bf16.mxu1 %v4226_v7  ;;  %v4285_v6 = vcombine.low %v207_v58, %v211_v59  ;;  %v4290_v7 = vcombine.high %v213_v1, %v217_v2  ;;  %v273_v0 = vld [vmem:[%s7826_s0 + $0x7e0] sm:$0xff]  ;;  %v271_v58 = vld [vmem:[%s7826_s0 + $0x7d0] sm:$0xff] }
  0xbb   :  { %2814 = vmatprep.mubr.bf16.mxu0 %v4230_v8  ;;  %v4294_v8 = vcombine.high %v215_v3, %v219_v4  ;;  %v275_v59 = vld [vmem:[%s7826_s0 + $0x7f0] sm:$0xff] }
  0xc1   :  { %2237 = vmatmul.mubr.bf16.gmra.mrb[64].mxu1 %v4225_v13  ;;  %v4289_v13 = vcombine.low %v213_v1, %v217_v2  ;;  %v22_v1 = vld [vmem:[%s7826_s0 + $0x8] sm:$0xff] }
  0xc2   :  { %2815 = vmatmul.mubr.bf16.gmra.mrb[64].mxu0 %v4229_v14  ;;  %2244 = vmatprep.mubr.bf16.mxu1 %v4234_v15  ;;  %v4293_v14 = vcombine.low %v215_v3, %v219_v4  ;;  %v4298_v15 = vcombine.high %v221_v9, %v225_v10  ;;  %v26_v2 = vld [vmem:[%s7826_s0 + $0x28] sm:$0xff]  ;;  %v24_v3 = vld [vmem:[%s7826_s0 + $0x18] sm:$0xff] }
  0xc3   :  { %2822 = vmatprep.mubr.bf16.mxu0 %v4238_v16  ;;  %v4302_v16 = vcombine.high %v223_v11, %v227_v12  ;;  %v28_v4 = vld [vmem:[%s7826_s0 + $0x38] sm:$0xff] }
  0xc9   :  { %2245 = vmatmul.mubr.bf16.gmra.mrb[68].mxu1 %v4233_v21  ;;  %v4297_v21 = vcombine.low %v221_v9, %v225_v10  ;;  %v30_v9 = vld [vmem:[%s7826_s0 + $0x48] sm:$0xff] }
  0xca   :  { %2823 = vmatmul.mubr.bf16.gmra.mrb[68].mxu0 %v4237_v22  ;;  %2252 = vmatprep.mubr.bf16.mxu1 %v4242_v23  ;;  %v4301_v22 = vcombine.low %v223_v11, %v227_v12  ;;  %v4306_v23 = vcombine.high %v229_v17, %v233_v18  ;;  %v34_v10 = vld [vmem:[%s7826_s0 + $0x68] sm:$0xff]  ;;  %v32_v11 = vld [vmem:[%s7826_s0 + $0x58] sm:$0xff] }
  0xcb   :  { %2830 = vmatprep.mubr.bf16.mxu0 %v4246_v24  ;;  %v4310_v24 = vcombine.high %v231_v19, %v235_v20  ;;  %v36_v12 = vld [vmem:[%s7826_s0 + $0x78] sm:$0xff] }
  0xd1   :  { %2253 = vmatmul.mubr.bf16.gmra.mrb[72].mxu1 %v4241_v29  ;;  %v4305_v29 = vcombine.low %v229_v17, %v233_v18  ;;  %v38_v17 = vld [vmem:[%s7826_s0 + $0x88] sm:$0xff] }
  0xd2   :  { %2831 = vmatmul.mubr.bf16.gmra.mrb[72].mxu0 %v4245_v30  ;;  %2260 = vmatprep.mubr.bf16.mxu1 %v4250_v31  ;;  %v4309_v30 = vcombine.low %v231_v19, %v235_v20  ;;  %v4314_v31 = vcombine.high %v237_v25, %v241_v26  ;;  %v42_v18 = vld [vmem:[%s7826_s0 + $0xa8] sm:$0xff]  ;;  %v40_v19 = vld [vmem:[%s7826_s0 + $0x98] sm:$0xff] }
  0xd3   :  { %2838 = vmatprep.mubr.bf16.mxu0 %v4254_v32  ;;  %v4318_v32 = vcombine.high %v239_v27, %v243_v28  ;;  %v44_v20 = vld [vmem:[%s7826_s0 + $0xb8] sm:$0xff] }
  0xd9   :  { %2261 = vmatmul.mubr.bf16.gmra.mrb[76].mxu1 %v4249_v37  ;;  %v4313_v37 = vcombine.low %v237_v25, %v241_v26  ;;  %v46_v25 = vld [vmem:[%s7826_s0 + $0xc8] sm:$0xff] }
  0xda   :  { %2839 = vmatmul.mubr.bf16.gmra.mrb[76].mxu0 %v4253_v38  ;;  %2268 = vmatprep.mubr.bf16.mxu1 %v4258_v39  ;;  %v4317_v38 = vcombine.low %v239_v27, %v243_v28  ;;  %v4322_v39 = vcombine.high %v245_v33, %v249_v34  ;;  %v50_v26 = vld [vmem:[%s7826_s0 + $0xe8] sm:$0xff]  ;;  %v48_v27 = vld [vmem:[%s7826_s0 + $0xd8] sm:$0xff] }
  0xdb   :  { %2846 = vmatprep.mubr.bf16.mxu0 %v4262_v40  ;;  %v4326_v40 = vcombine.high %v247_v35, %v251_v36  ;;  %v52_v28 = vld [vmem:[%s7826_s0 + $0xf8] sm:$0xff] }
  0xe1   :  { %2269 = vmatmul.mubr.bf16.gmra.mrb[80].mxu1 %v4257_v45  ;;  %v4321_v45 = vcombine.low %v245_v33, %v249_v34  ;;  %v54_v33 = vld [vmem:[%s7826_s0 + $0x108] sm:$0xff] }
  0xe2   :  { %2847 = vmatmul.mubr.bf16.gmra.mrb[80].mxu0 %v4261_v46  ;;  %2276 = vmatprep.mubr.bf16.mxu1 %v4266_v47  ;;  %v4325_v46 = vcombine.low %v247_v35, %v251_v36  ;;  %v4330_v47 = vcombine.high %v253_v41, %v257_v42  ;;  %v58_v34 = vld [vmem:[%s7826_s0 + $0x128] sm:$0xff]  ;;  %v56_v35 = vld [vmem:[%s7826_s0 + $0x118] sm:$0xff] }
  0xe3   :  { %2854 = vmatprep.mubr.bf16.mxu0 %v4270_v48  ;;  %v4334_v48 = vcombine.high %v255_v43, %v259_v44  ;;  %v60_v36 = vld [vmem:[%s7826_s0 + $0x138] sm:$0xff] }
  0xe9   :  { %2277 = vmatmul.mubr.bf16.gmra.mrb[84].mxu1 %v4265_v53  ;;  %v4329_v53 = vcombine.low %v253_v41, %v257_v42  ;;  %v62_v41 = vld [vmem:[%s7826_s0 + $0x148] sm:$0xff] }
  0xea   :  { %2855 = vmatmul.mubr.bf16.gmra.mrb[84].mxu0 %v4269_v54  ;;  %2284 = vmatprep.mubr.bf16.mxu1 %v4274_v55  ;;  %v4333_v54 = vcombine.low %v255_v43, %v259_v44  ;;  %v4338_v55 = vcombine.high %v261_v49, %v265_v50  ;;  %v66_v42 = vld [vmem:[%s7826_s0 + $0x168] sm:$0xff]  ;;  %v64_v43 = vld [vmem:[%s7826_s0 + $0x158] sm:$0xff] }
  0xeb   :  { %2862 = vmatprep.mubr.bf16.mxu0 %v4278_v56  ;;  %v4342_v56 = vcombine.high %v263_v51, %v267_v52  ;;  %v68_v44 = vld [vmem:[%s7826_s0 + $0x178] sm:$0xff] }
  0xf1   :  { %2285 = vmatmul.mubr.bf16.gmra.mrb[88].mxu1 %v4273_v60  ;;  %v4337_v60 = vcombine.low %v261_v49, %v265_v50  ;;  %v70_v49 = vld [vmem:[%s7826_s0 + $0x188] sm:$0xff] }
  0xf2   :  { %2863 = vmatmul.mubr.bf16.gmra.mrb[88].mxu0 %v4277_v61  ;;  %2292 = vmatprep.mubr.bf16.mxu1 %v4282_v62  ;;  %v4341_v61 = vcombine.low %v263_v51, %v267_v52  ;;  %v4346_v62 = vcombine.high %v269_v57, %v273_v0  ;;  %v74_v50 = vld [vmem:[%s7826_s0 + $0x1a8] sm:$0xff]  ;;  %v72_v51 = vld [vmem:[%s7826_s0 + $0x198] sm:$0xff] }
  0xf3   :  { %2870 = vmatprep.mubr.bf16.mxu0 %v4286_v63  ;;  %v4350_v63 = vcombine.high %v271_v58, %v275_v59  ;;  %v76_v52 = vld [vmem:[%s7826_s0 + $0x1b8] sm:$0xff] }
  0xf9   :  { %2293 = vmatmul.mubr.bf16.gmra.mrb[92].mxu1 %v4281_v5  ;;  %v4345_v5 = vcombine.low %v269_v57, %v273_v0  ;;  %v78_v57 = vld [vmem:[%s7826_s0 + $0x1c8] sm:$0xff] }
  0xfa   :  { %2871 = vmatmul.mubr.bf16.gmra.mrb[92].mxu0 %v4285_v6  ;;  %2300 = vmatprep.mubr.bf16.mxu1 %v4290_v7  ;;  %v4349_v6 = vcombine.low %v271_v58, %v275_v59  ;;  %v4100_v7 = vcombine.high %v22_v1, %v26_v2  ;;  %v82_v0 = vld [vmem:[%s7826_s0 + $0x1e8] sm:$0xff]  ;;  %v80_v58 = vld [vmem:[%s7826_s0 + $0x1d8] sm:$0xff] }
  0xfb   :  { %2878 = vmatprep.mubr.bf16.mxu0 %v4294_v8  ;;  %v4104_v8 = vcombine.high %v24_v3, %v28_v4  ;;  %v84_v59 = vld [vmem:[%s7826_s0 + $0x1f8] sm:$0xff] }
 0x101   :  { %2301 = vmatmul.mubr.bf16.gmra.mrb[96].mxu1 %v4289_v13  ;;  %v4099_v13 = vcombine.low %v22_v1, %v26_v2  ;;  %v86_v1 = vld [vmem:[%s7826_s0 + $0x208] sm:$0xff] }
 0x102   :  { %2879 = vmatmul.mubr.bf16.gmra.mrb[96].mxu0 %v4293_v14  ;;  %2308 = vmatprep.mubr.bf16.mxu1 %v4298_v15  ;;  %v4103_v14 = vcombine.low %v24_v3, %v28_v4  ;;  %v4108_v15 = vcombine.high %v30_v9, %v34_v10  ;;  %v90_v2 = vld [vmem:[%s7826_s0 + $0x228] sm:$0xff]  ;;  %v88_v3 = vld [vmem:[%s7826_s0 + $0x218] sm:$0xff] }
 0x103   :  { %2886 = vmatprep.mubr.bf16.mxu0 %v4302_v16  ;;  %v4112_v16 = vcombine.high %v32_v11, %v36_v12  ;;  %v92_v4 = vld [vmem:[%s7826_s0 + $0x238] sm:$0xff] }
 0x109   :  { %2309 = vmatmul.mubr.bf16.gmra.mrb[100].mxu1 %v4297_v21  ;;  %v4107_v21 = vcombine.low %v30_v9, %v34_v10  ;;  %v94_v9 = vld [vmem:[%s7826_s0 + $0x248] sm:$0xff] }
 0x10a   :  { %2887 = vmatmul.mubr.bf16.gmra.mrb[100].mxu0 %v4301_v22  ;;  %2316 = vmatprep.mubr.bf16.mxu1 %v4306_v23  ;;  %v4111_v22 = vcombine.low %v32_v11, %v36_v12  ;;  %v4116_v23 = vcombine.high %v38_v17, %v42_v18  ;;  %v98_v10 = vld [vmem:[%s7826_s0 + $0x268] sm:$0xff]  ;;  %v96_v11 = vld [vmem:[%s7826_s0 + $0x258] sm:$0xff] }
 0x10b   :  { %2894 = vmatprep.mubr.bf16.mxu0 %v4310_v24  ;;  %v4120_v24 = vcombine.high %v40_v19, %v44_v20  ;;  %v100_v12 = vld [vmem:[%s7826_s0 + $0x278] sm:$0xff] }
 0x111   :  { %2317 = vmatmul.mubr.bf16.gmra.mrb[104].mxu1 %v4305_v29  ;;  %v4115_v29 = vcombine.low %v38_v17, %v42_v18  ;;  %v102_v17 = vld [vmem:[%s7826_s0 + $0x288] sm:$0xff] }
 0x112   :  { %2895 = vmatmul.mubr.bf16.gmra.mrb[104].mxu0 %v4309_v30  ;;  %2324 = vmatprep.mubr.bf16.mxu1 %v4314_v31  ;;  %v4119_v30 = vcombine.low %v40_v19, %v44_v20  ;;  %v4124_v31 = vcombine.high %v46_v25, %v50_v26  ;;  %v106_v18 = vld [vmem:[%s7826_s0 + $0x2a8] sm:$0xff]  ;;  %v104_v19 = vld [vmem:[%s7826_s0 + $0x298] sm:$0xff] }
 0x113   :  { %2902 = vmatprep.mubr.bf16.mxu0 %v4318_v32  ;;  %v4128_v32 = vcombine.high %v48_v27, %v52_v28  ;;  %v108_v20 = vld [vmem:[%s7826_s0 + $0x2b8] sm:$0xff] }
 0x119   :  { %2325 = vmatmul.mubr.bf16.gmra.mrb[108].mxu1 %v4313_v37  ;;  %v4123_v37 = vcombine.low %v46_v25, %v50_v26  ;;  %v110_v25 = vld [vmem:[%s7826_s0 + $0x2c8] sm:$0xff] }
 0x11a   :  { %2903 = vmatmul.mubr.bf16.gmra.mrb[108].mxu0 %v4317_v38  ;;  %2332 = vmatprep.mubr.bf16.mxu1 %v4322_v39  ;;  %v4127_v38 = vcombine.low %v48_v27, %v52_v28  ;;  %v4132_v39 = vcombine.high %v54_v33, %v58_v34  ;;  %v114_v26 = vld [vmem:[%s7826_s0 + $0x2e8] sm:$0xff]  ;;  %v112_v27 = vld [vmem:[%s7826_s0 + $0x2d8] sm:$0xff] }
 0x11b   :  { %2910 = vmatprep.mubr.bf16.mxu0 %v4326_v40  ;;  %v4136_v40 = vcombine.high %v56_v35, %v60_v36  ;;  %v116_v28 = vld [vmem:[%s7826_s0 + $0x2f8] sm:$0xff] }
 0x121   :  { %2333 = vmatmul.mubr.bf16.gmra.mrb[112].mxu1 %v4321_v45  ;;  %v4131_v45 = vcombine.low %v54_v33, %v58_v34  ;;  %v118_v33 = vld [vmem:[%s7826_s0 + $0x308] sm:$0xff] }
 0x122   :  { %2911 = vmatmul.mubr.bf16.gmra.mrb[112].mxu0 %v4325_v46  ;;  %2340 = vmatprep.mubr.bf16.mxu1 %v4330_v47  ;;  %v4135_v46 = vcombine.low %v56_v35, %v60_v36  ;;  %v4140_v47 = vcombine.high %v62_v41, %v66_v42  ;;  %v122_v34 = vld [vmem:[%s7826_s0 + $0x328] sm:$0xff]  ;;  %v120_v35 = vld [vmem:[%s7826_s0 + $0x318] sm:$0xff] }
 0x123   :  { %2918 = vmatprep.mubr.bf16.mxu0 %v4334_v48  ;;  %v4144_v48 = vcombine.high %v64_v43, %v68_v44  ;;  %v124_v36 = vld [vmem:[%s7826_s0 + $0x338] sm:$0xff] }
 0x129   :  { %2341 = vmatmul.mubr.bf16.gmra.mrb[116].mxu1 %v4329_v53  ;;  %v4139_v53 = vcombine.low %v62_v41, %v66_v42  ;;  %v126_v41 = vld [vmem:[%s7826_s0 + $0x348] sm:$0xff] }
 0x12a   :  { %2919 = vmatmul.mubr.bf16.gmra.mrb[116].mxu0 %v4333_v54  ;;  %2348 = vmatprep.mubr.bf16.mxu1 %v4338_v55  ;;  %v4143_v54 = vcombine.low %v64_v43, %v68_v44  ;;  %v4148_v55 = vcombine.high %v70_v49, %v74_v50  ;;  %v130_v42 = vld [vmem:[%s7826_s0 + $0x368] sm:$0xff]  ;;  %v128_v43 = vld [vmem:[%s7826_s0 + $0x358] sm:$0xff] }
 0x12b   :  { %2926 = vmatprep.mubr.bf16.mxu0 %v4342_v56  ;;  %v4152_v56 = vcombine.high %v72_v51, %v76_v52  ;;  %v132_v44 = vld [vmem:[%s7826_s0 + $0x378] sm:$0xff] }
 0x131   :  { %2349 = vmatmul.mubr.bf16.gmra.mrb[120].mxu1 %v4337_v60  ;;  %v4147_v60 = vcombine.low %v70_v49, %v74_v50  ;;  %v134_v49 = vld [vmem:[%s7826_s0 + $0x388] sm:$0xff] }
 0x132   :  { %2927 = vmatmul.mubr.bf16.gmra.mrb[120].mxu0 %v4341_v61  ;;  %2356 = vmatprep.mubr.bf16.mxu1 %v4346_v62  ;;  %v4151_v61 = vcombine.low %v72_v51, %v76_v52  ;;  %v4156_v62 = vcombine.high %v78_v57, %v82_v0  ;;  %v138_v50 = vld [vmem:[%s7826_s0 + $0x3a8] sm:$0xff]  ;;  %v136_v51 = vld [vmem:[%s7826_s0 + $0x398] sm:$0xff] }
 0x133   :  { %2934 = vmatprep.mubr.bf16.mxu0 %v4350_v63  ;;  %v4160_v63 = vcombine.high %v80_v58, %v84_v59  ;;  %v140_v52 = vld [vmem:[%s7826_s0 + $0x3b8] sm:$0xff] }
 0x139   :  { %2357 = vmatmul.mubr.bf16.gmra.mrb[124].mxu1 %v4345_v5  ;;  %v4155_v5 = vcombine.low %v78_v57, %v82_v0  ;;  %v142_v57 = vld [vmem:[%s7826_s0 + $0x3c8] sm:$0xff] }
 0x13a   :  { %2935 = vmatmul.mubr.bf16.gmra.mrb[124].mxu0 %v4349_v6  ;;  %2397 = vmatprep.mubr.bf16.mxu1 %v4100_v7  ;;  %v4159_v6 = vcombine.low %v80_v58, %v84_v59  ;;  %v4164_v7 = vcombine.high %v86_v1, %v90_v2  ;;  %v146_v0 = vld [vmem:[%s7826_s0 + $0x3e8] sm:$0xff]  ;;  %v144_v58 = vld [vmem:[%s7826_s0 + $0x3d8] sm:$0xff] }
 0x13b   :  { %2975 = vmatprep.mubr.bf16.mxu0 %v4104_v8  ;;  %v4168_v8 = vcombine.high %v88_v3, %v92_v4  ;;  %v148_v59 = vld [vmem:[%s7826_s0 + $0x3f8] sm:$0xff] }
 0x141   :  { %2398 = vmatmul.mubr.bf16.vlgmr.msra.gmra.mrb[0].mxu1 %v4099_v13  ;;  %v4163_v13 = vcombine.low %v86_v1, %v90_v2  ;;  %v150_v1 = vld [vmem:[%s7826_s0 + $0x408] sm:$0xff] }
 0x142   :  { %2976 = vmatmul.mubr.bf16.vlgmr.msra.gmra.mrb[0].mxu0 %v4103_v14  ;;  %2405 = vmatprep.mubr.bf16.mxu1 %v4108_v15  ;;  %v4167_v14 = vcombine.low %v88_v3, %v92_v4  ;;  %v4172_v15 = vcombine.high %v94_v9, %v98_v10  ;;  %v154_v2 = vld [vmem:[%s7826_s0 + $0x428] sm:$0xff]  ;;  %v152_v3 = vld [vmem:[%s7826_s0 + $0x418] sm:$0xff] }
 0x143   :  { %2983 = vmatprep.mubr.bf16.mxu0 %v4112_v16  ;;  %v4176_v16 = vcombine.high %v96_v11, %v100_v12  ;;  %v156_v4 = vld [vmem:[%s7826_s0 + $0x438] sm:$0xff] }
 0x149   :  { %2406 = vmatmul.mubr.bf16.gmra.mrb[4].mxu1 %v4107_v21  ;;  %v4171_v21 = vcombine.low %v94_v9, %v98_v10  ;;  %v158_v9 = vld [vmem:[%s7826_s0 + $0x448] sm:$0xff] }
 0x14a   :  { %2984 = vmatmul.mubr.bf16.gmra.mrb[4].mxu0 %v4111_v22  ;;  %2413 = vmatprep.mubr.bf16.mxu1 %v4116_v23  ;;  %v4175_v22 = vcombine.low %v96_v11, %v100_v12  ;;  %v4180_v23 = vcombine.high %v102_v17, %v106_v18  ;;  %v162_v10 = vld [vmem:[%s7826_s0 + $0x468] sm:$0xff]  ;;  %v160_v11 = vld [vmem:[%s7826_s0 + $0x458] sm:$0xff] }
 0x14b   :  { %2991 = vmatprep.mubr.bf16.mxu0 %v4120_v24  ;;  %v4184_v24 = vcombine.high %v104_v19, %v108_v20  ;;  %v164_v12 = vld [vmem:[%s7826_s0 + $0x478] sm:$0xff] }
 0x151   :  { %2414 = vmatmul.mubr.bf16.gmra.mrb[8].mxu1 %v4115_v29  ;;  %v4179_v29 = vcombine.low %v102_v17, %v106_v18  ;;  %v166_v17 = vld [vmem:[%s7826_s0 + $0x488] sm:$0xff] }
 0x152   :  { %2992 = vmatmul.mubr.bf16.gmra.mrb[8].mxu0 %v4119_v30  ;;  %2421 = vmatprep.mubr.bf16.mxu1 %v4124_v31  ;;  %v4183_v30 = vcombine.low %v104_v19, %v108_v20  ;;  %v4188_v31 = vcombine.high %v110_v25, %v114_v26  ;;  %v170_v18 = vld [vmem:[%s7826_s0 + $0x4a8] sm:$0xff]  ;;  %v168_v19 = vld [vmem:[%s7826_s0 + $0x498] sm:$0xff] }
 0x153   :  { %2999 = vmatprep.mubr.bf16.mxu0 %v4128_v32  ;;  %v4192_v32 = vcombine.high %v112_v27, %v116_v28  ;;  %v172_v20 = vld [vmem:[%s7826_s0 + $0x4b8] sm:$0xff] }
 0x159   :  { %2422 = vmatmul.mubr.bf16.gmra.mrb[12].mxu1 %v4123_v37  ;;  %v4187_v37 = vcombine.low %v110_v25, %v114_v26  ;;  %v174_v25 = vld [vmem:[%s7826_s0 + $0x4c8] sm:$0xff] }
 0x15a   :  { %3000 = vmatmul.mubr.bf16.gmra.mrb[12].mxu0 %v4127_v38  ;;  %2429 = vmatprep.mubr.bf16.mxu1 %v4132_v39  ;;  %v4191_v38 = vcombine.low %v112_v27, %v116_v28  ;;  %v4196_v39 = vcombine.high %v118_v33, %v122_v34  ;;  %v178_v26 = vld [vmem:[%s7826_s0 + $0x4e8] sm:$0xff]  ;;  %v176_v27 = vld [vmem:[%s7826_s0 + $0x4d8] sm:$0xff] }
 0x15b   :  { %3007 = vmatprep.mubr.bf16.mxu0 %v4136_v40  ;;  %v4200_v40 = vcombine.high %v120_v35, %v124_v36  ;;  %v180_v28 = vld [vmem:[%s7826_s0 + $0x4f8] sm:$0xff] }
 0x161   :  { %2430 = vmatmul.mubr.bf16.gmra.mrb[16].mxu1 %v4131_v45  ;;  %v4195_v45 = vcombine.low %v118_v33, %v122_v34  ;;  %v182_v33 = vld [vmem:[%s7826_s0 + $0x508] sm:$0xff] }
 0x162   :  { %3008 = vmatmul.mubr.bf16.gmra.mrb[16].mxu0 %v4135_v46  ;;  %2437 = vmatprep.mubr.bf16.mxu1 %v4140_v47  ;;  %v4199_v46 = vcombine.low %v120_v35, %v124_v36  ;;  %v4204_v47 = vcombine.high %v126_v41, %v130_v42  ;;  %v186_v34 = vld [vmem:[%s7826_s0 + $0x528] sm:$0xff]  ;;  %v184_v35 = vld [vmem:[%s7826_s0 + $0x518] sm:$0xff] }
 0x163   :  { %3015 = vmatprep.mubr.bf16.mxu0 %v4144_v48  ;;  %v4208_v48 = vcombine.high %v128_v43, %v132_v44  ;;  %v188_v36 = vld [vmem:[%s7826_s0 + $0x538] sm:$0xff] }
 0x169   :  { %2438 = vmatmul.mubr.bf16.gmra.mrb[20].mxu1 %v4139_v53  ;;  %v4203_v53 = vcombine.low %v126_v41, %v130_v42  ;;  %v190_v41 = vld [vmem:[%s7826_s0 + $0x548] sm:$0xff] }
 0x16a   :  { %3016 = vmatmul.mubr.bf16.gmra.mrb[20].mxu0 %v4143_v54  ;;  %2445 = vmatprep.mubr.bf16.mxu1 %v4148_v55  ;;  %v4207_v54 = vcombine.low %v128_v43, %v132_v44  ;;  %v4212_v55 = vcombine.high %v134_v49, %v138_v50  ;;  %v194_v42 = vld [vmem:[%s7826_s0 + $0x568] sm:$0xff]  ;;  %v192_v43 = vld [vmem:[%s7826_s0 + $0x558] sm:$0xff] }
 0x16b   :  { %3023 = vmatprep.mubr.bf16.mxu0 %v4152_v56  ;;  %v4216_v56 = vcombine.high %v136_v51, %v140_v52  ;;  %v196_v44 = vld [vmem:[%s7826_s0 + $0x578] sm:$0xff] }
 0x171   :  { %2446 = vmatmul.mubr.bf16.gmra.mrb[24].mxu1 %v4147_v60  ;;  %v4211_v60 = vcombine.low %v134_v49, %v138_v50  ;;  %v198_v49 = vld [vmem:[%s7826_s0 + $0x588] sm:$0xff] }
 0x172   :  { %3024 = vmatmul.mubr.bf16.gmra.mrb[24].mxu0 %v4151_v61  ;;  %2453 = vmatprep.mubr.bf16.mxu1 %v4156_v62  ;;  %v4215_v61 = vcombine.low %v136_v51, %v140_v52  ;;  %v4220_v62 = vcombine.high %v142_v57, %v146_v0  ;;  %v202_v50 = vld [vmem:[%s7826_s0 + $0x5a8] sm:$0xff]  ;;  %v200_v51 = vld [vmem:[%s7826_s0 + $0x598] sm:$0xff] }
 0x173   :  { %3031 = vmatprep.mubr.bf16.mxu0 %v4160_v63  ;;  %v4224_v63 = vcombine.high %v144_v58, %v148_v59  ;;  %v204_v52 = vld [vmem:[%s7826_s0 + $0x5b8] sm:$0xff] }
 0x179   :  { %2454 = vmatmul.mubr.bf16.gmra.mrb[28].mxu1 %v4155_v5  ;;  %v4219_v5 = vcombine.low %v142_v57, %v146_v0  ;;  %v206_v57 = vld [vmem:[%s7826_s0 + $0x5c8] sm:$0xff] }
 0x17a   :  { %3032 = vmatmul.mubr.bf16.gmra.mrb[28].mxu0 %v4159_v6  ;;  %2461 = vmatprep.mubr.bf16.mxu1 %v4164_v7  ;;  %v4223_v6 = vcombine.low %v144_v58, %v148_v59  ;;  %v4228_v7 = vcombine.high %v150_v1, %v154_v2  ;;  %v210_v0 = vld [vmem:[%s7826_s0 + $0x5e8] sm:$0xff]  ;;  %v208_v58 = vld [vmem:[%s7826_s0 + $0x5d8] sm:$0xff] }
 0x17b   :  { %3039 = vmatprep.mubr.bf16.mxu0 %v4168_v8  ;;  %v4232_v8 = vcombine.high %v152_v3, %v156_v4  ;;  %v212_v59 = vld [vmem:[%s7826_s0 + $0x5f8] sm:$0xff] }
 0x181   :  { %2462 = vmatmul.mubr.bf16.gmra.mrb[32].mxu1 %v4163_v13  ;;  %v4227_v13 = vcombine.low %v150_v1, %v154_v2  ;;  %v214_v1 = vld [vmem:[%s7826_s0 + $0x608] sm:$0xff] }
 0x182   :  { %3040 = vmatmul.mubr.bf16.gmra.mrb[32].mxu0 %v4167_v14  ;;  %2469 = vmatprep.mubr.bf16.mxu1 %v4172_v15  ;;  %v4231_v14 = vcombine.low %v152_v3, %v156_v4  ;;  %v4236_v15 = vcombine.high %v158_v9, %v162_v10  ;;  %v218_v2 = vld [vmem:[%s7826_s0 + $0x628] sm:$0xff]  ;;  %v216_v3 = vld [vmem:[%s7826_s0 + $0x618] sm:$0xff] }
 0x183   :  { %3047 = vmatprep.mubr.bf16.mxu0 %v4176_v16  ;;  %v4240_v16 = vcombine.high %v160_v11, %v164_v12  ;;  %v220_v4 = vld [vmem:[%s7826_s0 + $0x638] sm:$0xff] }
 0x189   :  { %2470 = vmatmul.mubr.bf16.gmra.mrb[36].mxu1 %v4171_v21  ;;  %v4235_v21 = vcombine.low %v158_v9, %v162_v10  ;;  %v222_v9 = vld [vmem:[%s7826_s0 + $0x648] sm:$0xff] }
 0x18a   :  { %3048 = vmatmul.mubr.bf16.gmra.mrb[36].mxu0 %v4175_v22  ;;  %2477 = vmatprep.mubr.bf16.mxu1 %v4180_v23  ;;  %v4239_v22 = vcombine.low %v160_v11, %v164_v12  ;;  %v4244_v23 = vcombine.high %v166_v17, %v170_v18  ;;  %v226_v10 = vld [vmem:[%s7826_s0 + $0x668] sm:$0xff]  ;;  %v224_v11 = vld [vmem:[%s7826_s0 + $0x658] sm:$0xff] }
 0x18b   :  { %3055 = vmatprep.mubr.bf16.mxu0 %v4184_v24  ;;  %v4248_v24 = vcombine.high %v168_v19, %v172_v20  ;;  %v228_v12 = vld [vmem:[%s7826_s0 + $0x678] sm:$0xff] }
 0x191   :  { %2478 = vmatmul.mubr.bf16.gmra.mrb[40].mxu1 %v4179_v29  ;;  %v4243_v29 = vcombine.low %v166_v17, %v170_v18  ;;  %v230_v17 = vld [vmem:[%s7826_s0 + $0x688] sm:$0xff] }
 0x192   :  { %3056 = vmatmul.mubr.bf16.gmra.mrb[40].mxu0 %v4183_v30  ;;  %2485 = vmatprep.mubr.bf16.mxu1 %v4188_v31  ;;  %v4247_v30 = vcombine.low %v168_v19, %v172_v20  ;;  %v4252_v31 = vcombine.high %v174_v25, %v178_v26  ;;  %v234_v18 = vld [vmem:[%s7826_s0 + $0x6a8] sm:$0xff]  ;;  %v232_v19 = vld [vmem:[%s7826_s0 + $0x698] sm:$0xff] }
 0x193   :  { %3063 = vmatprep.mubr.bf16.mxu0 %v4192_v32  ;;  %v4256_v32 = vcombine.high %v176_v27, %v180_v28  ;;  %v236_v20 = vld [vmem:[%s7826_s0 + $0x6b8] sm:$0xff] }
 0x199   :  { %2486 = vmatmul.mubr.bf16.gmra.mrb[44].mxu1 %v4187_v37  ;;  %v4251_v37 = vcombine.low %v174_v25, %v178_v26  ;;  %v238_v25 = vld [vmem:[%s7826_s0 + $0x6c8] sm:$0xff] }
 0x19a   :  { %3064 = vmatmul.mubr.bf16.gmra.mrb[44].mxu0 %v4191_v38  ;;  %2493 = vmatprep.mubr.bf16.mxu1 %v4196_v39  ;;  %v4255_v38 = vcombine.low %v176_v27, %v180_v28  ;;  %v4260_v39 = vcombine.high %v182_v33, %v186_v34  ;;  %v242_v26 = vld [vmem:[%s7826_s0 + $0x6e8] sm:$0xff]  ;;  %v240_v27 = vld [vmem:[%s7826_s0 + $0x6d8] sm:$0xff] }
 0x19b   :  { %3071 = vmatprep.mubr.bf16.mxu0 %v4200_v40  ;;  %v4264_v40 = vcombine.high %v184_v35, %v188_v36  ;;  %v244_v28 = vld [vmem:[%s7826_s0 + $0x6f8] sm:$0xff] }
 0x1a1   :  { %2494 = vmatmul.mubr.bf16.gmra.mrb[48].mxu1 %v4195_v45  ;;  %v4259_v45 = vcombine.low %v182_v33, %v186_v34  ;;  %v6215_v33 = vld [vmem:[%s7827_s2] ss:$0 sm:$0xff]  ;;  %v246_v34 = vld [vmem:[%s7826_s0 + $0x708] sm:$0xff] }
 0x1a2   :  { %3072 = vmatmul.mubr.bf16.gmra.mrb[48].mxu0 %v4199_v46  ;;  %2501 = vmatprep.mubr.bf16.mxu1 %v4204_v47  ;;  %v4263_v46 = vcombine.low %v184_v35, %v188_v36  ;;  %v4268_v47 = vcombine.high %v190_v41, %v194_v42  ;;  %v250_v35 = vld [vmem:[%s7826_s0 + $0x728] sm:$0xff] }
 0x1a3   :  { %3079 = vmatprep.mubr.bf16.mxu0 %v4208_v48  ;;  %v4272_v48 = vcombine.high %v192_v43, %v196_v44 }
 0x1a9   :  { %2502 = vmatmul.mubr.bf16.gmra.mrb[52].mxu1 %v4203_v53  ;;  %v4267_v53 = vcombine.low %v190_v41, %v194_v42  ;;  %v4315_v42 = vcombine.low %v238_v25, %v242_v26 }
 0x1aa   :  { %3080 = vmatmul.mubr.bf16.gmra.mrb[52].mxu0 %v4207_v54  ;;  %2509 = vmatprep.mubr.bf16.mxu1 %v4212_v55  ;;  %v4271_v54 = vcombine.low %v192_v43, %v196_v44  ;;  %v4276_v55 = vcombine.high %v198_v49, %v202_v50 }
 0x1ab   :  { %3087 = vmatprep.mubr.bf16.mxu0 %v4216_v56  ;;  %v4280_v56 = vcombine.high %v200_v51, %v204_v52 }
 0x1b1   :  { %2510 = vmatmul.mubr.bf16.gmra.mrb[56].mxu1 %v4211_v60  ;;  %v4275_v60 = vcombine.low %v198_v49, %v202_v50 }
 0x1b2   :  { %3088 = vmatmul.mubr.bf16.gmra.mrb[56].mxu0 %v4215_v61  ;;  %2517 = vmatprep.mubr.bf16.mxu1 %v4220_v62  ;;  %v4279_v61 = vcombine.low %v200_v51, %v204_v52  ;;  %v4284_v62 = vcombine.high %v206_v57, %v210_v0 }
 0x1b3   :  { %3095 = vmatprep.mubr.bf16.mxu0 %v4224_v63  ;;  %v4288_v63 = vcombine.high %v208_v58, %v212_v59 }
 0x1b9   :  { %2518 = vmatmul.mubr.bf16.gmra.mrb[60].mxu1 %v4219_v5  ;;  %v4283_v5 = vcombine.low %v206_v57, %v210_v0  ;;  %v256_v57 = vld [vmem:[%s7826_s0 + $0x758] sm:$0xff] }
 0x1ba   :  { %3096 = vmatmul.mubr.bf16.gmra.mrb[60].mxu0 %v4223_v6  ;;  %2525 = vmatprep.mubr.bf16.mxu1 %v4228_v7  ;;  %v4287_v6 = vcombine.low %v208_v58, %v212_v59  ;;  %v4292_v7 = vcombine.high %v214_v1, %v218_v2  ;;  %v260_v0 = vld [vmem:[%s7826_s0 + $0x778] sm:$0xff] }
 0x1bb   :  { %3103 = vmatprep.mubr.bf16.mxu0 %v4232_v8  ;;  %v4296_v8 = vcombine.high %v216_v3, %v220_v4 }
 0x1c1   :  { %2526 = vmatmul.mubr.bf16.gmra.mrb[64].mxu1 %v4227_v13  ;;  %v4291_v13 = vcombine.low %v214_v1, %v218_v2 }
 0x1c2   :  { %3104 = vmatmul.mubr.bf16.gmra.mrb[64].mxu0 %v4231_v14  ;;  %2533 = vmatprep.mubr.bf16.mxu1 %v4236_v15  ;;  %v4295_v14 = vcombine.low %v216_v3, %v220_v4  ;;  %v4300_v15 = vcombine.high %v222_v9, %v226_v10 }
 0x1c3   :  { %3111 = vmatprep.mubr.bf16.mxu0 %v4240_v16  ;;  %v4304_v16 = vcombine.high %v224_v11, %v228_v12 }
 0x1c9   :  { %2534 = vmatmul.mubr.bf16.gmra.mrb[68].mxu1 %v4235_v21  ;;  %v4299_v21 = vcombine.low %v222_v9, %v226_v10  ;;  %v262_v10 = vld [vmem:[%s7826_s0 + $0x788] sm:$0xff] }
 0x1ca   :  { %3112 = vmatmul.mubr.bf16.gmra.mrb[68].mxu0 %v4239_v22  ;;  %2541 = vmatprep.mubr.bf16.mxu1 %v4244_v23  ;;  %v4303_v22 = vcombine.low %v224_v11, %v228_v12  ;;  %v4308_v23 = vcombine.high %v230_v17, %v234_v18  ;;  %v266_v11 = vld [vmem:[%s7826_s0 + $0x7a8] sm:$0xff] }
 0x1cb   :  { %3119 = vmatprep.mubr.bf16.mxu0 %v4248_v24  ;;  %v4312_v24 = vcombine.high %v232_v19, %v236_v20 }
 0x1d1   :  { %2542 = vmatmul.mubr.bf16.gmra.mrb[72].mxu1 %v4243_v29  ;;  %v4307_v29 = vcombine.low %v230_v17, %v234_v18 }
 0x1d2   :  { %3120 = vmatmul.mubr.bf16.gmra.mrb[72].mxu0 %v4247_v30  ;;  %2549 = vmatprep.mubr.bf16.mxu1 %v4252_v31  ;;  %v4311_v30 = vcombine.low %v232_v19, %v236_v20  ;;  %v4316_v31 = vcombine.high %v238_v25, %v242_v26 }
 0x1d3   :  { %3127 = vmatprep.mubr.bf16.mxu0 %v4256_v32  ;;  %v4320_v32 = vcombine.high %v240_v27, %v244_v28 }
 0x1d9   :  { %2550 = vmatmul.mubr.bf16.gmra.mrb[76].mxu1 %v4251_v37  ;;  %v248_v37 = vld [vmem:[%s7826_s0 + $0x718] sm:$0xff] }
 0x1da   :  { %3128 = vmatmul.mubr.bf16.gmra.mrb[76].mxu0 %v4255_v38  ;;  %2557 = vmatprep.mubr.bf16.mxu1 %v4260_v39  ;;  %v252_v38 = vld [vmem:[%s7826_s0 + $0x738] sm:$0xff] }
 0x1db   :  { %3135 = vmatprep.mubr.bf16.mxu0 %v4264_v40  ;;  %v4328_v51 = vcombine.high %v248_v37, %v252_v38  ;;  %v4327_v1 = vcombine.low %v248_v37, %v252_v38 }
 0x1e1   :  { %2558 = vmatmul.mubr.bf16.gmra.mrb[80].mxu1 %v4259_v45  ;;  %v4319_v45 = vcombine.low %v240_v27, %v244_v28 }
 0x1e2   :  { %3136 = vmatmul.mubr.bf16.gmra.mrb[80].mxu0 %v4263_v46  ;;  %2565 = vmatprep.mubr.bf16.mxu1 %v4268_v47  ;;  %v4324_v46 = vcombine.high %v246_v34, %v250_v35 }
 0x1e3   :  { %3143 = vmatprep.mubr.bf16.mxu0 %v4272_v48 }
 0x1e9   :  { %2566 = vmatmul.mubr.bf16.gmra.mrb[84].mxu1 %v4267_v53 }
 0x1ea   :  { %3144 = vmatmul.mubr.bf16.gmra.mrb[84].mxu0 %v4271_v54  ;;  %2573 = vmatprep.mubr.bf16.mxu1 %v4276_v55  ;;  %v254_v54 = vld [vmem:[%s7826_s0 + $0x748] sm:$0xff] }
 0x1eb   :  { %3151 = vmatprep.mubr.bf16.mxu0 %v4280_v56  ;;  %v258_v55 = vld [vmem:[%s7826_s0 + $0x768] sm:$0xff] }
 0x1ec   :  { %v4332_v2 = vcombine.high %v254_v54, %v258_v55  ;;  %v4331_v18 = vcombine.low %v254_v54, %v258_v55 }
 0x1f1   :  { %2574 = vmatmul.mubr.bf16.gmra.mrb[88].mxu1 %v4275_v60 }
 0x1f2   :  { %3152 = vmatmul.mubr.bf16.gmra.mrb[88].mxu0 %v4279_v61  ;;  %2581 = vmatprep.mubr.bf16.mxu1 %v4284_v62  ;;  %v4323_v61 = vcombine.low %v246_v34, %v250_v35  ;;  %v272_v34 = vld [vmem:[%s7826_s0 + $0x7d8] sm:$0xff] }
 0x1f3   :  { %3159 = vmatprep.mubr.bf16.mxu0 %v4288_v63  ;;  %v276_v35 = vld [vmem:[%s7826_s0 + $0x7f8] sm:$0xff] }
 0x1f9   :  { %2582 = vmatmul.mubr.bf16.gmra.mrb[92].mxu1 %v4283_v5 }
 0x1fa   :  { %3160 = vmatmul.mubr.bf16.gmra.mrb[92].mxu0 %v4287_v6  ;;  %2589 = vmatprep.mubr.bf16.mxu1 %v4292_v7  ;;  %v4336_v7 = vcombine.high %v256_v57, %v260_v0 }
 0x1fb   :  { %3167 = vmatprep.mubr.bf16.mxu0 %v4296_v8 }
 0x201   :  { %2590 = vmatmul.mubr.bf16.gmra.mrb[96].mxu1 %v4291_v13  ;;  %v264_v13 = vld [vmem:[%s7826_s0 + $0x798] sm:$0xff] }
 0x202   :  { %3168 = vmatmul.mubr.bf16.gmra.mrb[96].mxu0 %v4295_v14  ;;  %2597 = vmatprep.mubr.bf16.mxu1 %v4300_v15  ;;  %v268_v14 = vld [vmem:[%s7826_s0 + $0x7b8] sm:$0xff] }
 0x203   :  { %3175 = vmatprep.mubr.bf16.mxu0 %v4304_v16  ;;  %v4344_v27 = vcombine.high %v264_v13, %v268_v14 }
 0x209   :  { %2598 = vmatmul.mubr.bf16.gmra.mrb[100].mxu1 %v4299_v21  ;;  %v4335_v21 = vcombine.low %v256_v57, %v260_v0 }
 0x20a   :  { %3176 = vmatmul.mubr.bf16.gmra.mrb[100].mxu0 %v4303_v22  ;;  %2605 = vmatprep.mubr.bf16.mxu1 %v4308_v23  ;;  %v4340_v22 = vcombine.high %v262_v10, %v266_v11 }
 0x20b   :  { %3183 = vmatprep.mubr.bf16.mxu0 %v4312_v24 }
 0x211   :  { %2606 = vmatmul.mubr.bf16.gmra.mrb[104].mxu1 %v4307_v29 }
 0x212   :  { %3184 = vmatmul.mubr.bf16.gmra.mrb[104].mxu0 %v4311_v30  ;;  %2613 = vmatprep.mubr.bf16.mxu1 %v4316_v31  ;;  %v270_v30 = vld [vmem:[%s7826_s0 + $0x7c8] sm:$0xff] }
 0x213   :  { %3191 = vmatprep.mubr.bf16.mxu0 %v4320_v32  ;;  %v274_v31 = vld [vmem:[%s7826_s0 + $0x7e8] sm:$0xff] }
 0x214   :  { %v2399_v36 = vpop.f32.mrb[0].mxu1  ;;  %v4347_v57 = vcombine.low %v270_v30, %v274_v31 }
 0x215   :  { %v4738_v39 = vadd.f32 %v6215_v33, %v2399_v36  ;;  %v2977_v40 = vpop.f32.mrb[0].mxu0  ;;  %v2401_v41 = vpop.f32.mrb[1].mxu1 }
 0x216   :  { %v2979_v43 = vpop.f32.mrb[1].mxu0  ;;  %v2402_v44 = vpop.f32.mrb[2].mxu1 }
 0x217   :  { %v6230_v47 = vadd.f32 %v4738_v39, %v2977_v40  ;;  %v4740_v48 = vadd.f32 %v6215_v33, %v2402_v44  ;;  %v2980_v49 = vpop.f32.mrb[2].mxu0  ;;  %v2404_v50 = vpop.f32.mrb[3].mxu1  ;;  %v4339_v39 = vcombine.low %v262_v10, %v266_v11  ;;  %v4348_v43 = vcombine.high %v270_v30, %v274_v31 }
 0x218   :  { %v2982_v52 = vpop.f32.mrb[3].mxu0 }
 0x219   :  { %v6233_v53 = vadd.f32 %v4740_v48, %v2980_v49  ;;  %2614 = vmatmul.mubr.bf16.gmra.mrb[108].mxu1 %v4315_v42  ;;  %v4343_v42 = vcombine.low %v264_v13, %v268_v14  ;;  %v4352_v49 = vcombine.high %v272_v34, %v276_v35 }
 0x21a   :  { %3192 = vmatmul.mubr.bf16.gmra.mrb[108].mxu0 %v4319_v45  ;;  %2621 = vmatprep.mubr.bf16.mxu1 %v4324_v46 }
 0x21b   :  { %3199 = vmatprep.mubr.bf16.mxu0 %v4328_v51 }
 0x21c   :  { %v2407_v56 = vpop.f32.mrb[4].mxu1 }
 0x21d   :  { %v4742_v58 = vadd.f32 %v6215_v33, %v2407_v56  ;;  %v2985_v59 = vpop.f32.mrb[4].mxu0  ;;  %v2409_v60 = vpop.f32.mrb[5].mxu1 }
 0x21e   :  { %v2987_v62 = vpop.f32.mrb[5].mxu0  ;;  %v2410_v63 = vpop.f32.mrb[6].mxu1 }
 0x21f   :  { %v6248_v3 = vadd.f32 %v4742_v58, %v2985_v59  ;;  %v4744_v4 = vadd.f32 %v6215_v33, %v2410_v63  ;;  %v2988_v5 = vpop.f32.mrb[6].mxu0  ;;  %v2412_v6 = vpop.f32.mrb[7].mxu1  ;;  %v4351_v59 = vcombine.low %v272_v34, %v276_v35 }
 0x220   :  { %v2990_v8 = vpop.f32.mrb[7].mxu0 }
 0x221   :  { %v6251_v9 = vadd.f32 %v4744_v4, %v2988_v5  ;;  %2622 = vmatmul.mubr.bf16.gmra.mrb[112].mxu1 %v4323_v61 }
 0x222   :  { %3200 = vmatmul.mubr.bf16.gmra.mrb[112].mxu0 %v4327_v1  ;;  %2629 = vmatprep.mubr.bf16.mxu1 %v4332_v2 }
 0x223   :  { %3207 = vmatprep.mubr.bf16.mxu0 %v4336_v7 }
 0x224   :  { %v2415_v12 = vpop.f32.mrb[8].mxu1 }
 0x225   :  { %v4746_v15 = vadd.f32 %v6215_v33, %v2415_v12  ;;  %v2993_v16 = vpop.f32.mrb[8].mxu0  ;;  %v2417_v17 = vpop.f32.mrb[9].mxu1 }
 0x226   :  { %v2995_v19 = vpop.f32.mrb[9].mxu0  ;;  %v2418_v20 = vpop.f32.mrb[10].mxu1 }
 0x227   :  { %v6266_v23 = vadd.f32 %v4746_v15, %v2993_v16  ;;  %v4748_v24 = vadd.f32 %v6215_v33, %v2418_v20  ;;  %v2996_v25 = vpop.f32.mrb[10].mxu0  ;;  %v2420_v26 = vpop.f32.mrb[11].mxu1 }
 0x228   :  { %v2998_v28 = vpop.f32.mrb[11].mxu0 }
 0x229   :  { %v6269_v29 = vadd.f32 %v4748_v24, %v2996_v25  ;;  %2630 = vmatmul.mubr.bf16.gmra.mrb[116].mxu1 %v4331_v18 }
 0x22a   :  { %3208 = vmatmul.mubr.bf16.gmra.mrb[116].mxu0 %v4335_v21  ;;  %2637 = vmatprep.mubr.bf16.mxu1 %v4340_v22 }
 0x22b   :  { %3215 = vmatprep.mubr.bf16.mxu0 %v4344_v27 }
 0x22c   :  { %v2423_v32 = vpop.f32.mrb[12].mxu1 }
 0x22d   :  { %v4750_v36 = vadd.f32 %v6215_v33, %v2423_v32  ;;  %v3001_v37 = vpop.f32.mrb[12].mxu0  ;;  %v2425_v38 = vpop.f32.mrb[13].mxu1 }
 0x22e   :  { %v3003_v40 = vpop.f32.mrb[13].mxu0  ;;  %v2426_v41 = vpop.f32.mrb[14].mxu1 }
 0x22f   :  { %v6284_v44 = vadd.f32 %v4750_v36, %v3001_v37  ;;  %v4752_v45 = vadd.f32 %v6215_v33, %v2426_v41  ;;  %v3004_v46 = vpop.f32.mrb[14].mxu0  ;;  %v2428_v48 = vpop.f32.mrb[15].mxu1 }
 0x230   :  { %v3006_v50 = vpop.f32.mrb[15].mxu0 }
 0x231   :  { %v6287_v51 = vadd.f32 %v4752_v45, %v3004_v46  ;;  %2638 = vmatmul.mubr.bf16.gmra.mrb[120].mxu1 %v4339_v39  ;;  %v3232_v45 = vadd.f32 %v6233_v53, %v6230_v47 }
 0x232   :  { %3216 = vmatmul.mubr.bf16.gmra.mrb[120].mxu0 %v4343_v42  ;;  %2645 = vmatprep.mubr.bf16.mxu1 %v4348_v43 }
 0x233   :  { %3223 = vmatprep.mubr.bf16.mxu0 %v4352_v49  ;;  %v3233_v48 = vadd.f32 %v6248_v3, %v3232_v45 }
 0x234   :  { %v2431_v52 = vpop.f32.mrb[16].mxu1 }
 0x235   :  { %v4754_v54 = vadd.f32 %v6215_v33, %v2431_v52  ;;  %v3009_v55 = vpop.f32.mrb[16].mxu0  ;;  %v2433_v56 = vpop.f32.mrb[17].mxu1 }
 0x236   :  { %v3011_v0 = vpop.f32.mrb[17].mxu0  ;;  %v2434_v58 = vpop.f32.mrb[18].mxu1 }
 0x237   :  { %v6290_v60 = vadd.f32 %v4754_v54, %v3009_v55  ;;  %v4756_v61 = vadd.f32 %v6215_v33, %v2434_v58  ;;  %v3012_v62 = vpop.f32.mrb[18].mxu0  ;;  %v2436_v63 = vpop.f32.mrb[19].mxu1 }
 0x238   :  { %v3014_v1 = vpop.f32.mrb[19].mxu0 }
 0x239   :  { %v6293_v2 = vadd.f32 %v4756_v61, %v3012_v62  ;;  %2646 = vmatmul.mubr.bf16.gmra.mrb[124].mxu1 %v4347_v57  ;;  %v3234_v61 = vadd.f32 %v6251_v9, %v3233_v48 }
 0x23a   :  { %3224 = vmatmul.mubr.bf16.gmra.mrb[124].mxu0 %v4351_v59 }
 0x23b   :  { %v3235_v63 = vadd.f32 %v6266_v23, %v3234_v61 }
 0x23c   :  { %v2439_v4 = vpop.f32.mrb[20].mxu1 }
 0x23d   :  { %v4758_v5 = vadd.f32 %v6215_v33, %v2439_v4  ;;  %v3017_v6 = vpop.f32.mrb[20].mxu0  ;;  %v2441_v7 = vpop.f32.mrb[21].mxu1 }
 0x23e   :  { %v3019_v8 = vpop.f32.mrb[21].mxu0  ;;  %v2442_v10 = vpop.f32.mrb[22].mxu1 }
 0x23f   :  { %v6296_v11 = vadd.f32 %v4758_v5, %v3017_v6  ;;  %v4760_v12 = vadd.f32 %v6215_v33, %v2442_v10  ;;  %v3020_v13 = vpop.f32.mrb[22].mxu0  ;;  %v2444_v14 = vpop.f32.mrb[23].mxu1  ;;  %v3236_v10 = vadd.f32 %v6269_v29, %v3235_v63 }
 0x240   :  { %v3022_v15 = vpop.f32.mrb[23].mxu0 }
 0x241   :  { %v6299_v16 = vadd.f32 %v4760_v12, %v3020_v13 }
 0x244   :  { %v2447_v17 = vpop.f32.mrb[24].mxu1 }
 0x245   :  { %v4762_v18 = vadd.f32 %v6215_v33, %v2447_v17  ;;  %v3025_v19 = vpop.f32.mrb[24].mxu0  ;;  %v2449_v20 = vpop.f32.mrb[25].mxu1 }
 0x246   :  { %v3027_v21 = vpop.f32.mrb[25].mxu0  ;;  %v2450_v22 = vpop.f32.mrb[26].mxu1 }
 0x247   :  { %v6302_v24 = vadd.f32 %v4762_v18, %v3025_v19  ;;  %v4764_v25 = vadd.f32 %v6215_v33, %v2450_v22  ;;  %v3028_v26 = vpop.f32.mrb[26].mxu0  ;;  %v2452_v27 = vpop.f32.mrb[27].mxu1  ;;  %v3237_v18 = vadd.f32 %v6284_v44, %v3236_v10 }
 0x248   :  { %v3030_v28 = vpop.f32.mrb[27].mxu0 }
 0x249   :  { %v6305_v30 = vadd.f32 %v4764_v25, %v3028_v26  ;;  %v3238_v21 = vadd.f32 %v6287_v51, %v3237_v18 }
 0x24c   :  { %v2455_v31 = vpop.f32.mrb[28].mxu1 }
 0x24d   :  { %v4766_v32 = vadd.f32 %v6215_v33, %v2455_v31  ;;  %v3033_v34 = vpop.f32.mrb[28].mxu0  ;;  %v2457_v35 = vpop.f32.mrb[29].mxu1  ;;  %v3239_v31 = vadd.f32 %v6290_v60, %v3238_v21 }
 0x24e   :  { %v3035_v36 = vpop.f32.mrb[29].mxu0  ;;  %v2458_v37 = vpop.f32.mrb[30].mxu1 }
 0x24f   :  { %v6308_v38 = vadd.f32 %v4766_v32, %v3033_v34  ;;  %v4768_v39 = vadd.f32 %v6215_v33, %v2458_v37  ;;  %v3036_v40 = vpop.f32.mrb[30].mxu0  ;;  %v2460_v41 = vpop.f32.mrb[31].mxu1 }
 0x250   :  { %v3038_v42 = vpop.f32.mrb[31].mxu0 }
 0x251   :  { %v6311_v43 = vadd.f32 %v4768_v39, %v3036_v40  ;;  %v3240_v40 = vadd.f32 %v6293_v2, %v3239_v31 }
 0x253   :  { %v3241_v42 = vadd.f32 %v6296_v11, %v3240_v40 }
 0x254   :  { %v2463_v46 = vpop.f32.mrb[32].mxu1 }
 0x255   :  { %v4770_v49 = vadd.f32 %v6215_v33, %v2463_v46  ;;  %v3041_v50 = vpop.f32.mrb[32].mxu0  ;;  %v2465_v52 = vpop.f32.mrb[33].mxu1 }
 0x256   :  { %v3043_v54 = vpop.f32.mrb[33].mxu0  ;;  %v2466_v55 = vpop.f32.mrb[34].mxu1 }
 0x257   :  { %v6317_v56 = vadd.f32 %v4770_v49, %v3041_v50  ;;  %v4772_v57 = vadd.f32 %v6215_v33, %v2466_v55  ;;  %v3044_v0 = vpop.f32.mrb[34].mxu0  ;;  %v2468_v58 = vpop.f32.mrb[35].mxu1 }
 0x258   :  { %v3046_v59 = vpop.f32.mrb[35].mxu0  ;;  %v3242_v58 = vadd.f32 %v6299_v16, %v3241_v42 }
 0x259   :  { %v6321_v62 = vadd.f32 %v4772_v57, %v3044_v0 }
 0x25a   :  { %v3243_v61 = vadd.f32 %v6302_v24, %v3242_v58 }
 0x25c   :  { %v2471_v1 = vpop.f32.mrb[36].mxu1 }
 0x25d   :  { %v4774_v4 = vadd.f32 %v6215_v33, %v2471_v1  ;;  %v3049_v5 = vpop.f32.mrb[36].mxu0  ;;  %v2473_v6 = vpop.f32.mrb[37].mxu1 }
 0x25e   :  { %v3051_v7 = vpop.f32.mrb[37].mxu0  ;;  %v2474_v8 = vpop.f32.mrb[38].mxu1 }
 0x25f   :  { %v6326_v12 = vadd.f32 %v4774_v4, %v3049_v5  ;;  %v4776_v13 = vadd.f32 %v6215_v33, %v2474_v8  ;;  %v3052_v14 = vpop.f32.mrb[38].mxu0  ;;  %v2476_v15 = vpop.f32.mrb[39].mxu1  ;;  %v3244_v8 = vadd.f32 %v6305_v30, %v3243_v61 }
 0x260   :  { %v3054_v17 = vpop.f32.mrb[39].mxu0 }
 0x261   :  { %v6330_v19 = vadd.f32 %v4776_v13, %v3052_v14  ;;  %v3245_v18 = vadd.f32 %v6308_v38, %v3244_v8 }
 0x264   :  { %v2479_v20 = vpop.f32.mrb[40].mxu1 }
 0x265   :  { %v4778_v22 = vadd.f32 %v6215_v33, %v2479_v20  ;;  %v3057_v25 = vpop.f32.mrb[40].mxu0  ;;  %v2481_v26 = vpop.f32.mrb[41].mxu1 }
 0x266   :  { %v3059_v27 = vpop.f32.mrb[41].mxu0  ;;  %v2482_v28 = vpop.f32.mrb[42].mxu1 }
 0x267   :  { %v6335_v32 = vadd.f32 %v4778_v22, %v3057_v25  ;;  %v4780_v34 = vadd.f32 %v6215_v33, %v2482_v28  ;;  %v3060_v35 = vpop.f32.mrb[42].mxu0  ;;  %v2484_v36 = vpop.f32.mrb[43].mxu1  ;;  %v3246_v22 = vadd.f32 %v6311_v43, %v3245_v18 }
 0x268   :  { %v3062_v37 = vpop.f32.mrb[43].mxu0 }
 0x269   :  { %v6338_v39 = vadd.f32 %v4780_v34, %v3060_v35  ;;  %v3247_v34 = vadd.f32 %v6317_v56, %v3246_v22 }
 0x26c   :  { %v2487_v41 = vpop.f32.mrb[44].mxu1 }
 0x26d   :  { %v4782_v45 = vadd.f32 %v6215_v33, %v2487_v41  ;;  %v3065_v46 = vpop.f32.mrb[44].mxu0  ;;  %v2489_v48 = vpop.f32.mrb[45].mxu1 }
 0x26e   :  { %v3067_v49 = vpop.f32.mrb[45].mxu0  ;;  %v2490_v50 = vpop.f32.mrb[46].mxu1 }
 0x26f   :  { %v6343_v52 = vadd.f32 %v4782_v45, %v3065_v46  ;;  %v4784_v54 = vadd.f32 %v6215_v33, %v2490_v50  ;;  %v3068_v55 = vpop.f32.mrb[46].mxu0  ;;  %v2492_v57 = vpop.f32.mrb[47].mxu1  ;;  %v3248_v45 = vadd.f32 %v6321_v62, %v3247_v34 }
 0x270   :  { %v3070_v0 = vpop.f32.mrb[47].mxu0 }
 0x271   :  { %v6347_v59 = vadd.f32 %v4784_v54, %v3068_v55  ;;  %v3249_v48 = vadd.f32 %v6326_v12, %v3248_v45 }
 0x274   :  { %v2495_v63 = vpop.f32.mrb[48].mxu1 }
 0x275   :  { %v4786_v1 = vadd.f32 %v6215_v33, %v2495_v63  ;;  %v3073_v4 = vpop.f32.mrb[48].mxu0  ;;  %v2497_v5 = vpop.f32.mrb[49].mxu1 }
 0x276   :  { %v3075_v6 = vpop.f32.mrb[49].mxu0  ;;  %v2498_v7 = vpop.f32.mrb[50].mxu1 }
 0x277   :  { %v6352_v10 = vadd.f32 %v4786_v1, %v3073_v4  ;;  %v4788_v13 = vadd.f32 %v6215_v33, %v2498_v7  ;;  %v3076_v14 = vpop.f32.mrb[50].mxu0  ;;  %v2500_v15 = vpop.f32.mrb[51].mxu1  ;;  %v3250_v4 = vadd.f32 %v6330_v19, %v3249_v48 }
 0x278   :  { %v3078_v17 = vpop.f32.mrb[51].mxu0 }
 0x279   :  { %v6356_v20 = vadd.f32 %v4788_v13, %v3076_v14  ;;  %v3251_v6 = vadd.f32 %v6335_v32, %v3250_v4 }
 0x27b   :  { %v3252_v18 = vadd.f32 %v6338_v39, %v3251_v6 }
 0x27c   :  { %v2503_v21 = vpop.f32.mrb[52].mxu1 }
 0x27d   :  { %v4790_v25 = vadd.f32 %v6215_v33, %v2503_v21  ;;  %v3081_v26 = vpop.f32.mrb[52].mxu0  ;;  %v2505_v27 = vpop.f32.mrb[53].mxu1 }
 0x27e   :  { %v3083_v28 = vpop.f32.mrb[53].mxu0  ;;  %v2506_v31 = vpop.f32.mrb[54].mxu1 }
 0x27f   :  { %v6361_v35 = vadd.f32 %v4790_v25, %v3081_v26  ;;  %v4792_v36 = vadd.f32 %v6215_v33, %v2506_v31  ;;  %v3084_v37 = vpop.f32.mrb[54].mxu0  ;;  %v2508_v40 = vpop.f32.mrb[55].mxu1  ;;  %v3253_v28 = vadd.f32 %v6343_v52, %v3252_v18 }
 0x280   :  { %v3086_v41 = vpop.f32.mrb[55].mxu0 }
 0x281   :  { %v6364_v42 = vadd.f32 %v4792_v36, %v3084_v37  ;;  %v3254_v36 = vadd.f32 %v6347_v59, %v3253_v28 }
 0x283   :  { %v3255_v48 = vadd.f32 %v6352_v10, %v3254_v36 }
 0x284   :  { %v2511_v46 = vpop.f32.mrb[56].mxu1 }
 0x285   :  { %v4794_v49 = vadd.f32 %v6215_v33, %v2511_v46  ;;  %v3089_v50 = vpop.f32.mrb[56].mxu0  ;;  %v2513_v54 = vpop.f32.mrb[57].mxu1 }
 0x286   :  { %v3091_v55 = vpop.f32.mrb[57].mxu0  ;;  %v2514_v57 = vpop.f32.mrb[58].mxu1 }
 0x287   :  { %v6369_v0 = vadd.f32 %v4794_v49, %v3089_v50  ;;  %v4796_v58 = vadd.f32 %v6215_v33, %v2514_v57  ;;  %v3092_v61 = vpop.f32.mrb[58].mxu0  ;;  %v2516_v63 = vpop.f32.mrb[59].mxu1 }
 0x288   :  { %v3094_v1 = vpop.f32.mrb[59].mxu0 }
 0x289   :  { %v6373_v5 = vadd.f32 %v4796_v58, %v3092_v61  ;;  %v3256_v61 = vadd.f32 %v6356_v20, %v3255_v48 }
 0x28b   :  { %v3257_v1 = vadd.f32 %v6361_v35, %v3256_v61 }
 0x28c   :  { %v2519_v7 = vpop.f32.mrb[60].mxu1 }
 0x28d   :  { %v4798_v8 = vadd.f32 %v6215_v33, %v2519_v7  ;;  %v3097_v13 = vpop.f32.mrb[60].mxu0  ;;  %v2521_v14 = vpop.f32.mrb[61].mxu1 }
 0x28e   :  { %v3099_v15 = vpop.f32.mrb[61].mxu0  ;;  %v2522_v17 = vpop.f32.mrb[62].mxu1 }
 0x28f   :  { %v6378_v21 = vadd.f32 %v4798_v8, %v3097_v13  ;;  %v4800_v22 = vadd.f32 %v6215_v33, %v2522_v17  ;;  %v3100_v25 = vpop.f32.mrb[62].mxu0  ;;  %v2524_v26 = vpop.f32.mrb[63].mxu1 }
 0x290   :  { %v3102_v27 = vpop.f32.mrb[63].mxu0 }
 0x291   :  { %v6382_v31 = vadd.f32 %v4800_v22, %v3100_v25  ;;  %v3258_v25 = vadd.f32 %v6364_v42, %v3257_v1 }
 0x293   :  { %v3259_v27 = vadd.f32 %v6369_v0, %v3258_v25 }
 0x294   :  { %v2527_v34 = vpop.f32.mrb[64].mxu1 }
 0x295   :  { %v4802_v37 = vadd.f32 %v6215_v33, %v2527_v34  ;;  %v3105_v40 = vpop.f32.mrb[64].mxu0  ;;  %v2529_v41 = vpop.f32.mrb[65].mxu1 }
 0x296   :  { %v3107_v45 = vpop.f32.mrb[65].mxu0  ;;  %v2530_v46 = vpop.f32.mrb[66].mxu1 }
 0x297   :  { %v6387_v49 = vadd.f32 %v4802_v37, %v3105_v40  ;;  %v4804_v50 = vadd.f32 %v6215_v33, %v2530_v46  ;;  %v3108_v54 = vpop.f32.mrb[66].mxu0  ;;  %v2532_v55 = vpop.f32.mrb[67].mxu1  ;;  %v3260_v45 = vadd.f32 %v6373_v5, %v3259_v27 }
 0x298   :  { %v3110_v57 = vpop.f32.mrb[67].mxu0 }
 0x299   :  { %v6390_v58 = vadd.f32 %v4804_v50, %v3108_v54  ;;  %v3261_v57 = vadd.f32 %v6378_v21, %v3260_v45 }
 0x29b   :  { %v3262_v1 = vadd.f32 %v6382_v31, %v3261_v57 }
 0x29c   :  { %v2535_v63 = vpop.f32.mrb[68].mxu1 }
 0x29d   :  { %v4806_v4 = vadd.f32 %v6215_v33, %v2535_v63  ;;  %v3113_v6 = vpop.f32.mrb[68].mxu0  ;;  %v2537_v7 = vpop.f32.mrb[69].mxu1 }
 0x29e   :  { %v3115_v8 = vpop.f32.mrb[69].mxu0  ;;  %v2538_v13 = vpop.f32.mrb[70].mxu1 }
 0x29f   :  { %v6395_v14 = vadd.f32 %v4806_v4, %v3113_v6  ;;  %v4808_v15 = vadd.f32 %v6215_v33, %v2538_v13  ;;  %v3116_v17 = vpop.f32.mrb[70].mxu0  ;;  %v2540_v18 = vpop.f32.mrb[71].mxu1 }
 0x2a0   :  { %v3118_v22 = vpop.f32.mrb[71].mxu0 }
 0x2a1   :  { %7874 = vst [vmem:[#allocation2_spill] sm:$0xff] %v6395_v14  ;;  %v6399_v26 = vadd.f32 %v4808_v15, %v3116_v17  ;;  %v3263_v15 = vadd.f32 %v6387_v49, %v3262_v1 }
 0x2a3   :  { %7875 = vst [vmem:[#allocation3_spill] sm:$0xff] %v6399_v26 }
 0x2a4   :  { %v2543_v28 = vpop.f32.mrb[72].mxu1 }
 0x2a5   :  { %v4810_v34 = vadd.f32 %v6215_v33, %v2543_v28  ;;  %v3121_v36 = vpop.f32.mrb[72].mxu0  ;;  %v2545_v37 = vpop.f32.mrb[73].mxu1 }
 0x2a6   :  { %v3123_v40 = vpop.f32.mrb[73].mxu0  ;;  %v2546_v41 = vpop.f32.mrb[74].mxu1 }
 0x2a7   :  { %v6404_v46 = vadd.f32 %v4810_v34, %v3121_v36  ;;  %v4812_v48 = vadd.f32 %v6215_v33, %v2546_v41  ;;  %v3124_v50 = vpop.f32.mrb[74].mxu0  ;;  %v2548_v54 = vpop.f32.mrb[75].mxu1  ;;  %v3264_v34 = vadd.f32 %v6390_v58, %v3263_v15 }
 0x2a8   :  { %v3126_v55 = vpop.f32.mrb[75].mxu0 }
 0x2a9   :  { %7876 = vst [vmem:[#allocation4_spill] sm:$0xff] %v6404_v46  ;;  %v6408_v61 = vadd.f32 %v4812_v48, %v3124_v50  ;;  %v3265_v37 = vadd.f32 %v6395_v14, %v3264_v34 }
 0x2ab   :  { %7877 = vst [vmem:[#allocation5_spill] sm:$0xff] %v6408_v61 }
 0x2ac   :  { %v2551_v63 = vpop.f32.mrb[76].mxu1 }
 0x2ad   :  { %v4814_v4 = vadd.f32 %v6215_v33, %v2551_v63  ;;  %v3129_v6 = vpop.f32.mrb[76].mxu0  ;;  %v2553_v7 = vpop.f32.mrb[77].mxu1 }
 0x2ae   :  { %v3131_v8 = vpop.f32.mrb[77].mxu0  ;;  %v2554_v13 = vpop.f32.mrb[78].mxu1 }
 0x2af   :  { %v6413_v17 = vadd.f32 %v4814_v4, %v3129_v6  ;;  %v4816_v18 = vadd.f32 %v6215_v33, %v2554_v13  ;;  %v3132_v22 = vpop.f32.mrb[78].mxu0  ;;  %v2556_v25 = vpop.f32.mrb[79].mxu1  ;;  %v3266_v4 = vadd.f32 %v6399_v26, %v3265_v37 }
 0x2b0   :  { %v3134_v27 = vpop.f32.mrb[79].mxu0 }
 0x2b1   :  { %7878 = vst [vmem:[#allocation6_spill] sm:$0xff] %v6413_v17  ;;  %v6416_v28 = vadd.f32 %v4816_v18, %v3132_v22  ;;  %v3267_v7 = vadd.f32 %v6404_v46, %v3266_v4 }
 0x2b3   :  { %7879 = vst [vmem:[#allocation7_spill] sm:$0xff] %v6416_v28  ;;  %v3268_v27 = vadd.f32 %v6408_v61, %v3267_v7 }
 0x2b4   :  { %v2559_v36 = vpop.f32.mrb[80].mxu1 }
 0x2b5   :  { %v4818_v40 = vadd.f32 %v6215_v33, %v2559_v36  ;;  %v3137_v41 = vpop.f32.mrb[80].mxu0  ;;  %v2561_v45 = vpop.f32.mrb[81].mxu1 }
 0x2b6   :  { %v3139_v48 = vpop.f32.mrb[81].mxu0  ;;  %v2562_v50 = vpop.f32.mrb[82].mxu1  ;;  %v3269_v45 = vadd.f32 %v6413_v17, %v3268_v27 }
 0x2b7   :  { %v6421_v54 = vadd.f32 %v4818_v40, %v3137_v41  ;;  %v4820_v55 = vadd.f32 %v6215_v33, %v2562_v50  ;;  %v3140_v57 = vpop.f32.mrb[82].mxu0  ;;  %v2564_v63 = vpop.f32.mrb[83].mxu1 }
 0x2b8   :  { %v3142_v1 = vpop.f32.mrb[83].mxu0 }
 0x2b9   :  { %7880 = vst [vmem:[#allocation8_spill] sm:$0xff] %v6421_v54  ;;  %v6425_v6 = vadd.f32 %v4820_v55, %v3140_v57  ;;  %v3270_v55 = vadd.f32 %v6416_v28, %v3269_v45 }
 0x2bb   :  { %7881 = vst [vmem:[#allocation9_spill] sm:$0xff] %v6425_v6 }
 0x2bc   :  { %v2567_v8 = vpop.f32.mrb[84].mxu1 }
 0x2bd   :  { %v4822_v13 = vadd.f32 %v6215_v33, %v2567_v8  ;;  %v3145_v15 = vpop.f32.mrb[84].mxu0  ;;  %v2569_v18 = vpop.f32.mrb[85].mxu1  ;;  %v3271_v8 = vadd.f32 %v6421_v54, %v3270_v55 }
 0x2be   :  { %v3147_v22 = vpop.f32.mrb[85].mxu0  ;;  %v2570_v25 = vpop.f32.mrb[86].mxu1 }
 0x2bf   :  { %v6430_v34 = vadd.f32 %v4822_v13, %v3145_v15  ;;  %v4824_v36 = vadd.f32 %v6215_v33, %v2570_v25  ;;  %v3148_v40 = vpop.f32.mrb[86].mxu0  ;;  %v2572_v41 = vpop.f32.mrb[87].mxu1 }
 0x2c0   :  { %v3150_v37 = vpop.f32.mrb[87].mxu0 }
 0x2c1   :  { %7882 = vst [vmem:[#allocation10_spill] sm:$0xff] %v6430_v34  ;;  %v6434_v48 = vadd.f32 %v4824_v36, %v3148_v40  ;;  %v3272_v36 = vadd.f32 %v6425_v6, %v3271_v8 }
 0x2c3   :  { %7883 = vst [vmem:[#allocation11_spill] sm:$0xff] %v6434_v48  ;;  %v3273_v41 = vadd.f32 %v6430_v34, %v3272_v36 }
 0x2c4   :  { %v2575_v50 = vpop.f32.mrb[88].mxu1 }
 0x2c5   :  { %v4826_v57 = vadd.f32 %v6215_v33, %v2575_v50  ;;  %v3153_v63 = vpop.f32.mrb[88].mxu0  ;;  %v2577_v1 = vpop.f32.mrb[89].mxu1 }
 0x2c6   :  { %v3155_v4 = vpop.f32.mrb[89].mxu0  ;;  %v2578_v7 = vpop.f32.mrb[90].mxu1 }
 0x2c7   :  { %v6439_v13 = vadd.f32 %v4826_v57, %v3153_v63  ;;  %v4828_v15 = vadd.f32 %v6215_v33, %v2578_v7  ;;  %v3156_v18 = vpop.f32.mrb[90].mxu0  ;;  %v2580_v22 = vpop.f32.mrb[91].mxu1 }
 0x2c8   :  { %v3158_v25 = vpop.f32.mrb[91].mxu0 }
 0x2c9   :  { %7884 = vst [vmem:[#allocation12_spill] sm:$0xff] %v6439_v13  ;;  %v6442_v27 = vadd.f32 %v4828_v15, %v3156_v18  ;;  %v3274_v15 = vadd.f32 %v6434_v48, %v3273_v41 }
 0x2cb   :  { %7885 = vst [vmem:[#allocation13_spill] sm:$0xff] %v6442_v27  ;;  %v3275_v8 = vadd.f32 %v6439_v13, %v3274_v15 }
 0x2cc   :  { %v2583_v40 = vpop.f32.mrb[92].mxu1 }
 0x2cd   :  { %v4830_v37 = vadd.f32 %v6215_v33, %v2583_v40  ;;  %v3161_v45 = vpop.f32.mrb[92].mxu0  ;;  %v2585_v50 = vpop.f32.mrb[93].mxu1 }
 0x2ce   :  { %v3163_v1 = vpop.f32.mrb[93].mxu0  ;;  %v2586_v55 = vpop.f32.mrb[94].mxu1 }
 0x2cf   :  { %v6447_v57 = vadd.f32 %v4830_v37, %v3161_v45  ;;  %v4832_v63 = vadd.f32 %v6215_v33, %v2586_v55  ;;  %v3164_v4 = vpop.f32.mrb[94].mxu0  ;;  %v2588_v7 = vpop.f32.mrb[95].mxu1  ;;  %v3276_v37 = vadd.f32 %v6442_v27, %v3275_v8 }
 0x2d0   :  { %v3166_v22 = vpop.f32.mrb[95].mxu0 }
 0x2d1   :  { %7886 = vst [vmem:[#allocation14_spill] sm:$0xff] %v6447_v57  ;;  %v6451_v18 = vadd.f32 %v4832_v63, %v3164_v4  ;;  %v3277_v63 = vadd.f32 %v6447_v57, %v3276_v37 }
 0x2d3   :  { %7887 = vst [vmem:[#allocation15_spill] sm:$0xff] %v6451_v18 }
 0x2d4   :  { %v2591_v25 = vpop.f32.mrb[96].mxu1 }
 0x2d5   :  { %v4834_v36 = vadd.f32 %v6215_v33, %v2591_v25  ;;  %v3169_v40 = vpop.f32.mrb[96].mxu0  ;;  %v2593_v50 = vpop.f32.mrb[97].mxu1  ;;  %v3278_v25 = vadd.f32 %v6451_v18, %v3277_v63 }
 0x2d6   :  { %v3171_v1 = vpop.f32.mrb[97].mxu0  ;;  %v2594_v34 = vpop.f32.mrb[98].mxu1 }
 0x2d7   :  { %v6456_v45 = vadd.f32 %v4834_v36, %v3169_v40  ;;  %v4836_v55 = vadd.f32 %v6215_v33, %v2594_v34  ;;  %v3172_v7 = vpop.f32.mrb[98].mxu0  ;;  %v2596_v22 = vpop.f32.mrb[99].mxu1 }
 0x2d8   :  { %v3174_v41 = vpop.f32.mrb[99].mxu0 }
 0x2d9   :  { %7888 = vst [vmem:[#allocation16_spill] sm:$0xff] %v6456_v45  ;;  %v6460_v4 = vadd.f32 %v4836_v55, %v3172_v7  ;;  %v3279_v36 = vadd.f32 %v6456_v45, %v3278_v25 }
 0x2db   :  { %7889 = vst [vmem:[#allocation17_spill] sm:$0xff] %v6460_v4  ;;  %v3280_v7 = vadd.f32 %v6460_v4, %v3279_v36 }
 0x2dc   :  { %v2599_v15 = vpop.f32.mrb[100].mxu1 }
 0x2dd   :  { %v4838_v50 = vadd.f32 %v6215_v33, %v2599_v15  ;;  %v3177_v1 = vpop.f32.mrb[100].mxu0  ;;  %v2601_v13 = vpop.f32.mrb[101].mxu1 }
 0x2de   :  { %v3179_v48 = vpop.f32.mrb[101].mxu0  ;;  %v2602_v8 = vpop.f32.mrb[102].mxu1 }
 0x2df   :  { %v6465_v40 = vadd.f32 %v4838_v50, %v3177_v1  ;;  %v4840_v34 = vadd.f32 %v6215_v33, %v2602_v8  ;;  %v3180_v22 = vpop.f32.mrb[102].mxu0  ;;  %v2604_v41 = vpop.f32.mrb[103].mxu1 }
 0x2e0   :  { %v3182_v37 = vpop.f32.mrb[103].mxu0 }
 0x2e1   :  { %7890 = vst [vmem:[#allocation18_spill] sm:$0xff] %v6465_v40  ;;  %v6468_v55 = vadd.f32 %v4840_v34, %v3180_v22  ;;  %v3281_v15 = vadd.f32 %v6465_v40, %v3280_v7 }
 0x2e3   :  { %7891 = vst [vmem:[#allocation19_spill] sm:$0xff] %v6468_v55  ;;  %v3282_v34 = vadd.f32 %v6468_v55, %v3281_v15 }
 0x2e4   :  { %v2607_v63 = vpop.f32.mrb[104].mxu1 }
 0x2e5   :  { %v4842_v13 = vadd.f32 %v6215_v33, %v2607_v63  ;;  %v3185_v48 = vpop.f32.mrb[104].mxu0  ;;  %v2609_v18 = vpop.f32.mrb[105].mxu1 }
 0x2e6   :  { %v3187_v57 = vpop.f32.mrb[105].mxu0  ;;  %v2610_v25 = vpop.f32.mrb[106].mxu1 }
 0x2e7   :  { %v6473_v50 = vadd.f32 %v4842_v13, %v3185_v48  ;;  %v4844_v1 = vadd.f32 %v6215_v33, %v2610_v25  ;;  %v3188_v8 = vpop.f32.mrb[106].mxu0  ;;  %v2612_v41 = vpop.f32.mrb[107].mxu1 }
 0x2e8   :  { %v3190_v37 = vpop.f32.mrb[107].mxu0 }
 0x2e9   :  { %7892 = vst [vmem:[#allocation20_spill] sm:$0xff] %v6473_v50  ;;  %v6477_v22 = vadd.f32 %v4844_v1, %v3188_v8  ;;  %v3283_v36 = vadd.f32 %v6473_v50, %v3282_v34 }
 0x2eb   :  { %7893 = vst [vmem:[#allocation21_spill] sm:$0xff] %v6477_v22  ;;  %v3284_v13 = vadd.f32 %v6477_v22, %v3283_v36 }
 0x2ec   :  { %v2615_v7 = vpop.f32.mrb[108].mxu1 }
 0x2ed   :  { %v4846_v63 = vadd.f32 %v6215_v33, %v2615_v7  ;;  %v3193_v40 = vpop.f32.mrb[108].mxu0  ;;  %v2617_v18 = vpop.f32.mrb[109].mxu1 }
 0x2ee   :  { %v3195_v57 = vpop.f32.mrb[109].mxu0  ;;  %v2618_v4 = vpop.f32.mrb[110].mxu1 }
 0x2ef   :  { %v6482_v48 = vadd.f32 %v4846_v63, %v3193_v40  ;;  %v4848_v25 = vadd.f32 %v6215_v33, %v2618_v4  ;;  %v3196_v41 = vpop.f32.mrb[110].mxu0  ;;  %v2620_v37 = vpop.f32.mrb[111].mxu1 }
 0x2f0   :  { %v3198_v15 = vpop.f32.mrb[111].mxu0 }
 0x2f1   :  { %v3285_v1 = vadd.f32 %v6482_v48, %v3284_v13  ;;  %v6486_v8 = vadd.f32 %v4848_v25, %v3196_v41 }
 0x2f3   :  { %v3286_v34 = vadd.f32 %v6486_v8, %v3285_v1 }
 0x2f4   :  { %v2623_v7 = vpop.f32.mrb[112].mxu1 }
 0x2f5   :  { %v4850_v18 = vadd.f32 %v6215_v33, %v2623_v7  ;;  %v3201_v57 = vpop.f32.mrb[112].mxu0  ;;  %v2625_v50 = vpop.f32.mrb[113].mxu1 }
 0x2f6   :  { %v3203_v55 = vpop.f32.mrb[113].mxu0  ;;  %v2626_v36 = vpop.f32.mrb[114].mxu1 }
 0x2f7   :  { %v4851_v40 = vadd.f32 %v4850_v18, %v3201_v57  ;;  %v4852_v63 = vadd.f32 %v6215_v33, %v2626_v36  ;;  %v3204_v4 = vpop.f32.mrb[114].mxu0  ;;  %v2628_v22 = vpop.f32.mrb[115].mxu1 }
 0x2f8   :  { %v3206_v37 = vpop.f32.mrb[115].mxu0 }
 0x2f9   :  { %v3287_v15 = vadd.f32 %v4851_v40, %v3286_v34  ;;  %v4853_v45 = vadd.f32 %v4852_v63, %v3204_v4 }
 0x2fb   :  { %v3288_v13 = vadd.f32 %v4853_v45, %v3287_v15 }
 0x2fc   :  { %v2631_v25 = vpop.f32.mrb[116].mxu1 }
 0x2fd   :  { %v4854_v41 = vadd.f32 %v6215_v33, %v2631_v25  ;;  %v3209_v1 = vpop.f32.mrb[116].mxu0  ;;  %v2633_v27 = vpop.f32.mrb[117].mxu1 }
 0x2fe   :  { %v3211_v6 = vpop.f32.mrb[117].mxu0  ;;  %v2634_v7 = vpop.f32.mrb[118].mxu1 }
 0x2ff   :  { %v4855_v54 = vadd.f32 %v4854_v41, %v3209_v1  ;;  %v4856_v55 = vadd.f32 %v6215_v33, %v2634_v7  ;;  %v3212_v50 = vpop.f32.mrb[118].mxu0  ;;  %v2636_v18 = vpop.f32.mrb[119].mxu1 }
 0x300   :  { %v3214_v57 = vpop.f32.mrb[119].mxu0 }
 0x301   :  { %v3289_v36 = vadd.f32 %v4855_v54, %v3288_v13  ;;  %v4857_v28 = vadd.f32 %v4856_v55, %v3212_v50 }
 0x303   :  { %v3290_v22 = vadd.f32 %v4857_v28, %v3289_v36 }
 0x304   :  { %v2639_v37 = vpop.f32.mrb[120].mxu1 }
 0x305   :  { %v4858_v34 = vadd.f32 %v6215_v33, %v2639_v37  ;;  %v3217_v63 = vpop.f32.mrb[120].mxu0  ;;  %v2641_v4 = vpop.f32.mrb[121].mxu1 }
 0x306   :  { %v3219_v15 = vpop.f32.mrb[121].mxu0  ;;  %v2642_v25 = vpop.f32.mrb[122].mxu1 }
 0x307   :  { %v4859_v17 = vadd.f32 %v4858_v34, %v3217_v63  ;;  %v4860_v6 = vadd.f32 %v6215_v33, %v2642_v25  ;;  %v3220_v27 = vpop.f32.mrb[122].mxu0  ;;  %v2644_v41 = vpop.f32.mrb[123].mxu1 }
 0x308   :  { %v3222_v1 = vpop.f32.mrb[123].mxu0 }
 0x309   :  { %v3291_v7 = vadd.f32 %v4859_v17, %v3290_v22  ;;  %v4861_v61 = vadd.f32 %v4860_v6, %v3220_v27 }
 0x30b   :  { %v3292_v18 = vadd.f32 %v4861_v61, %v3291_v7 }
 0x30c   :  { %v2647_v57 = vpop.f32.mrb[124].mxu1 }
 0x30d   :  { %v4862_v13 = vadd.f32 %v6215_v33, %v2647_v57  ;;  %v3225_v55 = vpop.f32.mrb[124].mxu0  ;;  %v2649_v50 = vpop.f32.mrb[125].mxu1 }
 0x30e   :  { %v3227_v36 = vpop.f32.mrb[125].mxu0  ;;  %v2650_v37 = vpop.f32.mrb[126].mxu1 }
 0x30f   :  { %v4863_v46 = vadd.f32 %v4862_v13, %v3225_v55  ;;  %v4864_v4 = vadd.f32 %v6215_v33, %v2650_v37  ;;  %v3228_v15 = vpop.f32.mrb[126].mxu0  ;;  %v2652_v34 = vpop.f32.mrb[127].mxu1 }
 0x310   :  { %v3230_v63 = vpop.f32.mrb[127].mxu0 }
 0x311   :  { %v3293_v25 = vadd.f32 %v4863_v46, %v3292_v18  ;;  %v4865_v26 = vadd.f32 %v4864_v4, %v3228_v15 }
 0x313   :  { %v3294_v41 = vadd.f32 %v4865_v26, %v3293_v25 }
 0x315   :  { %v3295_v1 = vrot.slane %v3294_v41, 4 }
 0x317   :  { %v3296_v22 = vadd.f32 %v3295_v1, %v3294_v41 }
 0x319   :  { %v3297_v6 = vrot.slane %v3296_v22, 2 }
 0x31b   :  { %v3298_v27 = vadd.f32 %v3297_v6, %v3296_v22 }
 0x31d   :  { %v3299_v7 = vrot.slane %v3298_v27, 1 }
 0x31f   :  { %v3300_v14 = vadd.f32 %v3299_v7, %v3298_v27 }
 0x321   :  { %v6497_v57 = vmul.f32 0.001953125, %v3300_v14 }
 0x323   :  { %v6501_v50 = vsub.f32 %v6482_v48, %v6497_v57  ;;  %v6505_v33 = vsub.f32 %v6486_v8, %v6497_v57  ;;  %v6508_v18 = vsub.f32 %v4851_v40, %v6497_v57  ;;  %v6511_v13 = vsub.f32 %v4853_v45, %v6497_v57 }
 0x324   :  { %v6514_v55 = vsub.f32 %v4855_v54, %v6497_v57  ;;  %v6517_v14 = vsub.f32 %v4857_v28, %v6497_v57  ;;  %v6520_v36 = vsub.f32 %v4859_v17, %v6497_v57  ;;  %v6523_v48 = vsub.f32 %v4861_v61, %v6497_v57 }
 0x325   :  { %7894 = vst [vmem:[#allocation22_spill] sm:$0xff] %v6511_v13  ;;  %v6526_v8 = vsub.f32 %v4863_v46, %v6497_v57  ;;  %v6529_v40 = vsub.f32 %v4865_v26, %v6497_v57  ;;  %v6533_v45 = vsub.f32 %v6230_v47, %v6497_v57  ;;  %v6537_v28 = vsub.f32 %v6233_v53, %v6497_v57 }
 0x326   :  { %7895 = vst [vmem:[#allocation23_spill] sm:$0xff] %v6514_v55  ;;  %7896 = vst [vmem:[#allocation24_spill] sm:$0xff] %v6517_v14  ;;  %v6541_v17 = vsub.f32 %v6248_v3, %v6497_v57  ;;  %v6549_v26 = vsub.f32 %v6251_v9, %v6497_v57  ;;  %v6553_v47 = vsub.f32 %v6266_v23, %v6497_v57 }
 0x327   :  { %7897 = vst [vmem:[#allocation25_spill] sm:$0xff] %v6520_v36  ;;  %7898 = vst [vmem:[#allocation26_spill] sm:$0xff] %v6523_v48  ;;  %v3366_v61 = vmul.f32 %v6533_v45, %v6533_v45  ;;  %v3367_v46 = vmul.f32 %v6537_v28, %v6537_v28  ;;  %v6559_v3 = vsub.f32 %v6269_v29, %v6497_v57 }
 0x328   :  { %v3368_v53 = vmul.f32 %v6541_v17, %v6541_v17  ;;  %v3369_v37 = vmul.f32 %v6549_v26, %v6549_v26  ;;  %v6565_v9 = vsub.f32 %v6284_v44, %v6497_v57  ;;  %v3370_v23 = vmul.f32 %v6553_v47, %v6553_v47 }
 0x329   :  { %v3430_v54 = vadd.f32 %v3367_v46, %v3366_v61  ;;  %v6571_v34 = vsub.f32 %v6287_v51, %v6497_v57  ;;  %v3371_v29 = vmul.f32 %v6559_v3, %v6559_v3  ;;  %v6577_v25 = vsub.f32 %v6290_v60, %v6497_v57 }
 0x32a   :  { %v3372_v44 = vmul.f32 %v6565_v9, %v6565_v9  ;;  %v6583_v1 = vsub.f32 %v6293_v2, %v6497_v57  ;;  %v6589_v6 = vsub.f32 %v6296_v11, %v6497_v57  ;;  %v6595_v7 = vsub.f32 %v6299_v16, %v6497_v57 }
 0x32b   :  { %v3431_v4 = vadd.f32 %v3430_v54, %v3368_v53  ;;  %v3373_v51 = vmul.f32 %v6571_v34, %v6571_v34  ;;  %v3374_v60 = vmul.f32 %v6577_v25, %v6577_v25  ;;  %v6601_v46 = vsub.f32 %v6302_v24, %v6497_v57 }
 0x32c   :  { %v3375_v2 = vmul.f32 %v6583_v1, %v6583_v1  ;;  %v3376_v11 = vmul.f32 %v6589_v6, %v6589_v6  ;;  %v6607_v54 = vsub.f32 %v6305_v30, %v6497_v57  ;;  %v3377_v16 = vmul.f32 %v6595_v7, %v6595_v7 }
 0x32d   :  { %v3432_v15 = vadd.f32 %v3431_v4, %v3369_v37  ;;  %v6613_v4 = vsub.f32 %v6308_v38, %v6497_v57  ;;  %v3378_v24 = vmul.f32 %v6601_v46, %v6601_v46 }
 0x32e   :  { %v3379_v30 = vmul.f32 %v6607_v54, %v6607_v54 }
 0x32f   :  { %v3433_v63 = vadd.f32 %v3432_v15, %v3370_v23  ;;  %v6619_v15 = vsub.f32 %v6311_v43, %v6497_v57  ;;  %v3380_v38 = vmul.f32 %v6613_v4, %v6613_v4 }
 0x331   :  { %v3434_v41 = vadd.f32 %v3433_v63, %v3371_v29  ;;  %v6625_v63 = vsub.f32 %v6317_v56, %v6497_v57  ;;  %v3381_v43 = vmul.f32 %v6619_v15, %v6619_v15 }
 0x333   :  { %v3435_v22 = vadd.f32 %v3434_v41, %v3372_v44  ;;  %v6631_v41 = vsub.f32 %v6321_v62, %v6497_v57  ;;  %v3382_v56 = vmul.f32 %v6625_v63, %v6625_v63 }
 0x335   :  { %v3436_v27 = vadd.f32 %v3435_v22, %v3373_v51  ;;  %v6637_v22 = vsub.f32 %v6326_v12, %v6497_v57  ;;  %v3383_v62 = vmul.f32 %v6631_v41, %v6631_v41 }
 0x337   :  { %v3437_v61 = vadd.f32 %v3436_v27, %v3374_v60  ;;  %v6643_v27 = vsub.f32 %v6330_v19, %v6497_v57  ;;  %v3384_v12 = vmul.f32 %v6637_v22, %v6637_v22 }
 0x339   :  { %v3438_v53 = vadd.f32 %v3437_v61, %v3375_v2  ;;  %v6649_v61 = vsub.f32 %v6335_v32, %v6497_v57  ;;  %v3385_v19 = vmul.f32 %v6643_v27, %v6643_v27 }
 0x33b   :  { %v3439_v37 = vadd.f32 %v3438_v53, %v3376_v11  ;;  %v6655_v53 = vsub.f32 %v6338_v39, %v6497_v57  ;;  %v3386_v32 = vmul.f32 %v6649_v61, %v6649_v61 }
 0x33d   :  { %v3440_v23 = vadd.f32 %v3439_v37, %v3377_v16  ;;  %v6661_v37 = vsub.f32 %v6343_v52, %v6497_v57  ;;  %v3387_v39 = vmul.f32 %v6655_v53, %v6655_v53 }
 0x33f   :  { %v3441_v29 = vadd.f32 %v3440_v23, %v3378_v24  ;;  %v6667_v23 = vsub.f32 %v6347_v59, %v6497_v57  ;;  %v3388_v52 = vmul.f32 %v6661_v37, %v6661_v37 }
 0x341   :  { %v3442_v44 = vadd.f32 %v3441_v29, %v3379_v30  ;;  %v6673_v29 = vsub.f32 %v6352_v10, %v6497_v57  ;;  %v3389_v59 = vmul.f32 %v6667_v23, %v6667_v23 }
 0x343   :  { %v3443_v51 = vadd.f32 %v3442_v44, %v3380_v38  ;;  %v6679_v44 = vsub.f32 %v6356_v20, %v6497_v57  ;;  %v3390_v10 = vmul.f32 %v6673_v29, %v6673_v29 }
 0x345   :  { %v3444_v60 = vadd.f32 %v3443_v51, %v3381_v43  ;;  %v6685_v51 = vsub.f32 %v6361_v35, %v6497_v57  ;;  %v3391_v20 = vmul.f32 %v6679_v44, %v6679_v44 }
 0x347   :  { %v3445_v2 = vadd.f32 %v3444_v60, %v3382_v56  ;;  %v6691_v60 = vsub.f32 %v6364_v42, %v6497_v57  ;;  %v3392_v35 = vmul.f32 %v6685_v51, %v6685_v51 }
 0x349   :  { %v3446_v11 = vadd.f32 %v3445_v2, %v3383_v62  ;;  %v6697_v2 = vsub.f32 %v6369_v0, %v6497_v57  ;;  %v3393_v42 = vmul.f32 %v6691_v60, %v6691_v60 }
 0x34b   :  { %v3447_v16 = vadd.f32 %v3446_v11, %v3384_v12  ;;  %v6703_v11 = vsub.f32 %v6373_v5, %v6497_v57  ;;  %v3394_v0 = vmul.f32 %v6697_v2, %v6697_v2 }
 0x34d   :  { %v3448_v24 = vadd.f32 %v3447_v16, %v3385_v19  ;;  %v6709_v16 = vsub.f32 %v6378_v21, %v6497_v57  ;;  %v3395_v5 = vmul.f32 %v6703_v11, %v6703_v11 }
 0x34f   :  { %v3449_v30 = vadd.f32 %v3448_v24, %v3386_v32  ;;  %v6715_v24 = vsub.f32 %v6382_v31, %v6497_v57  ;;  %v3396_v21 = vmul.f32 %v6709_v16, %v6709_v16 }
 0x351   :  { %v3450_v38 = vadd.f32 %v3449_v30, %v3387_v39  ;;  %v6721_v30 = vsub.f32 %v6387_v49, %v6497_v57  ;;  %v3397_v31 = vmul.f32 %v6715_v24, %v6715_v24 }
 0x353   :  { %v3451_v43 = vadd.f32 %v3450_v38, %v3388_v52  ;;  %v6727_v38 = vsub.f32 %v6390_v58, %v6497_v57  ;;  %v3398_v49 = vmul.f32 %v6721_v30, %v6721_v30 }
 0x355   :  { %v3452_v56 = vadd.f32 %v3451_v43, %v3389_v59  ;;  %v7899_v43 = vld [vmem:[#allocation2_spill] sm:$0xff]  ;;  %v3399_v58 = vmul.f32 %v6727_v38, %v6727_v38 }
 0x357   :  { %v3453_v62 = vadd.f32 %v3452_v56, %v3390_v10  ;;  %v6733_v10 = vsub.f32 %v7899_v43, %v6497_v57 }
 0x359   :  { %v3454_v12 = vadd.f32 %v3453_v62, %v3391_v20  ;;  %v7900_v20 = vld [vmem:[#allocation3_spill] sm:$0xff] }
 0x35a   :  { %v6739_v62 = vsub.f32 %v7900_v20, %v6497_v57 }
 0x35b   :  { %v3455_v19 = vadd.f32 %v3454_v12, %v3392_v35  ;;  %v7901_v12 = vld [vmem:[#allocation4_spill] sm:$0xff] }
 0x35d   :  { %v3456_v32 = vadd.f32 %v3455_v19, %v3393_v42  ;;  %v6745_v42 = vsub.f32 %v7901_v12, %v6497_v57  ;;  %v3400_v19 = vmul.f32 %v6733_v10, %v6733_v10 }
 0x35f   :  { %v3457_v39 = vadd.f32 %v3456_v32, %v3394_v0  ;;  %v7902_v32 = vld [vmem:[#allocation5_spill] sm:$0xff] }
 0x361   :  { %v3458_v52 = vadd.f32 %v3457_v39, %v3395_v5  ;;  %v6751_v5 = vsub.f32 %v7902_v32, %v6497_v57  ;;  %v3401_v39 = vmul.f32 %v6739_v62, %v6739_v62  ;;  %v7910_v32 = vld [vmem:[#allocation9_spill] sm:$0xff] }
 0x363   :  { %v3459_v59 = vadd.f32 %v3458_v52, %v3396_v21  ;;  %7903 = vst [vmem:[#allocation2_spill] sm:$0xff] %v6751_v5  ;;  %v7904_v52 = vld [vmem:[#allocation6_spill] sm:$0xff]  ;;  %v3403_v20 = vmul.f32 %v6751_v5, %v6751_v5 }
 0x365   :  { %v3460_v56 = vadd.f32 %v3459_v59, %v3397_v31  ;;  %v6757_v31 = vsub.f32 %v7904_v52, %v6497_v57  ;;  %v3402_v59 = vmul.f32 %v6745_v42, %v6745_v42  ;;  %v6775_v52 = vsub.f32 %v7910_v32, %v6497_v57  ;;  %v7916_v32 = vld [vmem:[#allocation12_spill] sm:$0xff] }
 0x367   :  { %v3461_v35 = vadd.f32 %v3460_v56, %v3398_v49  ;;  %7905 = vst [vmem:[#allocation3_spill] sm:$0xff] %v6757_v31  ;;  %v7906_v49 = vld [vmem:[#allocation7_spill] sm:$0xff]  ;;  %7911 = vst [vmem:[#allocation6_spill] sm:$0xff] %v6775_v52 }
 0x368   :  { %v6763_v56 = vsub.f32 %v7906_v49, %v6497_v57  ;;  %v7912_v49 = vld [vmem:[#allocation10_spill] sm:$0xff] }
 0x369   :  { %v3462_v0 = vadd.f32 %v3461_v35, %v3399_v58  ;;  %v7908_v35 = vld [vmem:[#allocation8_spill] sm:$0xff]  ;;  %v6781_v5 = vsub.f32 %v7912_v49, %v6497_v57  ;;  %v7918_v49 = vld [vmem:[#allocation13_spill] sm:$0xff] }
 0x36a   :  { %7907 = vst [vmem:[#allocation4_spill] sm:$0xff] %v6763_v56  ;;  %v6769_v12 = vsub.f32 %v7908_v35, %v6497_v57  ;;  %v7914_v35 = vld [vmem:[#allocation11_spill] sm:$0xff] }
 0x36b   :  { %v3463_v21 = vadd.f32 %v3462_v0, %v3400_v19  ;;  %v3404_v19 = vmul.f32 %v6757_v31, %v6757_v31  ;;  %7913 = vst [vmem:[#allocation7_spill] sm:$0xff] %v6781_v5  ;;  %v6787_v31 = vsub.f32 %v7914_v35, %v6497_v57  ;;  %v7920_v35 = vld [vmem:[#allocation14_spill] sm:$0xff] }
 0x36c   :  { %7909 = vst [vmem:[#allocation5_spill] sm:$0xff] %v6769_v12 }
 0x36d   :  { %v3464_v43 = vadd.f32 %v3463_v21, %v3401_v39  ;;  %v3405_v39 = vmul.f32 %v6763_v56, %v6763_v56  ;;  %7915 = vst [vmem:[#allocation8_spill] sm:$0xff] %v6787_v31  ;;  %v6793_v56 = vsub.f32 %v7916_v32, %v6497_v57  ;;  %v7922_v32 = vld [vmem:[#allocation15_spill] sm:$0xff] }
 0x36f   :  { %v3465_v58 = vadd.f32 %v3464_v43, %v3402_v59  ;;  %v3406_v59 = vmul.f32 %v6769_v12, %v6769_v12  ;;  %7917 = vst [vmem:[#allocation9_spill] sm:$0xff] %v6793_v56  ;;  %v6799_v12 = vsub.f32 %v7918_v49, %v6497_v57  ;;  %v7924_v49 = vld [vmem:[#allocation16_spill] sm:$0xff] }
 0x371   :  { %v3466_v0 = vadd.f32 %v3465_v58, %v3403_v20  ;;  %v3407_v20 = vmul.f32 %v6775_v52, %v6775_v52  ;;  %7919 = vst [vmem:[#allocation10_spill] sm:$0xff] %v6799_v12  ;;  %v6805_v52 = vsub.f32 %v7920_v35, %v6497_v57  ;;  %v7926_v35 = vld [vmem:[#allocation17_spill] sm:$0xff] }
 0x373   :  { %v3467_v21 = vadd.f32 %v3466_v0, %v3404_v19  ;;  %v3408_v19 = vmul.f32 %v6781_v5, %v6781_v5  ;;  %7921 = vst [vmem:[#allocation11_spill] sm:$0xff] %v6805_v52  ;;  %v6811_v5 = vsub.f32 %v7922_v32, %v6497_v57  ;;  %v7927_v32 = vld [vmem:[#allocation18_spill] sm:$0xff] }
 0x375   :  { %v3468_v43 = vadd.f32 %v3467_v21, %v3405_v39  ;;  %v3409_v39 = vmul.f32 %v6787_v31, %v6787_v31  ;;  %7923 = vst [vmem:[#allocation12_spill] sm:$0xff] %v6811_v5  ;;  %v6817_v31 = vsub.f32 %v7924_v49, %v6497_v57  ;;  %v7929_v49 = vld [vmem:[#allocation19_spill] sm:$0xff] }
 0x377   :  { %v3469_v58 = vadd.f32 %v3468_v43, %v3406_v59  ;;  %v3410_v59 = vmul.f32 %v6793_v56, %v6793_v56  ;;  %7925 = vst [vmem:[#allocation13_spill] sm:$0xff] %v6817_v31  ;;  %v6823_v56 = vsub.f32 %v7926_v35, %v6497_v57  ;;  %v7930_v35 = vld [vmem:[#allocation20_spill] sm:$0xff] }
 0x379   :  { %v3470_v0 = vadd.f32 %v3469_v58, %v3407_v20  ;;  %v3411_v20 = vmul.f32 %v6799_v12, %v6799_v12  ;;  %v6829_v12 = vsub.f32 %v7927_v32, %v6497_v57  ;;  %v7931_v32 = vld [vmem:[#allocation21_spill] sm:$0xff] }
 0x37b   :  { %v3471_v21 = vadd.f32 %v3470_v0, %v3408_v19  ;;  %v3412_v19 = vmul.f32 %v6805_v52, %v6805_v52  ;;  %7928 = vst [vmem:[#allocation14_spill] sm:$0xff] %v6829_v12  ;;  %v6835_v52 = vsub.f32 %v7929_v49, %v6497_v57 }
 0x37d   :  { %v3472_v43 = vadd.f32 %v3471_v21, %v3409_v39  ;;  %v3413_v39 = vmul.f32 %v6811_v5, %v6811_v5  ;;  %v6841_v5 = vsub.f32 %v7930_v35, %v6497_v57 }
 0x37f   :  { %v3473_v58 = vadd.f32 %v3472_v43, %v3410_v59  ;;  %v3414_v59 = vmul.f32 %v6817_v31, %v6817_v31  ;;  %v6847_v31 = vsub.f32 %v7931_v32, %v6497_v57  ;;  %v3418_v49 = vmul.f32 %v6841_v5, %v6841_v5 }
 0x380   :  { %v3421_v57 = vmul.f32 %v6505_v33, %v6505_v33  ;;  %v3422_v32 = vmul.f32 %v6508_v18, %v6508_v18 }
 0x381   :  { %v3474_v0 = vadd.f32 %v3473_v58, %v3411_v20  ;;  %v3415_v20 = vmul.f32 %v6823_v56, %v6823_v56 }
 0x383   :  { %v3475_v21 = vadd.f32 %v3474_v0, %v3412_v19  ;;  %v3416_v19 = vmul.f32 %v6829_v12, %v6829_v12  ;;  %v3420_v12 = vmul.f32 %v6501_v50, %v6501_v50 }
 0x385   :  { %v3476_v43 = vadd.f32 %v3475_v21, %v3413_v39  ;;  %v3417_v39 = vmul.f32 %v6835_v52, %v6835_v52 }
 0x387   :  { %v3477_v58 = vadd.f32 %v3476_v43, %v3414_v59  ;;  %v3419_v43 = vmul.f32 %v6847_v31, %v6847_v31 }
 0x389   :  { %v3478_v0 = vadd.f32 %v3477_v58, %v3415_v20 }
 0x38b   :  { %v3479_v21 = vadd.f32 %v3478_v0, %v3416_v19  ;;  %v3423_v0 = vmul.f32 %v6511_v13, %v6511_v13 }
 0x38d   :  { %v3480_v59 = vadd.f32 %v3479_v21, %v3417_v39  ;;  %v3424_v21 = vmul.f32 %v6514_v55, %v6514_v55 }
 0x38f   :  { %v3481_v35 = vadd.f32 %v3480_v59, %v3418_v49  ;;  %v3425_v59 = vmul.f32 %v6517_v14, %v6517_v14 }
 0x391   :  { %v3482_v20 = vadd.f32 %v3481_v35, %v3419_v43  ;;  %v3426_v35 = vmul.f32 %v6520_v36, %v6520_v36 }
 0x393   :  { %v3483_v58 = vadd.f32 %v3482_v20, %v3420_v12  ;;  %v3427_v20 = vmul.f32 %v6523_v48, %v6523_v48 }
 0x395   :  { %v3484_v19 = vadd.f32 %v3483_v58, %v3421_v57  ;;  %v3428_v58 = vmul.f32 %v6526_v8, %v6526_v8 }
 0x397   :  { %v3485_v39 = vadd.f32 %v3484_v19, %v3422_v32  ;;  %v3429_v19 = vmul.f32 %v6529_v40, %v6529_v40 }
 0x399   :  { %v3486_v49 = vadd.f32 %v3485_v39, %v3423_v0 }
 0x39b   :  { %v3487_v43 = vadd.f32 %v3486_v49, %v3424_v21 }
 0x39d   :  { %v3488_v12 = vadd.f32 %v3487_v43, %v3425_v59 }
 0x39f   :  { %v3489_v57 = vadd.f32 %v3488_v12, %v3426_v35 }
 0x3a1   :  { %v3490_v32 = vadd.f32 %v3489_v57, %v3427_v20  ;;  %v7933_v20 = vld [vmem:[#allocation3_spill] sm:$0xff]  ;;  %v7934_v57 = vld [vmem:[#allocation4_spill] sm:$0xff] }
 0x3a3   :  { %v3491_v0 = vadd.f32 %v3490_v32, %v3428_v58  ;;  %v7935_v58 = vld [vmem:[#allocation5_spill] sm:$0xff]  ;;  %v7936_v32 = vld [vmem:[#allocation6_spill] sm:$0xff] }
 0x3a5   :  { %v3492_v39 = vadd.f32 %v3491_v0, %v3429_v19  ;;  %v7937_v19 = vld [vmem:[#allocation7_spill] sm:$0xff] }
 0x3a7   :  { %v3493_v55 = vrot.slane %v3492_v39, 4 }
 0x3a9   :  { %v3494_v14 = vadd.f32 %v3493_v55, %v3492_v39  ;;  %v7938_v39 = vld [vmem:[#allocation8_spill] sm:$0xff] }
 0x3ab   :  { %v3495_v21 = vrot.slane %v3494_v14, 2 }
 0x3ad   :  { %v3496_v49 = vadd.f32 %v3495_v21, %v3494_v14 }
 0x3af   :  { %v3497_v13 = vrot.slane %v3496_v49, 1 }
 0x3b1   :  { %v3498_v36 = vadd.f32 %v3497_v13, %v3496_v49  ;;  %v7939_v49 = vld [vmem:[#allocation9_spill] sm:$0xff] }
 0x3b3   :  { %v3499_v59 = vmul.f32 0.001953125, %v3498_v36 }
 0x3b5   :  { %v3500_v43 = vadd.f32 1e-05, %v3499_v59 }
 0x3b7   :  { %5187 = vrsqrt.f32 %v3500_v43  ;;  %v7941_v43 = vld [vmem:[#allocation10_spill] sm:$0xff] }
 0x3c1   :  { %v6875_v48 = vpop.eup %5187 }
 0x3c2   :  { %v6879_v35 = vmul.f32 %v6875_v48, %v6533_v45  ;;  %v6883_v12 = vmul.f32 %v6875_v48, %v6537_v28  ;;  %v6887_v55 = vmul.f32 %v6875_v48, %v6541_v17  ;;  %v6891_v13 = vmul.f32 %v6875_v48, %v6549_v26 }
 0x3c3   :  { %v6895_v14 = vmul.f32 %v6875_v48, %v6553_v47  ;;  %v6899_v36 = vmul.f32 %v6875_v48, %v6559_v3  ;;  %v6903_v45 = vmul.f32 %v6875_v48, %v6565_v9  ;;  %v6907_v28 = vmul.f32 %v6875_v48, %v6571_v34 }
 0x3c4   :  { %v6911_v17 = vmul.f32 %v6875_v48, %v6577_v25  ;;  %v6915_v26 = vmul.f32 %v6875_v48, %v6583_v1  ;;  %v6919_v47 = vmul.f32 %v6875_v48, %v6589_v6  ;;  %v6923_v3 = vmul.f32 %v6875_v48, %v6595_v7 }
 0x3c5   :  { %v6927_v9 = vmul.f32 %v6875_v48, %v6601_v46  ;;  %v6931_v34 = vmul.f32 %v6875_v48, %v6607_v54  ;;  %v6935_v25 = vmul.f32 %v6875_v48, %v6613_v4  ;;  %v6939_v1 = vmul.f32 %v6875_v48, %v6619_v15 }
 0x3c6   :  { %v6943_v6 = vmul.f32 %v6875_v48, %v6625_v63  ;;  %v6947_v7 = vmul.f32 %v6875_v48, %v6631_v41  ;;  %v6951_v46 = vmul.f32 %v6875_v48, %v6637_v22  ;;  %v6955_v54 = vmul.f32 %v6875_v48, %v6643_v27 }
 0x3c7   :  { %v6959_v4 = vmul.f32 %v6875_v48, %v6649_v61  ;;  %v6963_v15 = vmul.f32 %v6875_v48, %v6655_v53  ;;  %v6967_v63 = vmul.f32 %v6875_v48, %v6661_v37  ;;  %v6971_v41 = vmul.f32 %v6875_v48, %v6667_v23 }
 0x3c8   :  { %v6975_v22 = vmul.f32 %v6875_v48, %v6673_v29  ;;  %v6979_v27 = vmul.f32 %v6875_v48, %v6679_v44  ;;  %v6983_v61 = vmul.f32 %v6875_v48, %v6685_v51  ;;  %v6987_v53 = vmul.f32 %v6875_v48, %v6691_v60 }
 0x3c9   :  { %v6991_v37 = vmul.f32 %v6875_v48, %v6697_v2  ;;  %v6995_v23 = vmul.f32 %v6875_v48, %v6703_v11  ;;  %v6999_v29 = vmul.f32 %v6875_v48, %v6709_v16  ;;  %v7003_v44 = vmul.f32 %v6875_v48, %v6715_v24  ;;  %v7932_v24 = vld [vmem:[#allocation2_spill] sm:$0xff] }
 0x3ca   :  { %v7007_v51 = vmul.f32 %v6875_v48, %v6721_v30  ;;  %v7011_v60 = vmul.f32 %v6875_v48, %v6727_v38  ;;  %v7015_v2 = vmul.f32 %v6875_v48, %v6733_v10  ;;  %v7019_v11 = vmul.f32 %v6875_v48, %v6739_v62 }
 0x3cb   :  { %v7023_v16 = vmul.f32 %v6875_v48, %v6745_v42  ;;  %v7027_v30 = vmul.f32 %v6875_v48, %v7932_v24  ;;  %v7031_v38 = vmul.f32 %v6875_v48, %v7933_v20  ;;  %v7035_v10 = vmul.f32 %v6875_v48, %v7934_v57  ;;  %v7942_v20 = vld [vmem:[#allocation11_spill] sm:$0xff] }
 0x3cc   :  { %v7039_v62 = vmul.f32 %v6875_v48, %v7935_v58  ;;  %v7043_v42 = vmul.f32 %v6875_v48, %v7936_v32  ;;  %v7047_v0 = vmul.f32 %v6875_v48, %v7937_v19  ;;  %v7051_v21 = vmul.f32 %v6875_v48, %v7938_v39  ;;  %v7943_v58 = vld [vmem:[#allocation12_spill] sm:$0xff]  ;;  %v7944_v19 = vld [vmem:[#allocation13_spill] sm:$0xff] }
 0x3cd   :  { %v7055_v59 = vmul.f32 %v6875_v48, %v7939_v49  ;;  %v7059_v24 = vmul.f32 %v6875_v48, %v7941_v43  ;;  %v7063_v57 = vmul.f32 %v6875_v48, %v7942_v20  ;;  %v7067_v32 = vmul.f32 %v6875_v48, %v7943_v58 }
 0x3ce   :  { %v7071_v39 = vmul.f32 %v6875_v48, %v7944_v19  ;;  %v7075_v49 = vmul.f32 %v6875_v48, %v6823_v56  ;;  %v7083_v20 = vmul.f32 %v6875_v48, %v6835_v52  ;;  %v7087_v58 = vmul.f32 %v6875_v48, %v6841_v5  ;;  %v7104_v52 = vld [vmem:[%s7828_s3] ss:$0 sm:$0xff] }
 0x3cf   :  { %7940 = vst [vmem:[#allocation15_spill] sm:$0xff] %v7055_v59  ;;  %v7945_v59 = vld [vmem:[#allocation14_spill] sm:$0xff]  ;;  %v7091_v19 = vmul.f32 %v6875_v48, %v6847_v31  ;;  %v7095_v56 = vmul.f32 %v6875_v48, %v6501_v50  ;;  %v7108_v5 = vmul.f32 %v6875_v48, %v6508_v18 }
 0x3d0   :  { %v7079_v43 = vmul.f32 %v6875_v48, %v7945_v59  ;;  %7947 = vst [vmem:[#allocation17_spill] sm:$0xff] %v7083_v20  ;;  %7948 = vst [vmem:[#allocation18_spill] sm:$0xff] %v7087_v58  ;;  %v7099_v59 = vmul.f32 %v6875_v48, %v6505_v33  ;;  %v7952_v58 = vld [vmem:[#allocation22_spill] sm:$0xff] }
 0x3d1   :  { %7949 = vst [vmem:[#allocation19_spill] sm:$0xff] %v7091_v19  ;;  %7950 = vst [vmem:[#allocation20_spill] sm:$0xff] %v7095_v56  ;;  %v7112_v31 = vmul.f32 %v6875_v48, %v7952_v58  ;;  %v7953_v19 = vld [vmem:[#allocation23_spill] sm:$0xff]  ;;  %v7954_v56 = vld [vmem:[#allocation24_spill] sm:$0xff]  ;;  %v7132_v58 = vmul.f32 %v6875_v48, %v6526_v8  ;;  %v7152_v8 = vmul.f32 %v7104_v52, %v6891_v13 }
 0x3d2   :  { %7946 = vst [vmem:[#allocation16_spill] sm:$0xff] %v7079_v43  ;;  %7951 = vst [vmem:[#allocation21_spill] sm:$0xff] %v7099_v59  ;;  %v7116_v50 = vmul.f32 %v6875_v48, %v7953_v19  ;;  %v7120_v33 = vmul.f32 %v6875_v48, %v7954_v56  ;;  %v7955_v59 = vld [vmem:[#allocation25_spill] sm:$0xff]  ;;  %v7956_v43 = vld [vmem:[#allocation26_spill] sm:$0xff]  ;;  %v7136_v19 = vmul.f32 %v6875_v48, %v6529_v40 }
 0x3d3   :  { %v7124_v20 = vmul.f32 %v6875_v48, %v7955_v59  ;;  %v7128_v18 = vmul.f32 %v6875_v48, %v7956_v43  ;;  %v7140_v56 = vmul.f32 %v7104_v52, %v6879_v35  ;;  %v7144_v59 = vmul.f32 %v7104_v52, %v6883_v12 }
 0x3d4   :  { %v7148_v43 = vmul.f32 %v7104_v52, %v6887_v55  ;;  %v7156_v48 = vmul.f32 %v7104_v52, %v6895_v14  ;;  %v7160_v40 = vmul.f32 %v7104_v52, %v6899_v36  ;;  %v7164_v35 = vmul.f32 %v7104_v52, %v6903_v45 }
 0x3d5   :  { %v7168_v12 = vmul.f32 %v7104_v52, %v6907_v28  ;;  %v7172_v55 = vmul.f32 %v7104_v52, %v6911_v17  ;;  %v7176_v13 = vmul.f32 %v7104_v52, %v6915_v26  ;;  %v7180_v14 = vmul.f32 %v7104_v52, %v6919_v47 }
 0x3d6   :  { %v7184_v36 = vmul.f32 %v7104_v52, %v6923_v3  ;;  %v7188_v45 = vmul.f32 %v7104_v52, %v6927_v9  ;;  %v7192_v28 = vmul.f32 %v7104_v52, %v6931_v34  ;;  %v7196_v17 = vmul.f32 %v7104_v52, %v6935_v25 }
 0x3d7   :  { %v7200_v26 = vmul.f32 %v7104_v52, %v6939_v1  ;;  %v7204_v47 = vmul.f32 %v7104_v52, %v6943_v6  ;;  %v7208_v3 = vmul.f32 %v7104_v52, %v6947_v7  ;;  %v7212_v9 = vmul.f32 %v7104_v52, %v6951_v46 }
 0x3d8   :  { %v7216_v34 = vmul.f32 %v7104_v52, %v6955_v54  ;;  %v7220_v25 = vmul.f32 %v7104_v52, %v6959_v4  ;;  %v7224_v1 = vmul.f32 %v7104_v52, %v6963_v15  ;;  %v7228_v6 = vmul.f32 %v7104_v52, %v6967_v63 }
 0x3d9   :  { %v7232_v7 = vmul.f32 %v7104_v52, %v6971_v41  ;;  %v7236_v46 = vmul.f32 %v7104_v52, %v6975_v22  ;;  %v7240_v54 = vmul.f32 %v7104_v52, %v6979_v27  ;;  %v7244_v4 = vmul.f32 %v7104_v52, %v6983_v61 }
 0x3da   :  { %v7248_v15 = vmul.f32 %v7104_v52, %v6987_v53  ;;  %v7252_v63 = vmul.f32 %v7104_v52, %v6991_v37  ;;  %v7256_v41 = vmul.f32 %v7104_v52, %v6995_v23  ;;  %v7260_v22 = vmul.f32 %v7104_v52, %v6999_v29 }
 0x3db   :  { %v7264_v27 = vmul.f32 %v7104_v52, %v7003_v44  ;;  %v7268_v61 = vmul.f32 %v7104_v52, %v7007_v51  ;;  %v7272_v53 = vmul.f32 %v7104_v52, %v7011_v60  ;;  %v7276_v37 = vmul.f32 %v7104_v52, %v7015_v2 }
 0x3dc   :  { %v7280_v23 = vmul.f32 %v7104_v52, %v7019_v11  ;;  %v7284_v29 = vmul.f32 %v7104_v52, %v7023_v16  ;;  %v7288_v44 = vmul.f32 %v7104_v52, %v7027_v30  ;;  %v7292_v51 = vmul.f32 %v7104_v52, %v7031_v38  ;;  %v7957_v38 = vld [vmem:[#allocation15_spill] sm:$0xff] }
 0x3dd   :  { %v7296_v60 = vmul.f32 %v7104_v52, %v7035_v10  ;;  %v7300_v2 = vmul.f32 %v7104_v52, %v7039_v62  ;;  %v7304_v11 = vmul.f32 %v7104_v52, %v7043_v42  ;;  %v7308_v16 = vmul.f32 %v7104_v52, %v7047_v0 }
 0x3de   :  { %v7312_v30 = vmul.f32 %v7104_v52, %v7051_v21  ;;  %v7316_v10 = vmul.f32 %v7104_v52, %v7957_v38  ;;  %v7320_v62 = vmul.f32 %v7104_v52, %v7059_v24  ;;  %v7324_v42 = vmul.f32 %v7104_v52, %v7063_v57 }
 0x3df   :  { %v7328_v0 = vmul.f32 %v7104_v52, %v7067_v32  ;;  %v7332_v21 = vmul.f32 %v7104_v52, %v7071_v39  ;;  %v7336_v38 = vmul.f32 %v7104_v52, %v7075_v49 }
 0x3e0   :  { %7958 = vst [vmem:[#allocation2_spill] sm:$0xff] %v7316_v10  ;;  %7959 = vst [vmem:[#allocation3_spill] sm:$0xff] %v7320_v62  ;;  %v7964_v10 = vld [vmem:[#allocation16_spill] sm:$0xff]  ;;  %v7965_v62 = vld [vmem:[#allocation17_spill] sm:$0xff] }
 0x3e1   :  { %7960 = vst [vmem:[#allocation4_spill] sm:$0xff] %v7324_v42  ;;  %7961 = vst [vmem:[#allocation5_spill] sm:$0xff] %v7328_v0  ;;  %v7340_v24 = vmul.f32 %v7104_v52, %v7964_v10  ;;  %v7344_v57 = vmul.f32 %v7104_v52, %v7965_v62  ;;  %v7966_v42 = vld [vmem:[#allocation18_spill] sm:$0xff]  ;;  %v7967_v0 = vld [vmem:[#allocation19_spill] sm:$0xff] }
 0x3e2   :  { %7962 = vst [vmem:[#allocation6_spill] sm:$0xff] %v7332_v21  ;;  %7963 = vst [vmem:[#allocation7_spill] sm:$0xff] %v7336_v38  ;;  %v7348_v32 = vmul.f32 %v7104_v52, %v7966_v42  ;;  %v7352_v39 = vmul.f32 %v7104_v52, %v7967_v0  ;;  %v7968_v21 = vld [vmem:[#allocation20_spill] sm:$0xff]  ;;  %v7969_v38 = vld [vmem:[#allocation21_spill] sm:$0xff]  ;;  %v7369_v42 = vmul.f32 %v7104_v52, %v7108_v5 }
 0x3e3   :  { %v7356_v49 = vmul.f32 %v7104_v52, %v7968_v21  ;;  %v7360_v10 = vmul.f32 %v7104_v52, %v7969_v38  ;;  %v7365_v62 = vld [vmem:[%s7829_s4] ss:$0 sm:$0xff]  ;;  %v7373_v0 = vmul.f32 %v7104_v52, %v7112_v31  ;;  %v7377_v21 = vmul.f32 %v7104_v52, %v7116_v50 }
 0x3e4   :  { %v7381_v38 = vmul.f32 %v7104_v52, %v7120_v33  ;;  %v7389_v5 = vmul.f32 %v7104_v52, %v7128_v18  ;;  %v7393_v31 = vmul.f32 %v7104_v52, %v7132_v58  ;;  %v7397_v50 = vmul.f32 %v7104_v52, %v7136_v19 }
 0x3e5   :  { %7970 = vst [vmem:[#allocation8_spill] sm:$0xff] %v7360_v10  ;;  %v7385_v10 = vmul.f32 %v7104_v52, %v7124_v20  ;;  %v7401_v33 = vadd.f32 %v7365_v62, %v7140_v56  ;;  %v7405_v20 = vadd.f32 %v7365_v62, %v7144_v59  ;;  %v7409_v18 = vadd.f32 %v7365_v62, %v7148_v43 }
 0x3e6   :  { %v7413_v58 = vadd.f32 %v7365_v62, %v7152_v8  ;;  %v7417_v52 = vadd.f32 %v7365_v62, %v7156_v48  ;;  %v7421_v19 = vadd.f32 %v7365_v62, %v7160_v40  ;;  %v7425_v56 = vadd.f32 %v7365_v62, %v7164_v35 }
 0x3e7   :  { %7971 = vst [vmem:[#allocation9_spill] sm:$0xff] %v7401_v33  ;;  %7972 = vst [vmem:[#allocation10_spill] sm:$0xff] %v7405_v20  ;;  %v7429_v59 = vadd.f32 %v7365_v62, %v7168_v12  ;;  %v7433_v43 = vadd.f32 %v7365_v62, %v7172_v55  ;;  %v7437_v8 = vadd.f32 %v7365_v62, %v7176_v13 }
 0x3e8   :  { %7973 = vst [vmem:[#allocation11_spill] sm:$0xff] %v7409_v18  ;;  %7974 = vst [vmem:[#allocation12_spill] sm:$0xff] %v7413_v58  ;;  %v7441_v48 = vadd.f32 %v7365_v62, %v7180_v14  ;;  %v7445_v40 = vadd.f32 %v7365_v62, %v7184_v36  ;;  %v7449_v35 = vadd.f32 %v7365_v62, %v7188_v45 }
 0x3e9   :  { %7975 = vst [vmem:[#allocation13_spill] sm:$0xff] %v7417_v52  ;;  %v7453_v12 = vadd.f32 %v7365_v62, %v7192_v28  ;;  %v7457_v55 = vadd.f32 %v7365_v62, %v7196_v17  ;;  %v7461_v13 = vadd.f32 %v7365_v62, %v7200_v26  ;;  %v7465_v14 = vadd.f32 %v7365_v62, %v7204_v47 }
 0x3ea   :  { %v7469_v36 = vadd.f32 %v7365_v62, %v7208_v3  ;;  %v7473_v45 = vadd.f32 %v7365_v62, %v7212_v9  ;;  %v7477_v28 = vadd.f32 %v7365_v62, %v7216_v34  ;;  %v7481_v17 = vadd.f32 %v7365_v62, %v7220_v25 }
 0x3eb   :  { %v7485_v26 = vadd.f32 %v7365_v62, %v7224_v1  ;;  %v7489_v47 = vadd.f32 %v7365_v62, %v7228_v6  ;;  %v7493_v3 = vadd.f32 %v7365_v62, %v7232_v7  ;;  %v7497_v9 = vadd.f32 %v7365_v62, %v7236_v46 }
 0x3ec   :  { %v7501_v34 = vadd.f32 %v7365_v62, %v7240_v54  ;;  %v7505_v25 = vadd.f32 %v7365_v62, %v7244_v4  ;;  %v7509_v1 = vadd.f32 %v7365_v62, %v7248_v15  ;;  %v7513_v6 = vadd.f32 %v7365_v62, %v7252_v63 }
 0x3ed   :  { %v7517_v7 = vadd.f32 %v7365_v62, %v7256_v41  ;;  %v7521_v46 = vadd.f32 %v7365_v62, %v7260_v22  ;;  %v7525_v54 = vadd.f32 %v7365_v62, %v7264_v27  ;;  %v7529_v4 = vadd.f32 %v7365_v62, %v7268_v61 }
 0x3ee   :  { %v7533_v15 = vadd.f32 %v7365_v62, %v7272_v53  ;;  %v7537_v63 = vadd.f32 %v7365_v62, %v7276_v37  ;;  %v7541_v41 = vadd.f32 %v7365_v62, %v7280_v23  ;;  %v7545_v22 = vadd.f32 %v7365_v62, %v7284_v29 }
 0x3ef   :  { %v7549_v27 = vadd.f32 %v7365_v62, %v7288_v44  ;;  %v7553_v61 = vadd.f32 %v7365_v62, %v7292_v51  ;;  %v7557_v53 = vadd.f32 %v7365_v62, %v7296_v60  ;;  %v7561_v37 = vadd.f32 %v7365_v62, %v7300_v2  ;;  %v7981_v51 = vld [vmem:[#allocation2_spill] sm:$0xff] }
 0x3f0   :  { %v7565_v23 = vadd.f32 %v7365_v62, %v7304_v11  ;;  %v7569_v29 = vadd.f32 %v7365_v62, %v7308_v16  ;;  %v7573_v44 = vadd.f32 %v7365_v62, %v7312_v30  ;;  %v7577_v60 = vadd.f32 %v7365_v62, %v7981_v51 }
 0x3f1   :  { %7976 = vst [vmem:[#allocation14_spill] sm:$0xff] %v7557_v53  ;;  %7977 = vst [vmem:[#allocation22_spill] sm:$0xff] %v7561_v37  ;;  %v7982_v53 = vld [vmem:[#allocation3_spill] sm:$0xff]  ;;  %v7983_v37 = vld [vmem:[#allocation4_spill] sm:$0xff] }
 0x3f2   :  { %7978 = vst [vmem:[#allocation23_spill] sm:$0xff] %v7565_v23  ;;  %7979 = vst [vmem:[#allocation24_spill] sm:$0xff] %v7569_v29  ;;  %v7581_v2 = vadd.f32 %v7365_v62, %v7982_v53  ;;  %v7585_v11 = vadd.f32 %v7365_v62, %v7983_v37  ;;  %v7984_v23 = vld [vmem:[#allocation5_spill] sm:$0xff]  ;;  %v7985_v29 = vld [vmem:[#allocation6_spill] sm:$0xff]  ;;  %v7601_v53 = vadd.f32 %v7365_v62, %v7340_v24 }
 0x3f3   :  { %7980 = vst [vmem:[#allocation25_spill] sm:$0xff] %v7573_v44  ;;  %v7589_v16 = vadd.f32 %v7365_v62, %v7984_v23  ;;  %v7593_v30 = vadd.f32 %v7365_v62, %v7985_v29  ;;  %v7986_v44 = vld [vmem:[#allocation7_spill] sm:$0xff]  ;;  %v7605_v37 = vadd.f32 %v7365_v62, %v7344_v57  ;;  %v7609_v23 = vadd.f32 %v7365_v62, %v7348_v32 }
 0x3f4   :  { %v7597_v51 = vadd.f32 %v7365_v62, %v7986_v44  ;;  %v7613_v29 = vadd.f32 %v7365_v62, %v7352_v39  ;;  %v7617_v44 = vadd.f32 %v7365_v62, %v7356_v49  ;;  %v7625_v57 = vadd.f32 %v7365_v62, %v7369_v42 }
 0x3f5   :  { %v7629_v32 = vadd.f32 %v7365_v62, %v7373_v0  ;;  %v7633_v39 = vadd.f32 %v7365_v62, %v7377_v21  ;;  %v7637_v49 = vadd.f32 %v7365_v62, %v7381_v38  ;;  %v7645_v42 = vadd.f32 %v7365_v62, %v7389_v5 }
 0x3f6   :  { %7987 = vst [vmem:[#allocation26_spill] sm:$0xff] %v7597_v51  ;;  %v7988_v51 = vld [vmem:[#allocation8_spill] sm:$0xff]  ;;  %v7649_v0 = vadd.f32 %v7365_v62, %v7393_v31  ;;  %v7653_v21 = vadd.f32 %v7365_v62, %v7397_v50  ;;  %v3713_v5 = vmax.f32 %v7421_v19, 0.0  ;;  %v3715_v31 = vmax.f32 %v7429_v59, 0.0 }
 0x3f7   :  { %v7621_v24 = vadd.f32 %v7365_v62, %v7988_v51  ;;  %7989 = vst [vmem:[#allocation15_spill] sm:$0xff] %v7633_v39  ;;  %7990 = vst [vmem:[#allocation16_spill] sm:$0xff] %v7637_v49  ;;  %v7641_v51 = vadd.f32 %v7365_v62, %v7385_v10  ;;  %v3717_v62 = vmax.f32 %v7437_v8, 0.0  ;;  %v3718_v50 = vmax.f32 %v7441_v48, 0.0 }
 0x3f8   :  { %7992 = vst [vmem:[#allocation18_spill] sm:$0xff] %v7645_v42  ;;  %7993 = vst [vmem:[#allocation19_spill] sm:$0xff] %v7649_v0  ;;  %v3714_v42 = vmax.f32 %v7425_v56, 0.0  ;;  %v3716_v0 = vmax.f32 %v7433_v43, 0.0  ;;  %v3719_v38 = vmax.f32 %v7445_v40, 0.0  ;;  %v3720_v49 = vmax.f32 %v7449_v35, 0.0 }
 0x3f9   :  { %7991 = vst [vmem:[#allocation17_spill] sm:$0xff] %v7641_v51  ;;  %7994 = vst [vmem:[#allocation20_spill] sm:$0xff] %v7653_v21  ;;  %v3721_v10 = vmax.f32 %v7453_v12, 0.0  ;;  %v3722_v51 = vmax.f32 %v7457_v55, 0.0  ;;  %v3723_v19 = vmax.f32 %v7461_v13, 0.0  ;;  %v3724_v56 = vmax.f32 %v7465_v14, 0.0 }
 0x3fa   :  { %v3725_v59 = vmax.f32 %v7469_v36, 0.0  ;;  %v3726_v43 = vmax.f32 %v7473_v45, 0.0  ;;  %v3727_v8 = vmax.f32 %v7477_v28, 0.0  ;;  %v3728_v48 = vmax.f32 %v7481_v17, 0.0  ;;  %v7995_v39 = vld [vmem:[#allocation14_spill] sm:$0xff]  ;;  %v7997_v58 = vld [vmem:[#allocation23_spill] sm:$0xff] }
 0x3fb   :  { %v3729_v40 = vmax.f32 %v7485_v26, 0.0  ;;  %v3730_v35 = vmax.f32 %v7489_v47, 0.0  ;;  %v3731_v12 = vmax.f32 %v7493_v3, 0.0  ;;  %v3732_v55 = vmax.f32 %v7497_v9, 0.0  ;;  %v7996_v52 = vld [vmem:[#allocation22_spill] sm:$0xff]  ;;  %v7998_v18 = vld [vmem:[#allocation24_spill] sm:$0xff] }
 0x3fc   :  { %v3733_v13 = vmax.f32 %v7501_v34, 0.0  ;;  %v3734_v14 = vmax.f32 %v7505_v25, 0.0  ;;  %v3735_v36 = vmax.f32 %v7509_v1, 0.0  ;;  %v3736_v45 = vmax.f32 %v7513_v6, 0.0  ;;  %v7999_v20 = vld [vmem:[#allocation25_spill] sm:$0xff] }
 0x3fd   :  { %v3737_v28 = vmax.f32 %v7517_v7, 0.0  ;;  %v3738_v17 = vmax.f32 %v7521_v46, 0.0  ;;  %v3739_v26 = vmax.f32 %v7525_v54, 0.0  ;;  %v3740_v47 = vmax.f32 %v7529_v4, 0.0  ;;  %v8000_v33 = vld [vmem:[#allocation26_spill] sm:$0xff] }
 0x3fe   :  { %v3741_v3 = vmax.f32 %v7533_v15, 0.0  ;;  %v3742_v9 = vmax.f32 %v7537_v63, 0.0  ;;  %v3743_v34 = vmax.f32 %v7541_v41, 0.0  ;;  %v3744_v25 = vmax.f32 %v7545_v22, 0.0  ;;  %v8001_v21 = vld [vmem:[#allocation15_spill] sm:$0xff] }
 0x3ff   :  { %v3745_v1 = vmax.f32 %v7549_v27, 0.0  ;;  %v3746_v6 = vmax.f32 %v7553_v61, 0.0  ;;  %v3747_v7 = vmax.f32 %v7995_v39, 0.0  ;;  %v3748_v46 = vmax.f32 %v7996_v52, 0.0 }
 0x400   :  { %v3749_v54 = vmax.f32 %v7997_v58, 0.0  ;;  %v3750_v4 = vmax.f32 %v7998_v18, 0.0  ;;  %v3751_v15 = vmax.f32 %v7999_v20, 0.0  ;;  %v3752_v63 = vmax.f32 %v7577_v60, 0.0 }
 0x401   :  { %v3753_v41 = vmax.f32 %v7581_v2, 0.0  ;;  %v3754_v22 = vmax.f32 %v7585_v11, 0.0  ;;  %v3755_v27 = vmax.f32 %v7589_v16, 0.0  ;;  %v3756_v61 = vmax.f32 %v7593_v30, 0.0 }
 0x402   :  { %v3757_v39 = vmax.f32 %v8000_v33, 0.0  ;;  %v3758_v52 = vmax.f32 %v7601_v53, 0.0  ;;  %v3759_v58 = vmax.f32 %v7605_v37, 0.0  ;;  %v3760_v18 = vmax.f32 %v7609_v23, 0.0  ;;  %v8002_v33 = vld [vmem:[#allocation16_spill] sm:$0xff]  ;;  %v8003_v37 = vld [vmem:[#allocation17_spill] sm:$0xff] }
 0x403   :  { %v3761_v20 = vmax.f32 %v7613_v29, 0.0  ;;  %v3762_v60 = vmax.f32 %v7617_v44, 0.0  ;;  %v3763_v2 = vmax.f32 %v7621_v24, 0.0  ;;  %v3764_v11 = vmax.f32 %v7625_v57, 0.0  ;;  %v8004_v29 = vld [vmem:[#allocation18_spill] sm:$0xff]  ;;  %v8005_v24 = vld [vmem:[#allocation19_spill] sm:$0xff] }
 0x404   :  { %v3765_v16 = vmax.f32 %v7629_v32, 0.0  ;;  %v3766_v30 = vmax.f32 %v8001_v21, 0.0  ;;  %v3767_v53 = vmax.f32 %v8002_v33, 0.0  ;;  %v3768_v23 = vmax.f32 %v8003_v37, 0.0  ;;  %v8006_v32 = vld [vmem:[#allocation20_spill] sm:$0xff]  ;;  %v8007_v33 = vld [vmem:[#allocation9_spill] sm:$0xff] }
 0x405   :  { %v3769_v44 = vmax.f32 %v8004_v29, 0.0  ;;  %v3770_v57 = vmax.f32 %v8005_v24, 0.0  ;;  %v3771_v21 = vmax.f32 %v8006_v32, 0.0  ;;  %v8008_v37 = vmax.f32 %v8007_v33, 0.0  ;;  %v8009_v29 = vld [vmem:[#allocation10_spill] sm:$0xff]  ;;  %v8011_v33 = vld [vmem:[#allocation11_spill] sm:$0xff] }
 0x406   :  { %v8010_v24 = vmax.f32 %v8009_v29, 0.0  ;;  %v8012_v29 = vmax.f32 %v8011_v33, 0.0 }
 0x408   :  { %v4550_v32 = vpack.c.bf16 %v8010_v24, %v8008_v37  ;;  %v8013_v24 = vld [vmem:[#allocation12_spill] sm:$0xff] }
 0x409   :  { %v8014_v37 = vmax.f32 %v8013_v24, 0.0  ;;  %v8015_v24 = vld [vmem:[#allocation13_spill] sm:$0xff] }
 0x40a   :  { %4551 = vst [vmem:[%s7830_s5] sm:$0xff] %v4550_v32  }
 0x40b   :  { %v4555_v33 = vpack.c.bf16 %v8014_v37, %v8012_v29  ;;  %v8016_v29 = vmax.f32 %v8015_v24, 0.0  ;;  %v4565_v24 = vpack.c.bf16 %v3715_v31, %v3714_v42  ;;  %v4580_v31 = vpack.c.bf16 %v3721_v10, %v3720_v49 }
 0x40c   :  { %v4585_v42 = vpack.c.bf16 %v3723_v19, %v3722_v51  ;;  %v4600_v49 = vpack.c.bf16 %v3729_v40, %v3728_v48  ;;  %v4605_v51 = vpack.c.bf16 %v3731_v12, %v3730_v35  ;;  %v4610_v10 = vpack.c.bf16 %v3733_v13, %v3732_v55 }
 0x40d   :  { %v4560_v37 = vpack.c.bf16 %v3713_v5, %v8016_v29  ;;  %v4570_v5 = vpack.c.bf16 %v3717_v62, %v3716_v0  ;;  %v4575_v29 = vpack.c.bf16 %v3719_v38, %v3718_v50  ;;  %4707 = vst [vmem:[%s7830_s5 + $0x8] sm:$0xff] %v4555_v33   ;;  %4709 = vst [vmem:[%s7830_s5 + $0x18] sm:$0xff] %v4565_v24  }
 0x40e   :  { %v4590_v0 = vpack.c.bf16 %v3725_v59, %v3724_v56  ;;  %v4595_v38 = vpack.c.bf16 %v3727_v8, %v3726_v43  ;;  %4712 = vst [vmem:[%s7830_s5 + $0x30] sm:$0xff] %v4580_v31   ;;  %4713 = vst [vmem:[%s7830_s5 + $0x38] sm:$0xff] %v4585_v42   ;;  %v4615_v62 = vpack.c.bf16 %v3735_v36, %v3734_v14 }
 0x40f   :  { %4708 = vst [vmem:[%s7830_s5 + $0x10] sm:$0xff] %v4560_v37   ;;  %4710 = vst [vmem:[%s7830_s5 + $0x20] sm:$0xff] %v4570_v5   ;;  %v4620_v50 = vpack.c.bf16 %v3737_v28, %v3736_v45  ;;  %v4625_v19 = vpack.c.bf16 %v3739_v26, %v3738_v17  ;;  %v4630_v56 = vpack.c.bf16 %v3741_v3, %v3740_v47 }
 0x410   :  { %4711 = vst [vmem:[%s7830_s5 + $0x28] sm:$0xff] %v4575_v29   ;;  %4714 = vst [vmem:[%s7830_s5 + $0x40] sm:$0xff] %v4590_v0   ;;  %v4635_v59 = vpack.c.bf16 %v3743_v34, %v3742_v9  ;;  %v4640_v43 = vpack.c.bf16 %v3745_v1, %v3744_v25  ;;  %v4645_v8 = vpack.c.bf16 %v3747_v7, %v3746_v6 }
 0x411   :  { %4715 = vst [vmem:[%s7830_s5 + $0x48] sm:$0xff] %v4595_v38   ;;  %4716 = vst [vmem:[%s7830_s5 + $0x50] sm:$0xff] %v4600_v49   ;;  %v4650_v48 = vpack.c.bf16 %v3749_v54, %v3748_v46  ;;  %v4655_v40 = vpack.c.bf16 %v3751_v15, %v3750_v4  ;;  %v4660_v35 = vpack.c.bf16 %v3753_v41, %v3752_v63 }
 0x412   :  { %4717 = vst [vmem:[%s7830_s5 + $0x58] sm:$0xff] %v4605_v51   ;;  %4718 = vst [vmem:[%s7830_s5 + $0x60] sm:$0xff] %v4610_v10   ;;  %v4665_v12 = vpack.c.bf16 %v3755_v27, %v3754_v22  ;;  %v4670_v55 = vpack.c.bf16 %v3757_v39, %v3756_v61  ;;  %v4675_v13 = vpack.c.bf16 %v3759_v58, %v3758_v52 }
 0x413   :  { %4719 = vst [vmem:[%s7830_s5 + $0x68] sm:$0xff] %v4615_v62   ;;  %4720 = vst [vmem:[%s7830_s5 + $0x70] sm:$0xff] %v4620_v50   ;;  %v4680_v14 = vpack.c.bf16 %v3761_v20, %v3760_v18  ;;  %v4685_v36 = vpack.c.bf16 %v3763_v2, %v3762_v60  ;;  %v4690_v45 = vpack.c.bf16 %v3765_v16, %v3764_v11 }
 0x414   :  { %4721 = vst [vmem:[%s7830_s5 + $0x78] sm:$0xff] %v4625_v19   ;;  %4722 = vst [vmem:[%s7830_s5 + $0x80] sm:$0xff] %v4630_v56   ;;  %v4695_v28 = vpack.c.bf16 %v3767_v53, %v3766_v30  ;;  %v4700_v17 = vpack.c.bf16 %v3769_v44, %v3768_v23  ;;  %v4705_v26 = vpack.c.bf16 %v3771_v21, %v3770_v57 }
 0x415   :  { %4723 = vst [vmem:[%s7830_s5 + $0x88] sm:$0xff] %v4635_v59   ;;  %4724 = vst [vmem:[%s7830_s5 + $0x90] sm:$0xff] %v4640_v43  }
 0x416   :  { %4725 = vst [vmem:[%s7830_s5 + $0x98] sm:$0xff] %v4645_v8   ;;  %4726 = vst [vmem:[%s7830_s5 + $0xa0] sm:$0xff] %v4650_v48  }
 0x417   :  { %4727 = vst [vmem:[%s7830_s5 + $0xa8] sm:$0xff] %v4655_v40   ;;  %4728 = vst [vmem:[%s7830_s5 + $0xb0] sm:$0xff] %v4660_v35  }
 0x418   :  { %4729 = vst [vmem:[%s7830_s5 + $0xb8] sm:$0xff] %v4665_v12   ;;  %4730 = vst [vmem:[%s7830_s5 + $0xc0] sm:$0xff] %v4670_v55  }
 0x419   :  { %4731 = vst [vmem:[%s7830_s5 + $0xc8] sm:$0xff] %v4675_v13   ;;  %4732 = vst [vmem:[%s7830_s5 + $0xd0] sm:$0xff] %v4680_v14  }
 0x41a   :  { %4733 = vst [vmem:[%s7830_s5 + $0xd8] sm:$0xff] %v4685_v36   ;;  %4734 = vst [vmem:[%s7830_s5 + $0xe0] sm:$0xff] %v4690_v45  }
 0x41b   :  { %4735 = vst [vmem:[%s7830_s5 + $0xe8] sm:$0xff] %v4695_v28   ;;  %4736 = vst [vmem:[%s7830_s5 + $0xf0] sm:$0xff] %v4700_v17  }
 0x41c   :  { %4737 = vst [vmem:[%s7830_s5 + $0xf8] sm:$0xff] %v4705_v26  }

// kernel: discriminator_forward.6
= control target key start
LH: loop header
LB: loop body
LE: loop exit
PB: predicated region body
PF: predicated region fallthrough
CT: control target
= control target key end

     0   :  { %s6389_s1 = inlined_call_operand.vmem [shape: bf16[1,2048,256], index: 1, kind: input, shape index: {}]   ;;  %s6390_s0 = inlined_call_operand.vmem [shape: bf16[128,2048], index: 0, kind: input, shape index: {}]   ;;  %s6391_s2 = inlined_call_operand.vmem [shape: f32[1,256], index: 2, kind: input, shape index: {}]   ;;  %s6392_s3 = inlined_call_operand.vmem [shape: f32[1,256], index: 3, kind: input, shape index: {}]   ;;  %s6393_s4 = inlined_call_operand.vmem [shape: f32[1,256], index: 4, kind: input, shape index: {}]   ;;  %s6394_s5 = inlined_call_operand.vmem [shape: bf16[128,256], index: 5, kind: output, shape index: {}]  }
   0x1   :  { %v4336_v0 = vld [vmem:[%s6389_s1 + $0x4] ss:$8 sps:$4 sm:$0xff]   ;;  %v4340_v2 = vld [vmem:[%s6389_s1] ss:$8 sps:$4 sm:$0xff]   ;;  %v4342_v4 = vld [vmem:[%s6389_s1 + $0x14] ss:$8 sps:$4 sm:$0xff]  }
   0x2   :  { %v4338_v1 = vld [vmem:[%s6389_s1 + $0x404] ss:$8 sps:$4 sm:$0xff]   ;;  %2336 = vmatprep.subr.bf16.mxu1 %v4336_v0  ;;  %v4341_v3 = vld [vmem:[%s6389_s1 + $0x400] ss:$8 sps:$4 sm:$0xff]   ;;  %v4344_v5 = vld [vmem:[%s6389_s1 + $0x414] ss:$8 sps:$4 sm:$0xff]  }
   0x3   :  { %2788 = vmatprep.subr.bf16.mxu0 %v4338_v1  ;;  %2337 = vmatpush1.bf16.msra.mxu1 %v4340_v2  ;;  %v4346_v6 = vld [vmem:[%s6389_s1 + $0x10] ss:$8 sps:$4 sm:$0xff]   ;;  %v4348_v8 = vld [vmem:[%s6389_s1 + $0x24] ss:$8 sps:$4 sm:$0xff]   ;;  %v4352_v10 = vld [vmem:[%s6389_s1 + $0x20] ss:$8 sps:$4 sm:$0xff]  }
   0x4   :  { %2789 = vmatpush1.bf16.msra.mxu0 %v4341_v3  ;;  %2338 = vmatprep.subr.bf16.mxu1 %v4342_v4  ;;  %v4347_v7 = vld [vmem:[%s6389_s1 + $0x410] ss:$8 sps:$4 sm:$0xff]   ;;  %v4350_v9 = vld [vmem:[%s6389_s1 + $0x424] ss:$8 sps:$4 sm:$0xff]   ;;  %v4353_v11 = vld [vmem:[%s6389_s1 + $0x420] ss:$8 sps:$4 sm:$0xff]  }
   0x5   :  { %2790 = vmatprep.subr.bf16.mxu0 %v4344_v5  ;;  %v4354_v12 = vld [vmem:[%s6389_s1 + $0x34] ss:$8 sps:$4 sm:$0xff]   ;;  %v4358_v14 = vld [vmem:[%s6389_s1 + $0x30] ss:$8 sps:$4 sm:$0xff]   ;;  %v4360_v16 = vld [vmem:[%s6389_s1 + $0x44] ss:$8 sps:$4 sm:$0xff]  }
   0x6   :  { %v4356_v13 = vld [vmem:[%s6389_s1 + $0x434] ss:$8 sps:$4 sm:$0xff]   ;;  %v4359_v15 = vld [vmem:[%s6389_s1 + $0x430] ss:$8 sps:$4 sm:$0xff]   ;;  %v4362_v17 = vld [vmem:[%s6389_s1 + $0x444] ss:$8 sps:$4 sm:$0xff]  }
   0x7   :  { %2339 = vmatpush1.bf16.msra.mxu1 %v4346_v6  ;;  %v4364_v18 = vld [vmem:[%s6389_s1 + $0x40] ss:$8 sps:$4 sm:$0xff]   ;;  %v4366_v20 = vld [vmem:[%s6389_s1 + $0x54] ss:$8 sps:$4 sm:$0xff]   ;;  %v4370_v22 = vld [vmem:[%s6389_s1 + $0x50] ss:$8 sps:$4 sm:$0xff]  }
   0x8   :  { %2791 = vmatpush1.bf16.msra.mxu0 %v4347_v7  ;;  %2340 = vmatprep.subr.bf16.mxu1 %v4348_v8  ;;  %v4365_v19 = vld [vmem:[%s6389_s1 + $0x440] ss:$8 sps:$4 sm:$0xff]   ;;  %v4368_v21 = vld [vmem:[%s6389_s1 + $0x454] ss:$8 sps:$4 sm:$0xff]   ;;  %v4371_v23 = vld [vmem:[%s6389_s1 + $0x450] ss:$8 sps:$4 sm:$0xff]  }
   0x9   :  { %2792 = vmatprep.subr.bf16.mxu0 %v4350_v9  ;;  %v4372_v24 = vld [vmem:[%s6389_s1 + $0x64] ss:$8 sps:$4 sm:$0xff]   ;;  %v4376_v26 = vld [vmem:[%s6389_s1 + $0x60] ss:$8 sps:$4 sm:$0xff]   ;;  %v4378_v28 = vld [vmem:[%s6389_s1 + $0x74] ss:$8 sps:$4 sm:$0xff]  }
   0xa   :  { %v4374_v25 = vld [vmem:[%s6389_s1 + $0x464] ss:$8 sps:$4 sm:$0xff]   ;;  %v4377_v27 = vld [vmem:[%s6389_s1 + $0x460] ss:$8 sps:$4 sm:$0xff]   ;;  %v4380_v29 = vld [vmem:[%s6389_s1 + $0x474] ss:$8 sps:$4 sm:$0xff]  }
   0xb   :  { %2341 = vmatpush1.bf16.msra.mxu1 %v4352_v10  ;;  %v4382_v30 = vld [vmem:[%s6389_s1 + $0x70] ss:$8 sps:$4 sm:$0xff]   ;;  %v4384_v32 = vld [vmem:[%s6389_s1 + $0x84] ss:$8 sps:$4 sm:$0xff]   ;;  %v4388_v34 = vld [vmem:[%s6389_s1 + $0x80] ss:$8 sps:$4 sm:$0xff]  }
   0xc   :  { %2793 = vmatpush1.bf16.msra.mxu0 %v4353_v11  ;;  %2342 = vmatprep.subr.bf16.mxu1 %v4354_v12  ;;  %v4383_v31 = vld [vmem:[%s6389_s1 + $0x470] ss:$8 sps:$4 sm:$0xff]   ;;  %v4386_v33 = vld [vmem:[%s6389_s1 + $0x484] ss:$8 sps:$4 sm:$0xff]   ;;  %v4389_v35 = vld [vmem:[%s6389_s1 + $0x480] ss:$8 sps:$4 sm:$0xff]  }
   0xd   :  { %2794 = vmatprep.subr.bf16.mxu0 %v4356_v13  ;;  %v4390_v36 = vld [vmem:[%s6389_s1 + $0x94] ss:$8 sps:$4 sm:$0xff]   ;;  %v4394_v38 = vld [vmem:[%s6389_s1 + $0x90] ss:$8 sps:$4 sm:$0xff]   ;;  %v4396_v40 = vld [vmem:[%s6389_s1 + $0xa4] ss:$8 sps:$4 sm:$0xff]  }
   0xe   :  { %v4392_v37 = vld [vmem:[%s6389_s1 + $0x494] ss:$8 sps:$4 sm:$0xff]   ;;  %v4395_v39 = vld [vmem:[%s6389_s1 + $0x490] ss:$8 sps:$4 sm:$0xff]   ;;  %v4398_v41 = vld [vmem:[%s6389_s1 + $0x4a4] ss:$8 sps:$4 sm:$0xff]  }
   0xf   :  { %2343 = vmatpush1.bf16.msra.mxu1 %v4358_v14  ;;  %v4400_v42 = vld [vmem:[%s6389_s1 + $0xa0] ss:$8 sps:$4 sm:$0xff]   ;;  %v4402_v44 = vld [vmem:[%s6389_s1 + $0xb4] ss:$8 sps:$4 sm:$0xff]   ;;  %v4406_v46 = vld [vmem:[%s6389_s1 + $0xb0] ss:$8 sps:$4 sm:$0xff]  }
  0x10   :  { %2795 = vmatpush1.bf16.msra.mxu0 %v4359_v15  ;;  %2344 = vmatprep.subr.bf16.mxu1 %v4360_v16  ;;  %v4401_v43 = vld [vmem:[%s6389_s1 + $0x4a0] ss:$8 sps:$4 sm:$0xff]   ;;  %v4404_v45 = vld [vmem:[%s6389_s1 + $0x4b4] ss:$8 sps:$4 sm:$0xff]   ;;  %v4407_v47 = vld [vmem:[%s6389_s1 + $0x4b0] ss:$8 sps:$4 sm:$0xff]  }
  0x11   :  { %2796 = vmatprep.subr.bf16.mxu0 %v4362_v17  ;;  %v20_v48 = vld [vmem:[%s6390_s0] sm:$0xff]  ;;  %v4414_v58 = vld [vmem:[%s6389_s1 + $0xd4] ss:$8 sps:$4 sm:$0xff]   ;;  %v4418_v60 = vld [vmem:[%s6389_s1 + $0xd0] ss:$8 sps:$4 sm:$0xff]  }
  0x12   :  { %v28_v49 = vld [vmem:[%s6390_s0 + $0x40] sm:$0xff]  ;;  %v4416_v59 = vld [vmem:[%s6389_s1 + $0x4d4] ss:$8 sps:$4 sm:$0xff]   ;;  %v4419_v61 = vld [vmem:[%s6389_s1 + $0x4d0] ss:$8 sps:$4 sm:$0xff]  }
  0x13   :  { %2345 = vmatpush1.bf16.msra.mxu1 %v4364_v18  ;;  %v24_v50 = vld [vmem:[%s6390_s0 + $0x20] sm:$0xff]  ;;  %v3665_v53 = vcombine.high %v20_v48, %v28_v49  ;;  %v4426_v2 = vld [vmem:[%s6389_s1 + $0xf4] ss:$8 sps:$4 sm:$0xff]   ;;  %v4430_v4 = vld [vmem:[%s6389_s1 + $0xf0] ss:$8 sps:$4 sm:$0xff]   ;;  %v3664_v11 = vcombine.low %v20_v48, %v28_v49 }
  0x14   :  { %2797 = vmatpush1.bf16.msra.mxu0 %v4365_v19  ;;  %2346 = vmatprep.subr.bf16.mxu1 %v4366_v20  ;;  %v32_v51 = vld [vmem:[%s6390_s0 + $0x60] sm:$0xff]  ;;  %v4428_v3 = vld [vmem:[%s6389_s1 + $0x4f4] ss:$8 sps:$4 sm:$0xff]   ;;  %v4431_v5 = vld [vmem:[%s6389_s1 + $0x4f0] ss:$8 sps:$4 sm:$0xff]  }
  0x15   :  { %2798 = vmatprep.subr.bf16.mxu0 %v4368_v21  ;;  %v4408_v52 = vld [vmem:[%s6389_s1 + $0xc4] ss:$8 sps:$4 sm:$0xff]   ;;  %v3673_v55 = vcombine.high %v24_v50, %v32_v51  ;;  %2368 = vmatprep.mubr.bf16.mxu1 %v3665_v53  ;;  %v4412_v56 = vld [vmem:[%s6389_s1 + $0xc0] ss:$8 sps:$4 sm:$0xff]   ;;  %v3672_v12 = vcombine.low %v24_v50, %v32_v51  ;;  %v4440_v16 = vld [vmem:[%s6389_s1 + $0x114] ss:$8 sps:$4 sm:$0xff]  }
  0x16   :  { %v4410_v54 = vld [vmem:[%s6389_s1 + $0x4c4] ss:$8 sps:$4 sm:$0xff]   ;;  %v4413_v57 = vld [vmem:[%s6389_s1 + $0x4c0] ss:$8 sps:$4 sm:$0xff]   ;;  %v4443_v17 = vld [vmem:[%s6389_s1 + $0x514] ss:$8 sps:$4 sm:$0xff]  }
  0x17   :  { %2347 = vmatpush1.bf16.msra.mxu1 %v4370_v22  ;;  %2820 = vmatprep.mubr.bf16.mxu0 %v3673_v55  ;;  %v4420_v62 = vld [vmem:[%s6389_s1 + $0xe4] ss:$8 sps:$4 sm:$0xff]   ;;  %v4424_v0 = vld [vmem:[%s6389_s1 + $0xe0] ss:$8 sps:$4 sm:$0xff]   ;;  %v4438_v20 = vld [vmem:[%s6389_s1 + $0x110] ss:$8 sps:$4 sm:$0xff]  }
  0x18   :  { %2799 = vmatpush1.bf16.msra.mxu0 %v4371_v23  ;;  %2348 = vmatprep.subr.bf16.mxu1 %v4372_v24  ;;  %v4422_v63 = vld [vmem:[%s6389_s1 + $0x4e4] ss:$8 sps:$4 sm:$0xff]   ;;  %v4425_v1 = vld [vmem:[%s6389_s1 + $0x4e0] ss:$8 sps:$4 sm:$0xff]   ;;  %v4441_v21 = vld [vmem:[%s6389_s1 + $0x510] ss:$8 sps:$4 sm:$0xff]  }
  0x19   :  { %2800 = vmatprep.subr.bf16.mxu0 %v4374_v25  ;;  %v4434_v6 = vld [vmem:[%s6389_s1 + $0x104] ss:$8 sps:$4 sm:$0xff]   ;;  %v4432_v8 = vld [vmem:[%s6389_s1 + $0x100] ss:$8 sps:$4 sm:$0xff]   ;;  %v4464_v48 = vld [vmem:[%s6389_s1 + $0x154] ss:$8 sps:$4 sm:$0xff]  }
  0x1a   :  { %v4437_v7 = vld [vmem:[%s6389_s1 + $0x504] ss:$8 sps:$4 sm:$0xff]   ;;  %v4435_v9 = vld [vmem:[%s6389_s1 + $0x500] ss:$8 sps:$4 sm:$0xff]   ;;  %v4467_v49 = vld [vmem:[%s6389_s1 + $0x554] ss:$8 sps:$4 sm:$0xff]  }
  0x1b   :  { %2349 = vmatpush1.bf16.msra.mxu1 %v4376_v26  ;;  %v36_v10 = vld [vmem:[%s6390_s0 + $0x80] sm:$0xff]  ;;  %v4465_v53 = vld [vmem:[%s6389_s1 + $0x550] ss:$8 sps:$4 sm:$0xff]  }
  0x1c   :  { %2801 = vmatpush1.bf16.msra.mxu0 %v4377_v27  ;;  %2350 = vmatprep.subr.bf16.mxu1 %v4378_v28  ;;  %v44_v13 = vld [vmem:[%s6390_s0 + $0xc0] sm:$0xff] }
  0x1d   :  { %2802 = vmatprep.subr.bf16.mxu0 %v4380_v29  ;;  %v40_v14 = vld [vmem:[%s6390_s0 + $0xa0] sm:$0xff]  ;;  %v3681_v18 = vcombine.high %v36_v10, %v44_v13  ;;  %v3680_v28 = vcombine.low %v36_v10, %v44_v13 }
  0x1e   :  { %v48_v15 = vld [vmem:[%s6390_s0 + $0xe0] sm:$0xff] }
  0x1f   :  { %2351 = vmatpush1.bf16.msra.mxu1 %v4382_v30  ;;  %v3689_v19 = vcombine.high %v40_v14, %v48_v15  ;;  %v4446_v22 = vld [vmem:[%s6389_s1 + $0x124] ss:$8 sps:$4 sm:$0xff]   ;;  %v4444_v24 = vld [vmem:[%s6389_s1 + $0x120] ss:$8 sps:$4 sm:$0xff]   ;;  %v3688_v29 = vcombine.low %v40_v14, %v48_v15 }
  0x20   :  { %2803 = vmatpush1.bf16.msra.mxu0 %v4383_v31  ;;  %2352 = vmatprep.subr.bf16.mxu1 %v4384_v32  ;;  %v4449_v23 = vld [vmem:[%s6389_s1 + $0x524] ss:$8 sps:$4 sm:$0xff]   ;;  %v4447_v25 = vld [vmem:[%s6389_s1 + $0x520] ss:$8 sps:$4 sm:$0xff]   ;;  %v4452_v32 = vld [vmem:[%s6389_s1 + $0x134] ss:$8 sps:$4 sm:$0xff]  }
  0x21   :  { %2804 = vmatprep.subr.bf16.mxu0 %v4386_v33  ;;  %v52_v26 = vld [vmem:[%s6390_s0 + $0x100] sm:$0xff]  ;;  %v4455_v33 = vld [vmem:[%s6389_s1 + $0x534] ss:$8 sps:$4 sm:$0xff]  }
  0x22   :  { %v60_v27 = vld [vmem:[%s6390_s0 + $0x140] sm:$0xff] }
  0x23   :  { %2353 = vmatpush1.bf16.msra.mxu1 %v4388_v34  ;;  %v56_v30 = vld [vmem:[%s6390_s0 + $0x120] sm:$0xff]  ;;  %v3697_v34 = vcombine.high %v52_v26, %v60_v27 }
  0x24   :  { %2805 = vmatpush1.bf16.msra.mxu0 %v4389_v35  ;;  %2354 = vmatprep.subr.bf16.mxu1 %v4390_v36  ;;  %v64_v31 = vld [vmem:[%s6390_s0 + $0x160] sm:$0xff]  ;;  %v4450_v36 = vld [vmem:[%s6389_s1 + $0x130] ss:$8 sps:$4 sm:$0xff]  }
  0x25   :  { %2806 = vmatprep.subr.bf16.mxu0 %v4392_v37  ;;  %v3705_v35 = vcombine.high %v56_v30, %v64_v31  ;;  %v4453_v37 = vld [vmem:[%s6389_s1 + $0x530] ss:$8 sps:$4 sm:$0xff]   ;;  %v4473_v55 = vld [vmem:[%s6389_s1 + $0x564] ss:$8 sps:$4 sm:$0xff]   ;;  %v4480_v14 = vld [vmem:[%s6389_s1 + $0x180] ss:$8 sps:$4 sm:$0xff]  }
  0x26   :  { %v112_v13 = vld [vmem:[%s6390_s0 + $0x2e0] sm:$0xff] }
  0x27   :  { %2355 = vmatpush1.bf16.msra.mxu1 %v4394_v38  ;;  %v4458_v38 = vld [vmem:[%s6389_s1 + $0x144] ss:$8 sps:$4 sm:$0xff]   ;;  %v4483_v15 = vld [vmem:[%s6389_s1 + $0x580] ss:$8 sps:$4 sm:$0xff]  }
  0x28   :  { %2807 = vmatpush1.bf16.msra.mxu0 %v4395_v39  ;;  %2356 = vmatprep.subr.bf16.mxu1 %v4396_v40  ;;  %v4461_v39 = vld [vmem:[%s6389_s1 + $0x544] ss:$8 sps:$4 sm:$0xff]   ;;  %v4456_v40 = vld [vmem:[%s6389_s1 + $0x140] ss:$8 sps:$4 sm:$0xff]  }
  0x29   :  { %2808 = vmatprep.subr.bf16.mxu0 %v4398_v41  ;;  %v4459_v41 = vld [vmem:[%s6389_s1 + $0x540] ss:$8 sps:$4 sm:$0xff]  }
  0x2b   :  { %2357 = vmatpush1.bf16.msra.mxu1 %v4400_v42  ;;  %v68_v42 = vld [vmem:[%s6390_s0 + $0x180] sm:$0xff] }
  0x2c   :  { %2809 = vmatpush1.bf16.msra.mxu0 %v4401_v43  ;;  %2358 = vmatprep.subr.bf16.mxu1 %v4402_v44  ;;  %v76_v43 = vld [vmem:[%s6390_s0 + $0x1c0] sm:$0xff]  ;;  %v3696_v44 = vcombine.low %v52_v26, %v60_v27 }
  0x2d   :  { %2810 = vmatprep.subr.bf16.mxu0 %v4404_v45  ;;  %v3704_v45 = vcombine.low %v56_v30, %v64_v31  ;;  %v3713_v50 = vcombine.high %v68_v42, %v76_v43  ;;  %v116_v26 = vld [vmem:[%s6390_s0 + $0x300] sm:$0xff] }
  0x2e   :  { %v120_v30 = vld [vmem:[%s6390_s0 + $0x320] sm:$0xff] }
  0x2f   :  { %2359 = vmatpush1.bf16.msra.mxu1 %v4406_v46  ;;  %v72_v46 = vld [vmem:[%s6390_s0 + $0x1a0] sm:$0xff] }
  0x30   :  { %2811 = vmatpush1.bf16.msra.mxu0 %v4407_v47  ;;  %2360 = vmatprep.subr.bf16.mxu1 %v4408_v52  ;;  %v80_v47 = vld [vmem:[%s6390_s0 + $0x1e0] sm:$0xff]  ;;  %v4462_v52 = vld [vmem:[%s6389_s1 + $0x150] ss:$8 sps:$4 sm:$0xff]  }
  0x31   :  { %2812 = vmatprep.subr.bf16.mxu0 %v4410_v54  ;;  %v3721_v51 = vcombine.high %v72_v46, %v80_v47  ;;  %v4470_v54 = vld [vmem:[%s6389_s1 + $0x164] ss:$8 sps:$4 sm:$0xff]  }
  0x32   :  { %v128_v31 = vld [vmem:[%s6390_s0 + $0x360] sm:$0xff] }
  0x33   :  { %2361 = vmatpush1.bf16.msra.mxu1 %v4412_v56  ;;  %v4468_v56 = vld [vmem:[%s6389_s1 + $0x160] ss:$8 sps:$4 sm:$0xff]  }
  0x34   :  { %2813 = vmatpush1.bf16.msra.mxu0 %v4413_v57  ;;  %2362 = vmatprep.subr.bf16.mxu1 %v4414_v58  ;;  %v84_v57 = vld [vmem:[%s6390_s0 + $0x200] sm:$0xff] }
  0x35   :  { %2814 = vmatprep.subr.bf16.mxu0 %v4416_v59  ;;  %v92_v58 = vld [vmem:[%s6390_s0 + $0x240] sm:$0xff]  ;;  %v3712_v59 = vcombine.low %v68_v42, %v76_v43 }
  0x36   :  { %v3728_v10 = vcombine.low %v84_v57, %v92_v58  ;;  %v132_v42 = vld [vmem:[%s6390_s0 + $0x380] sm:$0xff] }
  0x37   :  { %2363 = vmatpush1.bf16.msra.mxu1 %v4418_v60  ;;  %v3720_v60 = vcombine.low %v72_v46, %v80_v47  ;;  %v140_v43 = vld [vmem:[%s6390_s0 + $0x3c0] sm:$0xff] }
  0x38   :  { %2815 = vmatpush1.bf16.msra.mxu0 %v4419_v61  ;;  %2364 = vmatprep.subr.bf16.mxu1 %v4420_v62  ;;  %v88_v61 = vld [vmem:[%s6390_s0 + $0x220] sm:$0xff] }
  0x39   :  { %2816 = vmatprep.subr.bf16.mxu0 %v4422_v63  ;;  %v96_v62 = vld [vmem:[%s6390_s0 + $0x260] sm:$0xff] }
  0x3a   :  { %v4471_v63 = vld [vmem:[%s6389_s1 + $0x560] ss:$8 sps:$4 sm:$0xff]  }
  0x3b   :  { %2365 = vmatpush1.bf16.msra.mxu1 %v4424_v0  ;;  %v4476_v0 = vld [vmem:[%s6389_s1 + $0x174] ss:$8 sps:$4 sm:$0xff]   ;;  %v136_v46 = vld [vmem:[%s6390_s0 + $0x3a0] sm:$0xff] }
  0x3c   :  { %2817 = vmatpush1.bf16.msra.mxu0 %v4425_v1  ;;  %2366 = vmatprep.subr.bf16.mxu1 %v4426_v2  ;;  %v4479_v1 = vld [vmem:[%s6389_s1 + $0x574] ss:$8 sps:$4 sm:$0xff]   ;;  %v3729_v2 = vcombine.high %v84_v57, %v92_v58  ;;  %v144_v47 = vld [vmem:[%s6390_s0 + $0x3e0] sm:$0xff]  ;;  %v21_v58 = vld [vmem:[%s6390_s0 + $0x8] sm:$0xff] }
  0x3d   :  { %2818 = vmatprep.subr.bf16.mxu0 %v4428_v3  ;;  %v3737_v3 = vcombine.high %v88_v61, %v96_v62  ;;  %v4519_v57 = vld [vmem:[%s6389_s1 + $0x5e0] ss:$8 sps:$4 sm:$0xff]  }
  0x3f   :  { %2367 = vmatpush1.bf16.msra.mxu1 %v4430_v4  ;;  %v4474_v4 = vld [vmem:[%s6389_s1 + $0x170] ss:$8 sps:$4 sm:$0xff]  }
  0x40   :  { %2819 = vmatpush1.bf16.msra.mxu0 %v4431_v5  ;;  %2449 = vmatprep.subr.bf16.mxu1 %v4434_v6  ;;  %v4477_v5 = vld [vmem:[%s6389_s1 + $0x570] ss:$8 sps:$4 sm:$0xff]   ;;  %v4482_v6 = vld [vmem:[%s6389_s1 + $0x184] ss:$8 sps:$4 sm:$0xff]  }
  0x41   :  { %2901 = vmatprep.subr.bf16.mxu0 %v4437_v7  ;;  %v4485_v7 = vld [vmem:[%s6389_s1 + $0x584] ss:$8 sps:$4 sm:$0xff]  }
  0x42   :  { %2369 = vmatmul.mubr.bf16.vlgmr.msra.gmra.mrb[0].mxu1 %v3664_v11  ;;  %v3736_v11 = vcombine.low %v88_v61, %v96_v62  ;;  %v3784_v61 = vcombine.low %v136_v46, %v144_v47  ;;  %v25_v62 = vld [vmem:[%s6390_s0 + $0x28] sm:$0xff] }
  0x43   :  { %2821 = vmatmul.mubr.bf16.vlgmr.msra.gmra.mrb[0].mxu0 %v3672_v12  ;;  %2450 = vmatpush1.bf16.msra.mxu1 %v4432_v8  ;;  %v100_v8 = vld [vmem:[%s6390_s0 + $0x280] sm:$0xff] }
  0x44   :  { %2902 = vmatpush1.bf16.msra.mxu0 %v4435_v9  ;;  %2451 = vmatprep.subr.bf16.mxu1 %v4440_v16  ;;  %v108_v9 = vld [vmem:[%s6390_s0 + $0x2c0] sm:$0xff]  ;;  %v4488_v16 = vld [vmem:[%s6389_s1 + $0x194] ss:$8 sps:$4 sm:$0xff]  }
  0x45   :  { %2903 = vmatprep.subr.bf16.mxu0 %v4443_v17  ;;  %2378 = vmatprep.mubr.bf16.mxu1 %v3681_v18  ;;  %v104_v12 = vld [vmem:[%s6390_s0 + $0x2a0] sm:$0xff]  ;;  %v4491_v17 = vld [vmem:[%s6389_s1 + $0x594] ss:$8 sps:$4 sm:$0xff]   ;;  %v3745_v18 = vcombine.high %v100_v8, %v108_v9  ;;  %v3744_v27 = vcombine.low %v100_v8, %v108_v9  ;;  %v37_v9 = vld [vmem:[%s6390_s0 + $0x88] sm:$0xff] }
  0x46   :  { %2830 = vmatprep.mubr.bf16.mxu0 %v3689_v19  ;;  %v3753_v19 = vcombine.high %v104_v12, %v112_v13  ;;  %v4528_v8 = vld [vmem:[%s6389_s1 + $0x200] ss:$8 sps:$4 sm:$0xff]  }
  0x47   :  { %2452 = vmatpush1.bf16.msra.mxu1 %v4438_v20  ;;  %v4486_v20 = vld [vmem:[%s6389_s1 + $0x190] ss:$8 sps:$4 sm:$0xff]  }
  0x48   :  { %2904 = vmatpush1.bf16.msra.mxu0 %v4441_v21  ;;  %2453 = vmatprep.subr.bf16.mxu1 %v4446_v22  ;;  %v4489_v21 = vld [vmem:[%s6389_s1 + $0x590] ss:$8 sps:$4 sm:$0xff]   ;;  %v4494_v22 = vld [vmem:[%s6389_s1 + $0x1a4] ss:$8 sps:$4 sm:$0xff]  }
  0x49   :  { %2905 = vmatprep.subr.bf16.mxu0 %v4449_v23  ;;  %v4497_v23 = vld [vmem:[%s6389_s1 + $0x5a4] ss:$8 sps:$4 sm:$0xff]  }
  0x4a   :  { %2379 = vmatmul.mubr.bf16.gmra.mrb[4].mxu1 %v3680_v28  ;;  %v3752_v28 = vcombine.low %v104_v12, %v112_v13  ;;  %v41_v13 = vld [vmem:[%s6390_s0 + $0xa8] sm:$0xff] }
  0x4b   :  { %2831 = vmatmul.mubr.bf16.gmra.mrb[4].mxu0 %v3688_v29  ;;  %2454 = vmatpush1.bf16.msra.mxu1 %v4444_v24  ;;  %v4492_v24 = vld [vmem:[%s6389_s1 + $0x1a0] ss:$8 sps:$4 sm:$0xff]  }
  0x4c   :  { %2906 = vmatpush1.bf16.msra.mxu0 %v4447_v25  ;;  %2455 = vmatprep.subr.bf16.mxu1 %v4452_v32  ;;  %v4495_v25 = vld [vmem:[%s6389_s1 + $0x5a0] ss:$8 sps:$4 sm:$0xff]   ;;  %v4500_v32 = vld [vmem:[%s6389_s1 + $0x1b4] ss:$8 sps:$4 sm:$0xff]  }
  0x4d   :  { %2907 = vmatprep.subr.bf16.mxu0 %v4455_v33  ;;  %2388 = vmatprep.mubr.bf16.mxu1 %v3697_v34  ;;  %v124_v29 = vld [vmem:[%s6390_s0 + $0x340] sm:$0xff]  ;;  %v4503_v33 = vld [vmem:[%s6389_s1 + $0x5b4] ss:$8 sps:$4 sm:$0xff]  }
  0x4e   :  { %2840 = vmatprep.mubr.bf16.mxu0 %v3705_v35  ;;  %v3761_v34 = vcombine.high %v116_v26, %v124_v29  ;;  %v3769_v35 = vcombine.high %v120_v30, %v128_v31 }
  0x4f   :  { %2456 = vmatpush1.bf16.msra.mxu1 %v4450_v36  ;;  %v4498_v36 = vld [vmem:[%s6389_s1 + $0x1b0] ss:$8 sps:$4 sm:$0xff]  }
  0x50   :  { %2908 = vmatpush1.bf16.msra.mxu0 %v4453_v37  ;;  %2457 = vmatprep.subr.bf16.mxu1 %v4458_v38  ;;  %v4501_v37 = vld [vmem:[%s6389_s1 + $0x5b0] ss:$8 sps:$4 sm:$0xff]   ;;  %v4506_v38 = vld [vmem:[%s6389_s1 + $0x1c4] ss:$8 sps:$4 sm:$0xff]  }
  0x51   :  { %2909 = vmatprep.subr.bf16.mxu0 %v4461_v39  ;;  %v4509_v39 = vld [vmem:[%s6389_s1 + $0x5c4] ss:$8 sps:$4 sm:$0xff]  }
  0x52   :  { %2389 = vmatmul.mubr.bf16.gmra.mrb[8].mxu1 %v3696_v44  ;;  %v3760_v44 = vcombine.low %v116_v26, %v124_v29  ;;  %v65_v29 = vld [vmem:[%s6390_s0 + $0x168] sm:$0xff] }
  0x53   :  { %2841 = vmatmul.mubr.bf16.gmra.mrb[8].mxu0 %v3704_v45  ;;  %2458 = vmatpush1.bf16.msra.mxu1 %v4456_v40  ;;  %v4504_v40 = vld [vmem:[%s6389_s1 + $0x1c0] ss:$8 sps:$4 sm:$0xff]   ;;  %v3768_v45 = vcombine.low %v120_v30, %v128_v31 }
  0x54   :  { %2910 = vmatpush1.bf16.msra.mxu0 %v4459_v41  ;;  %2459 = vmatprep.subr.bf16.mxu1 %v4464_v48  ;;  %v4507_v41 = vld [vmem:[%s6389_s1 + $0x5c0] ss:$8 sps:$4 sm:$0xff]   ;;  %v4512_v48 = vld [vmem:[%s6389_s1 + $0x1d4] ss:$8 sps:$4 sm:$0xff]  }
  0x55   :  { %2911 = vmatprep.subr.bf16.mxu0 %v4467_v49  ;;  %2398 = vmatprep.mubr.bf16.mxu1 %v3713_v50  ;;  %v4515_v49 = vld [vmem:[%s6389_s1 + $0x5d4] ss:$8 sps:$4 sm:$0xff]   ;;  %v3777_v50 = vcombine.high %v132_v42, %v140_v43  ;;  %v4540_v30 = vld [vmem:[%s6389_s1 + $0x220] ss:$8 sps:$4 sm:$0xff]  }
  0x56   :  { %2850 = vmatprep.mubr.bf16.mxu0 %v3721_v51  ;;  %v3785_v51 = vcombine.high %v136_v46, %v144_v47  ;;  %v4543_v31 = vld [vmem:[%s6389_s1 + $0x620] ss:$8 sps:$4 sm:$0xff]  }
  0x57   :  { %2460 = vmatpush1.bf16.msra.mxu1 %v4462_v52  ;;  %v4510_v52 = vld [vmem:[%s6389_s1 + $0x1d0] ss:$8 sps:$4 sm:$0xff]   ;;  %v73_v46 = vld [vmem:[%s6390_s0 + $0x1a8] sm:$0xff] }
  0x58   :  { %2912 = vmatpush1.bf16.msra.mxu0 %v4465_v53  ;;  %2461 = vmatprep.subr.bf16.mxu1 %v4470_v54  ;;  %v4513_v53 = vld [vmem:[%s6389_s1 + $0x5d0] ss:$8 sps:$4 sm:$0xff]   ;;  %v4518_v54 = vld [vmem:[%s6389_s1 + $0x1e4] ss:$8 sps:$4 sm:$0xff]  }
  0x59   :  { %2913 = vmatprep.subr.bf16.mxu0 %v4473_v55  ;;  %v4521_v55 = vld [vmem:[%s6389_s1 + $0x5e4] ss:$8 sps:$4 sm:$0xff]  }
  0x5a   :  { %2399 = vmatmul.mubr.bf16.gmra.mrb[12].mxu1 %v3712_v59  ;;  %v29_v59 = vld [vmem:[%s6390_s0 + $0x48] sm:$0xff] }
  0x5b   :  { %2851 = vmatmul.mubr.bf16.gmra.mrb[12].mxu0 %v3720_v60  ;;  %2462 = vmatpush1.bf16.msra.mxu1 %v4468_v56  ;;  %v4516_v56 = vld [vmem:[%s6389_s1 + $0x1e0] ss:$8 sps:$4 sm:$0xff]   ;;  %v3776_v60 = vcombine.low %v132_v42, %v140_v43 }
  0x5c   :  { %2914 = vmatpush1.bf16.msra.mxu0 %v4471_v63  ;;  %2463 = vmatprep.subr.bf16.mxu1 %v4476_v0  ;;  %v33_v63 = vld [vmem:[%s6390_s0 + $0x68] sm:$0xff]  ;;  %v4524_v0 = vld [vmem:[%s6389_s1 + $0x1f4] ss:$8 sps:$4 sm:$0xff]  }
  0x5d   :  { %2915 = vmatprep.subr.bf16.mxu0 %v4479_v1  ;;  %2408 = vmatprep.mubr.bf16.mxu1 %v3729_v2  ;;  %v4527_v1 = vld [vmem:[%s6389_s1 + $0x5f4] ss:$8 sps:$4 sm:$0xff]   ;;  %v3667_v2 = vcombine.high %v21_v58, %v29_v59  ;;  %v3674_v12 = vcombine.low %v25_v62, %v33_v63  ;;  %v69_v42 = vld [vmem:[%s6390_s0 + $0x188] sm:$0xff] }
  0x5e   :  { %2860 = vmatprep.mubr.bf16.mxu0 %v3737_v3  ;;  %v3675_v3 = vcombine.high %v25_v62, %v33_v63  ;;  %v81_v47 = vld [vmem:[%s6390_s0 + $0x1e8] sm:$0xff] }
  0x5f   :  { %2464 = vmatpush1.bf16.msra.mxu1 %v4474_v4  ;;  %v4522_v4 = vld [vmem:[%s6389_s1 + $0x1f0] ss:$8 sps:$4 sm:$0xff]   ;;  %v89_v62 = vld [vmem:[%s6390_s0 + $0x228] sm:$0xff] }
  0x60   :  { %2916 = vmatpush1.bf16.msra.mxu0 %v4477_v5  ;;  %2465 = vmatprep.subr.bf16.mxu1 %v4482_v6  ;;  %v4525_v5 = vld [vmem:[%s6389_s1 + $0x5f0] ss:$8 sps:$4 sm:$0xff]   ;;  %v4530_v6 = vld [vmem:[%s6389_s1 + $0x204] ss:$8 sps:$4 sm:$0xff]  }
  0x61   :  { %2917 = vmatprep.subr.bf16.mxu0 %v4485_v7  ;;  %v4533_v7 = vld [vmem:[%s6389_s1 + $0x604] ss:$8 sps:$4 sm:$0xff]  }
  0x62   :  { %2409 = vmatmul.mubr.bf16.gmra.mrb[16].mxu1 %v3728_v10  ;;  %v45_v10 = vld [vmem:[%s6390_s0 + $0xc8] sm:$0xff] }
  0x63   :  { %2861 = vmatmul.mubr.bf16.gmra.mrb[16].mxu0 %v3736_v11  ;;  %2466 = vmatpush1.bf16.msra.mxu1 %v4480_v14  ;;  %v3666_v11 = vcombine.low %v21_v58, %v29_v59  ;;  %v49_v14 = vld [vmem:[%s6390_s0 + $0xe8] sm:$0xff]  ;;  %v3682_v26 = vcombine.low %v37_v9, %v45_v10 }
  0x64   :  { %2918 = vmatpush1.bf16.msra.mxu0 %v4483_v15  ;;  %2467 = vmatprep.subr.bf16.mxu1 %v4488_v16  ;;  %v4531_v15 = vld [vmem:[%s6389_s1 + $0x600] ss:$8 sps:$4 sm:$0xff]   ;;  %v4536_v16 = vld [vmem:[%s6389_s1 + $0x214] ss:$8 sps:$4 sm:$0xff]  }
  0x65   :  { %2919 = vmatprep.subr.bf16.mxu0 %v4491_v17  ;;  %2418 = vmatprep.mubr.bf16.mxu1 %v3745_v18  ;;  %v4539_v17 = vld [vmem:[%s6389_s1 + $0x614] ss:$8 sps:$4 sm:$0xff]   ;;  %v3683_v18 = vcombine.high %v37_v9, %v45_v10  ;;  %v85_v58 = vld [vmem:[%s6390_s0 + $0x208] sm:$0xff] }
  0x66   :  { %2870 = vmatprep.mubr.bf16.mxu0 %v3753_v19  ;;  %v3691_v19 = vcombine.high %v41_v13, %v49_v14  ;;  %v93_v59 = vld [vmem:[%s6390_s0 + $0x248] sm:$0xff] }
  0x67   :  { %2468 = vmatpush1.bf16.msra.mxu1 %v4486_v20  ;;  %v4534_v20 = vld [vmem:[%s6389_s1 + $0x210] ss:$8 sps:$4 sm:$0xff]   ;;  %v97_v63 = vld [vmem:[%s6390_s0 + $0x268] sm:$0xff] }
  0x68   :  { %2920 = vmatpush1.bf16.msra.mxu0 %v4489_v21  ;;  %2469 = vmatprep.subr.bf16.mxu1 %v4494_v22  ;;  %v4537_v21 = vld [vmem:[%s6389_s1 + $0x610] ss:$8 sps:$4 sm:$0xff]   ;;  %v4542_v22 = vld [vmem:[%s6389_s1 + $0x224] ss:$8 sps:$4 sm:$0xff]   ;;  %v4579_v9 = vld [vmem:[%s6389_s1 + $0x680] ss:$8 sps:$4 sm:$0xff]  }
  0x69   :  { %2921 = vmatprep.subr.bf16.mxu0 %v4497_v23  ;;  %v4545_v23 = vld [vmem:[%s6389_s1 + $0x624] ss:$8 sps:$4 sm:$0xff]  }
  0x6a   :  { %2419 = vmatmul.mubr.bf16.gmra.mrb[20].mxu1 %v3744_v27  ;;  %v3690_v27 = vcombine.low %v41_v13, %v49_v14  ;;  %v101_v10 = vld [vmem:[%s6390_s0 + $0x288] sm:$0xff]  ;;  %v3738_v13 = vcombine.low %v89_v62, %v97_v63 }
  0x6b   :  { %2871 = vmatmul.mubr.bf16.gmra.mrb[20].mxu0 %v3752_v28  ;;  %2470 = vmatpush1.bf16.msra.mxu1 %v4492_v24  ;;  %v53_v24 = vld [vmem:[%s6390_s0 + $0x108] sm:$0xff] }
  0x6c   :  { %2922 = vmatpush1.bf16.msra.mxu0 %v4495_v25  ;;  %2471 = vmatprep.subr.bf16.mxu1 %v4500_v32  ;;  %v61_v25 = vld [vmem:[%s6390_s0 + $0x148] sm:$0xff]  ;;  %v4548_v32 = vld [vmem:[%s6389_s1 + $0x234] ss:$8 sps:$4 sm:$0xff]  }
  0x6d   :  { %2923 = vmatprep.subr.bf16.mxu0 %v4503_v33  ;;  %2428 = vmatprep.mubr.bf16.mxu1 %v3761_v34  ;;  %v57_v28 = vld [vmem:[%s6390_s0 + $0x128] sm:$0xff]  ;;  %v4551_v33 = vld [vmem:[%s6389_s1 + $0x634] ss:$8 sps:$4 sm:$0xff]   ;;  %v3699_v34 = vcombine.high %v53_v24, %v61_v25  ;;  %v3698_v43 = vcombine.low %v53_v24, %v61_v25 }
  0x6e   :  { %2880 = vmatprep.mubr.bf16.mxu0 %v3769_v35  ;;  %v3707_v35 = vcombine.high %v57_v28, %v65_v29  ;;  %v105_v14 = vld [vmem:[%s6390_s0 + $0x2a8] sm:$0xff] }
  0x6f   :  { %2472 = vmatpush1.bf16.msra.mxu1 %v4498_v36  ;;  %v4546_v36 = vld [vmem:[%s6389_s1 + $0x230] ss:$8 sps:$4 sm:$0xff]   ;;  %v4588_v24 = vld [vmem:[%s6389_s1 + $0x2a0] ss:$8 sps:$4 sm:$0xff]  }
  0x70   :  { %2924 = vmatpush1.bf16.msra.mxu0 %v4501_v37  ;;  %2473 = vmatprep.subr.bf16.mxu1 %v4506_v38  ;;  %v4549_v37 = vld [vmem:[%s6389_s1 + $0x630] ss:$8 sps:$4 sm:$0xff]   ;;  %v4554_v38 = vld [vmem:[%s6389_s1 + $0x244] ss:$8 sps:$4 sm:$0xff]  }
  0x71   :  { %2925 = vmatprep.subr.bf16.mxu0 %v4509_v39  ;;  %v4557_v39 = vld [vmem:[%s6389_s1 + $0x644] ss:$8 sps:$4 sm:$0xff]  }
  0x72   :  { %2429 = vmatmul.mubr.bf16.gmra.mrb[24].mxu1 %v3760_v44  ;;  %v3706_v44 = vcombine.low %v57_v28, %v65_v29  ;;  %v117_v25 = vld [vmem:[%s6390_s0 + $0x308] sm:$0xff] }
  0x73   :  { %2881 = vmatmul.mubr.bf16.gmra.mrb[24].mxu0 %v3768_v45  ;;  %2474 = vmatpush1.bf16.msra.mxu1 %v4504_v40  ;;  %v4552_v40 = vld [vmem:[%s6389_s1 + $0x240] ss:$8 sps:$4 sm:$0xff]  }
  0x74   :  { %2926 = vmatpush1.bf16.msra.mxu0 %v4507_v41  ;;  %2475 = vmatprep.subr.bf16.mxu1 %v4512_v48  ;;  %v4555_v41 = vld [vmem:[%s6389_s1 + $0x640] ss:$8 sps:$4 sm:$0xff]   ;;  %v4560_v48 = vld [vmem:[%s6389_s1 + $0x254] ss:$8 sps:$4 sm:$0xff]  }
  0x75   :  { %2927 = vmatprep.subr.bf16.mxu0 %v4515_v49  ;;  %2438 = vmatprep.mubr.bf16.mxu1 %v3777_v50  ;;  %v77_v45 = vld [vmem:[%s6390_s0 + $0x1c8] sm:$0xff]  ;;  %v4563_v49 = vld [vmem:[%s6389_s1 + $0x654] ss:$8 sps:$4 sm:$0xff]  }
  0x76   :  { %2890 = vmatprep.mubr.bf16.mxu0 %v3785_v51  ;;  %v3715_v50 = vcombine.high %v69_v42, %v77_v45  ;;  %v3723_v51 = vcombine.high %v73_v46, %v81_v47  ;;  %v121_v29 = vld [vmem:[%s6390_s0 + $0x328] sm:$0xff] }
  0x77   :  { %2476 = vmatpush1.bf16.msra.mxu1 %v4510_v52  ;;  %v4558_v52 = vld [vmem:[%s6389_s1 + $0x250] ss:$8 sps:$4 sm:$0xff]  }
  0x78   :  { %2928 = vmatpush1.bf16.msra.mxu0 %v4513_v53  ;;  %2477 = vmatprep.subr.bf16.mxu1 %v4518_v54  ;;  %v4561_v53 = vld [vmem:[%s6389_s1 + $0x650] ss:$8 sps:$4 sm:$0xff]   ;;  %v4566_v54 = vld [vmem:[%s6389_s1 + $0x264] ss:$8 sps:$4 sm:$0xff]  }
  0x79   :  { %2929 = vmatprep.subr.bf16.mxu0 %v4521_v55  ;;  %v4569_v55 = vld [vmem:[%s6389_s1 + $0x664] ss:$8 sps:$4 sm:$0xff]  }
  0x7a   :  { %2439 = vmatmul.mubr.bf16.gmra.mrb[28].mxu1 %v3776_v60  ;;  %v3714_v60 = vcombine.low %v69_v42, %v77_v45  ;;  %v145_v45 = vld [vmem:[%s6390_s0 + $0x3e8] sm:$0xff] }
  0x7b   :  { %2891 = vmatmul.mubr.bf16.gmra.mrb[28].mxu0 %v3784_v61  ;;  %2478 = vmatpush1.bf16.msra.mxu1 %v4516_v56  ;;  %v4564_v56 = vld [vmem:[%s6389_s1 + $0x260] ss:$8 sps:$4 sm:$0xff]   ;;  %v3722_v61 = vcombine.low %v73_v46, %v81_v47 }
  0x7c   :  { %2930 = vmatpush1.bf16.msra.mxu0 %v4519_v57  ;;  %2479 = vmatprep.subr.bf16.mxu1 %v4524_v0  ;;  %v4567_v57 = vld [vmem:[%s6389_s1 + $0x660] ss:$8 sps:$4 sm:$0xff]   ;;  %v4572_v0 = vld [vmem:[%s6389_s1 + $0x274] ss:$8 sps:$4 sm:$0xff]  }
  0x7d   :  { %2931 = vmatprep.subr.bf16.mxu0 %v4527_v1  ;;  %2481 = vmatprep.mubr.bf16.mxu1 %v3667_v2  ;;  %v4575_v1 = vld [vmem:[%s6389_s1 + $0x674] ss:$8 sps:$4 sm:$0xff]   ;;  %v3731_v2 = vcombine.high %v85_v58, %v93_v59  ;;  %v4600_v46 = vld [vmem:[%s6389_s1 + $0x2c0] ss:$8 sps:$4 sm:$0xff]  }
  0x7e   :  { %2933 = vmatprep.mubr.bf16.mxu0 %v3675_v3  ;;  %v3739_v3 = vcombine.high %v89_v62, %v97_v63  ;;  %v4603_v47 = vld [vmem:[%s6389_s1 + $0x6c0] ss:$8 sps:$4 sm:$0xff]   ;;  %v26_v62 = vld [vmem:[%s6390_s0 + $0x30] sm:$0xff] }
  0x7f   :  { %2480 = vmatpush1.bf16.msra.mxu1 %v4522_v4  ;;  %v4570_v4 = vld [vmem:[%s6389_s1 + $0x270] ss:$8 sps:$4 sm:$0xff]  }
  0x80   :  { %2932 = vmatpush1.bf16.msra.mxu0 %v4525_v5  ;;  %2562 = vmatprep.subr.bf16.mxu1 %v4530_v6  ;;  %v4573_v5 = vld [vmem:[%s6389_s1 + $0x670] ss:$8 sps:$4 sm:$0xff]   ;;  %v4578_v6 = vld [vmem:[%s6389_s1 + $0x284] ss:$8 sps:$4 sm:$0xff]  }
  0x81   :  { %3014 = vmatprep.subr.bf16.mxu0 %v4533_v7  ;;  %v4581_v7 = vld [vmem:[%s6389_s1 + $0x684] ss:$8 sps:$4 sm:$0xff]   ;;  %v34_v63 = vld [vmem:[%s6390_s0 + $0x70] sm:$0xff] }
  0x82   :  { %2482 = vmatmul.mubr.bf16.vlgmr.msra.gmra.mrb[0].mxu1 %v3666_v11  ;;  %v109_v11 = vld [vmem:[%s6390_s0 + $0x2c8] sm:$0xff] }
  0x83   :  { %2934 = vmatmul.mubr.bf16.vlgmr.msra.gmra.mrb[0].mxu0 %v3674_v12  ;;  %2563 = vmatpush1.bf16.msra.mxu1 %v4528_v8  ;;  %v4576_v8 = vld [vmem:[%s6389_s1 + $0x280] ss:$8 sps:$4 sm:$0xff]   ;;  %v3730_v12 = vcombine.low %v85_v58, %v93_v59  ;;  %v22_v58 = vld [vmem:[%s6390_s0 + $0x10] sm:$0xff] }
  0x84   :  { %3015 = vmatpush1.bf16.msra.mxu0 %v4531_v15  ;;  %2564 = vmatprep.subr.bf16.mxu1 %v4536_v16  ;;  %v113_v15 = vld [vmem:[%s6390_s0 + $0x2e8] sm:$0xff]  ;;  %v4584_v16 = vld [vmem:[%s6389_s1 + $0x294] ss:$8 sps:$4 sm:$0xff]  }
  0x85   :  { %3016 = vmatprep.subr.bf16.mxu0 %v4539_v17  ;;  %2491 = vmatprep.mubr.bf16.mxu1 %v3683_v18  ;;  %v4587_v17 = vld [vmem:[%s6389_s1 + $0x694] ss:$8 sps:$4 sm:$0xff]   ;;  %v3747_v18 = vcombine.high %v101_v10, %v109_v11  ;;  %v3754_v28 = vcombine.low %v105_v14, %v113_v15 }
  0x86   :  { %2943 = vmatprep.mubr.bf16.mxu0 %v3691_v19  ;;  %v3755_v19 = vcombine.high %v105_v14, %v113_v15  ;;  %v42_v14 = vld [vmem:[%s6390_s0 + $0xb0] sm:$0xff] }
  0x87   :  { %2565 = vmatpush1.bf16.msra.mxu1 %v4534_v20  ;;  %v4582_v20 = vld [vmem:[%s6389_s1 + $0x290] ss:$8 sps:$4 sm:$0xff]  }
  0x88   :  { %3017 = vmatpush1.bf16.msra.mxu0 %v4537_v21  ;;  %2566 = vmatprep.subr.bf16.mxu1 %v4542_v22  ;;  %v4585_v21 = vld [vmem:[%s6389_s1 + $0x690] ss:$8 sps:$4 sm:$0xff]   ;;  %v4590_v22 = vld [vmem:[%s6389_s1 + $0x2a4] ss:$8 sps:$4 sm:$0xff]  }
  0x89   :  { %3018 = vmatprep.subr.bf16.mxu0 %v4545_v23  ;;  %v4593_v23 = vld [vmem:[%s6389_s1 + $0x6a4] ss:$8 sps:$4 sm:$0xff]   ;;  %v50_v15 = vld [vmem:[%s6390_s0 + $0xf0] sm:$0xff] }
  0x8a   :  { %2492 = vmatmul.mubr.bf16.gmra.mrb[4].mxu1 %v3682_v26  ;;  %v125_v26 = vld [vmem:[%s6390_s0 + $0x348] sm:$0xff] }
  0x8b   :  { %2944 = vmatmul.mubr.bf16.gmra.mrb[4].mxu0 %v3690_v27  ;;  %2567 = vmatpush1.bf16.msra.mxu1 %v4540_v30  ;;  %v3746_v27 = vcombine.low %v101_v10, %v109_v11  ;;  %v129_v30 = vld [vmem:[%s6390_s0 + $0x368] sm:$0xff]  ;;  %v3762_v42 = vcombine.low %v117_v25, %v125_v26  ;;  %v38_v10 = vld [vmem:[%s6390_s0 + $0x90] sm:$0xff] }
  0x8c   :  { %3019 = vmatpush1.bf16.msra.mxu0 %v4543_v31  ;;  %2568 = vmatprep.subr.bf16.mxu1 %v4548_v32  ;;  %v4591_v31 = vld [vmem:[%s6389_s1 + $0x6a0] ss:$8 sps:$4 sm:$0xff]   ;;  %v4596_v32 = vld [vmem:[%s6389_s1 + $0x2b4] ss:$8 sps:$4 sm:$0xff]  }
  0x8d   :  { %3020 = vmatprep.subr.bf16.mxu0 %v4551_v33  ;;  %2501 = vmatprep.mubr.bf16.mxu1 %v3699_v34  ;;  %v4599_v33 = vld [vmem:[%s6389_s1 + $0x6b4] ss:$8 sps:$4 sm:$0xff]   ;;  %v3763_v34 = vcombine.high %v117_v25, %v125_v26  ;;  %v4639_v25 = vld [vmem:[%s6389_s1 + $0x720] ss:$8 sps:$4 sm:$0xff]  }
  0x8e   :  { %2953 = vmatprep.mubr.bf16.mxu0 %v3707_v35  ;;  %v3771_v35 = vcombine.high %v121_v29, %v129_v30  ;;  %v46_v11 = vld [vmem:[%s6390_s0 + $0xd0] sm:$0xff] }
  0x8f   :  { %2569 = vmatpush1.bf16.msra.mxu1 %v4546_v36  ;;  %v4594_v36 = vld [vmem:[%s6389_s1 + $0x2b0] ss:$8 sps:$4 sm:$0xff]  }
  0x90   :  { %3021 = vmatpush1.bf16.msra.mxu0 %v4549_v37  ;;  %2570 = vmatprep.subr.bf16.mxu1 %v4554_v38  ;;  %v4597_v37 = vld [vmem:[%s6389_s1 + $0x6b0] ss:$8 sps:$4 sm:$0xff]   ;;  %v4602_v38 = vld [vmem:[%s6389_s1 + $0x2c4] ss:$8 sps:$4 sm:$0xff]  }
  0x91   :  { %3022 = vmatprep.subr.bf16.mxu0 %v4557_v39  ;;  %v4605_v39 = vld [vmem:[%s6389_s1 + $0x6c4] ss:$8 sps:$4 sm:$0xff]   ;;  %v54_v26 = vld [vmem:[%s6390_s0 + $0x110] sm:$0xff] }
  0x92   :  { %2502 = vmatmul.mubr.bf16.gmra.mrb[8].mxu1 %v3698_v43  ;;  %v3770_v43 = vcombine.low %v121_v29, %v129_v30  ;;  %v3692_v29 = vcombine.low %v42_v14, %v50_v15  ;;  %v58_v30 = vld [vmem:[%s6390_s0 + $0x130] sm:$0xff] }
  0x93   :  { %2954 = vmatmul.mubr.bf16.gmra.mrb[8].mxu0 %v3706_v44  ;;  %2571 = vmatpush1.bf16.msra.mxu1 %v4552_v40  ;;  %v133_v40 = vld [vmem:[%s6390_s0 + $0x388] sm:$0xff] }
  0x94   :  { %3023 = vmatpush1.bf16.msra.mxu0 %v4555_v41  ;;  %2572 = vmatprep.subr.bf16.mxu1 %v4560_v48  ;;  %v141_v41 = vld [vmem:[%s6390_s0 + $0x3c8] sm:$0xff]  ;;  %v4608_v48 = vld [vmem:[%s6389_s1 + $0x2d4] ss:$8 sps:$4 sm:$0xff]  }
  0x95   :  { %3024 = vmatprep.subr.bf16.mxu0 %v4563_v49  ;;  %2511 = vmatprep.mubr.bf16.mxu1 %v3715_v50  ;;  %v137_v44 = vld [vmem:[%s6390_s0 + $0x3a8] sm:$0xff]  ;;  %v4611_v49 = vld [vmem:[%s6389_s1 + $0x6d4] ss:$8 sps:$4 sm:$0xff]   ;;  %v3779_v50 = vcombine.high %v133_v40, %v141_v41  ;;  %v3778_v59 = vcombine.low %v133_v40, %v141_v41 }
  0x96   :  { %2963 = vmatprep.mubr.bf16.mxu0 %v3723_v51  ;;  %v3787_v51 = vcombine.high %v137_v44, %v145_v45  ;;  %v70_v40 = vld [vmem:[%s6390_s0 + $0x190] sm:$0xff] }
  0x97   :  { %2573 = vmatpush1.bf16.msra.mxu1 %v4558_v52  ;;  %v4606_v52 = vld [vmem:[%s6389_s1 + $0x2d0] ss:$8 sps:$4 sm:$0xff]  }
  0x98   :  { %3025 = vmatpush1.bf16.msra.mxu0 %v4561_v53  ;;  %2574 = vmatprep.subr.bf16.mxu1 %v4566_v54  ;;  %v4609_v53 = vld [vmem:[%s6389_s1 + $0x6d0] ss:$8 sps:$4 sm:$0xff]   ;;  %v4614_v54 = vld [vmem:[%s6389_s1 + $0x2e4] ss:$8 sps:$4 sm:$0xff]  }
  0x99   :  { %3026 = vmatprep.subr.bf16.mxu0 %v4569_v55  ;;  %v4617_v55 = vld [vmem:[%s6389_s1 + $0x6e4] ss:$8 sps:$4 sm:$0xff]  }
  0x9a   :  { %2512 = vmatmul.mubr.bf16.gmra.mrb[12].mxu1 %v3714_v60  ;;  %v3786_v60 = vcombine.low %v137_v44, %v145_v45  ;;  %v74_v44 = vld [vmem:[%s6390_s0 + $0x1b0] sm:$0xff] }
  0x9b   :  { %2964 = vmatmul.mubr.bf16.gmra.mrb[12].mxu0 %v3722_v61  ;;  %2575 = vmatpush1.bf16.msra.mxu1 %v4564_v56  ;;  %v4612_v56 = vld [vmem:[%s6389_s1 + $0x2e0] ss:$8 sps:$4 sm:$0xff]   ;;  %v30_v61 = vld [vmem:[%s6390_s0 + $0x50] sm:$0xff] }
  0x9c   :  { %3027 = vmatpush1.bf16.msra.mxu0 %v4567_v57  ;;  %2576 = vmatprep.subr.bf16.mxu1 %v4572_v0  ;;  %v4615_v57 = vld [vmem:[%s6389_s1 + $0x6e0] ss:$8 sps:$4 sm:$0xff]   ;;  %v4620_v0 = vld [vmem:[%s6389_s1 + $0x2f4] ss:$8 sps:$4 sm:$0xff]  }
  0x9d   :  { %3028 = vmatprep.subr.bf16.mxu0 %v4575_v1  ;;  %2521 = vmatprep.mubr.bf16.mxu1 %v3731_v2  ;;  %v4623_v1 = vld [vmem:[%s6389_s1 + $0x6f4] ss:$8 sps:$4 sm:$0xff]   ;;  %v3669_v2 = vcombine.high %v22_v58, %v30_v61 }
  0x9e   :  { %2973 = vmatprep.mubr.bf16.mxu0 %v3739_v3  ;;  %v3677_v3 = vcombine.high %v26_v62, %v34_v63  ;;  %v82_v45 = vld [vmem:[%s6390_s0 + $0x1f0] sm:$0xff] }
  0x9f   :  { %2577 = vmatpush1.bf16.msra.mxu1 %v4570_v4  ;;  %v4618_v4 = vld [vmem:[%s6389_s1 + $0x2f0] ss:$8 sps:$4 sm:$0xff]  }
  0xa0   :  { %3029 = vmatpush1.bf16.msra.mxu0 %v4573_v5  ;;  %2578 = vmatprep.subr.bf16.mxu1 %v4578_v6  ;;  %v4621_v5 = vld [vmem:[%s6389_s1 + $0x6f0] ss:$8 sps:$4 sm:$0xff]   ;;  %v4626_v6 = vld [vmem:[%s6389_s1 + $0x304] ss:$8 sps:$4 sm:$0xff]  }
  0xa1   :  { %3030 = vmatprep.subr.bf16.mxu0 %v4581_v7  ;;  %v4629_v7 = vld [vmem:[%s6389_s1 + $0x704] ss:$8 sps:$4 sm:$0xff]  }
  0xa2   :  { %2522 = vmatmul.mubr.bf16.gmra.mrb[16].mxu1 %v3730_v12  ;;  %v3668_v12 = vcombine.low %v22_v58, %v30_v61  ;;  %v3724_v58 = vcombine.low %v74_v44, %v82_v45  ;;  %v98_v61 = vld [vmem:[%s6390_s0 + $0x270] sm:$0xff] }
  0xa3   :  { %2974 = vmatmul.mubr.bf16.gmra.mrb[16].mxu0 %v3738_v13  ;;  %2579 = vmatpush1.bf16.msra.mxu1 %v4576_v8  ;;  %v4624_v8 = vld [vmem:[%s6389_s1 + $0x300] ss:$8 sps:$4 sm:$0xff]   ;;  %v3676_v13 = vcombine.low %v26_v62, %v34_v63 }
  0xa4   :  { %3031 = vmatpush1.bf16.msra.mxu0 %v4579_v9  ;;  %2580 = vmatprep.subr.bf16.mxu1 %v4584_v16  ;;  %v4627_v9 = vld [vmem:[%s6389_s1 + $0x700] ss:$8 sps:$4 sm:$0xff]   ;;  %v4632_v16 = vld [vmem:[%s6389_s1 + $0x314] ss:$8 sps:$4 sm:$0xff]  }
  0xa5   :  { %3032 = vmatprep.subr.bf16.mxu0 %v4587_v17  ;;  %2531 = vmatprep.mubr.bf16.mxu1 %v3747_v18  ;;  %v4635_v17 = vld [vmem:[%s6389_s1 + $0x714] ss:$8 sps:$4 sm:$0xff]   ;;  %v3685_v18 = vcombine.high %v38_v10, %v46_v11  ;;  %v4660_v62 = vld [vmem:[%s6389_s1 + $0x360] ss:$8 sps:$4 sm:$0xff]  }
  0xa6   :  { %2983 = vmatprep.mubr.bf16.mxu0 %v3755_v19  ;;  %v3693_v19 = vcombine.high %v42_v14, %v50_v15  ;;  %v4663_v63 = vld [vmem:[%s6389_s1 + $0x760] ss:$8 sps:$4 sm:$0xff]  }
  0xa7   :  { %2581 = vmatpush1.bf16.msra.mxu1 %v4582_v20  ;;  %v4630_v20 = vld [vmem:[%s6389_s1 + $0x310] ss:$8 sps:$4 sm:$0xff]   ;;  %v4672_v14 = vld [vmem:[%s6389_s1 + $0x380] ss:$8 sps:$4 sm:$0xff]  }
  0xa8   :  { %3033 = vmatpush1.bf16.msra.mxu0 %v4585_v21  ;;  %2582 = vmatprep.subr.bf16.mxu1 %v4590_v22  ;;  %v4633_v21 = vld [vmem:[%s6389_s1 + $0x710] ss:$8 sps:$4 sm:$0xff]   ;;  %v4638_v22 = vld [vmem:[%s6389_s1 + $0x324] ss:$8 sps:$4 sm:$0xff]   ;;  %v4675_v15 = vld [vmem:[%s6389_s1 + $0x780] ss:$8 sps:$4 sm:$0xff]  }
  0xa9   :  { %3034 = vmatprep.subr.bf16.mxu0 %v4593_v23  ;;  %v4641_v23 = vld [vmem:[%s6389_s1 + $0x724] ss:$8 sps:$4 sm:$0xff]  }
  0xaa   :  { %2532 = vmatmul.mubr.bf16.gmra.mrb[20].mxu1 %v3746_v27  ;;  %v62_v27 = vld [vmem:[%s6390_s0 + $0x150] sm:$0xff] }
  0xab   :  { %2984 = vmatmul.mubr.bf16.gmra.mrb[20].mxu0 %v3754_v28  ;;  %2583 = vmatpush1.bf16.msra.mxu1 %v4588_v24  ;;  %v4636_v24 = vld [vmem:[%s6389_s1 + $0x320] ss:$8 sps:$4 sm:$0xff]   ;;  %v3684_v28 = vcombine.low %v38_v10, %v46_v11  ;;  %v3700_v41 = vcombine.low %v54_v26, %v62_v27  ;;  %v110_v11 = vld [vmem:[%s6390_s0 + $0x2d0] sm:$0xff] }
  0xac   :  { %3035 = vmatpush1.bf16.msra.mxu0 %v4591_v31  ;;  %2584 = vmatprep.subr.bf16.mxu1 %v4596_v32  ;;  %v66_v31 = vld [vmem:[%s6390_s0 + $0x170] sm:$0xff] }
  0xad   :  { %3036 = vmatprep.subr.bf16.mxu0 %v4599_v33  ;;  %2541 = vmatprep.mubr.bf16.mxu1 %v3763_v34  ;;  %v4644_v32 = vld [vmem:[%s6389_s1 + $0x334] ss:$8 sps:$4 sm:$0xff]   ;;  %v3701_v34 = vcombine.high %v54_v26, %v62_v27 }
  0xae   :  { %2993 = vmatprep.mubr.bf16.mxu0 %v3771_v35  ;;  %v4647_v33 = vld [vmem:[%s6389_s1 + $0x734] ss:$8 sps:$4 sm:$0xff]   ;;  %v3709_v35 = vcombine.high %v58_v30, %v66_v31 }
  0xaf   :  { %2585 = vmatpush1.bf16.msra.mxu1 %v4594_v36  ;;  %v4642_v36 = vld [vmem:[%s6389_s1 + $0x330] ss:$8 sps:$4 sm:$0xff]  }
  0xb0   :  { %3037 = vmatpush1.bf16.msra.mxu0 %v4597_v37  ;;  %2586 = vmatprep.subr.bf16.mxu1 %v4602_v38  ;;  %v4645_v37 = vld [vmem:[%s6389_s1 + $0x730] ss:$8 sps:$4 sm:$0xff]   ;;  %v4650_v38 = vld [vmem:[%s6389_s1 + $0x344] ss:$8 sps:$4 sm:$0xff]  }
  0xb1   :  { %3038 = vmatprep.subr.bf16.mxu0 %v4605_v39  ;;  %v4653_v39 = vld [vmem:[%s6389_s1 + $0x744] ss:$8 sps:$4 sm:$0xff]   ;;  %v126_v27 = vld [vmem:[%s6390_s0 + $0x350] sm:$0xff] }
  0xb2   :  { %2542 = vmatmul.mubr.bf16.gmra.mrb[24].mxu1 %v3762_v42  ;;  %v3708_v42 = vcombine.low %v58_v30, %v66_v31  ;;  %v4684_v30 = vld [vmem:[%s6389_s1 + $0x3a0] ss:$8 sps:$4 sm:$0xff]  }
  0xb3   :  { %2994 = vmatmul.mubr.bf16.gmra.mrb[24].mxu0 %v3770_v43  ;;  %2587 = vmatpush1.bf16.msra.mxu1 %v4600_v46  ;;  %v78_v43 = vld [vmem:[%s6390_s0 + $0x1d0] sm:$0xff]  ;;  %v4648_v46 = vld [vmem:[%s6389_s1 + $0x340] ss:$8 sps:$4 sm:$0xff]  }
  0xb4   :  { %3039 = vmatpush1.bf16.msra.mxu0 %v4603_v47  ;;  %2588 = vmatprep.subr.bf16.mxu1 %v4608_v48  ;;  %v4651_v47 = vld [vmem:[%s6389_s1 + $0x740] ss:$8 sps:$4 sm:$0xff]   ;;  %v4656_v48 = vld [vmem:[%s6389_s1 + $0x354] ss:$8 sps:$4 sm:$0xff]  }
  0xb5   :  { %3040 = vmatprep.subr.bf16.mxu0 %v4611_v49  ;;  %2551 = vmatprep.mubr.bf16.mxu1 %v3779_v50  ;;  %v4659_v49 = vld [vmem:[%s6389_s1 + $0x754] ss:$8 sps:$4 sm:$0xff]   ;;  %v3717_v50 = vcombine.high %v70_v40, %v78_v43  ;;  %v4687_v31 = vld [vmem:[%s6389_s1 + $0x7a0] ss:$8 sps:$4 sm:$0xff]  }
  0xb6   :  { %3003 = vmatprep.mubr.bf16.mxu0 %v3787_v51  ;;  %v3725_v51 = vcombine.high %v74_v44, %v82_v45  ;;  %v138_v44 = vld [vmem:[%s6390_s0 + $0x3b0] sm:$0xff] }
  0xb7   :  { %2589 = vmatpush1.bf16.msra.mxu1 %v4606_v52  ;;  %v4654_v52 = vld [vmem:[%s6389_s1 + $0x350] ss:$8 sps:$4 sm:$0xff]  }
  0xb8   :  { %3041 = vmatpush1.bf16.msra.mxu0 %v4609_v53  ;;  %2590 = vmatprep.subr.bf16.mxu1 %v4614_v54  ;;  %v4657_v53 = vld [vmem:[%s6389_s1 + $0x750] ss:$8 sps:$4 sm:$0xff]   ;;  %v4662_v54 = vld [vmem:[%s6389_s1 + $0x364] ss:$8 sps:$4 sm:$0xff]  }
  0xb9   :  { %3042 = vmatprep.subr.bf16.mxu0 %v4617_v55  ;;  %v4665_v55 = vld [vmem:[%s6389_s1 + $0x764] ss:$8 sps:$4 sm:$0xff]   ;;  %v146_v45 = vld [vmem:[%s6390_s0 + $0x3f0] sm:$0xff] }
  0xba   :  { %2552 = vmatmul.mubr.bf16.gmra.mrb[28].mxu1 %v3778_v59  ;;  %v94_v59 = vld [vmem:[%s6390_s0 + $0x250] sm:$0xff] }
  0xbb   :  { %3004 = vmatmul.mubr.bf16.gmra.mrb[28].mxu0 %v3786_v60  ;;  %2591 = vmatpush1.bf16.msra.mxu1 %v4612_v56  ;;  %v86_v56 = vld [vmem:[%s6390_s0 + $0x210] sm:$0xff] }
  0xbc   :  { %3043 = vmatpush1.bf16.msra.mxu0 %v4615_v57  ;;  %2592 = vmatprep.subr.bf16.mxu1 %v4620_v0  ;;  %v3716_v57 = vcombine.low %v70_v40, %v78_v43  ;;  %v90_v60 = vld [vmem:[%s6390_s0 + $0x230] sm:$0xff] }
  0xbd   :  { %3044 = vmatprep.subr.bf16.mxu0 %v4623_v1  ;;  %2594 = vmatprep.mubr.bf16.mxu1 %v3669_v2  ;;  %v4668_v0 = vld [vmem:[%s6389_s1 + $0x374] ss:$8 sps:$4 sm:$0xff]   ;;  %v3733_v2 = vcombine.high %v86_v56, %v94_v59  ;;  %v3740_v10 = vcombine.low %v90_v60, %v98_v61 }
  0xbe   :  { %3046 = vmatprep.mubr.bf16.mxu0 %v3677_v3  ;;  %v4671_v1 = vld [vmem:[%s6389_s1 + $0x774] ss:$8 sps:$4 sm:$0xff]   ;;  %v3741_v3 = vcombine.high %v90_v60, %v98_v61 }
  0xbf   :  { %2593 = vmatpush1.bf16.msra.mxu1 %v4618_v4  ;;  %v4666_v4 = vld [vmem:[%s6389_s1 + $0x370] ss:$8 sps:$4 sm:$0xff]  }
  0xc0   :  { %3045 = vmatpush1.bf16.msra.mxu0 %v4621_v5  ;;  %2675 = vmatprep.subr.bf16.mxu1 %v4626_v6  ;;  %v4669_v5 = vld [vmem:[%s6389_s1 + $0x770] ss:$8 sps:$4 sm:$0xff]   ;;  %v4674_v6 = vld [vmem:[%s6389_s1 + $0x384] ss:$8 sps:$4 sm:$0xff]  }
  0xc1   :  { %3127 = vmatprep.subr.bf16.mxu0 %v4629_v7  ;;  %v4677_v7 = vld [vmem:[%s6389_s1 + $0x784] ss:$8 sps:$4 sm:$0xff]   ;;  %v134_v40 = vld [vmem:[%s6390_s0 + $0x390] sm:$0xff]  ;;  %v27_v60 = vld [vmem:[%s6390_s0 + $0x38] sm:$0xff] }
  0xc2   :  { %2595 = vmatmul.mubr.bf16.vlgmr.msra.gmra.mrb[0].mxu1 %v3668_v12  ;;  %v106_v12 = vld [vmem:[%s6390_s0 + $0x2b0] sm:$0xff]  ;;  %v35_v61 = vld [vmem:[%s6390_s0 + $0x78] sm:$0xff] }
  0xc3   :  { %3047 = vmatmul.mubr.bf16.vlgmr.msra.gmra.mrb[0].mxu0 %v3676_v13  ;;  %2676 = vmatpush1.bf16.msra.mxu1 %v4624_v8  ;;  %v102_v8 = vld [vmem:[%s6390_s0 + $0x290] sm:$0xff] }
  0xc4   :  { %3128 = vmatpush1.bf16.msra.mxu0 %v4627_v9  ;;  %2677 = vmatprep.subr.bf16.mxu1 %v4632_v16  ;;  %v3732_v9 = vcombine.low %v86_v56, %v94_v59  ;;  %v114_v13 = vld [vmem:[%s6390_s0 + $0x2f0] sm:$0xff]  ;;  %v23_v56 = vld [vmem:[%s6390_s0 + $0x18] sm:$0xff] }
  0xc5   :  { %3129 = vmatprep.subr.bf16.mxu0 %v4635_v17  ;;  %2604 = vmatprep.mubr.bf16.mxu1 %v3685_v18  ;;  %v4680_v16 = vld [vmem:[%s6389_s1 + $0x394] ss:$8 sps:$4 sm:$0xff]   ;;  %v3749_v18 = vcombine.high %v102_v8, %v110_v11  ;;  %v3756_v26 = vcombine.low %v106_v12, %v114_v13 }
  0xc6   :  { %3056 = vmatprep.mubr.bf16.mxu0 %v3693_v19  ;;  %v4683_v17 = vld [vmem:[%s6389_s1 + $0x794] ss:$8 sps:$4 sm:$0xff]   ;;  %v3757_v19 = vcombine.high %v106_v12, %v114_v13 }
  0xc7   :  { %2678 = vmatpush1.bf16.msra.mxu1 %v4630_v20  ;;  %v4678_v20 = vld [vmem:[%s6389_s1 + $0x390] ss:$8 sps:$4 sm:$0xff]  }
  0xc8   :  { %3130 = vmatpush1.bf16.msra.mxu0 %v4633_v21  ;;  %2679 = vmatprep.subr.bf16.mxu1 %v4638_v22  ;;  %v4681_v21 = vld [vmem:[%s6389_s1 + $0x790] ss:$8 sps:$4 sm:$0xff]   ;;  %v4686_v22 = vld [vmem:[%s6389_s1 + $0x3a4] ss:$8 sps:$4 sm:$0xff]  }
  0xc9   :  { %3131 = vmatprep.subr.bf16.mxu0 %v4641_v23  ;;  %v4689_v23 = vld [vmem:[%s6389_s1 + $0x7a4] ss:$8 sps:$4 sm:$0xff]   ;;  %v142_v43 = vld [vmem:[%s6390_s0 + $0x3d0] sm:$0xff]  ;;  %v31_v59 = vld [vmem:[%s6390_s0 + $0x58] sm:$0xff] }
  0xca   :  { %2605 = vmatmul.mubr.bf16.gmra.mrb[4].mxu1 %v3684_v28  ;;  %v122_v28 = vld [vmem:[%s6390_s0 + $0x330] sm:$0xff] }
  0xcb   :  { %3057 = vmatmul.mubr.bf16.gmra.mrb[4].mxu0 %v3692_v29  ;;  %2680 = vmatpush1.bf16.msra.mxu1 %v4636_v24  ;;  %v118_v24 = vld [vmem:[%s6390_s0 + $0x310] sm:$0xff] }
  0xcc   :  { %3132 = vmatpush1.bf16.msra.mxu0 %v4639_v25  ;;  %2681 = vmatprep.subr.bf16.mxu1 %v4644_v32  ;;  %v3748_v25 = vcombine.low %v102_v8, %v110_v11  ;;  %v130_v29 = vld [vmem:[%s6390_s0 + $0x370] sm:$0xff]  ;;  %v43_v8 = vld [vmem:[%s6390_s0 + $0xb8] sm:$0xff]  ;;  %v3678_v11 = vcombine.low %v27_v60, %v35_v61 }
  0xcd   :  { %3133 = vmatprep.subr.bf16.mxu0 %v4647_v33  ;;  %2614 = vmatprep.mubr.bf16.mxu1 %v3701_v34  ;;  %v4692_v32 = vld [vmem:[%s6389_s1 + $0x3b4] ss:$8 sps:$4 sm:$0xff]   ;;  %v3765_v34 = vcombine.high %v118_v24, %v126_v27 }
  0xce   :  { %3066 = vmatprep.mubr.bf16.mxu0 %v3709_v35  ;;  %v4695_v33 = vld [vmem:[%s6389_s1 + $0x7b4] ss:$8 sps:$4 sm:$0xff]   ;;  %v3773_v35 = vcombine.high %v122_v28, %v130_v29 }
  0xcf   :  { %2682 = vmatpush1.bf16.msra.mxu1 %v4642_v36  ;;  %v4690_v36 = vld [vmem:[%s6389_s1 + $0x3b0] ss:$8 sps:$4 sm:$0xff]  }
  0xd0   :  { %3134 = vmatpush1.bf16.msra.mxu0 %v4645_v37  ;;  %2683 = vmatprep.subr.bf16.mxu1 %v4650_v38  ;;  %v4693_v37 = vld [vmem:[%s6389_s1 + $0x7b0] ss:$8 sps:$4 sm:$0xff]   ;;  %v4698_v38 = vld [vmem:[%s6389_s1 + $0x3c4] ss:$8 sps:$4 sm:$0xff]  }
  0xd1   :  { %3135 = vmatprep.subr.bf16.mxu0 %v4653_v39  ;;  %v4701_v39 = vld [vmem:[%s6389_s1 + $0x7c4] ss:$8 sps:$4 sm:$0xff]  }
  0xd2   :  { %2615 = vmatmul.mubr.bf16.gmra.mrb[8].mxu1 %v3700_v41  ;;  %v3764_v41 = vcombine.low %v118_v24, %v126_v27  ;;  %v75_v24 = vld [vmem:[%s6390_s0 + $0x1b8] sm:$0xff] }
  0xd3   :  { %3067 = vmatmul.mubr.bf16.gmra.mrb[8].mxu0 %v3708_v42  ;;  %2684 = vmatpush1.bf16.msra.mxu1 %v4648_v46  ;;  %v3772_v42 = vcombine.low %v122_v28, %v130_v29  ;;  %v4696_v46 = vld [vmem:[%s6389_s1 + $0x3c0] ss:$8 sps:$4 sm:$0xff]  }
  0xd4   :  { %3136 = vmatpush1.bf16.msra.mxu0 %v4651_v47  ;;  %2685 = vmatprep.subr.bf16.mxu1 %v4656_v48  ;;  %v4699_v47 = vld [vmem:[%s6389_s1 + $0x7c0] ss:$8 sps:$4 sm:$0xff]   ;;  %v4704_v48 = vld [vmem:[%s6389_s1 + $0x3d4] ss:$8 sps:$4 sm:$0xff]  }
  0xd5   :  { %3137 = vmatprep.subr.bf16.mxu0 %v4659_v49  ;;  %2624 = vmatprep.mubr.bf16.mxu1 %v3717_v50  ;;  %v4707_v49 = vld [vmem:[%s6389_s1 + $0x7d4] ss:$8 sps:$4 sm:$0xff]   ;;  %v3781_v50 = vcombine.high %v134_v40, %v142_v43 }
  0xd6   :  { %3076 = vmatprep.mubr.bf16.mxu0 %v3725_v51  ;;  %v3789_v51 = vcombine.high %v138_v44, %v146_v45 }
  0xd7   :  { %2686 = vmatpush1.bf16.msra.mxu1 %v4654_v52  ;;  %v4702_v52 = vld [vmem:[%s6389_s1 + $0x3d0] ss:$8 sps:$4 sm:$0xff]  }
  0xd8   :  { %3138 = vmatpush1.bf16.msra.mxu0 %v4657_v53  ;;  %2687 = vmatprep.subr.bf16.mxu1 %v4662_v54  ;;  %v4705_v53 = vld [vmem:[%s6389_s1 + $0x7d0] ss:$8 sps:$4 sm:$0xff]   ;;  %v4710_v54 = vld [vmem:[%s6389_s1 + $0x3e4] ss:$8 sps:$4 sm:$0xff]  }
  0xd9   :  { %3139 = vmatprep.subr.bf16.mxu0 %v4665_v55  ;;  %v4713_v55 = vld [vmem:[%s6389_s1 + $0x7e4] ss:$8 sps:$4 sm:$0xff]  }
  0xda   :  { %2625 = vmatmul.mubr.bf16.gmra.mrb[12].mxu1 %v3716_v57  ;;  %v3780_v57 = vcombine.low %v134_v40, %v142_v43  ;;  %v107_v40 = vld [vmem:[%s6390_s0 + $0x2b8] sm:$0xff] }
  0xdb   :  { %3077 = vmatmul.mubr.bf16.gmra.mrb[12].mxu0 %v3724_v58  ;;  %2688 = vmatpush1.bf16.msra.mxu1 %v4660_v62  ;;  %v3788_v58 = vcombine.low %v138_v44, %v146_v45  ;;  %v4708_v62 = vld [vmem:[%s6389_s1 + $0x3e0] ss:$8 sps:$4 sm:$0xff]  }
  0xdc   :  { %3140 = vmatpush1.bf16.msra.mxu0 %v4663_v63  ;;  %2689 = vmatprep.subr.bf16.mxu1 %v4668_v0  ;;  %v4711_v63 = vld [vmem:[%s6389_s1 + $0x7e0] ss:$8 sps:$4 sm:$0xff]   ;;  %v4716_v0 = vld [vmem:[%s6389_s1 + $0x3f4] ss:$8 sps:$4 sm:$0xff]  }
  0xdd   :  { %3141 = vmatprep.subr.bf16.mxu0 %v4671_v1  ;;  %2634 = vmatprep.mubr.bf16.mxu1 %v3733_v2  ;;  %v4719_v1 = vld [vmem:[%s6389_s1 + $0x7f4] ss:$8 sps:$4 sm:$0xff]   ;;  %v3671_v2 = vcombine.high %v23_v56, %v31_v59 }
  0xde   :  { %3086 = vmatprep.mubr.bf16.mxu0 %v3741_v3  ;;  %v3679_v3 = vcombine.high %v27_v60, %v35_v61 }
  0xdf   :  { %2690 = vmatpush1.bf16.msra.mxu1 %v4666_v4  ;;  %v4714_v4 = vld [vmem:[%s6389_s1 + $0x3f0] ss:$8 sps:$4 sm:$0xff]  }
  0xe0   :  { %3142 = vmatpush1.bf16.msra.mxu0 %v4669_v5  ;;  %2691 = vmatprep.subr.bf16.mxu1 %v4674_v6  ;;  %v4717_v5 = vld [vmem:[%s6389_s1 + $0x7f0] ss:$8 sps:$4 sm:$0xff]  }
  0xe1   :  { %3143 = vmatprep.subr.bf16.mxu0 %v4677_v7  ;;  %v39_v6 = vld [vmem:[%s6390_s0 + $0x98] sm:$0xff] }
  0xe2   :  { %2635 = vmatmul.mubr.bf16.gmra.mrb[16].mxu1 %v3732_v9  ;;  %v47_v7 = vld [vmem:[%s6390_s0 + $0xd8] sm:$0xff] }
  0xe3   :  { %3087 = vmatmul.mubr.bf16.gmra.mrb[16].mxu0 %v3740_v10  ;;  %2692 = vmatpush1.bf16.msra.mxu1 %v4672_v14  ;;  %v51_v9 = vld [vmem:[%s6390_s0 + $0xf8] sm:$0xff]  ;;  %v3670_v10 = vcombine.low %v23_v56, %v31_v59  ;;  %v3687_v12 = vcombine.high %v39_v6, %v47_v7 }
  0xe4   :  { %3144 = vmatpush1.bf16.msra.mxu0 %v4675_v15  ;;  %2693 = vmatprep.subr.bf16.mxu1 %v4680_v16  ;;  %v3695_v13 = vcombine.high %v43_v8, %v51_v9  ;;  %v55_v14 = vld [vmem:[%s6390_s0 + $0x118] sm:$0xff] }
  0xe5   :  { %3145 = vmatprep.subr.bf16.mxu0 %v4683_v17  ;;  %2644 = vmatprep.mubr.bf16.mxu1 %v3749_v18  ;;  %v63_v15 = vld [vmem:[%s6390_s0 + $0x158] sm:$0xff]  ;;  %v3686_v18 = vcombine.low %v39_v6, %v47_v7 }
  0xe6   :  { %3096 = vmatprep.mubr.bf16.mxu0 %v3757_v19  ;;  %v59_v16 = vld [vmem:[%s6390_s0 + $0x138] sm:$0xff]  ;;  %v3694_v19 = vcombine.low %v43_v8, %v51_v9 }
  0xe7   :  { %2694 = vmatpush1.bf16.msra.mxu1 %v4678_v20  ;;  %v67_v17 = vld [vmem:[%s6390_s0 + $0x178] sm:$0xff]  ;;  %v3703_v20 = vcombine.high %v55_v14, %v63_v15 }
  0xe8   :  { %3146 = vmatpush1.bf16.msra.mxu0 %v4681_v21  ;;  %2695 = vmatprep.subr.bf16.mxu1 %v4686_v22  ;;  %v3711_v21 = vcombine.high %v59_v16, %v67_v17  ;;  %v71_v22 = vld [vmem:[%s6390_s0 + $0x198] sm:$0xff]  ;;  %v3710_v27 = vcombine.low %v59_v16, %v67_v17 }
  0xe9   :  { %3147 = vmatprep.subr.bf16.mxu0 %v4689_v23  ;;  %v79_v23 = vld [vmem:[%s6390_s0 + $0x1d8] sm:$0xff] }
  0xea   :  { %2645 = vmatmul.mubr.bf16.gmra.mrb[20].mxu1 %v3748_v25  ;;  %v83_v25 = vld [vmem:[%s6390_s0 + $0x1f8] sm:$0xff]  ;;  %v3719_v28 = vcombine.high %v71_v22, %v79_v23 }
  0xeb   :  { %3097 = vmatmul.mubr.bf16.gmra.mrb[20].mxu0 %v3756_v26  ;;  %2696 = vmatpush1.bf16.msra.mxu1 %v4684_v30  ;;  %v3702_v26 = vcombine.low %v55_v14, %v63_v15  ;;  %v3727_v29 = vcombine.high %v75_v24, %v83_v25  ;;  %v87_v30 = vld [vmem:[%s6390_s0 + $0x218] sm:$0xff] }
  0xec   :  { %3148 = vmatpush1.bf16.msra.mxu0 %v4687_v31  ;;  %2697 = vmatprep.subr.bf16.mxu1 %v4692_v32  ;;  %v95_v31 = vld [vmem:[%s6390_s0 + $0x258] sm:$0xff] }
  0xed   :  { %3149 = vmatprep.subr.bf16.mxu0 %v4695_v33  ;;  %2654 = vmatprep.mubr.bf16.mxu1 %v3765_v34  ;;  %v91_v32 = vld [vmem:[%s6390_s0 + $0x238] sm:$0xff]  ;;  %v3718_v34 = vcombine.low %v71_v22, %v79_v23 }
  0xee   :  { %3106 = vmatprep.mubr.bf16.mxu0 %v3773_v35  ;;  %v99_v33 = vld [vmem:[%s6390_s0 + $0x278] sm:$0xff]  ;;  %v3726_v35 = vcombine.low %v75_v24, %v83_v25 }
  0xef   :  { %2698 = vmatpush1.bf16.msra.mxu1 %v4690_v36  ;;  %v3735_v36 = vcombine.high %v87_v30, %v95_v31  ;;  %v3742_v43 = vcombine.low %v91_v32, %v99_v33  ;;  %v139_v56 = vld [vmem:[%s6390_s0 + $0x3b8] sm:$0xff] }
  0xf0   :  { %3150 = vmatpush1.bf16.msra.mxu0 %v4693_v37  ;;  %2699 = vmatprep.subr.bf16.mxu1 %v4698_v38  ;;  %v3743_v37 = vcombine.high %v91_v32, %v99_v33  ;;  %v103_v38 = vld [vmem:[%s6390_s0 + $0x298] sm:$0xff] }
  0xf1   :  { %3151 = vmatprep.subr.bf16.mxu0 %v4701_v39  ;;  %v111_v39 = vld [vmem:[%s6390_s0 + $0x2d8] sm:$0xff] }
  0xf2   :  { %2655 = vmatmul.mubr.bf16.gmra.mrb[24].mxu1 %v3764_v41  ;;  %v115_v41 = vld [vmem:[%s6390_s0 + $0x2f8] sm:$0xff]  ;;  %v3751_v44 = vcombine.high %v103_v38, %v111_v39 }
  0xf3   :  { %3107 = vmatmul.mubr.bf16.gmra.mrb[24].mxu0 %v3772_v42  ;;  %2700 = vmatpush1.bf16.msra.mxu1 %v4696_v46  ;;  %v3734_v42 = vcombine.low %v87_v30, %v95_v31  ;;  %v3759_v45 = vcombine.high %v107_v40, %v115_v41  ;;  %v119_v46 = vld [vmem:[%s6390_s0 + $0x318] sm:$0xff] }
  0xf4   :  { %3152 = vmatpush1.bf16.msra.mxu0 %v4699_v47  ;;  %2701 = vmatprep.subr.bf16.mxu1 %v4704_v48  ;;  %v127_v47 = vld [vmem:[%s6390_s0 + $0x358] sm:$0xff] }
  0xf5   :  { %3153 = vmatprep.subr.bf16.mxu0 %v4707_v49  ;;  %2664 = vmatprep.mubr.bf16.mxu1 %v3781_v50  ;;  %v123_v48 = vld [vmem:[%s6390_s0 + $0x338] sm:$0xff]  ;;  %v3750_v50 = vcombine.low %v103_v38, %v111_v39 }
  0xf6   :  { %3116 = vmatprep.mubr.bf16.mxu0 %v3789_v51  ;;  %v131_v49 = vld [vmem:[%s6390_s0 + $0x378] sm:$0xff]  ;;  %v3758_v51 = vcombine.low %v107_v40, %v115_v41 }
  0xf7   :  { %2702 = vmatpush1.bf16.msra.mxu1 %v4702_v52  ;;  %v3767_v52 = vcombine.high %v119_v46, %v127_v47  ;;  %v3774_v59 = vcombine.low %v123_v48, %v131_v49 }
  0xf8   :  { %3154 = vmatpush1.bf16.msra.mxu0 %v4705_v53  ;;  %2703 = vmatprep.subr.bf16.mxu1 %v4710_v54  ;;  %v3775_v53 = vcombine.high %v123_v48, %v131_v49  ;;  %v135_v54 = vld [vmem:[%s6390_s0 + $0x398] sm:$0xff] }
  0xf9   :  { %3155 = vmatprep.subr.bf16.mxu0 %v4713_v55  ;;  %v143_v55 = vld [vmem:[%s6390_s0 + $0x3d8] sm:$0xff] }
  0xfa   :  { %2665 = vmatmul.mubr.bf16.gmra.mrb[28].mxu1 %v3780_v57  ;;  %v147_v57 = vld [vmem:[%s6390_s0 + $0x3f8] sm:$0xff]  ;;  %v3783_v60 = vcombine.high %v135_v54, %v143_v55 }
  0xfb   :  { %3117 = vmatmul.mubr.bf16.gmra.mrb[28].mxu0 %v3788_v58  ;;  %2704 = vmatpush1.bf16.msra.mxu1 %v4708_v62  ;;  %v3766_v58 = vcombine.low %v119_v46, %v127_v47  ;;  %v3791_v61 = vcombine.high %v139_v56, %v147_v57  ;;  %v3782_v62 = vcombine.low %v135_v54, %v143_v55 }
  0xfc   :  { %3156 = vmatpush1.bf16.msra.mxu0 %v4711_v63  ;;  %2705 = vmatprep.subr.bf16.mxu1 %v4716_v0  ;;  %v3790_v63 = vcombine.low %v139_v56, %v147_v57  ;;  %v406_v0 = vlaneseq }
  0xfd   :  { %3157 = vmatprep.subr.bf16.mxu0 %v4719_v1  ;;  %2707 = vmatprep.mubr.bf16.mxu1 %v3671_v2 }
  0xfe   :  { %3159 = vmatprep.mubr.bf16.mxu0 %v3679_v3  ;;  %v407_v1 = vshrl.u32 %v406_v0, 7  ;;  %v404_v3 = vld [vmem:[%s6391_s2] sm:$0x3] }
  0xff   :  { %2706 = vmatpush1.bf16.msra.mxu1 %v4714_v4 }
 0x100   :  { %3158 = vmatpush1.bf16.msra.mxu0 %v4717_v5  ;;  %v5906_v2 = vsub.s32 0, %v407_v1  ;;  %v5911_v4 = vsub.s32 1, %v407_v1 }
 0x102   :  { %2708 = vmatmul.mubr.bf16.vlgmr.msra.gmra.mrb[0].mxu1 %v3670_v10  ;;  %v5914_v5 = vrot.slane %v404_v3, %v5906_v2  ;;  %v5917_v6 = vrot.slane %v404_v3, %v5911_v4 }
 0x103   :  { %3160 = vmatmul.mubr.bf16.vlgmr.msra.gmra.mrb[0].mxu0 %v3678_v11  ;;  %2717 = vmatprep.mubr.bf16.mxu1 %v3687_v12 }
 0x104   :  { %3169 = vmatprep.mubr.bf16.mxu0 %v3695_v13 }
 0x10a   :  { %2718 = vmatmul.mubr.bf16.gmra.mrb[4].mxu1 %v3686_v18 }
 0x10b   :  { %3170 = vmatmul.mubr.bf16.gmra.mrb[4].mxu0 %v3694_v19  ;;  %2727 = vmatprep.mubr.bf16.mxu1 %v3703_v20 }
 0x10c   :  { %3179 = vmatprep.mubr.bf16.mxu0 %v3711_v21 }
 0x112   :  { %2728 = vmatmul.mubr.bf16.gmra.mrb[8].mxu1 %v3702_v26 }
 0x113   :  { %3180 = vmatmul.mubr.bf16.gmra.mrb[8].mxu0 %v3710_v27  ;;  %2737 = vmatprep.mubr.bf16.mxu1 %v3719_v28 }
 0x114   :  { %3189 = vmatprep.mubr.bf16.mxu0 %v3727_v29 }
 0x11a   :  { %2738 = vmatmul.mubr.bf16.gmra.mrb[12].mxu1 %v3718_v34 }
 0x11b   :  { %3190 = vmatmul.mubr.bf16.gmra.mrb[12].mxu0 %v3726_v35  ;;  %2747 = vmatprep.mubr.bf16.mxu1 %v3735_v36 }
 0x11c   :  { %3199 = vmatprep.mubr.bf16.mxu0 %v3743_v37 }
 0x122   :  { %2748 = vmatmul.mubr.bf16.gmra.mrb[16].mxu1 %v3734_v42 }
 0x123   :  { %3200 = vmatmul.mubr.bf16.gmra.mrb[16].mxu0 %v3742_v43  ;;  %2757 = vmatprep.mubr.bf16.mxu1 %v3751_v44 }
 0x124   :  { %3209 = vmatprep.mubr.bf16.mxu0 %v3759_v45 }
 0x12a   :  { %2758 = vmatmul.mubr.bf16.gmra.mrb[20].mxu1 %v3750_v50 }
 0x12b   :  { %3210 = vmatmul.mubr.bf16.gmra.mrb[20].mxu0 %v3758_v51  ;;  %2767 = vmatprep.mubr.bf16.mxu1 %v3767_v52 }
 0x12c   :  { %3219 = vmatprep.mubr.bf16.mxu0 %v3775_v53 }
 0x132   :  { %2768 = vmatmul.mubr.bf16.gmra.mrb[24].mxu1 %v3766_v58 }
 0x133   :  { %3220 = vmatmul.mubr.bf16.gmra.mrb[24].mxu0 %v3774_v59  ;;  %2777 = vmatprep.mubr.bf16.mxu1 %v3783_v60 }
 0x134   :  { %3229 = vmatprep.mubr.bf16.mxu0 %v3791_v61 }
 0x13a   :  { %2778 = vmatmul.mubr.bf16.gmra.mrb[28].mxu1 %v3782_v62 }
 0x13b   :  { %3230 = vmatmul.mubr.bf16.gmra.mrb[28].mxu0 %v3790_v63 }
 0x1d5   :  { %v2709_v7 = vpop.f32.mrb[0].mxu1 }
 0x1d6   :  { %v3161_v8 = vpop.f32.mrb[0].mxu0  ;;  %v4080_v9 = vadd.f32 %v2709_v7, %v5914_v5  ;;  %v2711_v10 = vpop.f32.mrb[1].mxu1 }
 0x1d7   :  { %v3163_v11 = vpop.f32.mrb[1].mxu0  ;;  %v4082_v12 = vadd.f32 %v2711_v10, %v5917_v6  ;;  %v2713_v13 = vpop.f32.mrb[2].mxu1 }
 0x1d8   :  { %v3165_v14 = vpop.f32.mrb[2].mxu0  ;;  %v5921_v15 = vadd.f32 %v4080_v9, %v3161_v8  ;;  %v4084_v16 = vadd.f32 %v2713_v13, %v5914_v5  ;;  %v2715_v17 = vpop.f32.mrb[3].mxu1 }
 0x1d9   :  { %v3167_v18 = vpop.f32.mrb[3].mxu0  ;;  %v5924_v19 = vadd.f32 %v4082_v12, %v3163_v11  ;;  %v4086_v20 = vadd.f32 %v2715_v17, %v5917_v6 }
 0x1da   :  { %v5927_v21 = vadd.f32 %v4084_v16, %v3165_v14 }
 0x1db   :  { %v5929_v22 = vadd.f32 %v4086_v20, %v3167_v18 }
 0x1dc   :  { %v3240_v23 = vadd.f32 %v5927_v21, %v5921_v15 }
 0x1dd   :  { %v3261_v24 = vadd.f32 %v5929_v22, %v5924_v19  ;;  %v2719_v25 = vpop.f32.mrb[4].mxu1 }
 0x1de   :  { %v3171_v26 = vpop.f32.mrb[4].mxu0  ;;  %v4088_v27 = vadd.f32 %v2719_v25, %v5914_v5  ;;  %v2721_v28 = vpop.f32.mrb[5].mxu1 }
 0x1df   :  { %v3173_v29 = vpop.f32.mrb[5].mxu0  ;;  %v4090_v30 = vadd.f32 %v2721_v28, %v5917_v6  ;;  %v2723_v31 = vpop.f32.mrb[6].mxu1 }
 0x1e0   :  { %v3175_v32 = vpop.f32.mrb[6].mxu0  ;;  %v5937_v33 = vadd.f32 %v4088_v27, %v3171_v26  ;;  %v4092_v34 = vadd.f32 %v2723_v31, %v5914_v5  ;;  %v2725_v35 = vpop.f32.mrb[7].mxu1 }
 0x1e1   :  { %v3177_v36 = vpop.f32.mrb[7].mxu0  ;;  %v5940_v37 = vadd.f32 %v4090_v30, %v3173_v29  ;;  %v4094_v38 = vadd.f32 %v2725_v35, %v5917_v6 }
 0x1e2   :  { %v3241_v39 = vadd.f32 %v5937_v33, %v3240_v23  ;;  %v5944_v40 = vadd.f32 %v4092_v34, %v3175_v32 }
 0x1e3   :  { %v3262_v41 = vadd.f32 %v5940_v37, %v3261_v24  ;;  %v5947_v42 = vadd.f32 %v4094_v38, %v3177_v36 }
 0x1e4   :  { %v3242_v43 = vadd.f32 %v5944_v40, %v3241_v39 }
 0x1e5   :  { %v3263_v44 = vadd.f32 %v5947_v42, %v3262_v41  ;;  %v2729_v45 = vpop.f32.mrb[8].mxu1 }
 0x1e6   :  { %v3181_v46 = vpop.f32.mrb[8].mxu0  ;;  %v4096_v47 = vadd.f32 %v2729_v45, %v5914_v5  ;;  %v2731_v48 = vpop.f32.mrb[9].mxu1 }
 0x1e7   :  { %v3183_v49 = vpop.f32.mrb[9].mxu0  ;;  %v4098_v50 = vadd.f32 %v2731_v48, %v5917_v6  ;;  %v2733_v51 = vpop.f32.mrb[10].mxu1 }
 0x1e8   :  { %v3185_v52 = vpop.f32.mrb[10].mxu0  ;;  %v5953_v53 = vadd.f32 %v4096_v47, %v3181_v46  ;;  %v4100_v54 = vadd.f32 %v2733_v51, %v5914_v5  ;;  %v2735_v55 = vpop.f32.mrb[11].mxu1 }
 0x1e9   :  { %v3187_v56 = vpop.f32.mrb[11].mxu0  ;;  %v5956_v57 = vadd.f32 %v4098_v50, %v3183_v49  ;;  %v4102_v58 = vadd.f32 %v2735_v55, %v5917_v6 }
 0x1ea   :  { %v3243_v59 = vadd.f32 %v5953_v53, %v3242_v43  ;;  %v5960_v60 = vadd.f32 %v4100_v54, %v3185_v52 }
 0x1eb   :  { %v3264_v61 = vadd.f32 %v5956_v57, %v3263_v44  ;;  %v5963_v62 = vadd.f32 %v4102_v58, %v3187_v56 }
 0x1ec   :  { %v3244_v63 = vadd.f32 %v5960_v60, %v3243_v59 }
 0x1ed   :  { %v3265_v0 = vadd.f32 %v5963_v62, %v3264_v61  ;;  %v2739_v1 = vpop.f32.mrb[12].mxu1 }
 0x1ee   :  { %v3191_v3 = vpop.f32.mrb[12].mxu0  ;;  %v4104_v7 = vadd.f32 %v2739_v1, %v5914_v5  ;;  %v2741_v8 = vpop.f32.mrb[13].mxu1 }
 0x1ef   :  { %v3193_v9 = vpop.f32.mrb[13].mxu0  ;;  %v4106_v10 = vadd.f32 %v2741_v8, %v5917_v6  ;;  %v2743_v11 = vpop.f32.mrb[14].mxu1 }
 0x1f0   :  { %v3195_v12 = vpop.f32.mrb[14].mxu0  ;;  %v5969_v13 = vadd.f32 %v4104_v7, %v3191_v3  ;;  %v4108_v14 = vadd.f32 %v2743_v11, %v5914_v5  ;;  %v2745_v16 = vpop.f32.mrb[15].mxu1 }
 0x1f1   :  { %v3197_v17 = vpop.f32.mrb[15].mxu0  ;;  %v5972_v18 = vadd.f32 %v4106_v10, %v3193_v9  ;;  %v4110_v20 = vadd.f32 %v2745_v16, %v5917_v6 }
 0x1f2   :  { %v3245_v23 = vadd.f32 %v5969_v13, %v3244_v63  ;;  %v5976_v24 = vadd.f32 %v4108_v14, %v3195_v12 }
 0x1f3   :  { %v3266_v25 = vadd.f32 %v5972_v18, %v3265_v0  ;;  %v5979_v26 = vadd.f32 %v4110_v20, %v3197_v17 }
 0x1f4   :  { %v3246_v27 = vadd.f32 %v5976_v24, %v3245_v23 }
 0x1f5   :  { %v3267_v28 = vadd.f32 %v5979_v26, %v3266_v25  ;;  %v2749_v29 = vpop.f32.mrb[16].mxu1 }
 0x1f6   :  { %v3201_v30 = vpop.f32.mrb[16].mxu0  ;;  %v4112_v31 = vadd.f32 %v2749_v29, %v5914_v5  ;;  %v2751_v32 = vpop.f32.mrb[17].mxu1 }
 0x1f7   :  { %v3203_v34 = vpop.f32.mrb[17].mxu0  ;;  %v4114_v35 = vadd.f32 %v2751_v32, %v5917_v6  ;;  %v2753_v36 = vpop.f32.mrb[18].mxu1 }
 0x1f8   :  { %v3205_v38 = vpop.f32.mrb[18].mxu0  ;;  %v5985_v39 = vadd.f32 %v4112_v31, %v3201_v30  ;;  %v4116_v41 = vadd.f32 %v2753_v36, %v5914_v5  ;;  %v2755_v43 = vpop.f32.mrb[19].mxu1 }
 0x1f9   :  { %v3207_v44 = vpop.f32.mrb[19].mxu0  ;;  %v5988_v45 = vadd.f32 %v4114_v35, %v3203_v34  ;;  %v4118_v46 = vadd.f32 %v2755_v43, %v5917_v6 }
 0x1fa   :  { %v3247_v47 = vadd.f32 %v5985_v39, %v3246_v27  ;;  %v5992_v48 = vadd.f32 %v4116_v41, %v3205_v38 }
 0x1fb   :  { %v3268_v49 = vadd.f32 %v5988_v45, %v3267_v28  ;;  %v5995_v50 = vadd.f32 %v4118_v46, %v3207_v44 }
 0x1fc   :  { %v3248_v51 = vadd.f32 %v5992_v48, %v3247_v47 }
 0x1fd   :  { %v3269_v52 = vadd.f32 %v5995_v50, %v3268_v49  ;;  %v2759_v54 = vpop.f32.mrb[20].mxu1 }
 0x1fe   :  { %v3211_v55 = vpop.f32.mrb[20].mxu0  ;;  %v4120_v56 = vadd.f32 %v2759_v54, %v5914_v5  ;;  %v2761_v58 = vpop.f32.mrb[21].mxu1 }
 0x1ff   :  { %v3213_v59 = vpop.f32.mrb[21].mxu0  ;;  %v4122_v61 = vadd.f32 %v2761_v58, %v5917_v6  ;;  %v2763_v63 = vpop.f32.mrb[22].mxu1 }
 0x200   :  { %v3215_v0 = vpop.f32.mrb[22].mxu0  ;;  %v6001_v1 = vadd.f32 %v4120_v56, %v3211_v55  ;;  %v4124_v3 = vadd.f32 %v2763_v63, %v5914_v5  ;;  %v2765_v7 = vpop.f32.mrb[23].mxu1 }
 0x201   :  { %v3217_v8 = vpop.f32.mrb[23].mxu0  ;;  %v6004_v9 = vadd.f32 %v4122_v61, %v3213_v59  ;;  %v4126_v10 = vadd.f32 %v2765_v7, %v5917_v6 }
 0x202   :  { %v3249_v11 = vadd.f32 %v6001_v1, %v3248_v51  ;;  %v6008_v12 = vadd.f32 %v4124_v3, %v3215_v0 }
 0x203   :  { %v3270_v14 = vadd.f32 %v6004_v9, %v3269_v52  ;;  %v6011_v16 = vadd.f32 %v4126_v10, %v3217_v8 }
 0x204   :  { %v3250_v17 = vadd.f32 %v6008_v12, %v3249_v11 }
 0x205   :  { %v3271_v20 = vadd.f32 %v6011_v16, %v3270_v14  ;;  %v2769_v23 = vpop.f32.mrb[24].mxu1 }
 0x206   :  { %v3221_v25 = vpop.f32.mrb[24].mxu0  ;;  %v4128_v27 = vadd.f32 %v2769_v23, %v5914_v5  ;;  %v2771_v28 = vpop.f32.mrb[25].mxu1 }
 0x207   :  { %v3223_v29 = vpop.f32.mrb[25].mxu0  ;;  %v4130_v30 = vadd.f32 %v2771_v28, %v5917_v6  ;;  %v2773_v31 = vpop.f32.mrb[26].mxu1 }
 0x208   :  { %v3225_v32 = vpop.f32.mrb[26].mxu0  ;;  %v4129_v34 = vadd.f32 %v4128_v27, %v3221_v25  ;;  %v4132_v35 = vadd.f32 %v2773_v31, %v5914_v5  ;;  %v2775_v36 = vpop.f32.mrb[27].mxu1 }
 0x209   :  { %v3227_v38 = vpop.f32.mrb[27].mxu0  ;;  %v6018_v41 = vadd.f32 %v4130_v30, %v3223_v29  ;;  %v4134_v43 = vadd.f32 %v2775_v36, %v5917_v6 }
 0x20a   :  { %v3251_v44 = vadd.f32 %v4129_v34, %v3250_v17  ;;  %v4133_v46 = vadd.f32 %v4132_v35, %v3225_v32 }
 0x20b   :  { %v3272_v47 = vadd.f32 %v6018_v41, %v3271_v20  ;;  %v6022_v49 = vadd.f32 %v4134_v43, %v3227_v38 }
 0x20c   :  { %v3252_v51 = vadd.f32 %v4133_v46, %v3251_v44 }
 0x20d   :  { %v3273_v52 = vadd.f32 %v6022_v49, %v3272_v47  ;;  %v2779_v54 = vpop.f32.mrb[28].mxu1 }
 0x20e   :  { %v3231_v55 = vpop.f32.mrb[28].mxu0  ;;  %v4136_v56 = vadd.f32 %v2779_v54, %v5914_v5  ;;  %v2781_v58 = vpop.f32.mrb[29].mxu1 }
 0x20f   :  { %v3233_v59 = vpop.f32.mrb[29].mxu0  ;;  %v4138_v61 = vadd.f32 %v2781_v58, %v5917_v6  ;;  %v2783_v63 = vpop.f32.mrb[30].mxu1 }
 0x210   :  { %v3235_v0 = vpop.f32.mrb[30].mxu0  ;;  %v4137_v3 = vadd.f32 %v4136_v56, %v3231_v55  ;;  %v4140_v7 = vadd.f32 %v2783_v63, %v5914_v5  ;;  %v2785_v8 = vpop.f32.mrb[31].mxu1 }
 0x211   :  { %v3237_v10 = vpop.f32.mrb[31].mxu0  ;;  %v4139_v11 = vadd.f32 %v4138_v61, %v3233_v59  ;;  %v4142_v14 = vadd.f32 %v2785_v8, %v5917_v6 }
 0x212   :  { %v3253_v17 = vadd.f32 %v4137_v3, %v3252_v51  ;;  %v4141_v20 = vadd.f32 %v4140_v7, %v3235_v0 }
 0x213   :  { %v3274_v23 = vadd.f32 %v4139_v11, %v3273_v52  ;;  %v4143_v25 = vadd.f32 %v4142_v14, %v3237_v10 }
 0x214   :  { %v3254_v27 = vadd.f32 %v4141_v20, %v3253_v17 }
 0x215   :  { %v3275_v28 = vadd.f32 %v4143_v25, %v3274_v23 }
 0x216   :  { %v3255_v29 = vrot.slane %v3254_v27, 4 }
 0x217   :  { %v3276_v30 = vrot.slane %v3275_v28, 4 }
 0x218   :  { %v3256_v31 = vadd.f32 %v3255_v29, %v3254_v27 }
 0x219   :  { %v3277_v32 = vadd.f32 %v3276_v30, %v3275_v28 }
 0x21a   :  { %v3257_v35 = vrot.slane %v3256_v31, 2 }
 0x21b   :  { %v3278_v36 = vrot.slane %v3277_v32, 2 }
 0x21c   :  { %v3258_v38 = vadd.f32 %v3257_v35, %v3256_v31 }
 0x21d   :  { %v3279_v43 = vadd.f32 %v3278_v36, %v3277_v32 }
 0x21e   :  { %v3259_v5 = vrot.slane %v3258_v38, 1 }
 0x21f   :  { %v3280_v44 = vrot.slane %v3279_v43, 1 }
 0x220   :  { %v3260_v47 = vadd.f32 %v3259_v5, %v3258_v38 }
 0x221   :  { %v3281_v55 = vadd.f32 %v3280_v44, %v3279_v43 }
 0x222   :  { %v3282_v54 = vmul.f32 0.0078125, %v3260_v47 }
 0x223   :  { %v3283_v0 = vmul.f32 0.0078125, %v3281_v55 }
 0x224   :  { %v6030_v6 = vsub.f32 %v5921_v15, %v3282_v54  ;;  %v6033_v51 = vsub.f32 %v5927_v21, %v3282_v54  ;;  %v6036_v52 = vsub.f32 %v5937_v33, %v3282_v54  ;;  %v6039_v56 = vsub.f32 %v5944_v40, %v3282_v54 }
 0x225   :  { %v6042_v58 = vsub.f32 %v5953_v53, %v3282_v54  ;;  %v6045_v59 = vsub.f32 %v5960_v60, %v3282_v54  ;;  %v6048_v61 = vsub.f32 %v5969_v13, %v3282_v54  ;;  %v6051_v15 = vsub.f32 %v5976_v24, %v3282_v54 }
 0x226   :  { %v6054_v21 = vsub.f32 %v5985_v39, %v3282_v54  ;;  %v6057_v33 = vsub.f32 %v5992_v48, %v3282_v54  ;;  %v6060_v40 = vsub.f32 %v6001_v1, %v3282_v54  ;;  %v6063_v53 = vsub.f32 %v6008_v12, %v3282_v54 }
 0x227   :  { %v6065_v60 = vsub.f32 %v4129_v34, %v3282_v54  ;;  %v6067_v63 = vsub.f32 %v4133_v46, %v3282_v54  ;;  %v6069_v13 = vsub.f32 %v4137_v3, %v3282_v54  ;;  %v6071_v24 = vsub.f32 %v4141_v20, %v3282_v54 }
 0x228   :  { %v3316_v39 = vmul.f32 %v6030_v6, %v6030_v6  ;;  %v3318_v48 = vmul.f32 %v6033_v51, %v6033_v51  ;;  %v3320_v1 = vmul.f32 %v6036_v52, %v6036_v52  ;;  %v3322_v12 = vmul.f32 %v6039_v56, %v6039_v56 }
 0x229   :  { %v6082_v46 = vsub.f32 %v5924_v19, %v3283_v0  ;;  %v6085_v3 = vsub.f32 %v5929_v22, %v3283_v0  ;;  %v6088_v7 = vsub.f32 %v5940_v37, %v3283_v0  ;;  %v6091_v8 = vsub.f32 %v5947_v42, %v3283_v0 }
 0x22a   :  { %v3348_v34 = vadd.f32 %v3318_v48, %v3316_v39  ;;  %v6094_v10 = vsub.f32 %v5956_v57, %v3283_v0  ;;  %v6097_v14 = vsub.f32 %v5963_v62, %v3283_v0  ;;  %v6100_v17 = vsub.f32 %v5972_v18, %v3283_v0 }
 0x22b   :  { %v6103_v20 = vsub.f32 %v5979_v26, %v3283_v0  ;;  %v6106_v22 = vsub.f32 %v5988_v45, %v3283_v0  ;;  %v6109_v37 = vsub.f32 %v5995_v50, %v3283_v0  ;;  %v6112_v42 = vsub.f32 %v6004_v9, %v3283_v0 }
 0x22c   :  { %v3349_v19 = vadd.f32 %v3348_v34, %v3320_v1  ;;  %v6115_v57 = vsub.f32 %v6011_v16, %v3283_v0  ;;  %v6118_v62 = vsub.f32 %v6018_v41, %v3283_v0  ;;  %v6121_v18 = vsub.f32 %v6022_v49, %v3283_v0 }
 0x22d   :  { %v3324_v26 = vmul.f32 %v6042_v58, %v6042_v58  ;;  %v6125_v23 = vsub.f32 %v4139_v11, %v3283_v0  ;;  %v6127_v50 = vsub.f32 %v4143_v25, %v3283_v0  ;;  %v3317_v9 = vmul.f32 %v6082_v46, %v6082_v46 }
 0x22e   :  { %v3350_v45 = vadd.f32 %v3349_v19, %v3322_v12  ;;  %v3319_v16 = vmul.f32 %v6085_v3, %v6085_v3  ;;  %v3326_v41 = vmul.f32 %v6045_v59, %v6045_v59  ;;  %v3328_v49 = vmul.f32 %v6048_v61, %v6048_v61 }
 0x22f   :  { %v3321_v11 = vmul.f32 %v6088_v7, %v6088_v7  ;;  %v3330_v25 = vmul.f32 %v6051_v15, %v6051_v15  ;;  %v3323_v31 = vmul.f32 %v6091_v8, %v6091_v8  ;;  %v3332_v35 = vmul.f32 %v6054_v21, %v6054_v21 }
 0x230   :  { %v3351_v27 = vadd.f32 %v3350_v45, %v3324_v26  ;;  %v3369_v29 = vadd.f32 %v3319_v16, %v3317_v9  ;;  %v3325_v38 = vmul.f32 %v6094_v10, %v6094_v10  ;;  %v3334_v5 = vmul.f32 %v6057_v33, %v6057_v33 }
 0x231   :  { %v3327_v47 = vmul.f32 %v6097_v14, %v6097_v14  ;;  %v3336_v55 = vmul.f32 %v6060_v40, %v6060_v40  ;;  %v3329_v48 = vmul.f32 %v6100_v17, %v6100_v17  ;;  %v3338_v1 = vmul.f32 %v6063_v53, %v6063_v53 }
 0x232   :  { %v3352_v28 = vadd.f32 %v3351_v27, %v3326_v41  ;;  %v3370_v32 = vadd.f32 %v3369_v29, %v3321_v11  ;;  %v3331_v34 = vmul.f32 %v6103_v20, %v6103_v20  ;;  %v3340_v26 = vmul.f32 %v6065_v60, %v6065_v60 }
 0x233   :  { %v3333_v9 = vmul.f32 %v6106_v22, %v6106_v22  ;;  %v3342_v41 = vmul.f32 %v6067_v63, %v6067_v63  ;;  %v3344_v11 = vmul.f32 %v6069_v13, %v6069_v13 }
 0x234   :  { %v3353_v30 = vadd.f32 %v3352_v28, %v3328_v49  ;;  %v3371_v43 = vadd.f32 %v3370_v32, %v3323_v31  ;;  %v3335_v49 = vmul.f32 %v6109_v37, %v6109_v37  ;;  %v3346_v31 = vmul.f32 %v6071_v24, %v6071_v24 }
 0x236   :  { %v3354_v36 = vadd.f32 %v3353_v30, %v3330_v25  ;;  %v3372_v54 = vadd.f32 %v3371_v43, %v3325_v38  ;;  %v3337_v25 = vmul.f32 %v6112_v42, %v6112_v42  ;;  %v3341_v43 = vmul.f32 %v6118_v62, %v6118_v62 }
 0x238   :  { %v3355_v44 = vadd.f32 %v3354_v36, %v3332_v35  ;;  %v3373_v0 = vadd.f32 %v3372_v54, %v3327_v47  ;;  %v3339_v35 = vmul.f32 %v6115_v57, %v6115_v57  ;;  %v3343_v47 = vmul.f32 %v6121_v18, %v6121_v18 }
 0x23a   :  { %v3356_v39 = vadd.f32 %v3355_v44, %v3334_v5  ;;  %v3374_v19 = vadd.f32 %v3373_v0, %v3329_v48 }
 0x23c   :  { %v3357_v12 = vadd.f32 %v3356_v39, %v3336_v55  ;;  %v3375_v16 = vadd.f32 %v3374_v19, %v3331_v34  ;;  %v3345_v39 = vmul.f32 %v6125_v23, %v6125_v23 }
 0x23e   :  { %v3358_v45 = vadd.f32 %v3357_v12, %v3338_v1  ;;  %v3376_v28 = vadd.f32 %v3375_v16, %v3333_v9  ;;  %v3347_v1 = vmul.f32 %v6127_v50, %v6127_v50 }
 0x240   :  { %v3359_v27 = vadd.f32 %v3358_v45, %v3340_v26  ;;  %v3377_v30 = vadd.f32 %v3376_v28, %v3335_v49 }
 0x242   :  { %v3360_v29 = vadd.f32 %v3359_v27, %v3342_v41  ;;  %v3378_v36 = vadd.f32 %v3377_v30, %v3337_v25  ;;  %v3428_v30 = vld [vmem:[%s6392_s3] sm:$0x3] }
 0x244   :  { %v3361_v32 = vadd.f32 %v3360_v29, %v3344_v11  ;;  %v3379_v5 = vadd.f32 %v3378_v36, %v3339_v35  ;;  %v3433_v35 = vrot.slane %v3428_v30, %v5906_v2 }
 0x246   :  { %v3362_v38 = vadd.f32 %v3361_v32, %v3346_v31  ;;  %v3380_v54 = vadd.f32 %v3379_v5, %v3341_v43  ;;  %v3472_v31 = vld [vmem:[%s6393_s4] sm:$0x3]  ;;  %v6192_v43 = vrot.slane %v3428_v30, %v5911_v4 }
 0x247   :  { %v6195_v5 = vrot.slane %v3472_v31, %v5911_v4 }
 0x248   :  { %v3363_v44 = vrot.slane %v3362_v38, 4  ;;  %v3381_v48 = vadd.f32 %v3380_v54, %v3343_v47 }
 0x24a   :  { %v3364_v55 = vadd.f32 %v3363_v44, %v3362_v38  ;;  %v3382_v12 = vadd.f32 %v3381_v48, %v3345_v39  ;;  %v3477_v38 = vrot.slane %v3472_v31, %v5906_v2 }
 0x24c   :  { %v3365_v0 = vrot.slane %v3364_v55, 2  ;;  %v3383_v19 = vadd.f32 %v3382_v12, %v3347_v1 }
 0x24e   :  { %v3366_v34 = vadd.f32 %v3365_v0, %v3364_v55  ;;  %v3384_v45 = vrot.slane %v3383_v19, 4 }
 0x250   :  { %v3367_v26 = vrot.slane %v3366_v34, 1  ;;  %v3385_v16 = vadd.f32 %v3384_v45, %v3383_v19 }
 0x252   :  { %v3368_v9 = vadd.f32 %v3367_v26, %v3366_v34  ;;  %v3386_v27 = vrot.slane %v3385_v16, 2 }
 0x254   :  { %v3390_v41 = vmul.f32 0.0078125, %v3368_v9  ;;  %v3387_v28 = vadd.f32 %v3386_v27, %v3385_v16 }
 0x256   :  { %v3392_v49 = vadd.f32 1e-05, %v3390_v41  ;;  %v3388_v11 = vrot.slane %v3387_v28, 1 }
 0x258   :  { %4720 = vrsqrt.f32 %v3392_v49  ;;  %v3389_v29 = vadd.f32 %v3388_v11, %v3387_v28 }
 0x25a   :  { %v3391_v25 = vmul.f32 0.0078125, %v3389_v29 }
 0x25c   :  { %v3393_v32 = vadd.f32 1e-05, %v3391_v25 }
 0x25e   :  { %4722 = vrsqrt.f32 %v3393_v32 }
 0x262   :  { %v4721_v36 = vpop.eup %4720 }
 0x263   :  { %v3396_v44 = vmul.f32 %v4721_v36, %v6030_v6  ;;  %v3398_v47 = vmul.f32 %v4721_v36, %v6033_v51  ;;  %v3400_v54 = vmul.f32 %v4721_v36, %v6036_v52  ;;  %v3402_v55 = vmul.f32 %v4721_v36, %v6039_v56 }
 0x264   :  { %v3404_v39 = vmul.f32 %v4721_v36, %v6042_v58  ;;  %v3406_v48 = vmul.f32 %v4721_v36, %v6045_v59  ;;  %v3408_v2 = vmul.f32 %v4721_v36, %v6048_v61  ;;  %v3410_v0 = vmul.f32 %v4721_v36, %v6051_v15 }
 0x265   :  { %v3412_v1 = vmul.f32 %v4721_v36, %v6054_v21  ;;  %v3414_v4 = vmul.f32 %v4721_v36, %v6057_v33  ;;  %v3416_v6 = vmul.f32 %v4721_v36, %v6060_v40  ;;  %v3418_v51 = vmul.f32 %v4721_v36, %v6063_v53 }
 0x266   :  { %v3420_v52 = vmul.f32 %v4721_v36, %v6065_v60  ;;  %v3422_v56 = vmul.f32 %v4721_v36, %v6067_v63  ;;  %v3424_v58 = vmul.f32 %v4721_v36, %v6069_v13  ;;  %v3426_v59 = vmul.f32 %v4721_v36, %v6071_v24 }
 0x267   :  { %v3440_v12 = vmul.f32 %v3433_v35, %v3396_v44  ;;  %v3442_v61 = vmul.f32 %v3433_v35, %v3398_v47  ;;  %v3444_v34 = vmul.f32 %v3433_v35, %v3400_v54  ;;  %v3446_v15 = vmul.f32 %v3433_v35, %v3402_v55 }
 0x268   :  { %v3448_v19 = vmul.f32 %v3433_v35, %v3404_v39  ;;  %v3450_v21 = vmul.f32 %v3433_v35, %v3406_v48  ;;  %v3452_v26 = vmul.f32 %v3433_v35, %v3408_v2  ;;  %v3454_v33 = vmul.f32 %v3433_v35, %v3410_v0  ;;  %v4723_v28 = vpop.eup %4722 }
 0x269   :  { %v3456_v45 = vmul.f32 %v3433_v35, %v3412_v1  ;;  %v3458_v40 = vmul.f32 %v3433_v35, %v3414_v4  ;;  %v3460_v9 = vmul.f32 %v3433_v35, %v3416_v6  ;;  %v3462_v53 = vmul.f32 %v3433_v35, %v3418_v51 }
 0x26a   :  { %v3464_v16 = vmul.f32 %v3433_v35, %v3420_v52  ;;  %v3466_v60 = vmul.f32 %v3433_v35, %v3422_v56  ;;  %v3468_v41 = vmul.f32 %v3433_v35, %v3424_v58  ;;  %v3470_v63 = vmul.f32 %v3433_v35, %v3426_v59 }
 0x26b   :  { %v6213_v27 = vadd.f32 %v3477_v38, %v3440_v12  ;;  %v6215_v13 = vadd.f32 %v3477_v38, %v3442_v61  ;;  %v6217_v24 = vadd.f32 %v3477_v38, %v3444_v34  ;;  %v6219_v49 = vadd.f32 %v3477_v38, %v3446_v15 }
 0x26c   :  { %v6221_v11 = vadd.f32 %v3477_v38, %v3448_v19  ;;  %v6223_v29 = vadd.f32 %v3477_v38, %v3450_v21  ;;  %v6225_v25 = vadd.f32 %v3477_v38, %v3452_v26  ;;  %v6227_v30 = vadd.f32 %v3477_v38, %v3454_v33 }
 0x26d   :  { %v6229_v31 = vadd.f32 %v3477_v38, %v3456_v45  ;;  %v6231_v32 = vadd.f32 %v3477_v38, %v3458_v40  ;;  %v6233_v35 = vadd.f32 %v3477_v38, %v3460_v9  ;;  %v6235_v36 = vadd.f32 %v3477_v38, %v3462_v53 }
 0x26e   :  { %v6237_v44 = vadd.f32 %v3477_v38, %v3464_v16  ;;  %v6239_v47 = vadd.f32 %v3477_v38, %v3466_v60  ;;  %v6241_v54 = vadd.f32 %v3477_v38, %v3468_v41  ;;  %v6243_v55 = vadd.f32 %v3477_v38, %v3470_v63 }
 0x26f   :  { %v3516_v39 = vmax.f32 %v6213_v27, 0.0  ;;  %v3518_v48 = vmax.f32 %v6215_v13, 0.0  ;;  %v3520_v2 = vmax.f32 %v6217_v24, 0.0  ;;  %v3522_v0 = vmax.f32 %v6219_v49, 0.0 }
 0x270   :  { %v3524_v1 = vmax.f32 %v6221_v11, 0.0  ;;  %v3526_v4 = vmax.f32 %v6223_v29, 0.0  ;;  %v3528_v6 = vmax.f32 %v6225_v25, 0.0  ;;  %v3530_v51 = vmax.f32 %v6227_v30, 0.0 }
 0x271   :  { %v3532_v52 = vmax.f32 %v6229_v31, 0.0  ;;  %v3534_v38 = vmax.f32 %v6231_v32, 0.0  ;;  %v3536_v56 = vmax.f32 %v6233_v35, 0.0  ;;  %v3538_v58 = vmax.f32 %v6235_v36, 0.0 }
 0x272   :  { %v3540_v59 = vmax.f32 %v6237_v44, 0.0  ;;  %v3397_v15 = vmul.f32 %v4723_v28, %v6082_v46  ;;  %v3399_v19 = vmul.f32 %v4723_v28, %v6085_v3  ;;  %v3401_v21 = vmul.f32 %v4723_v28, %v6088_v7 }
 0x273   :  { %v3403_v26 = vmul.f32 %v4723_v28, %v6091_v8  ;;  %v3405_v33 = vmul.f32 %v4723_v28, %v6094_v10  ;;  %v3407_v45 = vmul.f32 %v4723_v28, %v6097_v14  ;;  %v3409_v40 = vmul.f32 %v4723_v28, %v6100_v17 }
 0x274   :  { %v3411_v9 = vmul.f32 %v4723_v28, %v6103_v20  ;;  %v3413_v53 = vmul.f32 %v4723_v28, %v6106_v22  ;;  %v3415_v16 = vmul.f32 %v4723_v28, %v6109_v37  ;;  %v3417_v46 = vmul.f32 %v4723_v28, %v6112_v42 }
 0x275   :  { %v3419_v3 = vmul.f32 %v4723_v28, %v6115_v57  ;;  %v3421_v7 = vmul.f32 %v4723_v28, %v6118_v62  ;;  %v3423_v8 = vmul.f32 %v4723_v28, %v6121_v18  ;;  %v3425_v10 = vmul.f32 %v4723_v28, %v6125_v23 }
 0x276   :  { %v3427_v14 = vmul.f32 %v4723_v28, %v6127_v50  ;;  %v3441_v17 = vmul.f32 %v6192_v43, %v3397_v15  ;;  %v3443_v20 = vmul.f32 %v6192_v43, %v3399_v19  ;;  %v3445_v22 = vmul.f32 %v6192_v43, %v3401_v21 }
 0x277   :  { %v3447_v37 = vmul.f32 %v6192_v43, %v3403_v26  ;;  %v3449_v42 = vmul.f32 %v6192_v43, %v3405_v33  ;;  %v3451_v57 = vmul.f32 %v6192_v43, %v3407_v45  ;;  %v3453_v62 = vmul.f32 %v6192_v43, %v3409_v40 }
 0x278   :  { %v3455_v18 = vmul.f32 %v6192_v43, %v3411_v9  ;;  %v3457_v23 = vmul.f32 %v6192_v43, %v3413_v53  ;;  %v3459_v50 = vmul.f32 %v6192_v43, %v3415_v16  ;;  %v3461_v60 = vmul.f32 %v6192_v43, %v3417_v46 }
 0x279   :  { %v3463_v41 = vmul.f32 %v6192_v43, %v3419_v3  ;;  %v3465_v63 = vmul.f32 %v6192_v43, %v3421_v7  ;;  %v3467_v28 = vmul.f32 %v6192_v43, %v3423_v8  ;;  %v3469_v15 = vmul.f32 %v6192_v43, %v3425_v10 }
 0x27a   :  { %v3471_v19 = vmul.f32 %v6192_v43, %v3427_v14  ;;  %v3485_v21 = vadd.f32 %v6195_v5, %v3441_v17  ;;  %v3487_v26 = vadd.f32 %v6195_v5, %v3443_v20  ;;  %v3489_v33 = vadd.f32 %v6195_v5, %v3445_v22 }
 0x27b   :  { %v3491_v45 = vadd.f32 %v6195_v5, %v3447_v37  ;;  %v3493_v40 = vadd.f32 %v6195_v5, %v3449_v42  ;;  %v3495_v9 = vadd.f32 %v6195_v5, %v3451_v57  ;;  %v3497_v53 = vadd.f32 %v6195_v5, %v3453_v62 }
 0x27c   :  { %v3499_v16 = vadd.f32 %v6195_v5, %v3455_v18  ;;  %v3501_v46 = vadd.f32 %v6195_v5, %v3457_v23  ;;  %v3503_v43 = vadd.f32 %v6195_v5, %v3459_v50  ;;  %v3505_v3 = vadd.f32 %v6195_v5, %v3461_v60 }
 0x27d   :  { %v3507_v7 = vadd.f32 %v6195_v5, %v3463_v41  ;;  %v3509_v8 = vadd.f32 %v6195_v5, %v3465_v63  ;;  %v3511_v10 = vadd.f32 %v6195_v5, %v3467_v28  ;;  %v3513_v14 = vadd.f32 %v6195_v5, %v3469_v15 }
 0x27e   :  { %v3515_v17 = vadd.f32 %v6195_v5, %v3471_v19  ;;  %v3517_v20 = vmax.f32 %v3485_v21, 0.0  ;;  %v3519_v22 = vmax.f32 %v3487_v26, 0.0  ;;  %v3521_v37 = vmax.f32 %v3489_v33, 0.0 }
 0x27f   :  { %v3523_v42 = vmax.f32 %v3491_v45, 0.0  ;;  %v3525_v57 = vmax.f32 %v3493_v40, 0.0  ;;  %v3527_v62 = vmax.f32 %v3495_v9, 0.0  ;;  %v3529_v18 = vmax.f32 %v3497_v53, 0.0 }
 0x280   :  { %v3531_v23 = vmax.f32 %v3499_v16, 0.0  ;;  %v3533_v50 = vmax.f32 %v3501_v46, 0.0  ;;  %v3535_v60 = vmax.f32 %v3503_v43, 0.0  ;;  %v3537_v34 = vmax.f32 %v3505_v3, 0.0 }
 0x281   :  { %v3539_v41 = vmax.f32 %v3507_v7, 0.0  ;;  %v3541_v61 = vmax.f32 %v3509_v8, 0.0  ;;  %v3543_v63 = vmax.f32 %v3511_v10, 0.0  ;;  %v3545_v12 = vmax.f32 %v3513_v14, 0.0 }
 0x282   :  { %v3547_v28 = vmax.f32 %v3515_v17, 0.0  ;;  %v4064_v15 = vpack.c.bf16 %v3517_v20, %v3516_v39  ;;  %v4065_v5 = vpack.c.bf16 %v3519_v22, %v3518_v48  ;;  %v4066_v19 = vpack.c.bf16 %v3521_v37, %v3520_v2 }
 0x283   :  { %v4067_v21 = vpack.c.bf16 %v3523_v42, %v3522_v0  ;;  %v4068_v26 = vpack.c.bf16 %v3525_v57, %v3524_v1  ;;  %v4069_v33 = vpack.c.bf16 %v3527_v62, %v3526_v4  ;;  %v4070_v45 = vpack.c.bf16 %v3529_v18, %v3528_v6 }
 0x284   :  { %v4071_v27 = vpack.c.bf16 %v3531_v23, %v3530_v51  ;;  %v4072_v13 = vpack.c.bf16 %v3533_v50, %v3532_v52  ;;  %v4073_v24 = vpack.c.bf16 %v3535_v60, %v3534_v38  ;;  %v4074_v49 = vpack.c.bf16 %v3537_v34, %v3536_v56  ;;  %3644 = vst [vmem:[%s6394_s5] sm:$0xff] %v4064_v15 }
 0x285   :  { %v4075_v11 = vpack.c.bf16 %v3539_v41, %v3538_v58  ;;  %3645 = vst [vmem:[%s6394_s5 + $0x8] sm:$0xff] %v4065_v5  ;;  %3646 = vst [vmem:[%s6394_s5 + $0x10] sm:$0xff] %v4066_v19  ;;  %v4076_v29 = vpack.c.bf16 %v3541_v61, %v3540_v59  ;;  %v6395_v25 = vmax.f32 %v6239_v47, 0.0  ;;  %v6396_v31 = vmax.f32 %v6241_v54, 0.0 }
 0x286   :  { %3647 = vst [vmem:[%s6394_s5 + $0x18] sm:$0xff] %v4067_v21  ;;  %v6397_v35 = vmax.f32 %v6243_v55, 0.0  ;;  %3648 = vst [vmem:[%s6394_s5 + $0x20] sm:$0xff] %v4068_v26 }
 0x287   :  { %v4077_v30 = vpack.c.bf16 %v3543_v63, %v6395_v25  ;;  %v4078_v32 = vpack.c.bf16 %v3545_v12, %v6396_v31  ;;  %3649 = vst [vmem:[%s6394_s5 + $0x28] sm:$0xff] %v4069_v33  ;;  %3650 = vst [vmem:[%s6394_s5 + $0x30] sm:$0xff] %v4070_v45 }
 0x288   :  { %v4079_v36 = vpack.c.bf16 %v3547_v28, %v6397_v35  ;;  %3651 = vst [vmem:[%s6394_s5 + $0x38] sm:$0xff] %v4071_v27  ;;  %3652 = vst [vmem:[%s6394_s5 + $0x40] sm:$0xff] %v4072_v13 }
 0x289   :  { %3653 = vst [vmem:[%s6394_s5 + $0x48] sm:$0xff] %v4073_v24  ;;  %3654 = vst [vmem:[%s6394_s5 + $0x50] sm:$0xff] %v4074_v49 }
 0x28a   :  { %3655 = vst [vmem:[%s6394_s5 + $0x58] sm:$0xff] %v4075_v11  ;;  %3656 = vst [vmem:[%s6394_s5 + $0x60] sm:$0xff] %v4076_v29 }
 0x28b   :  { %3657 = vst [vmem:[%s6394_s5 + $0x68] sm:$0xff] %v4077_v30  ;;  %3658 = vst [vmem:[%s6394_s5 + $0x70] sm:$0xff] %v4078_v32 }
 0x28c   :  { %3659 = vst [vmem:[%s6394_s5 + $0x78] sm:$0xff] %v4079_v36 }

// kernel: discriminator_forward.7
= control target key start
LH: loop header
LB: loop body
LE: loop exit
PB: predicated region body
PF: predicated region fallthrough
CT: control target
= control target key end

     0   :  { %s6492_s21 = smov 0   ;;  %s7391_s0 = inlined_call_operand.vmem [shape: bf16[32,4096], index: 0, kind: input, shape index: {}]   ;;  %s7392_s1 = inlined_call_operand.vmem [shape: bf16[2,4096,256], index: 1, kind: input, shape index: {}]   ;;  %s7393_s2 = inlined_call_operand.vmem [shape: f32[1,512], index: 2, kind: input, shape index: {}]   ;;  %s7394_s3 = inlined_call_operand.vmem [shape: f32[1,512], index: 3, kind: input, shape index: {}]   ;;  %s7395_s4 = inlined_call_operand.vmem [shape: f32[1,512], index: 4, kind: input, shape index: {}]   ;;  %s7396_s5 = inlined_call_operand.vmem [shape: bf16[2,16,256], index: 5, kind: input, shape index: {}]   ;;  %s7397_s6 = inlined_call_operand.vmem [shape: f32[2,2,256], index: 6, kind: output, shape index: {}]  }
   0x1 LB: > { %s6498_s22 = sadd.s32 4294967295, %s6454_s21   ;;  %p4948_p0 = scmp.ge.s32.totalorder %s6454_s21, 1  ;;  %s6454_s21 = sphi %s6492_s21, %s16_s21  }
   0x2   : > { %p252_p1 = scmp.lt.s32.totalorder %s6454_s21, 3 }
   0x4   : > { %p253_p2 = pnand %p4948_p0, %p252_p1 }
   0x5   : > { %p299_p3 = scmp.lt.s32.totalorder (!%p253_p2), %s6498_s22, 1  ;;  %v6506_v0 = vld [vmem:[%s7391_s0] sm:$0xff] (!%p253_p2)  ;;  %vm4840_vm0 = vcmask (!%p253_p2), 1041409   ;;  %vm4842_vm1 = vcmask (!%p253_p2), 1043459   ;;  %vm4844_vm2 = vcmask (!%p253_p2), 1045509   ;;  %vm4846_vm3 = vcmask (!%p253_p2), 1047559  }
   0x6   : > { %256 = sbr.rel (%p253_p2) target bundleno = 849 (0x351), region = 44  ;;  %v6511_v1 = vld [vmem:[%s7391_s0 + $0x80] sm:$0xff] (!%p253_p2) }
   0x7   : > { %v6516_v2 = vld [vmem:[%s7391_s0 + $0x40] sm:$0xff] (!%p253_p2)  ;;  %v4958_v3 = vcombine.low (!%p253_p2), %v6506_v0, %v6511_v1  ;;  %v4959_v4 = vcombine.high (!%p253_p2), %v6506_v0, %v6511_v1 }
   0x8   : > { %v6525_v5 = vld [vmem:[%s7391_s0 + $0xc0] sm:$0xff] (!%p253_p2) }
   0x9   : > { %v4974_v6 = vcombine.low (!%p253_p2), %v6516_v2, %v6525_v5  ;;  %v4975_v7 = vcombine.high (!%p253_p2), %v6516_v2, %v6525_v5  ;;  %3829 = vmatprep.mubr.bf16.mxu1 (!%p253_p2), %v4959_v4 }
   0xb   : > { %4253 = vmatprep.mubr.bf16.mxu0 (!%p253_p2), %v4975_v7 }
   0xd   : > { %s6528_s7 = scalar_select %p299_p3, %s6498_s22, 1 }
   0xf   : > { %s5536_s8 = sshll.u32 %s6528_s7, 12  ;;  %s5537_s20 = sshll.u32 %s6528_s7, 4 }
  0x10   : > { %s6538_s11 = scalar_lea.vmem %s7392_s1, %s5536_s8  ;;  %s323_s25 = scalar_lea.vmem %s7396_s5, %s5537_s20 }
  0x11   : > { %v5676_v8 = vld [vmem:[%s6538_s11 + $0x4] ss:$8 sps:$4 sm:$0xff]   ;;  %v5680_v10 = vld [vmem:[%s6538_s11] ss:$8 sps:$4 sm:$0xff]   ;;  %v5682_v12 = vld [vmem:[%s6538_s11 + $0x14] ss:$8 sps:$4 sm:$0xff]  }
  0x12   : > { %v5678_v9 = vld [vmem:[%s6538_s11 + $0x804] ss:$8 sps:$4 sm:$0xff]   ;;  %3797 = vmatprep.subr.bf16.mxu1 %v5676_v8  ;;  %v5681_v11 = vld [vmem:[%s6538_s11 + $0x800] ss:$8 sps:$4 sm:$0xff]   ;;  %v5684_v13 = vld [vmem:[%s6538_s11 + $0x814] ss:$8 sps:$4 sm:$0xff]  }
  0x13   : > { %4221 = vmatprep.subr.bf16.mxu0 %v5678_v9  ;;  %3798 = vmatpush1.bf16.msra.mxu1 %v5680_v10  ;;  %v5686_v14 = vld [vmem:[%s6538_s11 + $0x10] ss:$8 sps:$4 sm:$0xff]   ;;  %v5688_v16 = vld [vmem:[%s6538_s11 + $0x24] ss:$8 sps:$4 sm:$0xff]   ;;  %v5692_v18 = vld [vmem:[%s6538_s11 + $0x20] ss:$8 sps:$4 sm:$0xff]  }
  0x14   : > { %4222 = vmatpush1.bf16.msra.mxu0 %v5681_v11  ;;  %3799 = vmatprep.subr.bf16.mxu1 %v5682_v12  ;;  %v5687_v15 = vld [vmem:[%s6538_s11 + $0x810] ss:$8 sps:$4 sm:$0xff]   ;;  %v5690_v17 = vld [vmem:[%s6538_s11 + $0x824] ss:$8 sps:$4 sm:$0xff]   ;;  %v5693_v19 = vld [vmem:[%s6538_s11 + $0x820] ss:$8 sps:$4 sm:$0xff]  }
  0x15   : > { %4223 = vmatprep.subr.bf16.mxu0 %v5684_v13  ;;  %v5694_v20 = vld [vmem:[%s6538_s11 + $0x34] ss:$8 sps:$4 sm:$0xff]   ;;  %v5698_v22 = vld [vmem:[%s6538_s11 + $0x30] ss:$8 sps:$4 sm:$0xff]   ;;  %v5700_v24 = vld [vmem:[%s6538_s11 + $0x44] ss:$8 sps:$4 sm:$0xff]  }
  0x16   : > { %v5696_v21 = vld [vmem:[%s6538_s11 + $0x834] ss:$8 sps:$4 sm:$0xff]   ;;  %v5699_v23 = vld [vmem:[%s6538_s11 + $0x830] ss:$8 sps:$4 sm:$0xff]   ;;  %v5702_v25 = vld [vmem:[%s6538_s11 + $0x844] ss:$8 sps:$4 sm:$0xff]  }
  0x17   : > { %3800 = vmatpush1.bf16.msra.mxu1 %v5686_v14  ;;  %v5704_v26 = vld [vmem:[%s6538_s11 + $0x40] ss:$8 sps:$4 sm:$0xff]   ;;  %v5706_v28 = vld [vmem:[%s6538_s11 + $0x54] ss:$8 sps:$4 sm:$0xff]   ;;  %v5710_v30 = vld [vmem:[%s6538_s11 + $0x50] ss:$8 sps:$4 sm:$0xff]  }
  0x18   : > { %4224 = vmatpush1.bf16.msra.mxu0 %v5687_v15  ;;  %3801 = vmatprep.subr.bf16.mxu1 %v5688_v16  ;;  %v5705_v27 = vld [vmem:[%s6538_s11 + $0x840] ss:$8 sps:$4 sm:$0xff]   ;;  %v5708_v29 = vld [vmem:[%s6538_s11 + $0x854] ss:$8 sps:$4 sm:$0xff]   ;;  %v5711_v31 = vld [vmem:[%s6538_s11 + $0x850] ss:$8 sps:$4 sm:$0xff]  }
  0x19   : > { %4225 = vmatprep.subr.bf16.mxu0 %v5690_v17  ;;  %v5712_v32 = vld [vmem:[%s6538_s11 + $0x64] ss:$8 sps:$4 sm:$0xff]   ;;  %v5716_v34 = vld [vmem:[%s6538_s11 + $0x60] ss:$8 sps:$4 sm:$0xff]   ;;  %v5718_v36 = vld [vmem:[%s6538_s11 + $0x74] ss:$8 sps:$4 sm:$0xff]  }
  0x1a   : > { %v5714_v33 = vld [vmem:[%s6538_s11 + $0x864] ss:$8 sps:$4 sm:$0xff]   ;;  %v5717_v35 = vld [vmem:[%s6538_s11 + $0x860] ss:$8 sps:$4 sm:$0xff]   ;;  %v5720_v37 = vld [vmem:[%s6538_s11 + $0x874] ss:$8 sps:$4 sm:$0xff]  }
  0x1b   : > { %3802 = vmatpush1.bf16.msra.mxu1 %v5692_v18  ;;  %v5722_v38 = vld [vmem:[%s6538_s11 + $0x70] ss:$8 sps:$4 sm:$0xff]   ;;  %v5724_v40 = vld [vmem:[%s6538_s11 + $0x84] ss:$8 sps:$4 sm:$0xff]   ;;  %v5728_v42 = vld [vmem:[%s6538_s11 + $0x80] ss:$8 sps:$4 sm:$0xff]  }
  0x1c   : > { %4226 = vmatpush1.bf16.msra.mxu0 %v5693_v19  ;;  %3803 = vmatprep.subr.bf16.mxu1 %v5694_v20  ;;  %v5723_v39 = vld [vmem:[%s6538_s11 + $0x870] ss:$8 sps:$4 sm:$0xff]   ;;  %v5726_v41 = vld [vmem:[%s6538_s11 + $0x884] ss:$8 sps:$4 sm:$0xff]   ;;  %v5729_v43 = vld [vmem:[%s6538_s11 + $0x880] ss:$8 sps:$4 sm:$0xff]  }
  0x1d   : > { %4227 = vmatprep.subr.bf16.mxu0 %v5696_v21  ;;  %v5730_v44 = vld [vmem:[%s6538_s11 + $0x94] ss:$8 sps:$4 sm:$0xff]   ;;  %v5734_v46 = vld [vmem:[%s6538_s11 + $0x90] ss:$8 sps:$4 sm:$0xff]   ;;  %v5736_v48 = vld [vmem:[%s6538_s11 + $0xa4] ss:$8 sps:$4 sm:$0xff]  }
  0x1e   : > { %v5732_v45 = vld [vmem:[%s6538_s11 + $0x894] ss:$8 sps:$4 sm:$0xff]   ;;  %v5735_v47 = vld [vmem:[%s6538_s11 + $0x890] ss:$8 sps:$4 sm:$0xff]   ;;  %v5738_v49 = vld [vmem:[%s6538_s11 + $0x8a4] ss:$8 sps:$4 sm:$0xff]  }
  0x1f   : > { %3804 = vmatpush1.bf16.msra.mxu1 %v5698_v22  ;;  %v5740_v50 = vld [vmem:[%s6538_s11 + $0xa0] ss:$8 sps:$4 sm:$0xff]   ;;  %v5742_v52 = vld [vmem:[%s6538_s11 + $0xb4] ss:$8 sps:$4 sm:$0xff]   ;;  %v5746_v54 = vld [vmem:[%s6538_s11 + $0xb0] ss:$8 sps:$4 sm:$0xff]  }
  0x20   : > { %4228 = vmatpush1.bf16.msra.mxu0 %v5699_v23  ;;  %3805 = vmatprep.subr.bf16.mxu1 %v5700_v24  ;;  %v5741_v51 = vld [vmem:[%s6538_s11 + $0x8a0] ss:$8 sps:$4 sm:$0xff]   ;;  %v5744_v53 = vld [vmem:[%s6538_s11 + $0x8b4] ss:$8 sps:$4 sm:$0xff]   ;;  %v5747_v55 = vld [vmem:[%s6538_s11 + $0x8b0] ss:$8 sps:$4 sm:$0xff]  }
  0x21   : > { %4229 = vmatprep.subr.bf16.mxu0 %v5702_v25  ;;  %v5748_v56 = vld [vmem:[%s6538_s11 + $0xc4] ss:$8 sps:$4 sm:$0xff]   ;;  %v5752_v58 = vld [vmem:[%s6538_s11 + $0xc0] ss:$8 sps:$4 sm:$0xff]   ;;  %v5754_v60 = vld [vmem:[%s6538_s11 + $0xd4] ss:$8 sps:$4 sm:$0xff]  }
  0x22   : > { %v5750_v57 = vld [vmem:[%s6538_s11 + $0x8c4] ss:$8 sps:$4 sm:$0xff]   ;;  %v5753_v59 = vld [vmem:[%s6538_s11 + $0x8c0] ss:$8 sps:$4 sm:$0xff]   ;;  %v5756_v61 = vld [vmem:[%s6538_s11 + $0x8d4] ss:$8 sps:$4 sm:$0xff]  }
  0x23   : > { %3806 = vmatpush1.bf16.msra.mxu1 %v5704_v26  ;;  %v5758_v62 = vld [vmem:[%s6538_s11 + $0xd0] ss:$8 sps:$4 sm:$0xff]   ;;  %v5760_v4 = vld [vmem:[%s6538_s11 + $0xe4] ss:$8 sps:$4 sm:$0xff]   ;;  %v5764_v8 = vld [vmem:[%s6538_s11 + $0xe0] ss:$8 sps:$4 sm:$0xff]  }
  0x24   : > { %4230 = vmatpush1.bf16.msra.mxu0 %v5705_v27  ;;  %3807 = vmatprep.subr.bf16.mxu1 %v5706_v28  ;;  %v5759_v63 = vld [vmem:[%s6538_s11 + $0x8d0] ss:$8 sps:$4 sm:$0xff]   ;;  %v5762_v7 = vld [vmem:[%s6538_s11 + $0x8e4] ss:$8 sps:$4 sm:$0xff]   ;;  %v5765_v9 = vld [vmem:[%s6538_s11 + $0x8e0] ss:$8 sps:$4 sm:$0xff]  }
  0x25   : > { %4231 = vmatprep.subr.bf16.mxu0 %v5708_v29  ;;  %v5766_v10 = vld [vmem:[%s6538_s11 + $0xf4] ss:$8 sps:$4 sm:$0xff]   ;;  %v5770_v12 = vld [vmem:[%s6538_s11 + $0xf0] ss:$8 sps:$4 sm:$0xff]   ;;  %v5774_v14 = vld [vmem:[%s6538_s11 + $0x104] ss:$8 sps:$4 sm:$0xff]  }
  0x26   : > { %v5768_v11 = vld [vmem:[%s6538_s11 + $0x8f4] ss:$8 sps:$4 sm:$0xff]   ;;  %v5771_v13 = vld [vmem:[%s6538_s11 + $0x8f0] ss:$8 sps:$4 sm:$0xff]   ;;  %v5777_v15 = vld [vmem:[%s6538_s11 + $0x904] ss:$8 sps:$4 sm:$0xff]  }
  0x27   : > { %3808 = vmatpush1.bf16.msra.mxu1 %v5710_v30  ;;  %v361_v16 = vld [vmem:[%s7391_s0 + $0x100] sm:$0xff]  ;;  %v5780_v22 = vld [vmem:[%s6538_s11 + $0x114] ss:$8 sps:$4 sm:$0xff]   ;;  %v5778_v26 = vld [vmem:[%s6538_s11 + $0x110] ss:$8 sps:$4 sm:$0xff]   ;;  %s5538_s26 = sshll.u32 %s6528_s7, 2 }
  0x28   : > { %4232 = vmatpush1.bf16.msra.mxu0 %v5711_v31  ;;  %3809 = vmatprep.subr.bf16.mxu1 %v5712_v32  ;;  %v377_v17 = vld [vmem:[%s7391_s0 + $0x180] sm:$0xff]  ;;  %v5783_v23 = vld [vmem:[%s6538_s11 + $0x914] ss:$8 sps:$4 sm:$0xff]   ;;  %v5781_v27 = vld [vmem:[%s6538_s11 + $0x910] ss:$8 sps:$4 sm:$0xff]   ;;  %s328_s29 = scalar_lea.vmem %s7397_s6, %s5538_s26 }
  0x29   : > { %4233 = vmatprep.subr.bf16.mxu0 %v5714_v33  ;;  %v369_v18 = vld [vmem:[%s7391_s0 + $0x140] sm:$0xff]  ;;  %v4991_v24 = vcombine.high %v361_v16, %v377_v17  ;;  %v5792_v5 = vld [vmem:[%s6538_s11 + $0x134] ss:$8 sps:$4 sm:$0xff]   ;;  %v5790_v30 = vld [vmem:[%s6538_s11 + $0x130] ss:$8 sps:$4 sm:$0xff]  }
  0x2a   : > { %v385_v19 = vld [vmem:[%s7391_s0 + $0x1c0] sm:$0xff]  ;;  %v5793_v31 = vld [vmem:[%s6538_s11 + $0x930] ss:$8 sps:$4 sm:$0xff]  }
  0x2b   : > { %3810 = vmatpush1.bf16.msra.mxu1 %v5716_v34  ;;  %v5772_v20 = vld [vmem:[%s6538_s11 + $0x100] ss:$8 sps:$4 sm:$0xff]   ;;  %v5007_v25 = vcombine.high %v369_v18, %v385_v19  ;;  %v5786_v28 = vld [vmem:[%s6538_s11 + $0x124] ss:$8 sps:$4 sm:$0xff]   ;;  %v5006_v2 = vcombine.low %v369_v18, %v385_v19  ;;  %v5850_v18 = vld [vmem:[%s6538_s11 + $0x1d0] ss:$8 sps:$4 sm:$0xff]  }
  0x2c   : > { %4234 = vmatpush1.bf16.msra.mxu0 %v5717_v35  ;;  %3811 = vmatprep.subr.bf16.mxu1 %v5718_v36  ;;  %v5775_v21 = vld [vmem:[%s6538_s11 + $0x900] ss:$8 sps:$4 sm:$0xff]   ;;  %v5789_v29 = vld [vmem:[%s6538_s11 + $0x924] ss:$8 sps:$4 sm:$0xff]   ;;  %v5804_v36 = vld [vmem:[%s6538_s11 + $0x154] ss:$8 sps:$4 sm:$0xff]  }
  0x2d   : > { %4235 = vmatprep.subr.bf16.mxu0 %v5720_v37  ;;  %v5784_v0 = vld [vmem:[%s6538_s11 + $0x120] ss:$8 sps:$4 sm:$0xff]   ;;  %v5798_v32 = vld [vmem:[%s6538_s11 + $0x144] ss:$8 sps:$4 sm:$0xff]   ;;  %v5807_v37 = vld [vmem:[%s6538_s11 + $0x954] ss:$8 sps:$4 sm:$0xff]  }
  0x2e   : > { %v5787_v1 = vld [vmem:[%s6538_s11 + $0x920] ss:$8 sps:$4 sm:$0xff]   ;;  %v5801_v33 = vld [vmem:[%s6538_s11 + $0x944] ss:$8 sps:$4 sm:$0xff]   ;;  %v5853_v19 = vld [vmem:[%s6538_s11 + $0x9d0] ss:$8 sps:$4 sm:$0xff]  }
  0x2f   : > { %3812 = vmatpush1.bf16.msra.mxu1 %v5722_v38  ;;  %v5796_v34 = vld [vmem:[%s6538_s11 + $0x140] ss:$8 sps:$4 sm:$0xff]   ;;  %v5802_v38 = vld [vmem:[%s6538_s11 + $0x150] ss:$8 sps:$4 sm:$0xff]  }
  0x30   : > { %4236 = vmatpush1.bf16.msra.mxu0 %v5723_v39  ;;  %3813 = vmatprep.subr.bf16.mxu1 %v5724_v40  ;;  %v5799_v35 = vld [vmem:[%s6538_s11 + $0x940] ss:$8 sps:$4 sm:$0xff]   ;;  %v5805_v39 = vld [vmem:[%s6538_s11 + $0x950] ss:$8 sps:$4 sm:$0xff]   ;;  %v5810_v40 = vld [vmem:[%s6538_s11 + $0x164] ss:$8 sps:$4 sm:$0xff]  }
  0x31   : > { %4237 = vmatprep.subr.bf16.mxu0 %v5726_v41  ;;  %v5813_v41 = vld [vmem:[%s6538_s11 + $0x964] ss:$8 sps:$4 sm:$0xff]  }
  0x33   : > { %3814 = vmatpush1.bf16.msra.mxu1 %v5728_v42  ;;  %v6651_v42 = vld [vmem:[%s7391_s0 + $0x8] sm:$0xff] }
  0x34   : > { %4238 = vmatpush1.bf16.msra.mxu0 %v5729_v43  ;;  %3815 = vmatprep.subr.bf16.mxu1 %v5730_v44  ;;  %v6656_v43 = vld [vmem:[%s7391_s0 + $0x88] sm:$0xff] }
  0x35   : > { %4239 = vmatprep.subr.bf16.mxu0 %v5732_v45  ;;  %v5808_v44 = vld [vmem:[%s6538_s11 + $0x160] ss:$8 sps:$4 sm:$0xff]   ;;  %v4961_v45 = vcombine.high %v6651_v42, %v6656_v43 }
  0x37   : > { %3816 = vmatpush1.bf16.msra.mxu1 %v5734_v46  ;;  %v5811_v46 = vld [vmem:[%s6538_s11 + $0x960] ss:$8 sps:$4 sm:$0xff]  }
  0x38   : > { %4240 = vmatpush1.bf16.msra.mxu0 %v5735_v47  ;;  %3817 = vmatprep.subr.bf16.mxu1 %v5736_v48  ;;  %v6665_v47 = vld [vmem:[%s7391_s0 + $0x48] sm:$0xff] }
  0x39   : > { %4241 = vmatprep.subr.bf16.mxu0 %v5738_v49  ;;  %v6670_v48 = vld [vmem:[%s7391_s0 + $0xc8] sm:$0xff]  ;;  %v5816_v49 = vld [vmem:[%s6538_s11 + $0x174] ss:$8 sps:$4 sm:$0xff]  }
  0x3b   : > { %3818 = vmatpush1.bf16.msra.mxu1 %v5740_v50  ;;  %v4977_v50 = vcombine.high %v6665_v47, %v6670_v48 }
  0x3c   : > { %4242 = vmatpush1.bf16.msra.mxu0 %v5741_v51  ;;  %3819 = vmatprep.subr.bf16.mxu1 %v5742_v52  ;;  %v5819_v51 = vld [vmem:[%s6538_s11 + $0x974] ss:$8 sps:$4 sm:$0xff]   ;;  %v5814_v52 = vld [vmem:[%s6538_s11 + $0x170] ss:$8 sps:$4 sm:$0xff]  }
  0x3d   : > { %4243 = vmatprep.subr.bf16.mxu0 %v5744_v53  ;;  %v5817_v53 = vld [vmem:[%s6538_s11 + $0x970] ss:$8 sps:$4 sm:$0xff]  }
  0x3f   : > { %3820 = vmatpush1.bf16.msra.mxu1 %v5746_v54  ;;  %v5822_v54 = vld [vmem:[%s6538_s11 + $0x184] ss:$8 sps:$4 sm:$0xff]  }
  0x40   : > { %4244 = vmatpush1.bf16.msra.mxu0 %v5747_v55  ;;  %3821 = vmatprep.subr.bf16.mxu1 %v5748_v56  ;;  %v5825_v55 = vld [vmem:[%s6538_s11 + $0x984] ss:$8 sps:$4 sm:$0xff]   ;;  %v5820_v56 = vld [vmem:[%s6538_s11 + $0x180] ss:$8 sps:$4 sm:$0xff]  }
  0x41   : > { %4245 = vmatprep.subr.bf16.mxu0 %v5750_v57  ;;  %v5823_v57 = vld [vmem:[%s6538_s11 + $0x980] ss:$8 sps:$4 sm:$0xff]  }
  0x43   : > { %3822 = vmatpush1.bf16.msra.mxu1 %v5752_v58  ;;  %v5828_v58 = vld [vmem:[%s6538_s11 + $0x194] ss:$8 sps:$4 sm:$0xff]  }
  0x44   : > { %4246 = vmatpush1.bf16.msra.mxu0 %v5753_v59  ;;  %3823 = vmatprep.subr.bf16.mxu1 %v5754_v60  ;;  %v5831_v59 = vld [vmem:[%s6538_s11 + $0x994] ss:$8 sps:$4 sm:$0xff]   ;;  %v5826_v60 = vld [vmem:[%s6538_s11 + $0x190] ss:$8 sps:$4 sm:$0xff]  }
  0x45   : > { %4247 = vmatprep.subr.bf16.mxu0 %v5756_v61  ;;  %v5829_v61 = vld [vmem:[%s6538_s11 + $0x990] ss:$8 sps:$4 sm:$0xff]  }
  0x47   : > { %3824 = vmatpush1.bf16.msra.mxu1 %v5758_v62  ;;  %v5834_v62 = vld [vmem:[%s6538_s11 + $0x1a4] ss:$8 sps:$4 sm:$0xff]  }
  0x48   : > { %4248 = vmatpush1.bf16.msra.mxu0 %v5759_v63  ;;  %3825 = vmatprep.subr.bf16.mxu1 %v5760_v4  ;;  %v5837_v63 = vld [vmem:[%s6538_s11 + $0x9a4] ss:$8 sps:$4 sm:$0xff]   ;;  %v5832_v4 = vld [vmem:[%s6538_s11 + $0x1a0] ss:$8 sps:$4 sm:$0xff]  }
  0x49   : > { %4249 = vmatprep.subr.bf16.mxu0 %v5762_v7  ;;  %v5835_v7 = vld [vmem:[%s6538_s11 + $0x9a0] ss:$8 sps:$4 sm:$0xff]  }
  0x4b   : > { %3826 = vmatpush1.bf16.msra.mxu1 %v5764_v8  ;;  %v5840_v8 = vld [vmem:[%s6538_s11 + $0x1b4] ss:$8 sps:$4 sm:$0xff]  }
  0x4c   : > { %4250 = vmatpush1.bf16.msra.mxu0 %v5765_v9  ;;  %3827 = vmatprep.subr.bf16.mxu1 %v5766_v10  ;;  %v5843_v9 = vld [vmem:[%s6538_s11 + $0x9b4] ss:$8 sps:$4 sm:$0xff]   ;;  %v5838_v10 = vld [vmem:[%s6538_s11 + $0x1b0] ss:$8 sps:$4 sm:$0xff]  }
  0x4d   : > { %4251 = vmatprep.subr.bf16.mxu0 %v5768_v11  ;;  %v5841_v11 = vld [vmem:[%s6538_s11 + $0x9b0] ss:$8 sps:$4 sm:$0xff]  }
  0x4f   : > { %3828 = vmatpush1.bf16.msra.mxu1 %v5770_v12  ;;  %v5846_v12 = vld [vmem:[%s6538_s11 + $0x1c4] ss:$8 sps:$4 sm:$0xff]  }
  0x50   : > { %4252 = vmatpush1.bf16.msra.mxu0 %v5771_v13  ;;  %3850 = vmatprep.subr.bf16.mxu1 %v5774_v14  ;;  %v5849_v13 = vld [vmem:[%s6538_s11 + $0x9c4] ss:$8 sps:$4 sm:$0xff]   ;;  %v5844_v14 = vld [vmem:[%s6538_s11 + $0x1c0] ss:$8 sps:$4 sm:$0xff]  }
  0x51   : > { %4274 = vmatprep.subr.bf16.mxu0 %v5777_v15  ;;  %v5847_v15 = vld [vmem:[%s6538_s11 + $0x9c0] ss:$8 sps:$4 sm:$0xff]  }
  0x52   : > { %3830 = vmatmul.mubr.bf16.vlgmr.msra.gmra.mrb[0].mxu1 %v4958_v3  ;;  %v4990_v3 = vcombine.low %v361_v16, %v377_v17  ;;  %v5852_v16 = vld [vmem:[%s6538_s11 + $0x1d4] ss:$8 sps:$4 sm:$0xff]  }
  0x53   : > { %4254 = vmatmul.mubr.bf16.vlgmr.msra.gmra.mrb[0].mxu0 %v4974_v6  ;;  %3851 = vmatpush1.bf16.msra.mxu1 %v5772_v20  ;;  %v5795_v6 = vld [vmem:[%s6538_s11 + $0x934] ss:$8 sps:$4 sm:$0xff]   ;;  %v5858_v20 = vld [vmem:[%s6538_s11 + $0x1e4] ss:$8 sps:$4 sm:$0xff]  }
  0x54   : > { %4275 = vmatpush1.bf16.msra.mxu0 %v5775_v21  ;;  %3852 = vmatprep.subr.bf16.mxu1 %v5780_v22  ;;  %v5855_v17 = vld [vmem:[%s6538_s11 + $0x9d4] ss:$8 sps:$4 sm:$0xff]   ;;  %v5861_v21 = vld [vmem:[%s6538_s11 + $0x9e4] ss:$8 sps:$4 sm:$0xff]   ;;  %v5856_v22 = vld [vmem:[%s6538_s11 + $0x1e0] ss:$8 sps:$4 sm:$0xff]  }
  0x55   : > { %4276 = vmatprep.subr.bf16.mxu0 %v5783_v23  ;;  %3839 = vmatprep.mubr.bf16.mxu1 %v4991_v24  ;;  %v5859_v23 = vld [vmem:[%s6538_s11 + $0x9e0] ss:$8 sps:$4 sm:$0xff]   ;;  %v5864_v24 = vld [vmem:[%s6538_s11 + $0x1f4] ss:$8 sps:$4 sm:$0xff]  }
  0x56   : > { %4263 = vmatprep.mubr.bf16.mxu0 %v5007_v25  ;;  %v5867_v25 = vld [vmem:[%s6538_s11 + $0x9f4] ss:$8 sps:$4 sm:$0xff]  }
  0x57   : > { %3853 = vmatpush1.bf16.msra.mxu1 %v5778_v26  ;;  %v5862_v26 = vld [vmem:[%s6538_s11 + $0x1f0] ss:$8 sps:$4 sm:$0xff]  }
  0x58   : > { %4277 = vmatpush1.bf16.msra.mxu0 %v5781_v27  ;;  %3854 = vmatprep.subr.bf16.mxu1 %v5786_v28  ;;  %v5865_v27 = vld [vmem:[%s6538_s11 + $0x9f0] ss:$8 sps:$4 sm:$0xff]   ;;  %v5870_v28 = vld [vmem:[%s6538_s11 + $0x204] ss:$8 sps:$4 sm:$0xff]  }
  0x59   : > { %4278 = vmatprep.subr.bf16.mxu0 %v5789_v29  ;;  %v5873_v29 = vld [vmem:[%s6538_s11 + $0xa04] ss:$8 sps:$4 sm:$0xff]  }
  0x5a   : > { %3840 = vmatmul.mubr.bf16.gmra.mrb[4].mxu1 %v4990_v3  ;;  %v362_v3 = vld [vmem:[%s7391_s0 + $0x108] sm:$0xff] }
  0x5b   : > { %4264 = vmatmul.mubr.bf16.gmra.mrb[4].mxu0 %v5006_v2  ;;  %3855 = vmatpush1.bf16.msra.mxu1 %v5784_v0  ;;  %v5868_v0 = vld [vmem:[%s6538_s11 + $0x200] ss:$8 sps:$4 sm:$0xff]  }
  0x5c   : > { %4279 = vmatpush1.bf16.msra.mxu0 %v5787_v1  ;;  %3856 = vmatprep.subr.bf16.mxu1 %v5792_v5  ;;  %v5871_v1 = vld [vmem:[%s6538_s11 + $0xa00] ss:$8 sps:$4 sm:$0xff]   ;;  %v4960_v5 = vcombine.low %v6651_v42, %v6656_v43  ;;  %v6741_v42 = vld [vmem:[%s7391_s0 + $0x10] sm:$0xff] }
  0x5d   : > { %4280 = vmatprep.subr.bf16.mxu0 %v5795_v6  ;;  %3882 = vmatprep.mubr.bf16.mxu1 %v4961_v45  ;;  %v378_v2 = vld [vmem:[%s7391_s0 + $0x188] sm:$0xff]  ;;  %v4976_v6 = vcombine.low %v6665_v47, %v6670_v48  ;;  %v6746_v43 = vld [vmem:[%s7391_s0 + $0x90] sm:$0xff] }
  0x5e   : > { %4306 = vmatprep.mubr.bf16.mxu0 %v4977_v50  ;;  %v6756_v47 = vld [vmem:[%s7391_s0 + $0xd0] sm:$0xff]  ;;  %v4963_v50 = vcombine.high %v6741_v42, %v6746_v43 }
  0x5f   : > { %3857 = vmatpush1.bf16.msra.mxu1 %v5790_v30  ;;  %v370_v30 = vld [vmem:[%s7391_s0 + $0x148] sm:$0xff]  ;;  %v5888_v48 = vld [vmem:[%s6538_s11 + $0x234] ss:$8 sps:$4 sm:$0xff]  }
  0x60   : > { %4281 = vmatpush1.bf16.msra.mxu0 %v5793_v31  ;;  %3858 = vmatprep.subr.bf16.mxu1 %v5798_v32  ;;  %v386_v31 = vld [vmem:[%s7391_s0 + $0x1c8] sm:$0xff]  ;;  %v5876_v32 = vld [vmem:[%s6538_s11 + $0x214] ss:$8 sps:$4 sm:$0xff]  }
  0x61   : > { %4282 = vmatprep.subr.bf16.mxu0 %v5801_v33  ;;  %v5879_v33 = vld [vmem:[%s6538_s11 + $0xa14] ss:$8 sps:$4 sm:$0xff]   ;;  %v5008_v45 = vcombine.low %v370_v30, %v386_v31 }
  0x63   : > { %3859 = vmatpush1.bf16.msra.mxu1 %v5796_v34  ;;  %v4993_v34 = vcombine.high %v362_v3, %v378_v2 }
  0x64   : > { %4283 = vmatpush1.bf16.msra.mxu0 %v5799_v35  ;;  %3860 = vmatprep.subr.bf16.mxu1 %v5804_v36  ;;  %v5009_v35 = vcombine.high %v370_v30, %v386_v31  ;;  %v5874_v36 = vld [vmem:[%s6538_s11 + $0x210] ss:$8 sps:$4 sm:$0xff]   ;;  %v5954_v30 = vld [vmem:[%s6538_s11 + $0x2e4] ss:$8 sps:$4 sm:$0xff]  }
  0x65   : > { %4284 = vmatprep.subr.bf16.mxu0 %v5807_v37  ;;  %v5877_v37 = vld [vmem:[%s6538_s11 + $0xa10] ss:$8 sps:$4 sm:$0xff]   ;;  %v5957_v31 = vld [vmem:[%s6538_s11 + $0xae4] ss:$8 sps:$4 sm:$0xff]  }
  0x67   : > { %3861 = vmatpush1.bf16.msra.mxu1 %v5802_v38  ;;  %v5882_v38 = vld [vmem:[%s6538_s11 + $0x224] ss:$8 sps:$4 sm:$0xff]  }
  0x68   : > { %4285 = vmatpush1.bf16.msra.mxu0 %v5805_v39  ;;  %3862 = vmatprep.subr.bf16.mxu1 %v5810_v40  ;;  %v5885_v39 = vld [vmem:[%s6538_s11 + $0xa24] ss:$8 sps:$4 sm:$0xff]   ;;  %v5880_v40 = vld [vmem:[%s6538_s11 + $0x220] ss:$8 sps:$4 sm:$0xff]  }
  0x69   : > { %4286 = vmatprep.subr.bf16.mxu0 %v5813_v41  ;;  %v5883_v41 = vld [vmem:[%s6538_s11 + $0xa20] ss:$8 sps:$4 sm:$0xff]  }
  0x6b   : > { %3863 = vmatpush1.bf16.msra.mxu1 %v5808_v44  ;;  %v4992_v44 = vcombine.low %v362_v3, %v378_v2  ;;  %v5948_v3 = vld [vmem:[%s6538_s11 + $0x2d4] ss:$8 sps:$4 sm:$0xff]  }
  0x6c   : > { %4287 = vmatpush1.bf16.msra.mxu0 %v5811_v46  ;;  %3864 = vmatprep.subr.bf16.mxu1 %v5816_v49  ;;  %v6751_v46 = vld [vmem:[%s7391_s0 + $0x50] sm:$0xff] }
  0x6d   : > { %4288 = vmatprep.subr.bf16.mxu0 %v5819_v51  ;;  %v5891_v49 = vld [vmem:[%s6538_s11 + $0xa34] ss:$8 sps:$4 sm:$0xff]   ;;  %v4979_v51 = vcombine.high %v6751_v46, %v6756_v47 }
  0x6e   : > { %v5951_v2 = vld [vmem:[%s6538_s11 + $0xad4] ss:$8 sps:$4 sm:$0xff]  }
  0x6f   : > { %3865 = vmatpush1.bf16.msra.mxu1 %v5814_v52  ;;  %v5886_v52 = vld [vmem:[%s6538_s11 + $0x230] ss:$8 sps:$4 sm:$0xff]  }
  0x70   : > { %4289 = vmatpush1.bf16.msra.mxu0 %v5817_v53  ;;  %3866 = vmatprep.subr.bf16.mxu1 %v5822_v54  ;;  %v5889_v53 = vld [vmem:[%s6538_s11 + $0xa30] ss:$8 sps:$4 sm:$0xff]   ;;  %v5894_v54 = vld [vmem:[%s6538_s11 + $0x244] ss:$8 sps:$4 sm:$0xff]  }
  0x71   : > { %4290 = vmatprep.subr.bf16.mxu0 %v5825_v55  ;;  %v5897_v55 = vld [vmem:[%s6538_s11 + $0xa44] ss:$8 sps:$4 sm:$0xff]  }
  0x73   : > { %3867 = vmatpush1.bf16.msra.mxu1 %v5820_v56  ;;  %v5892_v56 = vld [vmem:[%s6538_s11 + $0x240] ss:$8 sps:$4 sm:$0xff]  }
  0x74   : > { %4291 = vmatpush1.bf16.msra.mxu0 %v5823_v57  ;;  %3868 = vmatprep.subr.bf16.mxu1 %v5828_v58  ;;  %v5895_v57 = vld [vmem:[%s6538_s11 + $0xa40] ss:$8 sps:$4 sm:$0xff]   ;;  %v5900_v58 = vld [vmem:[%s6538_s11 + $0x254] ss:$8 sps:$4 sm:$0xff]  }
  0x75   : > { %4292 = vmatprep.subr.bf16.mxu0 %v5831_v59  ;;  %v5903_v59 = vld [vmem:[%s6538_s11 + $0xa54] ss:$8 sps:$4 sm:$0xff]  }
  0x77   : > { %3869 = vmatpush1.bf16.msra.mxu1 %v5826_v60  ;;  %v5898_v60 = vld [vmem:[%s6538_s11 + $0x250] ss:$8 sps:$4 sm:$0xff]  }
  0x78   : > { %4293 = vmatpush1.bf16.msra.mxu0 %v5829_v61  ;;  %3870 = vmatprep.subr.bf16.mxu1 %v5834_v62  ;;  %v5901_v61 = vld [vmem:[%s6538_s11 + $0xa50] ss:$8 sps:$4 sm:$0xff]   ;;  %v5906_v62 = vld [vmem:[%s6538_s11 + $0x264] ss:$8 sps:$4 sm:$0xff]  }
  0x79   : > { %4294 = vmatprep.subr.bf16.mxu0 %v5837_v63  ;;  %v5909_v63 = vld [vmem:[%s6538_s11 + $0xa64] ss:$8 sps:$4 sm:$0xff]  }
  0x7b   : > { %3871 = vmatpush1.bf16.msra.mxu1 %v5832_v4  ;;  %v5904_v4 = vld [vmem:[%s6538_s11 + $0x260] ss:$8 sps:$4 sm:$0xff]  }
  0x7c   : > { %4295 = vmatpush1.bf16.msra.mxu0 %v5835_v7  ;;  %3872 = vmatprep.subr.bf16.mxu1 %v5840_v8  ;;  %v5907_v7 = vld [vmem:[%s6538_s11 + $0xa60] ss:$8 sps:$4 sm:$0xff]   ;;  %v5912_v8 = vld [vmem:[%s6538_s11 + $0x274] ss:$8 sps:$4 sm:$0xff]  }
  0x7d   : > { %4296 = vmatprep.subr.bf16.mxu0 %v5843_v9  ;;  %v5915_v9 = vld [vmem:[%s6538_s11 + $0xa74] ss:$8 sps:$4 sm:$0xff]  }
  0x7f   : > { %3873 = vmatpush1.bf16.msra.mxu1 %v5838_v10  ;;  %v5910_v10 = vld [vmem:[%s6538_s11 + $0x270] ss:$8 sps:$4 sm:$0xff]  }
  0x80   : > { %4297 = vmatpush1.bf16.msra.mxu0 %v5841_v11  ;;  %3874 = vmatprep.subr.bf16.mxu1 %v5846_v12  ;;  %v5913_v11 = vld [vmem:[%s6538_s11 + $0xa70] ss:$8 sps:$4 sm:$0xff]   ;;  %v5918_v12 = vld [vmem:[%s6538_s11 + $0x284] ss:$8 sps:$4 sm:$0xff]  }
  0x81   : > { %4298 = vmatprep.subr.bf16.mxu0 %v5849_v13  ;;  %v5921_v13 = vld [vmem:[%s6538_s11 + $0xa84] ss:$8 sps:$4 sm:$0xff]  }
  0x83   : > { %3875 = vmatpush1.bf16.msra.mxu1 %v5844_v14  ;;  %v5916_v14 = vld [vmem:[%s6538_s11 + $0x280] ss:$8 sps:$4 sm:$0xff]  }
  0x84   : > { %4299 = vmatpush1.bf16.msra.mxu0 %v5847_v15  ;;  %3876 = vmatprep.subr.bf16.mxu1 %v5852_v16  ;;  %v5919_v15 = vld [vmem:[%s6538_s11 + $0xa80] ss:$8 sps:$4 sm:$0xff]   ;;  %v5924_v16 = vld [vmem:[%s6538_s11 + $0x294] ss:$8 sps:$4 sm:$0xff]  }
  0x85   : > { %4300 = vmatprep.subr.bf16.mxu0 %v5855_v17  ;;  %v5927_v17 = vld [vmem:[%s6538_s11 + $0xa94] ss:$8 sps:$4 sm:$0xff]  }
  0x87   : > { %3877 = vmatpush1.bf16.msra.mxu1 %v5850_v18  ;;  %v5922_v18 = vld [vmem:[%s6538_s11 + $0x290] ss:$8 sps:$4 sm:$0xff]  }
  0x88   : > { %4301 = vmatpush1.bf16.msra.mxu0 %v5853_v19  ;;  %3878 = vmatprep.subr.bf16.mxu1 %v5858_v20  ;;  %v5925_v19 = vld [vmem:[%s6538_s11 + $0xa90] ss:$8 sps:$4 sm:$0xff]   ;;  %v5930_v20 = vld [vmem:[%s6538_s11 + $0x2a4] ss:$8 sps:$4 sm:$0xff]  }
  0x89   : > { %4302 = vmatprep.subr.bf16.mxu0 %v5861_v21  ;;  %v5933_v21 = vld [vmem:[%s6538_s11 + $0xaa4] ss:$8 sps:$4 sm:$0xff]  }
  0x8b   : > { %3879 = vmatpush1.bf16.msra.mxu1 %v5856_v22  ;;  %v5928_v22 = vld [vmem:[%s6538_s11 + $0x2a0] ss:$8 sps:$4 sm:$0xff]  }
  0x8c   : > { %4303 = vmatpush1.bf16.msra.mxu0 %v5859_v23  ;;  %3880 = vmatprep.subr.bf16.mxu1 %v5864_v24  ;;  %v5931_v23 = vld [vmem:[%s6538_s11 + $0xaa0] ss:$8 sps:$4 sm:$0xff]   ;;  %v5936_v24 = vld [vmem:[%s6538_s11 + $0x2b4] ss:$8 sps:$4 sm:$0xff]  }
  0x8d   : > { %4304 = vmatprep.subr.bf16.mxu0 %v5867_v25  ;;  %v5939_v25 = vld [vmem:[%s6538_s11 + $0xab4] ss:$8 sps:$4 sm:$0xff]  }
  0x8f   : > { %3881 = vmatpush1.bf16.msra.mxu1 %v5862_v26  ;;  %v5934_v26 = vld [vmem:[%s6538_s11 + $0x2b0] ss:$8 sps:$4 sm:$0xff]  }
  0x90   : > { %4305 = vmatpush1.bf16.msra.mxu0 %v5865_v27  ;;  %3903 = vmatprep.subr.bf16.mxu1 %v5870_v28  ;;  %v5937_v27 = vld [vmem:[%s6538_s11 + $0xab0] ss:$8 sps:$4 sm:$0xff]   ;;  %v5942_v28 = vld [vmem:[%s6538_s11 + $0x2c4] ss:$8 sps:$4 sm:$0xff]  }
  0x91   : > { %4327 = vmatprep.subr.bf16.mxu0 %v5873_v29  ;;  %v5945_v29 = vld [vmem:[%s6538_s11 + $0xac4] ss:$8 sps:$4 sm:$0xff]  }
  0x92   : > { %3883 = vmatmul.mubr.bf16.vlgmr.msra.gmra.mrb[0].mxu1 %v4960_v5  ;;  %v5946_v5 = vld [vmem:[%s6538_s11 + $0x2d0] ss:$8 sps:$4 sm:$0xff]  }
  0x93   : > { %4307 = vmatmul.mubr.bf16.vlgmr.msra.gmra.mrb[0].mxu0 %v4976_v6  ;;  %3904 = vmatpush1.bf16.msra.mxu1 %v5868_v0  ;;  %v5940_v0 = vld [vmem:[%s6538_s11 + $0x2c0] ss:$8 sps:$4 sm:$0xff]   ;;  %v5949_v6 = vld [vmem:[%s6538_s11 + $0xad0] ss:$8 sps:$4 sm:$0xff]  }
  0x94   : > { %4328 = vmatpush1.bf16.msra.mxu0 %v5871_v1  ;;  %3905 = vmatprep.subr.bf16.mxu1 %v5876_v32  ;;  %v5943_v1 = vld [vmem:[%s6538_s11 + $0xac0] ss:$8 sps:$4 sm:$0xff]  }
  0x95   : > { %4329 = vmatprep.subr.bf16.mxu0 %v5879_v33  ;;  %3892 = vmatprep.mubr.bf16.mxu1 %v4993_v34  ;;  %v5952_v32 = vld [vmem:[%s6538_s11 + $0x2e0] ss:$8 sps:$4 sm:$0xff]   ;;  %v5960_v34 = vld [vmem:[%s6538_s11 + $0x2f4] ss:$8 sps:$4 sm:$0xff]  }
  0x96   : > { %4316 = vmatprep.mubr.bf16.mxu0 %v5009_v35  ;;  %v5955_v33 = vld [vmem:[%s6538_s11 + $0xae0] ss:$8 sps:$4 sm:$0xff]   ;;  %v5963_v35 = vld [vmem:[%s6538_s11 + $0xaf4] ss:$8 sps:$4 sm:$0xff]  }
  0x97   : > { %3906 = vmatpush1.bf16.msra.mxu1 %v5874_v36  ;;  %v5958_v36 = vld [vmem:[%s6538_s11 + $0x2f0] ss:$8 sps:$4 sm:$0xff]  }
  0x98   : > { %4330 = vmatpush1.bf16.msra.mxu0 %v5877_v37  ;;  %3907 = vmatprep.subr.bf16.mxu1 %v5882_v38  ;;  %v5961_v37 = vld [vmem:[%s6538_s11 + $0xaf0] ss:$8 sps:$4 sm:$0xff]   ;;  %v5966_v38 = vld [vmem:[%s6538_s11 + $0x304] ss:$8 sps:$4 sm:$0xff]  }
  0x99   : > { %4331 = vmatprep.subr.bf16.mxu0 %v5885_v39  ;;  %v5969_v39 = vld [vmem:[%s6538_s11 + $0xb04] ss:$8 sps:$4 sm:$0xff]  }
  0x9a   : > { %3893 = vmatmul.mubr.bf16.gmra.mrb[4].mxu1 %v4992_v44  ;;  %v363_v44 = vld [vmem:[%s7391_s0 + $0x110] sm:$0xff] }
  0x9b   : > { %4317 = vmatmul.mubr.bf16.gmra.mrb[4].mxu0 %v5008_v45  ;;  %3908 = vmatpush1.bf16.msra.mxu1 %v5880_v40  ;;  %v5964_v40 = vld [vmem:[%s6538_s11 + $0x300] ss:$8 sps:$4 sm:$0xff]   ;;  %v379_v45 = vld [vmem:[%s7391_s0 + $0x190] sm:$0xff] }
  0x9c   : > { %4332 = vmatpush1.bf16.msra.mxu0 %v5883_v41  ;;  %3909 = vmatprep.subr.bf16.mxu1 %v5888_v48  ;;  %v5967_v41 = vld [vmem:[%s6538_s11 + $0xb00] ss:$8 sps:$4 sm:$0xff]   ;;  %v4962_v48 = vcombine.low %v6741_v42, %v6746_v43  ;;  %v5975_v42 = vld [vmem:[%s6538_s11 + $0xb14] ss:$8 sps:$4 sm:$0xff]   ;;  %v4995_v43 = vcombine.high %v363_v44, %v379_v45 }
  0x9d   : > { %4333 = vmatprep.subr.bf16.mxu0 %v5891_v49  ;;  %3935 = vmatprep.mubr.bf16.mxu1 %v4963_v50  ;;  %v4978_v49 = vcombine.low %v6751_v46, %v6756_v47  ;;  %v371_v50 = vld [vmem:[%s7391_s0 + $0x150] sm:$0xff] }
  0x9e   : > { %4359 = vmatprep.mubr.bf16.mxu0 %v4979_v51  ;;  %v387_v51 = vld [vmem:[%s7391_s0 + $0x1d0] sm:$0xff] }
  0x9f   : > { %3910 = vmatpush1.bf16.msra.mxu1 %v5886_v52  ;;  %v5972_v52 = vld [vmem:[%s6538_s11 + $0x314] ss:$8 sps:$4 sm:$0xff]   ;;  %v5011_v46 = vcombine.high %v371_v50, %v387_v51  ;;  %v5970_v47 = vld [vmem:[%s6538_s11 + $0x310] ss:$8 sps:$4 sm:$0xff]  }
  0xa0   : > { %4334 = vmatpush1.bf16.msra.mxu0 %v5889_v53  ;;  %3911 = vmatprep.subr.bf16.mxu1 %v5894_v54  ;;  %v5973_v53 = vld [vmem:[%s6538_s11 + $0xb10] ss:$8 sps:$4 sm:$0xff]   ;;  %v5978_v54 = vld [vmem:[%s6538_s11 + $0x324] ss:$8 sps:$4 sm:$0xff]  }
  0xa1   : > { %4335 = vmatprep.subr.bf16.mxu0 %v5897_v55  ;;  %v5981_v55 = vld [vmem:[%s6538_s11 + $0xb24] ss:$8 sps:$4 sm:$0xff]  }
  0xa3   : > { %3912 = vmatpush1.bf16.msra.mxu1 %v5892_v56  ;;  %v5976_v56 = vld [vmem:[%s6538_s11 + $0x320] ss:$8 sps:$4 sm:$0xff]  }
  0xa4   : > { %4336 = vmatpush1.bf16.msra.mxu0 %v5895_v57  ;;  %3913 = vmatprep.subr.bf16.mxu1 %v5900_v58  ;;  %v5979_v57 = vld [vmem:[%s6538_s11 + $0xb20] ss:$8 sps:$4 sm:$0xff]   ;;  %v6845_v58 = vld [vmem:[%s7391_s0 + $0x18] sm:$0xff] }
  0xa5   : > { %4337 = vmatprep.subr.bf16.mxu0 %v5903_v59  ;;  %v6850_v59 = vld [vmem:[%s7391_s0 + $0x98] sm:$0xff] }
  0xa7   : > { %3914 = vmatpush1.bf16.msra.mxu1 %v5898_v60  ;;  %v4994_v60 = vcombine.low %v363_v44, %v379_v45  ;;  %v6044_v44 = vld [vmem:[%s6538_s11 + $0x3d4] ss:$8 sps:$4 sm:$0xff]  }
  0xa8   : > { %4338 = vmatpush1.bf16.msra.mxu0 %v5901_v61  ;;  %3915 = vmatprep.subr.bf16.mxu1 %v5906_v62  ;;  %v5010_v61 = vcombine.low %v371_v50, %v387_v51  ;;  %v6855_v62 = vld [vmem:[%s7391_s0 + $0x58] sm:$0xff]  ;;  %v6050_v50 = vld [vmem:[%s6538_s11 + $0x3e4] ss:$8 sps:$4 sm:$0xff]  }
  0xa9   : > { %4339 = vmatprep.subr.bf16.mxu0 %v5909_v63  ;;  %v6860_v63 = vld [vmem:[%s7391_s0 + $0xd8] sm:$0xff]  ;;  %v6053_v51 = vld [vmem:[%s6538_s11 + $0xbe4] ss:$8 sps:$4 sm:$0xff]  }
  0xaa   : > { %v6047_v45 = vld [vmem:[%s6538_s11 + $0xbd4] ss:$8 sps:$4 sm:$0xff]  }
  0xab   : > { %3916 = vmatpush1.bf16.msra.mxu1 %v5904_v4  ;;  %v5984_v4 = vld [vmem:[%s6538_s11 + $0x334] ss:$8 sps:$4 sm:$0xff]  }
  0xac   : > { %4340 = vmatpush1.bf16.msra.mxu0 %v5907_v7  ;;  %3917 = vmatprep.subr.bf16.mxu1 %v5912_v8  ;;  %v5987_v7 = vld [vmem:[%s6538_s11 + $0xb34] ss:$8 sps:$4 sm:$0xff]   ;;  %v4965_v8 = vcombine.high %v6845_v58, %v6850_v59 }
  0xad   : > { %4341 = vmatprep.subr.bf16.mxu0 %v5915_v9  ;;  %v4981_v9 = vcombine.high %v6855_v62, %v6860_v63 }
  0xaf   : > { %3918 = vmatpush1.bf16.msra.mxu1 %v5910_v10  ;;  %v5982_v10 = vld [vmem:[%s6538_s11 + $0x330] ss:$8 sps:$4 sm:$0xff]  }
  0xb0   : > { %4342 = vmatpush1.bf16.msra.mxu0 %v5913_v11  ;;  %3919 = vmatprep.subr.bf16.mxu1 %v5918_v12  ;;  %v5985_v11 = vld [vmem:[%s6538_s11 + $0xb30] ss:$8 sps:$4 sm:$0xff]   ;;  %v5990_v12 = vld [vmem:[%s6538_s11 + $0x344] ss:$8 sps:$4 sm:$0xff]  }
  0xb1   : > { %4343 = vmatprep.subr.bf16.mxu0 %v5921_v13  ;;  %v5993_v13 = vld [vmem:[%s6538_s11 + $0xb44] ss:$8 sps:$4 sm:$0xff]  }
  0xb3   : > { %3920 = vmatpush1.bf16.msra.mxu1 %v5916_v14  ;;  %v5988_v14 = vld [vmem:[%s6538_s11 + $0x340] ss:$8 sps:$4 sm:$0xff]  }
  0xb4   : > { %4344 = vmatpush1.bf16.msra.mxu0 %v5919_v15  ;;  %3921 = vmatprep.subr.bf16.mxu1 %v5924_v16  ;;  %v5991_v15 = vld [vmem:[%s6538_s11 + $0xb40] ss:$8 sps:$4 sm:$0xff]   ;;  %v5996_v16 = vld [vmem:[%s6538_s11 + $0x354] ss:$8 sps:$4 sm:$0xff]  }
  0xb5   : > { %4345 = vmatprep.subr.bf16.mxu0 %v5927_v17  ;;  %v5999_v17 = vld [vmem:[%s6538_s11 + $0xb54] ss:$8 sps:$4 sm:$0xff]  }
  0xb7   : > { %3922 = vmatpush1.bf16.msra.mxu1 %v5922_v18  ;;  %v5994_v18 = vld [vmem:[%s6538_s11 + $0x350] ss:$8 sps:$4 sm:$0xff]  }
  0xb8   : > { %4346 = vmatpush1.bf16.msra.mxu0 %v5925_v19  ;;  %3923 = vmatprep.subr.bf16.mxu1 %v5930_v20  ;;  %v5997_v19 = vld [vmem:[%s6538_s11 + $0xb50] ss:$8 sps:$4 sm:$0xff]   ;;  %v6002_v20 = vld [vmem:[%s6538_s11 + $0x364] ss:$8 sps:$4 sm:$0xff]  }
  0xb9   : > { %4347 = vmatprep.subr.bf16.mxu0 %v5933_v21  ;;  %v6005_v21 = vld [vmem:[%s6538_s11 + $0xb64] ss:$8 sps:$4 sm:$0xff]  }
  0xbb   : > { %3924 = vmatpush1.bf16.msra.mxu1 %v5928_v22  ;;  %v6000_v22 = vld [vmem:[%s6538_s11 + $0x360] ss:$8 sps:$4 sm:$0xff]  }
  0xbc   : > { %4348 = vmatpush1.bf16.msra.mxu0 %v5931_v23  ;;  %3925 = vmatprep.subr.bf16.mxu1 %v5936_v24  ;;  %v6003_v23 = vld [vmem:[%s6538_s11 + $0xb60] ss:$8 sps:$4 sm:$0xff]   ;;  %v6008_v24 = vld [vmem:[%s6538_s11 + $0x374] ss:$8 sps:$4 sm:$0xff]  }
  0xbd   : > { %4349 = vmatprep.subr.bf16.mxu0 %v5939_v25  ;;  %v6011_v25 = vld [vmem:[%s6538_s11 + $0xb74] ss:$8 sps:$4 sm:$0xff]  }
  0xbf   : > { %3926 = vmatpush1.bf16.msra.mxu1 %v5934_v26  ;;  %v6006_v26 = vld [vmem:[%s6538_s11 + $0x370] ss:$8 sps:$4 sm:$0xff]  }
  0xc0   : > { %4350 = vmatpush1.bf16.msra.mxu0 %v5937_v27  ;;  %3927 = vmatprep.subr.bf16.mxu1 %v5942_v28  ;;  %v6009_v27 = vld [vmem:[%s6538_s11 + $0xb70] ss:$8 sps:$4 sm:$0xff]   ;;  %v6014_v28 = vld [vmem:[%s6538_s11 + $0x384] ss:$8 sps:$4 sm:$0xff]  }
  0xc1   : > { %4351 = vmatprep.subr.bf16.mxu0 %v5945_v29  ;;  %v6017_v29 = vld [vmem:[%s6538_s11 + $0xb84] ss:$8 sps:$4 sm:$0xff]  }
  0xc3   : > { %3928 = vmatpush1.bf16.msra.mxu1 %v5940_v0  ;;  %v6012_v0 = vld [vmem:[%s6538_s11 + $0x380] ss:$8 sps:$4 sm:$0xff]  }
  0xc4   : > { %4352 = vmatpush1.bf16.msra.mxu0 %v5943_v1  ;;  %3929 = vmatprep.subr.bf16.mxu1 %v5948_v3  ;;  %v6015_v1 = vld [vmem:[%s6538_s11 + $0xb80] ss:$8 sps:$4 sm:$0xff]   ;;  %v6020_v3 = vld [vmem:[%s6538_s11 + $0x394] ss:$8 sps:$4 sm:$0xff]  }
  0xc5   : > { %4353 = vmatprep.subr.bf16.mxu0 %v5951_v2  ;;  %v6023_v2 = vld [vmem:[%s6538_s11 + $0xb94] ss:$8 sps:$4 sm:$0xff]  }
  0xc7   : > { %3930 = vmatpush1.bf16.msra.mxu1 %v5946_v5  ;;  %v6018_v5 = vld [vmem:[%s6538_s11 + $0x390] ss:$8 sps:$4 sm:$0xff]  }
  0xc8   : > { %4354 = vmatpush1.bf16.msra.mxu0 %v5949_v6  ;;  %3931 = vmatprep.subr.bf16.mxu1 %v5954_v30  ;;  %v6021_v6 = vld [vmem:[%s6538_s11 + $0xb90] ss:$8 sps:$4 sm:$0xff]   ;;  %v6026_v30 = vld [vmem:[%s6538_s11 + $0x3a4] ss:$8 sps:$4 sm:$0xff]  }
  0xc9   : > { %4355 = vmatprep.subr.bf16.mxu0 %v5957_v31  ;;  %v6029_v31 = vld [vmem:[%s6538_s11 + $0xba4] ss:$8 sps:$4 sm:$0xff]  }
  0xcb   : > { %3932 = vmatpush1.bf16.msra.mxu1 %v5952_v32  ;;  %v6024_v32 = vld [vmem:[%s6538_s11 + $0x3a0] ss:$8 sps:$4 sm:$0xff]  }
  0xcc   : > { %4356 = vmatpush1.bf16.msra.mxu0 %v5955_v33  ;;  %3933 = vmatprep.subr.bf16.mxu1 %v5960_v34  ;;  %v6027_v33 = vld [vmem:[%s6538_s11 + $0xba0] ss:$8 sps:$4 sm:$0xff]   ;;  %v6032_v34 = vld [vmem:[%s6538_s11 + $0x3b4] ss:$8 sps:$4 sm:$0xff]  }
  0xcd   : > { %4357 = vmatprep.subr.bf16.mxu0 %v5963_v35  ;;  %v6035_v35 = vld [vmem:[%s6538_s11 + $0xbb4] ss:$8 sps:$4 sm:$0xff]  }
  0xcf   : > { %3934 = vmatpush1.bf16.msra.mxu1 %v5958_v36  ;;  %v6030_v36 = vld [vmem:[%s6538_s11 + $0x3b0] ss:$8 sps:$4 sm:$0xff]  }
  0xd0   : > { %4358 = vmatpush1.bf16.msra.mxu0 %v5961_v37  ;;  %3956 = vmatprep.subr.bf16.mxu1 %v5966_v38  ;;  %v6033_v37 = vld [vmem:[%s6538_s11 + $0xbb0] ss:$8 sps:$4 sm:$0xff]   ;;  %v6038_v38 = vld [vmem:[%s6538_s11 + $0x3c4] ss:$8 sps:$4 sm:$0xff]  }
  0xd1   : > { %4380 = vmatprep.subr.bf16.mxu0 %v5969_v39  ;;  %v6041_v39 = vld [vmem:[%s6538_s11 + $0xbc4] ss:$8 sps:$4 sm:$0xff]  }
  0xd2   : > { %3936 = vmatmul.mubr.bf16.vlgmr.msra.gmra.mrb[0].mxu1 %v4962_v48  ;;  %v6042_v48 = vld [vmem:[%s6538_s11 + $0x3d0] ss:$8 sps:$4 sm:$0xff]  }
  0xd3   : > { %4360 = vmatmul.mubr.bf16.vlgmr.msra.gmra.mrb[0].mxu0 %v4978_v49  ;;  %3957 = vmatpush1.bf16.msra.mxu1 %v5964_v40  ;;  %v6036_v40 = vld [vmem:[%s6538_s11 + $0x3c0] ss:$8 sps:$4 sm:$0xff]   ;;  %v6045_v49 = vld [vmem:[%s6538_s11 + $0xbd0] ss:$8 sps:$4 sm:$0xff]  }
  0xd4   : > { %4381 = vmatpush1.bf16.msra.mxu0 %v5967_v41  ;;  %3958 = vmatprep.subr.bf16.mxu1 %v5972_v52  ;;  %v6039_v41 = vld [vmem:[%s6538_s11 + $0xbc0] ss:$8 sps:$4 sm:$0xff]  }
  0xd5   : > { %4382 = vmatprep.subr.bf16.mxu0 %v5975_v42  ;;  %3945 = vmatprep.mubr.bf16.mxu1 %v4995_v43  ;;  %v6048_v52 = vld [vmem:[%s6538_s11 + $0x3e0] ss:$8 sps:$4 sm:$0xff]   ;;  %v6056_v43 = vld [vmem:[%s6538_s11 + $0x3f4] ss:$8 sps:$4 sm:$0xff]  }
  0xd6   : > { %4369 = vmatprep.mubr.bf16.mxu0 %v5011_v46  ;;  %v6051_v42 = vld [vmem:[%s6538_s11 + $0xbe0] ss:$8 sps:$4 sm:$0xff]   ;;  %v6059_v46 = vld [vmem:[%s6538_s11 + $0xbf4] ss:$8 sps:$4 sm:$0xff]  }
  0xd7   : > { %3959 = vmatpush1.bf16.msra.mxu1 %v5970_v47  ;;  %v6054_v47 = vld [vmem:[%s6538_s11 + $0x3f0] ss:$8 sps:$4 sm:$0xff]  }
  0xd8   : > { %4383 = vmatpush1.bf16.msra.mxu0 %v5973_v53  ;;  %3960 = vmatprep.subr.bf16.mxu1 %v5978_v54  ;;  %v6057_v53 = vld [vmem:[%s6538_s11 + $0xbf0] ss:$8 sps:$4 sm:$0xff]   ;;  %v6062_v54 = vld [vmem:[%s6538_s11 + $0x404] ss:$8 sps:$4 sm:$0xff]  }
  0xd9   : > { %4384 = vmatprep.subr.bf16.mxu0 %v5981_v55  ;;  %v6065_v55 = vld [vmem:[%s6538_s11 + $0xc04] ss:$8 sps:$4 sm:$0xff]  }
  0xda   : > { %3946 = vmatmul.mubr.bf16.gmra.mrb[4].mxu1 %v4994_v60  ;;  %v364_v60 = vld [vmem:[%s7391_s0 + $0x118] sm:$0xff] }
  0xdb   : > { %4370 = vmatmul.mubr.bf16.gmra.mrb[4].mxu0 %v5010_v61  ;;  %3961 = vmatpush1.bf16.msra.mxu1 %v5976_v56  ;;  %v6060_v56 = vld [vmem:[%s6538_s11 + $0x400] ss:$8 sps:$4 sm:$0xff]   ;;  %v380_v61 = vld [vmem:[%s7391_s0 + $0x198] sm:$0xff] }
  0xdc   : > { %4385 = vmatpush1.bf16.msra.mxu0 %v5979_v57  ;;  %3962 = vmatprep.subr.bf16.mxu1 %v5984_v4  ;;  %v6063_v57 = vld [vmem:[%s6538_s11 + $0xc00] ss:$8 sps:$4 sm:$0xff]   ;;  %v4964_v4 = vcombine.low %v6845_v58, %v6850_v59  ;;  %v6071_v58 = vld [vmem:[%s6538_s11 + $0xc14] ss:$8 sps:$4 sm:$0xff]   ;;  %v4997_v59 = vcombine.high %v364_v60, %v380_v61 }
  0xdd   : > { %4386 = vmatprep.subr.bf16.mxu0 %v5987_v7  ;;  %3988 = vmatprep.mubr.bf16.mxu1 %v4965_v8  ;;  %v4980_v7 = vcombine.low %v6855_v62, %v6860_v63  ;;  %v372_v8 = vld [vmem:[%s7391_s0 + $0x158] sm:$0xff] }
  0xde   : > { %4412 = vmatprep.mubr.bf16.mxu0 %v4981_v9  ;;  %v388_v9 = vld [vmem:[%s7391_s0 + $0x1d8] sm:$0xff] }
  0xdf   : > { %3963 = vmatpush1.bf16.msra.mxu1 %v5982_v10  ;;  %v6068_v10 = vld [vmem:[%s6538_s11 + $0x414] ss:$8 sps:$4 sm:$0xff]   ;;  %v5013_v62 = vcombine.high %v372_v8, %v388_v9  ;;  %v6066_v63 = vld [vmem:[%s6538_s11 + $0x410] ss:$8 sps:$4 sm:$0xff]  }
  0xe0   : > { %4387 = vmatpush1.bf16.msra.mxu0 %v5985_v11  ;;  %3964 = vmatprep.subr.bf16.mxu1 %v5990_v12  ;;  %v6069_v11 = vld [vmem:[%s6538_s11 + $0xc10] ss:$8 sps:$4 sm:$0xff]   ;;  %v6074_v12 = vld [vmem:[%s6538_s11 + $0x424] ss:$8 sps:$4 sm:$0xff]  }
  0xe1   : > { %4388 = vmatprep.subr.bf16.mxu0 %v5993_v13  ;;  %v6077_v13 = vld [vmem:[%s6538_s11 + $0xc24] ss:$8 sps:$4 sm:$0xff]  }
  0xe3   : > { %3965 = vmatpush1.bf16.msra.mxu1 %v5988_v14  ;;  %v6072_v14 = vld [vmem:[%s6538_s11 + $0x420] ss:$8 sps:$4 sm:$0xff]  }
  0xe4   : > { %4389 = vmatpush1.bf16.msra.mxu0 %v5991_v15  ;;  %3966 = vmatprep.subr.bf16.mxu1 %v5996_v16  ;;  %v6075_v15 = vld [vmem:[%s6538_s11 + $0xc20] ss:$8 sps:$4 sm:$0xff]  }
  0xe5   : > { %4390 = vmatprep.subr.bf16.mxu0 %v5999_v17  ;;  %v6949_v16 = vld [vmem:[%s7391_s0 + $0x20] sm:$0xff] }
  0xe6   : > { %v6954_v17 = vld [vmem:[%s7391_s0 + $0xa0] sm:$0xff] }
  0xe7   : > { %3967 = vmatpush1.bf16.msra.mxu1 %v5994_v18  ;;  %v4996_v18 = vcombine.low %v364_v60, %v380_v61  ;;  %v6140_v60 = vld [vmem:[%s6538_s11 + $0x4d4] ss:$8 sps:$4 sm:$0xff]  }
  0xe8   : > { %4391 = vmatpush1.bf16.msra.mxu0 %v5997_v19  ;;  %3968 = vmatprep.subr.bf16.mxu1 %v6002_v20  ;;  %v5012_v19 = vcombine.low %v372_v8, %v388_v9  ;;  %v6959_v20 = vld [vmem:[%s7391_s0 + $0x60] sm:$0xff]  ;;  %v6143_v61 = vld [vmem:[%s6538_s11 + $0xcd4] ss:$8 sps:$4 sm:$0xff]  }
  0xe9   : > { %4392 = vmatprep.subr.bf16.mxu0 %v6005_v21  ;;  %v6964_v21 = vld [vmem:[%s7391_s0 + $0xe0] sm:$0xff] }
  0xea   : > { %v6146_v8 = vld [vmem:[%s6538_s11 + $0x4e4] ss:$8 sps:$4 sm:$0xff]  }
  0xeb   : > { %3969 = vmatpush1.bf16.msra.mxu1 %v6000_v22  ;;  %v6080_v22 = vld [vmem:[%s6538_s11 + $0x434] ss:$8 sps:$4 sm:$0xff]   ;;  %v6149_v9 = vld [vmem:[%s6538_s11 + $0xce4] ss:$8 sps:$4 sm:$0xff]  }
  0xec   : > { %4393 = vmatpush1.bf16.msra.mxu0 %v6003_v23  ;;  %3970 = vmatprep.subr.bf16.mxu1 %v6008_v24  ;;  %v6083_v23 = vld [vmem:[%s6538_s11 + $0xc34] ss:$8 sps:$4 sm:$0xff]   ;;  %v4967_v24 = vcombine.high %v6949_v16, %v6954_v17 }
  0xed   : > { %4394 = vmatprep.subr.bf16.mxu0 %v6011_v25  ;;  %v4983_v25 = vcombine.high %v6959_v20, %v6964_v21 }
  0xef   : > { %3971 = vmatpush1.bf16.msra.mxu1 %v6006_v26  ;;  %v6078_v26 = vld [vmem:[%s6538_s11 + $0x430] ss:$8 sps:$4 sm:$0xff]  }
  0xf0   : > { %4395 = vmatpush1.bf16.msra.mxu0 %v6009_v27  ;;  %3972 = vmatprep.subr.bf16.mxu1 %v6014_v28  ;;  %v6081_v27 = vld [vmem:[%s6538_s11 + $0xc30] ss:$8 sps:$4 sm:$0xff]   ;;  %v6086_v28 = vld [vmem:[%s6538_s11 + $0x444] ss:$8 sps:$4 sm:$0xff]  }
  0xf1   : > { %4396 = vmatprep.subr.bf16.mxu0 %v6017_v29  ;;  %v6089_v29 = vld [vmem:[%s6538_s11 + $0xc44] ss:$8 sps:$4 sm:$0xff]  }
  0xf3   : > { %3973 = vmatpush1.bf16.msra.mxu1 %v6012_v0  ;;  %v6084_v0 = vld [vmem:[%s6538_s11 + $0x440] ss:$8 sps:$4 sm:$0xff]  }
  0xf4   : > { %4397 = vmatpush1.bf16.msra.mxu0 %v6015_v1  ;;  %3974 = vmatprep.subr.bf16.mxu1 %v6020_v3  ;;  %v6087_v1 = vld [vmem:[%s6538_s11 + $0xc40] ss:$8 sps:$4 sm:$0xff]   ;;  %v6092_v3 = vld [vmem:[%s6538_s11 + $0x454] ss:$8 sps:$4 sm:$0xff]  }
  0xf5   : > { %4398 = vmatprep.subr.bf16.mxu0 %v6023_v2  ;;  %v6095_v2 = vld [vmem:[%s6538_s11 + $0xc54] ss:$8 sps:$4 sm:$0xff]  }
  0xf7   : > { %3975 = vmatpush1.bf16.msra.mxu1 %v6018_v5  ;;  %v6090_v5 = vld [vmem:[%s6538_s11 + $0x450] ss:$8 sps:$4 sm:$0xff]  }
  0xf8   : > { %4399 = vmatpush1.bf16.msra.mxu0 %v6021_v6  ;;  %3976 = vmatprep.subr.bf16.mxu1 %v6026_v30  ;;  %v6093_v6 = vld [vmem:[%s6538_s11 + $0xc50] ss:$8 sps:$4 sm:$0xff]   ;;  %v6098_v30 = vld [vmem:[%s6538_s11 + $0x464] ss:$8 sps:$4 sm:$0xff]  }
  0xf9   : > { %4400 = vmatprep.subr.bf16.mxu0 %v6029_v31  ;;  %v6101_v31 = vld [vmem:[%s6538_s11 + $0xc64] ss:$8 sps:$4 sm:$0xff]  }
  0xfb   : > { %3977 = vmatpush1.bf16.msra.mxu1 %v6024_v32  ;;  %v6096_v32 = vld [vmem:[%s6538_s11 + $0x460] ss:$8 sps:$4 sm:$0xff]  }
  0xfc   : > { %4401 = vmatpush1.bf16.msra.mxu0 %v6027_v33  ;;  %3978 = vmatprep.subr.bf16.mxu1 %v6032_v34  ;;  %v6099_v33 = vld [vmem:[%s6538_s11 + $0xc60] ss:$8 sps:$4 sm:$0xff]   ;;  %v6104_v34 = vld [vmem:[%s6538_s11 + $0x474] ss:$8 sps:$4 sm:$0xff]  }
  0xfd   : > { %4402 = vmatprep.subr.bf16.mxu0 %v6035_v35  ;;  %v6107_v35 = vld [vmem:[%s6538_s11 + $0xc74] ss:$8 sps:$4 sm:$0xff]  }
  0xff   : > { %3979 = vmatpush1.bf16.msra.mxu1 %v6030_v36  ;;  %v6102_v36 = vld [vmem:[%s6538_s11 + $0x470] ss:$8 sps:$4 sm:$0xff]  }
 0x100   : > { %4403 = vmatpush1.bf16.msra.mxu0 %v6033_v37  ;;  %3980 = vmatprep.subr.bf16.mxu1 %v6038_v38  ;;  %v6105_v37 = vld [vmem:[%s6538_s11 + $0xc70] ss:$8 sps:$4 sm:$0xff]   ;;  %v6110_v38 = vld [vmem:[%s6538_s11 + $0x484] ss:$8 sps:$4 sm:$0xff]  }
 0x101   : > { %4404 = vmatprep.subr.bf16.mxu0 %v6041_v39  ;;  %v6113_v39 = vld [vmem:[%s6538_s11 + $0xc84] ss:$8 sps:$4 sm:$0xff]  }
 0x103   : > { %3981 = vmatpush1.bf16.msra.mxu1 %v6036_v40  ;;  %v6108_v40 = vld [vmem:[%s6538_s11 + $0x480] ss:$8 sps:$4 sm:$0xff]  }
 0x104   : > { %4405 = vmatpush1.bf16.msra.mxu0 %v6039_v41  ;;  %3982 = vmatprep.subr.bf16.mxu1 %v6044_v44  ;;  %v6111_v41 = vld [vmem:[%s6538_s11 + $0xc80] ss:$8 sps:$4 sm:$0xff]   ;;  %v6116_v44 = vld [vmem:[%s6538_s11 + $0x494] ss:$8 sps:$4 sm:$0xff]  }
 0x105   : > { %4406 = vmatprep.subr.bf16.mxu0 %v6047_v45  ;;  %v6119_v45 = vld [vmem:[%s6538_s11 + $0xc94] ss:$8 sps:$4 sm:$0xff]  }
 0x107   : > { %3983 = vmatpush1.bf16.msra.mxu1 %v6042_v48  ;;  %v6114_v48 = vld [vmem:[%s6538_s11 + $0x490] ss:$8 sps:$4 sm:$0xff]  }
 0x108   : > { %4407 = vmatpush1.bf16.msra.mxu0 %v6045_v49  ;;  %3984 = vmatprep.subr.bf16.mxu1 %v6050_v50  ;;  %v6117_v49 = vld [vmem:[%s6538_s11 + $0xc90] ss:$8 sps:$4 sm:$0xff]   ;;  %v6122_v50 = vld [vmem:[%s6538_s11 + $0x4a4] ss:$8 sps:$4 sm:$0xff]  }
 0x109   : > { %4408 = vmatprep.subr.bf16.mxu0 %v6053_v51  ;;  %v6125_v51 = vld [vmem:[%s6538_s11 + $0xca4] ss:$8 sps:$4 sm:$0xff]  }
 0x10b   : > { %3985 = vmatpush1.bf16.msra.mxu1 %v6048_v52  ;;  %v6120_v52 = vld [vmem:[%s6538_s11 + $0x4a0] ss:$8 sps:$4 sm:$0xff]  }
 0x10c   : > { %4409 = vmatpush1.bf16.msra.mxu0 %v6051_v42  ;;  %3986 = vmatprep.subr.bf16.mxu1 %v6056_v43  ;;  %v6123_v42 = vld [vmem:[%s6538_s11 + $0xca0] ss:$8 sps:$4 sm:$0xff]   ;;  %v6128_v43 = vld [vmem:[%s6538_s11 + $0x4b4] ss:$8 sps:$4 sm:$0xff]  }
 0x10d   : > { %4410 = vmatprep.subr.bf16.mxu0 %v6059_v46  ;;  %v6131_v46 = vld [vmem:[%s6538_s11 + $0xcb4] ss:$8 sps:$4 sm:$0xff]  }
 0x10f   : > { %3987 = vmatpush1.bf16.msra.mxu1 %v6054_v47  ;;  %v6126_v47 = vld [vmem:[%s6538_s11 + $0x4b0] ss:$8 sps:$4 sm:$0xff]  }
 0x110   : > { %4411 = vmatpush1.bf16.msra.mxu0 %v6057_v53  ;;  %4009 = vmatprep.subr.bf16.mxu1 %v6062_v54  ;;  %v6129_v53 = vld [vmem:[%s6538_s11 + $0xcb0] ss:$8 sps:$4 sm:$0xff]   ;;  %v6134_v54 = vld [vmem:[%s6538_s11 + $0x4c4] ss:$8 sps:$4 sm:$0xff]  }
 0x111   : > { %4433 = vmatprep.subr.bf16.mxu0 %v6065_v55  ;;  %v6137_v55 = vld [vmem:[%s6538_s11 + $0xcc4] ss:$8 sps:$4 sm:$0xff]  }
 0x112   : > { %3989 = vmatmul.mubr.bf16.vlgmr.msra.gmra.mrb[0].mxu1 %v4964_v4  ;;  %v6138_v4 = vld [vmem:[%s6538_s11 + $0x4d0] ss:$8 sps:$4 sm:$0xff]  }
 0x113   : > { %4413 = vmatmul.mubr.bf16.vlgmr.msra.gmra.mrb[0].mxu0 %v4980_v7  ;;  %4010 = vmatpush1.bf16.msra.mxu1 %v6060_v56  ;;  %v6132_v56 = vld [vmem:[%s6538_s11 + $0x4c0] ss:$8 sps:$4 sm:$0xff]   ;;  %v6141_v7 = vld [vmem:[%s6538_s11 + $0xcd0] ss:$8 sps:$4 sm:$0xff]  }
 0x114   : > { %4434 = vmatpush1.bf16.msra.mxu0 %v6063_v57  ;;  %4011 = vmatprep.subr.bf16.mxu1 %v6068_v10  ;;  %v6135_v57 = vld [vmem:[%s6538_s11 + $0xcc0] ss:$8 sps:$4 sm:$0xff]  }
 0x115   : > { %4435 = vmatprep.subr.bf16.mxu0 %v6071_v58  ;;  %3998 = vmatprep.mubr.bf16.mxu1 %v4997_v59  ;;  %v6144_v10 = vld [vmem:[%s6538_s11 + $0x4e0] ss:$8 sps:$4 sm:$0xff]   ;;  %v6152_v59 = vld [vmem:[%s6538_s11 + $0x4f4] ss:$8 sps:$4 sm:$0xff]  }
 0x116   : > { %4422 = vmatprep.mubr.bf16.mxu0 %v5013_v62  ;;  %v6147_v58 = vld [vmem:[%s6538_s11 + $0xce0] ss:$8 sps:$4 sm:$0xff]   ;;  %v6155_v62 = vld [vmem:[%s6538_s11 + $0xcf4] ss:$8 sps:$4 sm:$0xff]  }
 0x117   : > { %4012 = vmatpush1.bf16.msra.mxu1 %v6066_v63  ;;  %v6150_v63 = vld [vmem:[%s6538_s11 + $0x4f0] ss:$8 sps:$4 sm:$0xff]  }
 0x118   : > { %4436 = vmatpush1.bf16.msra.mxu0 %v6069_v11  ;;  %4013 = vmatprep.subr.bf16.mxu1 %v6074_v12  ;;  %v6153_v11 = vld [vmem:[%s6538_s11 + $0xcf0] ss:$8 sps:$4 sm:$0xff]   ;;  %v6158_v12 = vld [vmem:[%s6538_s11 + $0x504] ss:$8 sps:$4 sm:$0xff]  }
 0x119   : > { %4437 = vmatprep.subr.bf16.mxu0 %v6077_v13  ;;  %v6161_v13 = vld [vmem:[%s6538_s11 + $0xd04] ss:$8 sps:$4 sm:$0xff]  }
 0x11a   : > { %3999 = vmatmul.mubr.bf16.gmra.mrb[4].mxu1 %v4996_v18  ;;  %v373_v18 = vld [vmem:[%s7391_s0 + $0x160] sm:$0xff] }
 0x11b   : > { %4423 = vmatmul.mubr.bf16.gmra.mrb[4].mxu0 %v5012_v19  ;;  %4014 = vmatpush1.bf16.msra.mxu1 %v6072_v14  ;;  %v365_v14 = vld [vmem:[%s7391_s0 + $0x120] sm:$0xff] }
 0x11c   : > { %4438 = vmatpush1.bf16.msra.mxu0 %v6075_v15  ;;  %4015 = vmatprep.subr.bf16.mxu1 %v6080_v22  ;;  %v381_v15 = vld [vmem:[%s7391_s0 + $0x1a0] sm:$0xff]  ;;  %v4966_v22 = vcombine.low %v6949_v16, %v6954_v17 }
 0x11d   : > { %4439 = vmatprep.subr.bf16.mxu0 %v6083_v23  ;;  %4041 = vmatprep.mubr.bf16.mxu1 %v4967_v24  ;;  %v389_v19 = vld [vmem:[%s7391_s0 + $0x1e0] sm:$0xff]  ;;  %v4982_v23 = vcombine.low %v6959_v20, %v6964_v21  ;;  %v7051_v20 = vld [vmem:[%s7391_s0 + $0x28] sm:$0xff] }
 0x11e   : > { %4465 = vmatprep.mubr.bf16.mxu0 %v4983_v25  ;;  %v6156_v24 = vld [vmem:[%s6538_s11 + $0x500] ss:$8 sps:$4 sm:$0xff]   ;;  %v6170_v16 = vld [vmem:[%s6538_s11 + $0x524] ss:$8 sps:$4 sm:$0xff]  }
 0x11f   : > { %4016 = vmatpush1.bf16.msra.mxu1 %v6078_v26  ;;  %v6159_v25 = vld [vmem:[%s6538_s11 + $0xd00] ss:$8 sps:$4 sm:$0xff]   ;;  %v6164_v26 = vld [vmem:[%s6538_s11 + $0x514] ss:$8 sps:$4 sm:$0xff]   ;;  %v6173_v17 = vld [vmem:[%s6538_s11 + $0xd24] ss:$8 sps:$4 sm:$0xff]  }
 0x120   : > { %4440 = vmatpush1.bf16.msra.mxu0 %v6081_v27  ;;  %4017 = vmatprep.subr.bf16.mxu1 %v6086_v28  ;;  %v6167_v27 = vld [vmem:[%s6538_s11 + $0xd14] ss:$8 sps:$4 sm:$0xff]   ;;  %v6162_v28 = vld [vmem:[%s6538_s11 + $0x510] ss:$8 sps:$4 sm:$0xff]   ;;  %v7056_v21 = vld [vmem:[%s7391_s0 + $0xa8] sm:$0xff] }
 0x121   : > { %4441 = vmatprep.subr.bf16.mxu0 %v6089_v29  ;;  %v6165_v29 = vld [vmem:[%s6538_s11 + $0xd10] ss:$8 sps:$4 sm:$0xff]  }
 0x123   : > { %4018 = vmatpush1.bf16.msra.mxu1 %v6084_v0  ;;  %v4999_v0 = vcombine.high %v365_v14, %v381_v15 }
 0x124   : > { %4442 = vmatpush1.bf16.msra.mxu0 %v6087_v1  ;;  %4019 = vmatprep.subr.bf16.mxu1 %v6092_v3  ;;  %v5015_v1 = vcombine.high %v373_v18, %v389_v19  ;;  %v7061_v3 = vld [vmem:[%s7391_s0 + $0x68] sm:$0xff] }
 0x125   : > { %4443 = vmatprep.subr.bf16.mxu0 %v6095_v2  ;;  %v7066_v2 = vld [vmem:[%s7391_s0 + $0xe8] sm:$0xff] }
 0x127   : > { %4020 = vmatpush1.bf16.msra.mxu1 %v6090_v5  ;;  %v4998_v5 = vcombine.low %v365_v14, %v381_v15  ;;  %v6228_v14 = vld [vmem:[%s6538_s11 + $0x5c0] ss:$8 sps:$4 sm:$0xff]  }
 0x128   : > { %4444 = vmatpush1.bf16.msra.mxu0 %v6093_v6  ;;  %4021 = vmatprep.subr.bf16.mxu1 %v6098_v30  ;;  %v5014_v6 = vcombine.low %v373_v18, %v389_v19  ;;  %v6168_v30 = vld [vmem:[%s6538_s11 + $0x520] ss:$8 sps:$4 sm:$0xff]   ;;  %v6236_v18 = vld [vmem:[%s6538_s11 + $0x5d4] ss:$8 sps:$4 sm:$0xff]  }
 0x129   : > { %4445 = vmatprep.subr.bf16.mxu0 %v6101_v31  ;;  %v6171_v31 = vld [vmem:[%s6538_s11 + $0xd20] ss:$8 sps:$4 sm:$0xff]   ;;  %v6239_v19 = vld [vmem:[%s6538_s11 + $0xdd4] ss:$8 sps:$4 sm:$0xff]  }
 0x12a   : > { %v6231_v15 = vld [vmem:[%s6538_s11 + $0xdc0] ss:$8 sps:$4 sm:$0xff]  }
 0x12b   : > { %4022 = vmatpush1.bf16.msra.mxu1 %v6096_v32  ;;  %v6176_v32 = vld [vmem:[%s6538_s11 + $0x534] ss:$8 sps:$4 sm:$0xff]  }
 0x12c   : > { %4446 = vmatpush1.bf16.msra.mxu0 %v6099_v33  ;;  %4023 = vmatprep.subr.bf16.mxu1 %v6104_v34  ;;  %v6179_v33 = vld [vmem:[%s6538_s11 + $0xd34] ss:$8 sps:$4 sm:$0xff]   ;;  %v4969_v34 = vcombine.high %v7051_v20, %v7056_v21 }
 0x12d   : > { %4447 = vmatprep.subr.bf16.mxu0 %v6107_v35  ;;  %v4985_v35 = vcombine.high %v7061_v3, %v7066_v2 }
 0x12f   : > { %4024 = vmatpush1.bf16.msra.mxu1 %v6102_v36  ;;  %v6174_v36 = vld [vmem:[%s6538_s11 + $0x530] ss:$8 sps:$4 sm:$0xff]  }
 0x130   : > { %4448 = vmatpush1.bf16.msra.mxu0 %v6105_v37  ;;  %4025 = vmatprep.subr.bf16.mxu1 %v6110_v38  ;;  %v6177_v37 = vld [vmem:[%s6538_s11 + $0xd30] ss:$8 sps:$4 sm:$0xff]   ;;  %v6182_v38 = vld [vmem:[%s6538_s11 + $0x544] ss:$8 sps:$4 sm:$0xff]  }
 0x131   : > { %4449 = vmatprep.subr.bf16.mxu0 %v6113_v39  ;;  %v6185_v39 = vld [vmem:[%s6538_s11 + $0xd44] ss:$8 sps:$4 sm:$0xff]  }
 0x133   : > { %4026 = vmatpush1.bf16.msra.mxu1 %v6108_v40  ;;  %v6180_v40 = vld [vmem:[%s6538_s11 + $0x540] ss:$8 sps:$4 sm:$0xff]  }
 0x134   : > { %4450 = vmatpush1.bf16.msra.mxu0 %v6111_v41  ;;  %4027 = vmatprep.subr.bf16.mxu1 %v6116_v44  ;;  %v6183_v41 = vld [vmem:[%s6538_s11 + $0xd40] ss:$8 sps:$4 sm:$0xff]   ;;  %v6188_v44 = vld [vmem:[%s6538_s11 + $0x554] ss:$8 sps:$4 sm:$0xff]  }
 0x135   : > { %4451 = vmatprep.subr.bf16.mxu0 %v6119_v45  ;;  %v6191_v45 = vld [vmem:[%s6538_s11 + $0xd54] ss:$8 sps:$4 sm:$0xff]  }
 0x137   : > { %4028 = vmatpush1.bf16.msra.mxu1 %v6114_v48  ;;  %v6186_v48 = vld [vmem:[%s6538_s11 + $0x550] ss:$8 sps:$4 sm:$0xff]  }
 0x138   : > { %4452 = vmatpush1.bf16.msra.mxu0 %v6117_v49  ;;  %4029 = vmatprep.subr.bf16.mxu1 %v6122_v50  ;;  %v6189_v49 = vld [vmem:[%s6538_s11 + $0xd50] ss:$8 sps:$4 sm:$0xff]   ;;  %v6194_v50 = vld [vmem:[%s6538_s11 + $0x564] ss:$8 sps:$4 sm:$0xff]  }
 0x139   : > { %4453 = vmatprep.subr.bf16.mxu0 %v6125_v51  ;;  %v6197_v51 = vld [vmem:[%s6538_s11 + $0xd64] ss:$8 sps:$4 sm:$0xff]  }
 0x13b   : > { %4030 = vmatpush1.bf16.msra.mxu1 %v6120_v52  ;;  %v6192_v52 = vld [vmem:[%s6538_s11 + $0x560] ss:$8 sps:$4 sm:$0xff]  }
 0x13c   : > { %4454 = vmatpush1.bf16.msra.mxu0 %v6123_v42  ;;  %4031 = vmatprep.subr.bf16.mxu1 %v6128_v43  ;;  %v6195_v42 = vld [vmem:[%s6538_s11 + $0xd60] ss:$8 sps:$4 sm:$0xff]   ;;  %v6200_v43 = vld [vmem:[%s6538_s11 + $0x574] ss:$8 sps:$4 sm:$0xff]  }
 0x13d   : > { %4455 = vmatprep.subr.bf16.mxu0 %v6131_v46  ;;  %v6203_v46 = vld [vmem:[%s6538_s11 + $0xd74] ss:$8 sps:$4 sm:$0xff]  }
 0x13f   : > { %4032 = vmatpush1.bf16.msra.mxu1 %v6126_v47  ;;  %v6198_v47 = vld [vmem:[%s6538_s11 + $0x570] ss:$8 sps:$4 sm:$0xff]  }
 0x140   : > { %4456 = vmatpush1.bf16.msra.mxu0 %v6129_v53  ;;  %4033 = vmatprep.subr.bf16.mxu1 %v6134_v54  ;;  %v6201_v53 = vld [vmem:[%s6538_s11 + $0xd70] ss:$8 sps:$4 sm:$0xff]   ;;  %v6206_v54 = vld [vmem:[%s6538_s11 + $0x584] ss:$8 sps:$4 sm:$0xff]  }
 0x141   : > { %4457 = vmatprep.subr.bf16.mxu0 %v6137_v55  ;;  %v6209_v55 = vld [vmem:[%s6538_s11 + $0xd84] ss:$8 sps:$4 sm:$0xff]  }
 0x143   : > { %4034 = vmatpush1.bf16.msra.mxu1 %v6132_v56  ;;  %v6204_v56 = vld [vmem:[%s6538_s11 + $0x580] ss:$8 sps:$4 sm:$0xff]  }
 0x144   : > { %4458 = vmatpush1.bf16.msra.mxu0 %v6135_v57  ;;  %4035 = vmatprep.subr.bf16.mxu1 %v6140_v60  ;;  %v6207_v57 = vld [vmem:[%s6538_s11 + $0xd80] ss:$8 sps:$4 sm:$0xff]   ;;  %v6212_v60 = vld [vmem:[%s6538_s11 + $0x594] ss:$8 sps:$4 sm:$0xff]  }
 0x145   : > { %4459 = vmatprep.subr.bf16.mxu0 %v6143_v61  ;;  %v6215_v61 = vld [vmem:[%s6538_s11 + $0xd94] ss:$8 sps:$4 sm:$0xff]  }
 0x147   : > { %4036 = vmatpush1.bf16.msra.mxu1 %v6138_v4  ;;  %v6210_v4 = vld [vmem:[%s6538_s11 + $0x590] ss:$8 sps:$4 sm:$0xff]  }
 0x148   : > { %4460 = vmatpush1.bf16.msra.mxu0 %v6141_v7  ;;  %4037 = vmatprep.subr.bf16.mxu1 %v6146_v8  ;;  %v6213_v7 = vld [vmem:[%s6538_s11 + $0xd90] ss:$8 sps:$4 sm:$0xff]   ;;  %v6218_v8 = vld [vmem:[%s6538_s11 + $0x5a4] ss:$8 sps:$4 sm:$0xff]  }
 0x149   : > { %4461 = vmatprep.subr.bf16.mxu0 %v6149_v9  ;;  %v6221_v9 = vld [vmem:[%s6538_s11 + $0xda4] ss:$8 sps:$4 sm:$0xff]  }
 0x14b   : > { %4038 = vmatpush1.bf16.msra.mxu1 %v6144_v10  ;;  %v6216_v10 = vld [vmem:[%s6538_s11 + $0x5a0] ss:$8 sps:$4 sm:$0xff]  }
 0x14c   : > { %4462 = vmatpush1.bf16.msra.mxu0 %v6147_v58  ;;  %4039 = vmatprep.subr.bf16.mxu1 %v6152_v59  ;;  %v6219_v58 = vld [vmem:[%s6538_s11 + $0xda0] ss:$8 sps:$4 sm:$0xff]   ;;  %v6224_v59 = vld [vmem:[%s6538_s11 + $0x5b4] ss:$8 sps:$4 sm:$0xff]  }
 0x14d   : > { %4463 = vmatprep.subr.bf16.mxu0 %v6155_v62  ;;  %v6227_v62 = vld [vmem:[%s6538_s11 + $0xdb4] ss:$8 sps:$4 sm:$0xff]  }
 0x14f   : > { %4040 = vmatpush1.bf16.msra.mxu1 %v6150_v63  ;;  %v6222_v63 = vld [vmem:[%s6538_s11 + $0x5b0] ss:$8 sps:$4 sm:$0xff]  }
 0x150   : > { %4464 = vmatpush1.bf16.msra.mxu0 %v6153_v11  ;;  %4062 = vmatprep.subr.bf16.mxu1 %v6158_v12  ;;  %v6225_v11 = vld [vmem:[%s6538_s11 + $0xdb0] ss:$8 sps:$4 sm:$0xff]   ;;  %v6230_v12 = vld [vmem:[%s6538_s11 + $0x5c4] ss:$8 sps:$4 sm:$0xff]  }
 0x151   : > { %4486 = vmatprep.subr.bf16.mxu0 %v6161_v13  ;;  %v6233_v13 = vld [vmem:[%s6538_s11 + $0xdc4] ss:$8 sps:$4 sm:$0xff]  }
 0x152   : > { %4042 = vmatmul.mubr.bf16.vlgmr.msra.gmra.mrb[0].mxu1 %v4966_v22  ;;  %v6234_v22 = vld [vmem:[%s6538_s11 + $0x5d0] ss:$8 sps:$4 sm:$0xff]  }
 0x153   : > { %4466 = vmatmul.mubr.bf16.vlgmr.msra.gmra.mrb[0].mxu0 %v4982_v23  ;;  %4063 = vmatpush1.bf16.msra.mxu1 %v6156_v24  ;;  %v6237_v23 = vld [vmem:[%s6538_s11 + $0xdd0] ss:$8 sps:$4 sm:$0xff]   ;;  %v6242_v24 = vld [vmem:[%s6538_s11 + $0x5e4] ss:$8 sps:$4 sm:$0xff]  }
 0x154   : > { %4487 = vmatpush1.bf16.msra.mxu0 %v6159_v25  ;;  %4064 = vmatprep.subr.bf16.mxu1 %v6164_v26  ;;  %v6245_v25 = vld [vmem:[%s6538_s11 + $0xde4] ss:$8 sps:$4 sm:$0xff]   ;;  %v6240_v26 = vld [vmem:[%s6538_s11 + $0x5e0] ss:$8 sps:$4 sm:$0xff]  }
 0x155   : > { %4488 = vmatprep.subr.bf16.mxu0 %v6167_v27  ;;  %4051 = vmatprep.mubr.bf16.mxu1 %v4999_v0  ;;  %v6243_v27 = vld [vmem:[%s6538_s11 + $0xde0] ss:$8 sps:$4 sm:$0xff]   ;;  %v6246_v0 = vld [vmem:[%s6538_s11 + $0x5f0] ss:$8 sps:$4 sm:$0xff]  }
 0x156   : > { %4475 = vmatprep.mubr.bf16.mxu0 %v5015_v1  ;;  %v6249_v1 = vld [vmem:[%s6538_s11 + $0xdf0] ss:$8 sps:$4 sm:$0xff]  }
 0x157   : > { %4065 = vmatpush1.bf16.msra.mxu1 %v6162_v28  ;;  %v6248_v28 = vld [vmem:[%s6538_s11 + $0x5f4] ss:$8 sps:$4 sm:$0xff]  }
 0x158   : > { %4489 = vmatpush1.bf16.msra.mxu0 %v6165_v29  ;;  %4066 = vmatprep.subr.bf16.mxu1 %v6170_v16  ;;  %v6251_v29 = vld [vmem:[%s6538_s11 + $0xdf4] ss:$8 sps:$4 sm:$0xff]   ;;  %v6254_v16 = vld [vmem:[%s6538_s11 + $0x604] ss:$8 sps:$4 sm:$0xff]  }
 0x159   : > { %4490 = vmatprep.subr.bf16.mxu0 %v6173_v17  ;;  %v6257_v17 = vld [vmem:[%s6538_s11 + $0xe04] ss:$8 sps:$4 sm:$0xff]  }
 0x15a   : > { %4052 = vmatmul.mubr.bf16.gmra.mrb[4].mxu1 %v4998_v5  ;;  %v366_v5 = vld [vmem:[%s7391_s0 + $0x128] sm:$0xff] }
 0x15b   : > { %4476 = vmatmul.mubr.bf16.gmra.mrb[4].mxu0 %v5014_v6  ;;  %4067 = vmatpush1.bf16.msra.mxu1 %v6168_v30  ;;  %v4968_v6 = vcombine.low %v7051_v20, %v7056_v21  ;;  %v4984_v30 = vcombine.low %v7061_v3, %v7066_v2  ;;  %v6252_v20 = vld [vmem:[%s6538_s11 + $0x600] ss:$8 sps:$4 sm:$0xff]   ;;  %v6260_v3 = vld [vmem:[%s6538_s11 + $0x614] ss:$8 sps:$4 sm:$0xff]  }
 0x15c   : > { %4491 = vmatpush1.bf16.msra.mxu0 %v6171_v31  ;;  %4068 = vmatprep.subr.bf16.mxu1 %v6176_v32  ;;  %v382_v31 = vld [vmem:[%s7391_s0 + $0x1a8] sm:$0xff]  ;;  %v6263_v2 = vld [vmem:[%s6538_s11 + $0xe14] ss:$8 sps:$4 sm:$0xff]  }
 0x15d   : > { %4492 = vmatprep.subr.bf16.mxu0 %v6179_v33  ;;  %4094 = vmatprep.mubr.bf16.mxu1 %v4969_v34  ;;  %v374_v32 = vld [vmem:[%s7391_s0 + $0x168] sm:$0xff]  ;;  %v5001_v34 = vcombine.high %v366_v5, %v382_v31 }
 0x15e   : > { %4518 = vmatprep.mubr.bf16.mxu0 %v4985_v35  ;;  %v390_v33 = vld [vmem:[%s7391_s0 + $0x1e8] sm:$0xff] }
 0x15f   : > { %4069 = vmatpush1.bf16.msra.mxu1 %v6174_v36  ;;  %v6255_v21 = vld [vmem:[%s6538_s11 + $0xe00] ss:$8 sps:$4 sm:$0xff]   ;;  %v5017_v35 = vcombine.high %v374_v32, %v390_v33  ;;  %v6258_v36 = vld [vmem:[%s6538_s11 + $0x610] ss:$8 sps:$4 sm:$0xff]  }
 0x160   : > { %4493 = vmatpush1.bf16.msra.mxu0 %v6177_v37  ;;  %4070 = vmatprep.subr.bf16.mxu1 %v6182_v38  ;;  %v6261_v37 = vld [vmem:[%s6538_s11 + $0xe10] ss:$8 sps:$4 sm:$0xff]   ;;  %v6266_v38 = vld [vmem:[%s6538_s11 + $0x624] ss:$8 sps:$4 sm:$0xff]  }
 0x161   : > { %4494 = vmatprep.subr.bf16.mxu0 %v6185_v39  ;;  %v6269_v39 = vld [vmem:[%s6538_s11 + $0xe24] ss:$8 sps:$4 sm:$0xff]  }
 0x163   : > { %4071 = vmatpush1.bf16.msra.mxu1 %v6180_v40  ;;  %v7155_v40 = vld [vmem:[%s7391_s0 + $0x30] sm:$0xff] }
 0x164   : > { %4495 = vmatpush1.bf16.msra.mxu0 %v6183_v41  ;;  %4072 = vmatprep.subr.bf16.mxu1 %v6188_v44  ;;  %v5000_v41 = vcombine.low %v366_v5, %v382_v31  ;;  %v5016_v44 = vcombine.low %v374_v32, %v390_v33  ;;  %v6324_v5 = vld [vmem:[%s6538_s11 + $0x6c0] ss:$8 sps:$4 sm:$0xff]   ;;  %v6335_v31 = vld [vmem:[%s6538_s11 + $0xed4] ss:$8 sps:$4 sm:$0xff]   ;;  %v6330_v32 = vld [vmem:[%s6538_s11 + $0x6d0] ss:$8 sps:$4 sm:$0xff]  }
 0x165   : > { %4496 = vmatprep.subr.bf16.mxu0 %v6191_v45  ;;  %v7160_v45 = vld [vmem:[%s7391_s0 + $0xb0] sm:$0xff] }
 0x166   : > { %v6333_v33 = vld [vmem:[%s6538_s11 + $0xed0] ss:$8 sps:$4 sm:$0xff]  }
 0x167   : > { %4073 = vmatpush1.bf16.msra.mxu1 %v6186_v48  ;;  %v7165_v48 = vld [vmem:[%s7391_s0 + $0x70] sm:$0xff] }
 0x168   : > { %4497 = vmatpush1.bf16.msra.mxu0 %v6189_v49  ;;  %4074 = vmatprep.subr.bf16.mxu1 %v6194_v50  ;;  %v7170_v49 = vld [vmem:[%s7391_s0 + $0xf0] sm:$0xff]  ;;  %v6264_v50 = vld [vmem:[%s6538_s11 + $0x620] ss:$8 sps:$4 sm:$0xff]  }
 0x169   : > { %4498 = vmatprep.subr.bf16.mxu0 %v6197_v51  ;;  %v6267_v51 = vld [vmem:[%s6538_s11 + $0xe20] ss:$8 sps:$4 sm:$0xff]  }
 0x16b   : > { %4075 = vmatpush1.bf16.msra.mxu1 %v6192_v52  ;;  %v6272_v52 = vld [vmem:[%s6538_s11 + $0x634] ss:$8 sps:$4 sm:$0xff]  }
 0x16c   : > { %4499 = vmatpush1.bf16.msra.mxu0 %v6195_v42  ;;  %4076 = vmatprep.subr.bf16.mxu1 %v6200_v43  ;;  %v6275_v42 = vld [vmem:[%s6538_s11 + $0xe34] ss:$8 sps:$4 sm:$0xff]   ;;  %v4971_v43 = vcombine.high %v7155_v40, %v7160_v45 }
 0x16d   : > { %4500 = vmatprep.subr.bf16.mxu0 %v6203_v46  ;;  %v4987_v46 = vcombine.high %v7165_v48, %v7170_v49 }
 0x16f   : > { %4077 = vmatpush1.bf16.msra.mxu1 %v6198_v47  ;;  %v6270_v47 = vld [vmem:[%s6538_s11 + $0x630] ss:$8 sps:$4 sm:$0xff]  }
 0x170   : > { %4501 = vmatpush1.bf16.msra.mxu0 %v6201_v53  ;;  %4078 = vmatprep.subr.bf16.mxu1 %v6206_v54  ;;  %v6273_v53 = vld [vmem:[%s6538_s11 + $0xe30] ss:$8 sps:$4 sm:$0xff]   ;;  %v6278_v54 = vld [vmem:[%s6538_s11 + $0x644] ss:$8 sps:$4 sm:$0xff]  }
 0x171   : > { %4502 = vmatprep.subr.bf16.mxu0 %v6209_v55  ;;  %v6281_v55 = vld [vmem:[%s6538_s11 + $0xe44] ss:$8 sps:$4 sm:$0xff]  }
 0x173   : > { %4079 = vmatpush1.bf16.msra.mxu1 %v6204_v56  ;;  %v6276_v56 = vld [vmem:[%s6538_s11 + $0x640] ss:$8 sps:$4 sm:$0xff]  }
 0x174   : > { %4503 = vmatpush1.bf16.msra.mxu0 %v6207_v57  ;;  %4080 = vmatprep.subr.bf16.mxu1 %v6212_v60  ;;  %v6279_v57 = vld [vmem:[%s6538_s11 + $0xe40] ss:$8 sps:$4 sm:$0xff]   ;;  %v6284_v60 = vld [vmem:[%s6538_s11 + $0x654] ss:$8 sps:$4 sm:$0xff]  }
 0x175   : > { %4504 = vmatprep.subr.bf16.mxu0 %v6215_v61  ;;  %v6287_v61 = vld [vmem:[%s6538_s11 + $0xe54] ss:$8 sps:$4 sm:$0xff]  }
 0x177   : > { %4081 = vmatpush1.bf16.msra.mxu1 %v6210_v4  ;;  %v6282_v4 = vld [vmem:[%s6538_s11 + $0x650] ss:$8 sps:$4 sm:$0xff]  }
 0x178   : > { %4505 = vmatpush1.bf16.msra.mxu0 %v6213_v7  ;;  %4082 = vmatprep.subr.bf16.mxu1 %v6218_v8  ;;  %v6285_v7 = vld [vmem:[%s6538_s11 + $0xe50] ss:$8 sps:$4 sm:$0xff]   ;;  %v6290_v8 = vld [vmem:[%s6538_s11 + $0x664] ss:$8 sps:$4 sm:$0xff]  }
 0x179   : > { %4506 = vmatprep.subr.bf16.mxu0 %v6221_v9  ;;  %v6293_v9 = vld [vmem:[%s6538_s11 + $0xe64] ss:$8 sps:$4 sm:$0xff]  }
 0x17b   : > { %4083 = vmatpush1.bf16.msra.mxu1 %v6216_v10  ;;  %v6288_v10 = vld [vmem:[%s6538_s11 + $0x660] ss:$8 sps:$4 sm:$0xff]  }
 0x17c   : > { %4507 = vmatpush1.bf16.msra.mxu0 %v6219_v58  ;;  %4084 = vmatprep.subr.bf16.mxu1 %v6224_v59  ;;  %v6291_v58 = vld [vmem:[%s6538_s11 + $0xe60] ss:$8 sps:$4 sm:$0xff]   ;;  %v6296_v59 = vld [vmem:[%s6538_s11 + $0x674] ss:$8 sps:$4 sm:$0xff]  }
 0x17d   : > { %4508 = vmatprep.subr.bf16.mxu0 %v6227_v62  ;;  %v6299_v62 = vld [vmem:[%s6538_s11 + $0xe74] ss:$8 sps:$4 sm:$0xff]  }
 0x17f   : > { %4085 = vmatpush1.bf16.msra.mxu1 %v6222_v63  ;;  %v6294_v63 = vld [vmem:[%s6538_s11 + $0x670] ss:$8 sps:$4 sm:$0xff]  }
 0x180   : > { %4509 = vmatpush1.bf16.msra.mxu0 %v6225_v11  ;;  %4086 = vmatprep.subr.bf16.mxu1 %v6230_v12  ;;  %v6297_v11 = vld [vmem:[%s6538_s11 + $0xe70] ss:$8 sps:$4 sm:$0xff]   ;;  %v6302_v12 = vld [vmem:[%s6538_s11 + $0x684] ss:$8 sps:$4 sm:$0xff]  }
 0x181   : > { %4510 = vmatprep.subr.bf16.mxu0 %v6233_v13  ;;  %v6305_v13 = vld [vmem:[%s6538_s11 + $0xe84] ss:$8 sps:$4 sm:$0xff]  }
 0x183   : > { %4087 = vmatpush1.bf16.msra.mxu1 %v6228_v14  ;;  %v6300_v14 = vld [vmem:[%s6538_s11 + $0x680] ss:$8 sps:$4 sm:$0xff]  }
 0x184   : > { %4511 = vmatpush1.bf16.msra.mxu0 %v6231_v15  ;;  %4088 = vmatprep.subr.bf16.mxu1 %v6236_v18  ;;  %v6303_v15 = vld [vmem:[%s6538_s11 + $0xe80] ss:$8 sps:$4 sm:$0xff]   ;;  %v6308_v18 = vld [vmem:[%s6538_s11 + $0x694] ss:$8 sps:$4 sm:$0xff]  }
 0x185   : > { %4512 = vmatprep.subr.bf16.mxu0 %v6239_v19  ;;  %v6311_v19 = vld [vmem:[%s6538_s11 + $0xe94] ss:$8 sps:$4 sm:$0xff]  }
 0x187   : > { %4089 = vmatpush1.bf16.msra.mxu1 %v6234_v22  ;;  %v6306_v22 = vld [vmem:[%s6538_s11 + $0x690] ss:$8 sps:$4 sm:$0xff]  }
 0x188   : > { %4513 = vmatpush1.bf16.msra.mxu0 %v6237_v23  ;;  %4090 = vmatprep.subr.bf16.mxu1 %v6242_v24  ;;  %v6309_v23 = vld [vmem:[%s6538_s11 + $0xe90] ss:$8 sps:$4 sm:$0xff]   ;;  %v6314_v24 = vld [vmem:[%s6538_s11 + $0x6a4] ss:$8 sps:$4 sm:$0xff]  }
 0x189   : > { %4514 = vmatprep.subr.bf16.mxu0 %v6245_v25  ;;  %v6317_v25 = vld [vmem:[%s6538_s11 + $0xea4] ss:$8 sps:$4 sm:$0xff]  }
 0x18b   : > { %4091 = vmatpush1.bf16.msra.mxu1 %v6240_v26  ;;  %v6312_v26 = vld [vmem:[%s6538_s11 + $0x6a0] ss:$8 sps:$4 sm:$0xff]  }
 0x18c   : > { %4515 = vmatpush1.bf16.msra.mxu0 %v6243_v27  ;;  %4092 = vmatprep.subr.bf16.mxu1 %v6248_v28  ;;  %v6315_v27 = vld [vmem:[%s6538_s11 + $0xea0] ss:$8 sps:$4 sm:$0xff]   ;;  %v6320_v28 = vld [vmem:[%s6538_s11 + $0x6b4] ss:$8 sps:$4 sm:$0xff]  }
 0x18d   : > { %4516 = vmatprep.subr.bf16.mxu0 %v6251_v29  ;;  %v6323_v29 = vld [vmem:[%s6538_s11 + $0xeb4] ss:$8 sps:$4 sm:$0xff]  }
 0x18f   : > { %4093 = vmatpush1.bf16.msra.mxu1 %v6246_v0  ;;  %v6318_v0 = vld [vmem:[%s6538_s11 + $0x6b0] ss:$8 sps:$4 sm:$0xff]  }
 0x190   : > { %4517 = vmatpush1.bf16.msra.mxu0 %v6249_v1  ;;  %4115 = vmatprep.subr.bf16.mxu1 %v6254_v16  ;;  %v6321_v1 = vld [vmem:[%s6538_s11 + $0xeb0] ss:$8 sps:$4 sm:$0xff]   ;;  %v6326_v16 = vld [vmem:[%s6538_s11 + $0x6c4] ss:$8 sps:$4 sm:$0xff]  }
 0x191   : > { %4539 = vmatprep.subr.bf16.mxu0 %v6257_v17  ;;  %v6329_v17 = vld [vmem:[%s6538_s11 + $0xec4] ss:$8 sps:$4 sm:$0xff]  }
 0x192   : > { %4095 = vmatmul.mubr.bf16.vlgmr.msra.gmra.mrb[0].mxu1 %v4968_v6  ;;  %v6327_v6 = vld [vmem:[%s6538_s11 + $0xec0] ss:$8 sps:$4 sm:$0xff]  }
 0x193   : > { %4519 = vmatmul.mubr.bf16.vlgmr.msra.gmra.mrb[0].mxu0 %v4984_v30  ;;  %4116 = vmatpush1.bf16.msra.mxu1 %v6252_v20  ;;  %v6332_v30 = vld [vmem:[%s6538_s11 + $0x6d4] ss:$8 sps:$4 sm:$0xff]   ;;  %v6338_v20 = vld [vmem:[%s6538_s11 + $0x6e4] ss:$8 sps:$4 sm:$0xff]  }
 0x194   : > { %4540 = vmatpush1.bf16.msra.mxu0 %v6255_v21  ;;  %4117 = vmatprep.subr.bf16.mxu1 %v6260_v3  ;;  %v6341_v21 = vld [vmem:[%s6538_s11 + $0xee4] ss:$8 sps:$4 sm:$0xff]   ;;  %v6336_v3 = vld [vmem:[%s6538_s11 + $0x6e0] ss:$8 sps:$4 sm:$0xff]  }
 0x195   : > { %4541 = vmatprep.subr.bf16.mxu0 %v6263_v2  ;;  %4104 = vmatprep.mubr.bf16.mxu1 %v5001_v34  ;;  %v6339_v2 = vld [vmem:[%s6538_s11 + $0xee0] ss:$8 sps:$4 sm:$0xff]   ;;  %v6344_v34 = vld [vmem:[%s6538_s11 + $0x6f4] ss:$8 sps:$4 sm:$0xff]  }
 0x196   : > { %4528 = vmatprep.mubr.bf16.mxu0 %v5017_v35  ;;  %v6347_v35 = vld [vmem:[%s6538_s11 + $0xef4] ss:$8 sps:$4 sm:$0xff]  }
 0x197   : > { %4118 = vmatpush1.bf16.msra.mxu1 %v6258_v36  ;;  %v6342_v36 = vld [vmem:[%s6538_s11 + $0x6f0] ss:$8 sps:$4 sm:$0xff]  }
 0x198   : > { %4542 = vmatpush1.bf16.msra.mxu0 %v6261_v37  ;;  %4119 = vmatprep.subr.bf16.mxu1 %v6266_v38  ;;  %v6345_v37 = vld [vmem:[%s6538_s11 + $0xef0] ss:$8 sps:$4 sm:$0xff]   ;;  %v6350_v38 = vld [vmem:[%s6538_s11 + $0x704] ss:$8 sps:$4 sm:$0xff]  }
 0x199   : > { %4543 = vmatprep.subr.bf16.mxu0 %v6269_v39  ;;  %v6353_v39 = vld [vmem:[%s6538_s11 + $0xf04] ss:$8 sps:$4 sm:$0xff]  }
 0x19a   : > { %4105 = vmatmul.mubr.bf16.gmra.mrb[4].mxu1 %v5000_v41  ;;  %v367_v41 = vld [vmem:[%s7391_s0 + $0x130] sm:$0xff] }
 0x19b   : > { %4529 = vmatmul.mubr.bf16.gmra.mrb[4].mxu0 %v5016_v44  ;;  %4120 = vmatpush1.bf16.msra.mxu1 %v6264_v50  ;;  %v4970_v44 = vcombine.low %v7155_v40, %v7160_v45  ;;  %v4986_v50 = vcombine.low %v7165_v48, %v7170_v49  ;;  %v6348_v40 = vld [vmem:[%s6538_s11 + $0x700] ss:$8 sps:$4 sm:$0xff]   ;;  %v6356_v48 = vld [vmem:[%s6538_s11 + $0x714] ss:$8 sps:$4 sm:$0xff]  }
 0x19c   : > { %4544 = vmatpush1.bf16.msra.mxu0 %v6267_v51  ;;  %4121 = vmatprep.subr.bf16.mxu1 %v6272_v52  ;;  %v383_v51 = vld [vmem:[%s7391_s0 + $0x1b0] sm:$0xff]  ;;  %v6351_v45 = vld [vmem:[%s6538_s11 + $0xf00] ss:$8 sps:$4 sm:$0xff]  }
 0x19d   : > { %4545 = vmatprep.subr.bf16.mxu0 %v6275_v42  ;;  %4147 = vmatprep.mubr.bf16.mxu1 %v4971_v43  ;;  %v375_v52 = vld [vmem:[%s7391_s0 + $0x170] sm:$0xff]  ;;  %v5003_v43 = vcombine.high %v367_v41, %v383_v51 }
 0x19e   : > { %4571 = vmatprep.mubr.bf16.mxu0 %v4987_v46  ;;  %v391_v42 = vld [vmem:[%s7391_s0 + $0x1f0] sm:$0xff] }
 0x19f   : > { %4122 = vmatpush1.bf16.msra.mxu1 %v6270_v47  ;;  %v6359_v49 = vld [vmem:[%s6538_s11 + $0xf14] ss:$8 sps:$4 sm:$0xff]   ;;  %v5019_v46 = vcombine.high %v375_v52, %v391_v42  ;;  %v6354_v47 = vld [vmem:[%s6538_s11 + $0x710] ss:$8 sps:$4 sm:$0xff]  }
 0x1a0   : > { %4546 = vmatpush1.bf16.msra.mxu0 %v6273_v53  ;;  %4123 = vmatprep.subr.bf16.mxu1 %v6278_v54  ;;  %v6357_v53 = vld [vmem:[%s6538_s11 + $0xf10] ss:$8 sps:$4 sm:$0xff]   ;;  %v6362_v54 = vld [vmem:[%s6538_s11 + $0x724] ss:$8 sps:$4 sm:$0xff]  }
 0x1a1   : > { %4547 = vmatprep.subr.bf16.mxu0 %v6281_v55  ;;  %v6365_v55 = vld [vmem:[%s6538_s11 + $0xf24] ss:$8 sps:$4 sm:$0xff]  }
 0x1a3   : > { %4124 = vmatpush1.bf16.msra.mxu1 %v6276_v56  ;;  %v7259_v56 = vld [vmem:[%s7391_s0 + $0x38] sm:$0xff] }
 0x1a4   : > { %4548 = vmatpush1.bf16.msra.mxu0 %v6279_v57  ;;  %4125 = vmatprep.subr.bf16.mxu1 %v6284_v60  ;;  %v5002_v57 = vcombine.low %v367_v41, %v383_v51  ;;  %v5018_v60 = vcombine.low %v375_v52, %v391_v42  ;;  %v6420_v41 = vld [vmem:[%s6538_s11 + $0x7c0] ss:$8 sps:$4 sm:$0xff]   ;;  %v6431_v51 = vld [vmem:[%s6538_s11 + $0xfd4] ss:$8 sps:$4 sm:$0xff]   ;;  %v6426_v52 = vld [vmem:[%s6538_s11 + $0x7d0] ss:$8 sps:$4 sm:$0xff]  }
 0x1a5   : > { %4549 = vmatprep.subr.bf16.mxu0 %v6287_v61  ;;  %v7264_v61 = vld [vmem:[%s7391_s0 + $0xb8] sm:$0xff] }
 0x1a6   : > { %v6429_v42 = vld [vmem:[%s6538_s11 + $0xfd0] ss:$8 sps:$4 sm:$0xff]  }
 0x1a7   : > { %4126 = vmatpush1.bf16.msra.mxu1 %v6282_v4  ;;  %v7269_v4 = vld [vmem:[%s7391_s0 + $0x78] sm:$0xff] }
 0x1a8   : > { %4550 = vmatpush1.bf16.msra.mxu0 %v6285_v7  ;;  %4127 = vmatprep.subr.bf16.mxu1 %v6290_v8  ;;  %v7274_v7 = vld [vmem:[%s7391_s0 + $0xf8] sm:$0xff]  ;;  %v6360_v8 = vld [vmem:[%s6538_s11 + $0x720] ss:$8 sps:$4 sm:$0xff]  }
 0x1a9   : > { %4551 = vmatprep.subr.bf16.mxu0 %v6293_v9  ;;  %v6363_v9 = vld [vmem:[%s6538_s11 + $0xf20] ss:$8 sps:$4 sm:$0xff]  }
 0x1ab   : > { %4128 = vmatpush1.bf16.msra.mxu1 %v6288_v10  ;;  %v6368_v10 = vld [vmem:[%s6538_s11 + $0x734] ss:$8 sps:$4 sm:$0xff]  }
 0x1ac   : > { %4552 = vmatpush1.bf16.msra.mxu0 %v6291_v58  ;;  %4129 = vmatprep.subr.bf16.mxu1 %v6296_v59  ;;  %v6371_v58 = vld [vmem:[%s6538_s11 + $0xf34] ss:$8 sps:$4 sm:$0xff]   ;;  %v4973_v59 = vcombine.high %v7259_v56, %v7264_v61 }
 0x1ad   : > { %4553 = vmatprep.subr.bf16.mxu0 %v6299_v62  ;;  %v4989_v62 = vcombine.high %v7269_v4, %v7274_v7 }
 0x1af   : > { %4130 = vmatpush1.bf16.msra.mxu1 %v6294_v63  ;;  %v6366_v63 = vld [vmem:[%s6538_s11 + $0x730] ss:$8 sps:$4 sm:$0xff]  }
 0x1b0   : > { %4554 = vmatpush1.bf16.msra.mxu0 %v6297_v11  ;;  %4131 = vmatprep.subr.bf16.mxu1 %v6302_v12  ;;  %v6369_v11 = vld [vmem:[%s6538_s11 + $0xf30] ss:$8 sps:$4 sm:$0xff]   ;;  %v6374_v12 = vld [vmem:[%s6538_s11 + $0x744] ss:$8 sps:$4 sm:$0xff]  }
 0x1b1   : > { %4555 = vmatprep.subr.bf16.mxu0 %v6305_v13  ;;  %v6377_v13 = vld [vmem:[%s6538_s11 + $0xf44] ss:$8 sps:$4 sm:$0xff]  }
 0x1b3   : > { %4132 = vmatpush1.bf16.msra.mxu1 %v6300_v14  ;;  %v6372_v14 = vld [vmem:[%s6538_s11 + $0x740] ss:$8 sps:$4 sm:$0xff]  }
 0x1b4   : > { %4556 = vmatpush1.bf16.msra.mxu0 %v6303_v15  ;;  %4133 = vmatprep.subr.bf16.mxu1 %v6308_v18  ;;  %v6375_v15 = vld [vmem:[%s6538_s11 + $0xf40] ss:$8 sps:$4 sm:$0xff]   ;;  %v6380_v18 = vld [vmem:[%s6538_s11 + $0x754] ss:$8 sps:$4 sm:$0xff]  }
 0x1b5   : > { %4557 = vmatprep.subr.bf16.mxu0 %v6311_v19  ;;  %v6383_v19 = vld [vmem:[%s6538_s11 + $0xf54] ss:$8 sps:$4 sm:$0xff]  }
 0x1b7   : > { %4134 = vmatpush1.bf16.msra.mxu1 %v6306_v22  ;;  %v6378_v22 = vld [vmem:[%s6538_s11 + $0x750] ss:$8 sps:$4 sm:$0xff]  }
 0x1b8   : > { %4558 = vmatpush1.bf16.msra.mxu0 %v6309_v23  ;;  %4135 = vmatprep.subr.bf16.mxu1 %v6314_v24  ;;  %v6381_v23 = vld [vmem:[%s6538_s11 + $0xf50] ss:$8 sps:$4 sm:$0xff]   ;;  %v6386_v24 = vld [vmem:[%s6538_s11 + $0x764] ss:$8 sps:$4 sm:$0xff]  }
 0x1b9   : > { %4559 = vmatprep.subr.bf16.mxu0 %v6317_v25  ;;  %v6389_v25 = vld [vmem:[%s6538_s11 + $0xf64] ss:$8 sps:$4 sm:$0xff]  }
 0x1bb   : > { %4136 = vmatpush1.bf16.msra.mxu1 %v6312_v26  ;;  %v6384_v26 = vld [vmem:[%s6538_s11 + $0x760] ss:$8 sps:$4 sm:$0xff]  }
 0x1bc   : > { %4560 = vmatpush1.bf16.msra.mxu0 %v6315_v27  ;;  %4137 = vmatprep.subr.bf16.mxu1 %v6320_v28  ;;  %v6387_v27 = vld [vmem:[%s6538_s11 + $0xf60] ss:$8 sps:$4 sm:$0xff]   ;;  %v6392_v28 = vld [vmem:[%s6538_s11 + $0x774] ss:$8 sps:$4 sm:$0xff]  }
 0x1bd   : > { %4561 = vmatprep.subr.bf16.mxu0 %v6323_v29  ;;  %v6395_v29 = vld [vmem:[%s6538_s11 + $0xf74] ss:$8 sps:$4 sm:$0xff]  }
 0x1bf   : > { %4138 = vmatpush1.bf16.msra.mxu1 %v6318_v0  ;;  %v6390_v0 = vld [vmem:[%s6538_s11 + $0x770] ss:$8 sps:$4 sm:$0xff]  }
 0x1c0   : > { %4562 = vmatpush1.bf16.msra.mxu0 %v6321_v1  ;;  %4139 = vmatprep.subr.bf16.mxu1 %v6326_v16  ;;  %v6393_v1 = vld [vmem:[%s6538_s11 + $0xf70] ss:$8 sps:$4 sm:$0xff]   ;;  %v6398_v16 = vld [vmem:[%s6538_s11 + $0x784] ss:$8 sps:$4 sm:$0xff]  }
 0x1c1   : > { %4563 = vmatprep.subr.bf16.mxu0 %v6329_v17  ;;  %v6401_v17 = vld [vmem:[%s6538_s11 + $0xf84] ss:$8 sps:$4 sm:$0xff]  }
 0x1c3   : > { %4140 = vmatpush1.bf16.msra.mxu1 %v6324_v5  ;;  %v6396_v5 = vld [vmem:[%s6538_s11 + $0x780] ss:$8 sps:$4 sm:$0xff]  }
 0x1c4   : > { %4564 = vmatpush1.bf16.msra.mxu0 %v6327_v6  ;;  %4141 = vmatprep.subr.bf16.mxu1 %v6332_v30  ;;  %v6399_v6 = vld [vmem:[%s6538_s11 + $0xf80] ss:$8 sps:$4 sm:$0xff]   ;;  %v6404_v30 = vld [vmem:[%s6538_s11 + $0x794] ss:$8 sps:$4 sm:$0xff]  }
 0x1c5   : > { %4565 = vmatprep.subr.bf16.mxu0 %v6335_v31  ;;  %v6407_v31 = vld [vmem:[%s6538_s11 + $0xf94] ss:$8 sps:$4 sm:$0xff]  }
 0x1c7   : > { %4142 = vmatpush1.bf16.msra.mxu1 %v6330_v32  ;;  %v6402_v32 = vld [vmem:[%s6538_s11 + $0x790] ss:$8 sps:$4 sm:$0xff]  }
 0x1c8   : > { %4566 = vmatpush1.bf16.msra.mxu0 %v6333_v33  ;;  %4143 = vmatprep.subr.bf16.mxu1 %v6338_v20  ;;  %v6405_v33 = vld [vmem:[%s6538_s11 + $0xf90] ss:$8 sps:$4 sm:$0xff]   ;;  %v6410_v20 = vld [vmem:[%s6538_s11 + $0x7a4] ss:$8 sps:$4 sm:$0xff]  }
 0x1c9   : > { %4567 = vmatprep.subr.bf16.mxu0 %v6341_v21  ;;  %v6413_v21 = vld [vmem:[%s6538_s11 + $0xfa4] ss:$8 sps:$4 sm:$0xff]  }
 0x1cb   : > { %4144 = vmatpush1.bf16.msra.mxu1 %v6336_v3  ;;  %v6408_v3 = vld [vmem:[%s6538_s11 + $0x7a0] ss:$8 sps:$4 sm:$0xff]  }
 0x1cc   : > { %4568 = vmatpush1.bf16.msra.mxu0 %v6339_v2  ;;  %4145 = vmatprep.subr.bf16.mxu1 %v6344_v34  ;;  %v6411_v2 = vld [vmem:[%s6538_s11 + $0xfa0] ss:$8 sps:$4 sm:$0xff]   ;;  %v6416_v34 = vld [vmem:[%s6538_s11 + $0x7b4] ss:$8 sps:$4 sm:$0xff]  }
 0x1cd   : > { %4569 = vmatprep.subr.bf16.mxu0 %v6347_v35  ;;  %v6419_v35 = vld [vmem:[%s6538_s11 + $0xfb4] ss:$8 sps:$4 sm:$0xff]  }
 0x1cf   : > { %4146 = vmatpush1.bf16.msra.mxu1 %v6342_v36  ;;  %v6414_v36 = vld [vmem:[%s6538_s11 + $0x7b0] ss:$8 sps:$4 sm:$0xff]  }
 0x1d0   : > { %4570 = vmatpush1.bf16.msra.mxu0 %v6345_v37  ;;  %4168 = vmatprep.subr.bf16.mxu1 %v6350_v38  ;;  %v6417_v37 = vld [vmem:[%s6538_s11 + $0xfb0] ss:$8 sps:$4 sm:$0xff]   ;;  %v6422_v38 = vld [vmem:[%s6538_s11 + $0x7c4] ss:$8 sps:$4 sm:$0xff]  }
 0x1d1   : > { %4592 = vmatprep.subr.bf16.mxu0 %v6353_v39  ;;  %v6425_v39 = vld [vmem:[%s6538_s11 + $0xfc4] ss:$8 sps:$4 sm:$0xff]  }
 0x1d2   : > { %4148 = vmatmul.mubr.bf16.vlgmr.msra.gmra.mrb[0].mxu1 %v4970_v44  ;;  %v6423_v44 = vld [vmem:[%s6538_s11 + $0xfc0] ss:$8 sps:$4 sm:$0xff]  }
 0x1d3   : > { %4572 = vmatmul.mubr.bf16.vlgmr.msra.gmra.mrb[0].mxu0 %v4986_v50  ;;  %4169 = vmatpush1.bf16.msra.mxu1 %v6348_v40  ;;  %v6428_v50 = vld [vmem:[%s6538_s11 + $0x7d4] ss:$8 sps:$4 sm:$0xff]   ;;  %v6434_v40 = vld [vmem:[%s6538_s11 + $0x7e4] ss:$8 sps:$4 sm:$0xff]  }
 0x1d4   : > { %4593 = vmatpush1.bf16.msra.mxu0 %v6351_v45  ;;  %4170 = vmatprep.subr.bf16.mxu1 %v6356_v48  ;;  %v6437_v45 = vld [vmem:[%s6538_s11 + $0xfe4] ss:$8 sps:$4 sm:$0xff]   ;;  %v6432_v48 = vld [vmem:[%s6538_s11 + $0x7e0] ss:$8 sps:$4 sm:$0xff]  }
 0x1d5   : > { %4594 = vmatprep.subr.bf16.mxu0 %v6359_v49  ;;  %4157 = vmatprep.mubr.bf16.mxu1 %v5003_v43  ;;  %v6435_v49 = vld [vmem:[%s6538_s11 + $0xfe0] ss:$8 sps:$4 sm:$0xff]   ;;  %v6440_v43 = vld [vmem:[%s6538_s11 + $0x7f4] ss:$8 sps:$4 sm:$0xff]  }
 0x1d6   : > { %4581 = vmatprep.mubr.bf16.mxu0 %v5019_v46  ;;  %v6443_v46 = vld [vmem:[%s6538_s11 + $0xff4] ss:$8 sps:$4 sm:$0xff]  }
 0x1d7   : > { %4171 = vmatpush1.bf16.msra.mxu1 %v6354_v47  ;;  %v6438_v47 = vld [vmem:[%s6538_s11 + $0x7f0] ss:$8 sps:$4 sm:$0xff]  }
 0x1d8   : > { %4595 = vmatpush1.bf16.msra.mxu0 %v6357_v53  ;;  %4172 = vmatprep.subr.bf16.mxu1 %v6362_v54  ;;  %v6441_v53 = vld [vmem:[%s6538_s11 + $0xff0] ss:$8 sps:$4 sm:$0xff]   ;;  %s4951_s11 = sshll.u32 %s6498_s22, 1 }
 0x1d9   : > { %4596 = vmatprep.subr.bf16.mxu0 %v6365_v55  ;;  %v368_v54 = vld [vmem:[%s7391_s0 + $0x138] sm:$0xff]  ;;  %p305_p4 = scmp.lt.s32.totalorder %s4951_s11, 3 }
 0x1da   : > { %4158 = vmatmul.mubr.bf16.gmra.mrb[4].mxu1 %v5002_v57  ;;  %v384_v55 = vld [vmem:[%s7391_s0 + $0x1b8] sm:$0xff] }
 0x1db   : > { %4582 = vmatmul.mubr.bf16.gmra.mrb[4].mxu0 %v5018_v60  ;;  %4173 = vmatpush1.bf16.msra.mxu1 %v6360_v8  ;;  %v376_v57 = vld [vmem:[%s7391_s0 + $0x178] sm:$0xff]  ;;  %v4972_v8 = vcombine.low %v7259_v56, %v7264_v61  ;;  %s7399_s11 = smov (!%p305_p4, %s4951_s11), 3 }
 0x1dc   : > { %4597 = vmatpush1.bf16.msra.mxu0 %v6363_v9  ;;  %4174 = vmatprep.subr.bf16.mxu1 %v6368_v10  ;;  %v392_v60 = vld [vmem:[%s7391_s0 + $0x1f8] sm:$0xff]  ;;  %v4988_v9 = vcombine.low %v7269_v4, %v7274_v7  ;;  %v5005_v10 = vcombine.high %v368_v54, %v384_v55  ;;  %s307_s14 = scalar_lea.vmem %s7393_s2, %s7399_s11  ;;  %s312_s16 = scalar_lea.vmem %s7394_s3, %s7399_s11 }
 0x1dd   : > { %4598 = vmatprep.subr.bf16.mxu0 %v6371_v58  ;;  %4200 = vmatprep.mubr.bf16.mxu1 %v4973_v59  ;;  %v5021_v58 = vcombine.high %v376_v57, %v392_v60  ;;  %v5004_v59 = vcombine.low %v368_v54, %v384_v55  ;;  %v905_v4 = vld [vmem:[%s307_s14] sm:$0x3]  ;;  %s317_s19 = scalar_lea.vmem %s7395_s4, %s7399_s11 }
 0x1de   : > { %4624 = vmatprep.mubr.bf16.mxu0 %v4989_v62  ;;  %v5020_v62 = vcombine.low %v376_v57, %v392_v60 }
 0x1df   : > { %4175 = vmatpush1.bf16.msra.mxu1 %v6366_v63  ;;  %v907_v63 = vlaneseq }
 0x1e0   : > { %4599 = vmatpush1.bf16.msra.mxu0 %v6369_v11  ;;  %4176 = vmatprep.subr.bf16.mxu1 %v6374_v12 }
 0x1e1   : > { %4600 = vmatprep.subr.bf16.mxu0 %v6377_v13  ;;  %v7353_v56 = vshrl.u32 %v907_v63, 7 }
 0x1e3   : > { %4177 = vmatpush1.bf16.msra.mxu1 %v6372_v14  ;;  %v7360_v61 = vsub.s32 0, %v7353_v56  ;;  %v7363_v7 = vsub.s32 1, %v7353_v56 }
 0x1e4   : > { %4601 = vmatpush1.bf16.msra.mxu0 %v6375_v15  ;;  %4178 = vmatprep.subr.bf16.mxu1 %v6380_v18 }
 0x1e5   : > { %4602 = vmatprep.subr.bf16.mxu0 %v6383_v19  ;;  %v910_v11 = vrot.slane %v905_v4, %v7360_v61  ;;  %v914_v12 = vrot.slane %v905_v4, %v7363_v7 }
 0x1e7   : > { %4179 = vmatpush1.bf16.msra.mxu1 %v6378_v22 }
 0x1e8   : > { %4603 = vmatpush1.bf16.msra.mxu0 %v6381_v23  ;;  %4180 = vmatprep.subr.bf16.mxu1 %v6386_v24 }
 0x1e9   : > { %4604 = vmatprep.subr.bf16.mxu0 %v6389_v25 }
 0x1eb   : > { %4181 = vmatpush1.bf16.msra.mxu1 %v6384_v26 }
 0x1ec   : > { %4605 = vmatpush1.bf16.msra.mxu0 %v6387_v27  ;;  %4182 = vmatprep.subr.bf16.mxu1 %v6392_v28 }
 0x1ed   : > { %4606 = vmatprep.subr.bf16.mxu0 %v6395_v29 }
 0x1ef   : > { %4183 = vmatpush1.bf16.msra.mxu1 %v6390_v0 }
 0x1f0   : > { %4607 = vmatpush1.bf16.msra.mxu0 %v6393_v1  ;;  %4184 = vmatprep.subr.bf16.mxu1 %v6398_v16 }
 0x1f1   : > { %4608 = vmatprep.subr.bf16.mxu0 %v6401_v17 }
 0x1f3   : > { %4185 = vmatpush1.bf16.msra.mxu1 %v6396_v5 }
 0x1f4   : > { %4609 = vmatpush1.bf16.msra.mxu0 %v6399_v6  ;;  %4186 = vmatprep.subr.bf16.mxu1 %v6404_v30 }
 0x1f5   : > { %4610 = vmatprep.subr.bf16.mxu0 %v6407_v31 }
 0x1f7   : > { %4187 = vmatpush1.bf16.msra.mxu1 %v6402_v32 }
 0x1f8   : > { %4611 = vmatpush1.bf16.msra.mxu0 %v6405_v33  ;;  %4188 = vmatprep.subr.bf16.mxu1 %v6410_v20 }
 0x1f9   : > { %4612 = vmatprep.subr.bf16.mxu0 %v6413_v21 }
 0x1fb   : > { %4189 = vmatpush1.bf16.msra.mxu1 %v6408_v3 }
 0x1fc   : > { %4613 = vmatpush1.bf16.msra.mxu0 %v6411_v2  ;;  %4190 = vmatprep.subr.bf16.mxu1 %v6416_v34 }
 0x1fd   : > { %4614 = vmatprep.subr.bf16.mxu0 %v6419_v35 }
 0x1ff   : > { %4191 = vmatpush1.bf16.msra.mxu1 %v6414_v36 }
 0x200   : > { %4615 = vmatpush1.bf16.msra.mxu0 %v6417_v37  ;;  %4192 = vmatprep.subr.bf16.mxu1 %v6422_v38 }
 0x201   : > { %4616 = vmatprep.subr.bf16.mxu0 %v6425_v39 }
 0x203   : > { %4193 = vmatpush1.bf16.msra.mxu1 %v6420_v41 }
 0x204   : > { %4617 = vmatpush1.bf16.msra.mxu0 %v6423_v44  ;;  %4194 = vmatprep.subr.bf16.mxu1 %v6428_v50 }
 0x205   : > { %4618 = vmatprep.subr.bf16.mxu0 %v6431_v51 }
 0x207   : > { %4195 = vmatpush1.bf16.msra.mxu1 %v6426_v52 }
 0x208   : > { %4619 = vmatpush1.bf16.msra.mxu0 %v6429_v42  ;;  %4196 = vmatprep.subr.bf16.mxu1 %v6434_v40 }
 0x209   : > { %4620 = vmatprep.subr.bf16.mxu0 %v6437_v45 }
 0x20b   : > { %4197 = vmatpush1.bf16.msra.mxu1 %v6432_v48 }
 0x20c   : > { %4621 = vmatpush1.bf16.msra.mxu0 %v6435_v49  ;;  %4198 = vmatprep.subr.bf16.mxu1 %v6440_v43 }
 0x20d   : > { %4622 = vmatprep.subr.bf16.mxu0 %v6443_v46 }
 0x20f   : > { %4199 = vmatpush1.bf16.msra.mxu1 %v6438_v47 }
 0x210   : > { %4623 = vmatpush1.bf16.msra.mxu0 %v6441_v53 }
 0x212   : > { %4201 = vmatmul.mubr.bf16.vlgmr.msra.gmra.mrb[0].mxu1 %v4972_v8 }
 0x213   : > { %4625 = vmatmul.mubr.bf16.vlgmr.msra.gmra.mrb[0].mxu0 %v4988_v9  ;;  %4210 = vmatprep.mubr.bf16.mxu1 %v5005_v10 }
 0x214   : > { %4634 = vmatprep.mubr.bf16.mxu0 %v5021_v58 }
 0x21a   : > { %4211 = vmatmul.mubr.bf16.gmra.mrb[4].mxu1 %v5004_v59 }
 0x21b   : > { %4635 = vmatmul.mubr.bf16.gmra.mrb[4].mxu0 %v5020_v62 }
 0x2e5   : > { %v4202_v13 = vpop.f32.mrb[0].mxu1 }
 0x2e6   : > { %v4626_v14 = vpop.f32.mrb[0].mxu0  ;;  %v5539_v15 = vadd.f32 %v4202_v13, %v910_v11  ;;  %v4204_v18 = vpop.f32.mrb[1].mxu1 }
 0x2e7   : > { %v4628_v19 = vpop.f32.mrb[1].mxu0  ;;  %v5541_v22 = vadd.f32 %v4204_v18, %v914_v12  ;;  %v4206_v23 = vpop.f32.mrb[2].mxu1 }
 0x2e8   : > { %v4630_v24 = vpop.f32.mrb[2].mxu0  ;;  %v5540_v25 = vadd.f32 %v5539_v15, %v4626_v14  ;;  %v5543_v26 = vadd.f32 %v4206_v23, %v910_v11  ;;  %v4208_v27 = vpop.f32.mrb[3].mxu1 }
 0x2e9   : > { %v4632_v28 = vpop.f32.mrb[3].mxu0  ;;  %v5542_v29 = vadd.f32 %v5541_v22, %v4628_v19  ;;  %v5545_v0 = vadd.f32 %v4208_v27, %v914_v12 }
 0x2ea   : > { %v5544_v1 = vadd.f32 %v5543_v26, %v4630_v24 }
 0x2eb   : > { %v5546_v16 = vadd.f32 %v5545_v0, %v4632_v28 }
 0x2ec   : > { %v4645_v17 = vadd.f32 %v5544_v1, %v5540_v25 }
 0x2ed   : > { %v4654_v5 = vadd.f32 %v5546_v16, %v5542_v29  ;;  %v4212_v6 = vpop.f32.mrb[4].mxu1 }
 0x2ee   : > { %v4636_v30 = vpop.f32.mrb[4].mxu0  ;;  %v5547_v31 = vadd.f32 %v4212_v6, %v910_v11  ;;  %v4214_v32 = vpop.f32.mrb[5].mxu1 }
 0x2ef   : > { %v4638_v33 = vpop.f32.mrb[5].mxu0  ;;  %v5549_v20 = vadd.f32 %v4214_v32, %v914_v12  ;;  %v4216_v21 = vpop.f32.mrb[6].mxu1 }
 0x2f0   : > { %v4640_v3 = vpop.f32.mrb[6].mxu0  ;;  %v5548_v2 = vadd.f32 %v5547_v31, %v4636_v30  ;;  %v5551_v34 = vadd.f32 %v4216_v21, %v910_v11  ;;  %v4218_v35 = vpop.f32.mrb[7].mxu1 }
 0x2f1   : > { %v4642_v36 = vpop.f32.mrb[7].mxu0  ;;  %v5550_v37 = vadd.f32 %v5549_v20, %v4638_v33  ;;  %v5553_v38 = vadd.f32 %v4218_v35, %v914_v12 }
 0x2f2   : > { %v4646_v39 = vadd.f32 %v5548_v2, %v4645_v17  ;;  %v5552_v41 = vadd.f32 %v5551_v34, %v4640_v3 }
 0x2f3   : > { %v4655_v44 = vadd.f32 %v5550_v37, %v4654_v5  ;;  %v5554_v50 = vadd.f32 %v5553_v38, %v4642_v36  ;;  %v4713_v36 = vld [vmem:[%s312_s16] sm:$0x3] }
 0x2f4   : > { %v4647_v51 = vadd.f32 %v5552_v41, %v4646_v39  ;;  %v4718_v38 = vrot.slane %v4713_v36, %v7360_v61 }
 0x2f5   : > { %v4656_v52 = vadd.f32 %v5554_v50, %v4655_v44  ;;  %v4722_v44 = vrot.slane %v4713_v36, %v7363_v7 }
 0x2f6   : > { %v4648_v42 = vrot.slane %v4647_v51, 4 }
 0x2f7   : > { %v4657_v40 = vrot.slane %v4656_v52, 4 }
 0x2f8   : > { %v4649_v45 = vadd.f32 %v4648_v42, %v4647_v51 }
 0x2f9   : > { %v4658_v48 = vadd.f32 %v4657_v40, %v4656_v52 }
 0x2fa   : > { %v4650_v49 = vrot.slane %v4649_v45, 2 }
 0x2fb   : > { %v4659_v43 = vrot.slane %v4658_v48, 2 }
 0x2fc   : > { %v4651_v46 = vadd.f32 %v4650_v49, %v4649_v45 }
 0x2fd   : > { %v4660_v47 = vadd.f32 %v4659_v43, %v4658_v48 }
 0x2fe   : > { %v4652_v53 = vrot.slane %v4651_v46, 1 }
 0x2ff   : > { %v4661_v54 = vrot.slane %v4660_v47, 1 }
 0x300   : > { %v4653_v55 = vadd.f32 %v4652_v53, %v4651_v46 }
 0x301   : > { %v4662_v57 = vadd.f32 %v4661_v54, %v4660_v47 }
 0x302   : > { %v4663_v60 = vmul.f32 0.03125, %v4653_v55 }
 0x303   : > { %v4664_v8 = vmul.f32 0.03125, %v4662_v57 }
 0x304   : > { %v4665_v9 = vsub.f32 %v5540_v25, %v4663_v60  ;;  %v4667_v10 = vsub.f32 %v5544_v1, %v4663_v60  ;;  %v4669_v58 = vsub.f32 %v5548_v2, %v4663_v60  ;;  %v4671_v59 = vsub.f32 %v5552_v41, %v4663_v60 }
 0x305   : > { %v4666_v62 = vsub.f32 %v5542_v29, %v4664_v8  ;;  %v4668_v63 = vsub.f32 %v5546_v16, %v4664_v8  ;;  %v4670_v4 = vsub.f32 %v5550_v37, %v4664_v8  ;;  %v4672_v11 = vsub.f32 %v5554_v50, %v4664_v8  ;;  %v4733_v37 = vld [vmem:[%s317_s19] sm:$0x3] }
 0x306   : > { %v4673_v12 = vmul.f32 %v4665_v9, %v4665_v9  ;;  %v4675_v13 = vmul.f32 %v4667_v10, %v4667_v10  ;;  %v4677_v18 = vmul.f32 %v4669_v58, %v4669_v58  ;;  %v4679_v24 = vmul.f32 %v4671_v59, %v4671_v59 }
 0x307   : > { %v4674_v14 = vmul.f32 %v4666_v62, %v4666_v62  ;;  %v4676_v15 = vmul.f32 %v4668_v63, %v4668_v63  ;;  %v4678_v22 = vmul.f32 %v4670_v4, %v4670_v4  ;;  %v4680_v27 = vmul.f32 %v4672_v11, %v4672_v11 }
 0x308   : > { %v4681_v19 = vadd.f32 %v4675_v13, %v4673_v12  ;;  %v4738_v41 = vrot.slane %v4733_v37, %v7360_v61  ;;  %v4742_v50 = vrot.slane %v4733_v37, %v7363_v7 }
 0x309   : > { %v4690_v23 = vadd.f32 %v4676_v15, %v4674_v14 }
 0x30a   : > { %v4682_v26 = vadd.f32 %v4681_v19, %v4677_v18 }
 0x30b   : > { %v4691_v28 = vadd.f32 %v4690_v23, %v4678_v22 }
 0x30c   : > { %v4683_v25 = vadd.f32 %v4682_v26, %v4679_v24 }
 0x30d   : > { %v4692_v0 = vadd.f32 %v4691_v28, %v4680_v27 }
 0x30e   : > { %v4684_v1 = vrot.slane %v4683_v25, 4 }
 0x30f   : > { %v4693_v17 = vrot.slane %v4692_v0, 4 }
 0x310   : > { %v4685_v29 = vadd.f32 %v4684_v1, %v4683_v25 }
 0x311   : > { %v4694_v16 = vadd.f32 %v4693_v17, %v4692_v0 }
 0x312   : > { %v4686_v5 = vrot.slane %v4685_v29, 2 }
 0x313   : > { %v4695_v6 = vrot.slane %v4694_v16, 2 }
 0x314   : > { %v4687_v30 = vadd.f32 %v4686_v5, %v4685_v29 }
 0x315   : > { %v4696_v31 = vadd.f32 %v4695_v6, %v4694_v16 }
 0x316   : > { %v4688_v32 = vrot.slane %v4687_v30, 1 }
 0x317   : > { %v4697_v33 = vrot.slane %v4696_v31, 1 }
 0x318   : > { %v4689_v20 = vadd.f32 %v4688_v32, %v4687_v30 }
 0x319   : > { %v4698_v21 = vadd.f32 %v4697_v33, %v4696_v31 }
 0x31a   : > { %v4699_v3 = vmul.f32 0.03125, %v4689_v20 }
 0x31b   : > { %v4700_v2 = vmul.f32 0.03125, %v4698_v21 }
 0x31c   : > { %v4701_v34 = vadd.f32 1e-05, %v4699_v3 }
 0x31d   : > { %v4702_v35 = vadd.f32 1e-05, %v4700_v2 }
 0x31e   : > { %6444 = vrsqrt.f32 %v4701_v34 }
 0x31f   : > { %6446 = vrsqrt.f32 %v4702_v35 }
 0x328   : > { %v6445_v39 = vpop.eup %6444 }
 0x329   : > { %v6447_v51 = vpop.eup %6446  ;;  %v4705_v52 = vmul.f32 %v6445_v39, %v4665_v9  ;;  %v4707_v42 = vmul.f32 %v6445_v39, %v4667_v10  ;;  %v4709_v40 = vmul.f32 %v6445_v39, %v4669_v58  ;;  %v4711_v45 = vmul.f32 %v6445_v39, %v4671_v59  ;;  %v4773_v59 = vld [vmem:[%s323_s25] sm:$0xff] }
 0x32a   : > { %v4706_v48 = vmul.f32 %v6447_v51, %v4666_v62  ;;  %v4708_v49 = vmul.f32 %v6447_v51, %v4668_v63  ;;  %v4710_v43 = vmul.f32 %v6447_v51, %v4670_v4  ;;  %v4712_v46 = vmul.f32 %v6447_v51, %v4672_v11  ;;  %v4774_v62 = vld [vmem:[%s323_s25 + $0x8] sm:$0xff] }
 0x32b   : > { %v4725_v47 = vmul.f32 %v4718_v38, %v4705_v52  ;;  %v4727_v53 = vmul.f32 %v4718_v38, %v4707_v42  ;;  %v4729_v61 = vmul.f32 %v4718_v38, %v4709_v40  ;;  %v4731_v54 = vmul.f32 %v4718_v38, %v4711_v45 }
 0x32c   : > { %v4726_v55 = vmul.f32 %v4722_v44, %v4706_v48  ;;  %v4728_v57 = vmul.f32 %v4722_v44, %v4708_v49  ;;  %v4730_v7 = vmul.f32 %v4722_v44, %v4710_v43  ;;  %v4732_v60 = vmul.f32 %v4722_v44, %v4712_v46 }
 0x32d   : > { %v4745_v8 = vadd.f32 %v4738_v41, %v4725_v47  ;;  %v4747_v9 = vadd.f32 %v4738_v41, %v4727_v53  ;;  %v4749_v10 = vadd.f32 %v4738_v41, %v4729_v61  ;;  %v4751_v58 = vadd.f32 %v4738_v41, %v4731_v54 }
 0x32e   : > { %v4746_v63 = vadd.f32 %v4742_v50, %v4726_v55  ;;  %v4748_v4 = vadd.f32 %v4742_v50, %v4728_v57  ;;  %v4750_v11 = vadd.f32 %v4742_v50, %v4730_v7  ;;  %v4752_v12 = vadd.f32 %v4742_v50, %v4732_v60 }
 0x32f   : > { %v4753_v13 = vmax.f32 %v4745_v8, 0.0  ;;  %v4755_v14 = vmax.f32 %v4747_v9, 0.0  ;;  %v4757_v15 = vmax.f32 %v4749_v10, 0.0  ;;  %v4759_v18 = vmax.f32 %v4751_v58, 0.0 }
 0x330   : > { %v4754_v19 = vmax.f32 %v4746_v63, 0.0  ;;  %v4756_v22 = vmax.f32 %v4748_v4, 0.0  ;;  %v4758_v23 = vmax.f32 %v4750_v11, 0.0  ;;  %v4760_v24 = vmax.f32 %v4752_v12, 0.0 }
 0x331   : > { %v4761_v26 = vpack.c.bf16 %v4755_v14, %v4753_v13  ;;  %v4763_v27 = vpack.c.bf16 %v4759_v18, %v4757_v15  ;;  %v4775_v28 = vunpack.c.l.bf16 %v4773_v59  ;;  %v4777_v25 = vunpack.c.l.bf16 %v4774_v62 }
 0x332   : > { %v4762_v0 = vpack.c.bf16 %v4756_v22, %v4754_v19  ;;  %v4764_v1 = vpack.c.bf16 %v4760_v24, %v4758_v23  ;;  %v4776_v17 = vunpack.c.h.bf16 %v4773_v59  ;;  %v4778_v29 = vunpack.c.h.bf16 %v4774_v62 }
 0x333   : > { %v4765_v16 = vunpack.c.l.bf16 %v4761_v26  ;;  %v4767_v5 = vunpack.c.h.bf16 %v4761_v26  ;;  %v4769_v6 = vunpack.c.l.bf16 %v4763_v27  ;;  %v4771_v30 = vunpack.c.h.bf16 %v4763_v27 }
 0x334   : > { %v4766_v31 = vunpack.c.l.bf16 %v4762_v0  ;;  %v4768_v32 = vunpack.c.h.bf16 %v4762_v0  ;;  %v4770_v33 = vunpack.c.l.bf16 %v4764_v1  ;;  %v4772_v20 = vunpack.c.h.bf16 %v4764_v1 }
 0x335   : > { %v4779_v21 = vmul.f32 %v4775_v28, %v4765_v16  ;;  %v4781_v3 = vmul.f32 %v4777_v25, %v4767_v5  ;;  %v4783_v2 = vmul.f32 %v4775_v28, %v4769_v6  ;;  %v4785_v34 = vmul.f32 %v4777_v25, %v4771_v30 }
 0x336   : > { %v4780_v35 = vmul.f32 %v4776_v17, %v4766_v31  ;;  %v4782_v36 = vmul.f32 %v4778_v29, %v4768_v32  ;;  %v4784_v37 = vmul.f32 %v4776_v17, %v4770_v33  ;;  %v4786_v38 = vmul.f32 %v4778_v29, %v4772_v20 }
 0x337   : > { %v4787_v39 = vadd.f32 %v4781_v3, %v4779_v21  ;;  %v4801_v41 = vadd.f32 %v4785_v34, %v4783_v2  ;;  %v6456_v49 = vmov 1983009808  }
 0x338   : > { %v4794_v44 = vadd.f32 %v4782_v36, %v4780_v35  ;;  %v4808_v50 = vadd.f32 %v4786_v38, %v4784_v37  ;;  %v4821_v43 = vunpack.c.l.s4 %v6456_v49 }
 0x339   : > { %v4788_v51 = vrot.slane %v4787_v39, 4  ;;  %v4802_v52 = vrot.slane %v4801_v41, 4 }
 0x33a   : > { %v4795_v42 = vrot.slane %v4794_v44, 4  ;;  %v4809_v40 = vrot.slane %v4808_v50, 4  ;;  %v4822_v60 = vunpack.c.0.s8 %v4821_v43 }
 0x33b   : > { %v4789_v45 = vadd.f32 %v4788_v51, %v4787_v39  ;;  %v4803_v48 = vadd.f32 %v4802_v52, %v4801_v41 }
 0x33c   : > { %v4796_v46 = vadd.f32 %v4795_v42, %v4794_v44  ;;  %v4810_v47 = vadd.f32 %v4809_v40, %v4808_v50  ;;  %v4825_v11 = vsub.s32 %v4822_v60, %v7353_v56 }
 0x33d   : > { %v4790_v53 = vrot.slane %v4789_v45, 2  ;;  %v4804_v61 = vrot.slane %v4803_v48, 2 }
 0x33e   : > { %v4797_v54 = vrot.slane %v4796_v46, 2  ;;  %v4811_v55 = vrot.slane %v4810_v47, 2 }
 0x33f   : > { %v4791_v57 = vadd.f32 %v4790_v53, %v4789_v45  ;;  %v4805_v7 = vadd.f32 %v4804_v61, %v4803_v48 }
 0x340   : > { %v4798_v8 = vadd.f32 %v4797_v54, %v4796_v46  ;;  %v4812_v9 = vadd.f32 %v4811_v55, %v4810_v47 }
 0x341   : > { %v4792_v10 = vrot.slane %v4791_v57, 1  ;;  %v4806_v58 = vrot.slane %v4805_v7, 1 }
 0x342   : > { %v4799_v59 = vrot.slane %v4798_v8, 1  ;;  %v4813_v62 = vrot.slane %v4812_v9, 1 }
 0x343   : > { %v4793_v63 = vadd.f32 %v4792_v10, %v4791_v57  ;;  %v4807_v4 = vadd.f32 %v4806_v58, %v4805_v7 }
 0x344   : > { %v4800_v12 = vadd.f32 %v4799_v59, %v4798_v8  ;;  %v4814_v13 = vadd.f32 %v4813_v62, %v4812_v9 }
 0x346   : > { %v4819_v14 = vcombine.low %v4793_v63, %v4800_v12  ;;  %v4827_v15 = vcombine.low %v4807_v4, %v4814_v13 }
 0x348   : > { %v4834_v18 = vrot.slane %v4827_v15, %v4825_v11  ;;  %v4826_v19 = vrot.slane %v4819_v14, %v4825_v11 }
 0x34a   : > { %v4839_v22 = vrot.slane %v4834_v18, 7 }
 0x34c   : > { %v4841_v23 = vsel %vm4840_vm0, %v4839_v22, %v4826_v19 }
 0x34d   : > { %v4843_v24 = vsel %vm4842_vm1, %v4839_v22, %v4841_v23 }
 0x34e   : > { %v4845_v26 = vsel %vm4844_vm2, %v4839_v22, %v4843_v24 }
 0x34f   : > { %v4847_v56 = vsel %vm4846_vm3, %v4839_v22, %v4845_v26 }
 0x350   : > { %4849 = vst [vmem:[%s328_s29] sm:$0xf] %v4847_v56 }
 0x351 PF: > { %s16_s21 = sadd.s32 1, %s6454_s21  }
 0x352   : > { %p13_p5 = scmp.ge.s32.totalorder %s16_s21, 4  }
 0x354   :  { %15 = sbr.rel (!%p13_p5) target bundleno = 1 (0x1), region = 86 }

</bundles_post_ra>
